<compile_context>
chip_gen: v7x
topology: tpu7x:2x2x1
jax: 0.10.0
libtpu: 0.0.40
codegen_flags: <defaults>
</compile_context>

<pallas_src>
import math
import functools

import jax
import jax.numpy as jnp
import numpy as np
from jax import lax
from jax.experimental import pallas as pl
from jax.experimental.pallas import tpu as pltpu


# --------------------------------- kernel ------------------------------------


def _fcos_tower_kernel(x_ref, w_ref, b_ref, g_ref, t_ref, p_ref, mask_ref,
                       o_ref, buf_a, buf_b, pbuf,
                       *, H, W, CP, n_hidden, eps):
    Wp = W + 2
    M = H * Wp                      # rows computed per conv (incl. border cols)
    p0 = Wp + 1                     # flat index of pixel (0, 0) in padded space
    HW = H * W
    nrows = buf_a.shape[0]
    l = pl.program_id(2)            # 0..3: conv+GN+ReLU, 4: final conv
    even = (l % 2) == 0

    # ---- step 0: stage the zero-bordered input, clear the never-written halo
    # rows of the other ping-pong buffer (interior is always overwritten). ----
    @pl.when(l == 0)
    def _stage_input():
        buf_b[...] = x_ref[0]
        buf_a[0:p0, :] = jnp.zeros((p0, CP), jnp.bfloat16)
        buf_a[p0 + M:, :] = jnp.zeros((nrows - p0 - M, CP), jnp.bfloat16)

    # ---- im2col via flat shifts: 9 contiguous sublane windows, each stored to
    # a 128-lane-aligned slot of pbuf (bf16 in, bf16 out, unmasked stores). ---
    def im2col(src):
        for k in range(9):
            dy, dx = divmod(k, 3)
            off = dy * Wp + dx
            pbuf[:, k * CP:(k + 1) * CP] = src[off:off + M, :]

    @pl.when(even)
    def _():                         # layers 0, 2 and the final conv read buf_b
        im2col(buf_b)

    @pl.when(jnp.logical_not(even))
    def _():                         # layers 1, 3 read buf_a
        im2col(buf_a)

    # ---- one K-folded MXU matmul per conv layer (K = 9*CP, f32 accumulate) --
    acc = jnp.dot(pbuf[...], w_ref[0, 0],
                  preferred_element_type=jnp.float32)            # (M, CP) f32
    acc = acc + b_ref[0, 0]

    # ---- hidden layers: masked two-pass GroupNorm(32) + ReLU ----------------
    @pl.when(l < n_hidden)
    def _hidden():
        mask = mask_ref[...]                                     # (M, 1) f32
        inv_hw = 1.0 / float(HW)
        m1 = jnp.sum(acc * mask, axis=0, keepdims=True) * inv_hw  # per-lane E[x]
        gm = jnp.dot(m1, p_ref[...], preferred_element_type=jnp.float32)
        d = acc - gm
        v = jnp.sum(d * d * mask, axis=0, keepdims=True) * inv_hw
        gv = jnp.dot(v, p_ref[...], preferred_element_type=jnp.float32)
        y = d * lax.rsqrt(gv + eps) * g_ref[0, 0] + t_ref[0, 0]
        y_bf = (jnp.maximum(y, 0.0) * mask).astype(jnp.bfloat16)

        @pl.when(even)
        def _():
            buf_a[p0:p0 + M, :] = y_bf

        @pl.when(jnp.logical_not(even))
        def _():
            buf_b[p0:p0 + M, :] = y_bf

    # ---- final conv: raw lane-dense slab (decode / sigmoid done in wrapper) -
    @pl.when(l == n_hidden)
    def _final():
        o_ref[0, 0] = acc.astype(o_ref.dtype)


# --------------------------------- wrapper -----------------------------------


def fcos_head_forward(x_nchw, params, im_h, im_w, *, num_class, norm,
                      groups=32):
    B, C, H, W = x_nchw.shape
    HW = H * W
    Wp = W + 2
    M = H * Wp
    p0 = Wp + 1
    n_hidden = 4
    CP = ((max(C, num_class, 4 + 1) + 127) // 128) * 128   # lane-padded width
    NROWS = ((M + 2 * Wp + 2 + 7) // 8) * 8                # flat rows (+halo)
    assert C % groups == 0, "GroupNorm(32, C) needs C % 32 == 0"

    stride = (im_h - 1) // (H - 1)                         # matches the module
    scale = float(norm * stride)

    # ---- input: NCHW -> zero-bordered, lane-padded, flattened bf16 slab -----
    x = jnp.transpose(x_nchw, (0, 2, 3, 1))
    x = jnp.pad(x, ((0, 0), (1, 1), (1, 1), (0, CP - C)))
    x = x.reshape(B, (H + 2) * Wp, CP)
    x = jnp.pad(x, ((0, 0), (0, NROWS - (H + 2) * Wp), (0, 0)))
    x = x.astype(jnp.bfloat16)

    # ---- parameters: 5 "layers" per tower (4 hidden + final), lane padded ---
    # Weights are HWIO; real PyTorch OIHW weights must be transposed with
    # w.transpose(2, 3, 1, 0) before packing.
    def pack_tower(hidden, w_fin, b_fin, cout):
        ws, bs, gs, ts = [], [], [], []
        for (w, b, g, t) in hidden:
            w9 = jnp.pad(w.reshape(9, C, C), ((0, 0), (0, CP - C), (0, CP - C)))
            ws.append(w9.reshape(9 * CP, CP))
            bs.append(jnp.pad(b.reshape(1, C), ((0, 0), (0, CP - C))))
            gs.append(jnp.pad(g.reshape(1, C), ((0, 0), (0, CP - C))))
            ts.append(jnp.pad(t.reshape(1, C), ((0, 0), (0, CP - C))))
        wf9 = jnp.pad(w_fin.reshape(9, C, cout),
                      ((0, 0), (0, CP - C), (0, CP - cout)))
        ws.append(wf9.reshape(9 * CP, CP))
        bs.append(jnp.pad(b_fin.reshape(1, cout), ((0, 0), (0, CP - cout))))
        gs.append(jnp.ones((1, CP), jnp.float32))          # unused (final conv)
        ts.append(jnp.zeros((1, CP), jnp.float32))
        return (jnp.stack(ws), jnp.stack(bs), jnp.stack(gs), jnp.stack(ts))

    cw, cb, cgam, cbet = pack_tower(params["cls_hidden"], params["cls_final_w"],
                                    params["cls_final_b"], num_class)
    rw, rb, rgam, rbet = pack_tower(params["reg_hidden"], params["reg_final_w"],
                                    params["reg_final_b"], 4 + 1)
    w_all = jnp.stack([cw, rw]).astype(jnp.bfloat16)        # (2, 5, 9*CP, CP)
    b_all = jnp.stack([cb, rb]).astype(jnp.float32)         # (2, 5, 1, CP)
    g_all = jnp.stack([cgam, rgam]).astype(jnp.float32)     # (2, 5, 1, CP)
    t_all = jnp.stack([cbet, rbet]).astype(jnp.float32)     # (2, 5, 1, CP)

    # GroupNorm group-averaging matrix, lane padded with zeros.
    cgsz = C // groups
    gid = jnp.arange(C, dtype=jnp.int32) // cgsz
    P = (gid[:, None] == gid[None, :]).astype(jnp.float32) / float(cgsz)
    P = jnp.pad(P, ((0, CP - C), (0, CP - C)))

    # Interior-row mask over the M = H*(W+2) computed rows (precomputed once).
    px = (np.arange(M) + p0) % Wp
    mask = jnp.asarray(((px >= 1) & (px <= W)).astype(np.float32).reshape(M, 1))

    kern = functools.partial(_fcos_tower_kernel, H=H, W=W, CP=CP,
                             n_hidden=n_hidden, eps=1e-5)
    out = pl.pallas_call(
        kern,
        out_shape=jax.ShapeDtypeStruct((2, B, M, CP), jnp.bfloat16),
        grid=(2, B, n_hidden + 1),           # (branch, batch, layer)
        in_specs=[
            pl.BlockSpec((1, NROWS, CP), lambda br, b, l: (b, 0, 0)),
            pl.BlockSpec((1, 1, 9 * CP, CP), lambda br, b, l: (br, l, 0, 0)),
            pl.BlockSpec((1, 1, 1, CP), lambda br, b, l: (br, l, 0, 0)),
            pl.BlockSpec((1, 1, 1, CP), lambda br, b, l: (br, l, 0, 0)),
            pl.BlockSpec((1, 1, 1, CP), lambda br, b, l: (br, l, 0, 0)),
            pl.BlockSpec((CP, CP), lambda br, b, l: (0, 0)),
            pl.BlockSpec((M, 1), lambda br, b, l: (0, 0)),
        ],
        out_specs=pl.BlockSpec((1, 1, M, CP), lambda br, b, l: (br, b, 0, 0)),
        scratch_shapes=[
            pltpu.VMEM((NROWS, CP), jnp.bfloat16),          # activation ping
            pltpu.VMEM((NROWS, CP), jnp.bfloat16),          # activation pong
            pltpu.VMEM((M, 9 * CP), jnp.bfloat16),          # im2col patches
        ],
        compiler_params=pltpu.CompilerParams(
            dimension_semantics=("parallel", "parallel", "arbitrary"),
            vmem_limit_bytes=16 * 1024 * 1024),             # ~7x actual usage
    )(x, w_all, b_all, g_all, t_all, P, mask)

    # ---- cheap slicing / decode on the few useful lanes (f32, exact centers)
    out5 = out.reshape(2, B, H, Wp, CP)
    cls_s = out5[0, :, :, :W, :num_class].astype(jnp.float32)
    cls_s = cls_s.reshape(B, HW, num_class)
    reg_raw = out5[1, :, :, :W, :4].astype(jnp.float32).reshape(B, HW, 4)
    ctr_s = jax.nn.sigmoid(out5[1, :, :, :W, 4].astype(jnp.float32)).reshape(B, HW)

    # TODO(synk): center_scatter() is not provided in the reference code;
    # per-location centers are assumed to be at (row*stride, col*stride).
    yy = jnp.arange(H, dtype=jnp.float32) * float(stride)
    xx = jnp.arange(W, dtype=jnp.float32) * float(stride)
    cy = jnp.repeat(yy, W)
    cx = jnp.tile(xx, H)
    cen4 = jnp.stack([cy, cx, cy, cx], axis=1)              # (HW, 4)
    reg_s = cen4[None, :, :] + reg_raw * scale
    return cls_s, reg_s, ctr_s


# ------------------------------- parameters ----------------------------------


def init_params(key, channels, num_class):
    """Deterministic synthetic init matching FCOSHead.__init__ shapes/init."""
    def conv_w(k, cin, cout):                 # HWIO layout
        return 0.01 * jax.random.normal(k, (3, 3, cin, cout), jnp.float32)

    keys = jax.random.split(key, 10)
    params = {"cls_hidden": [], "reg_hidden": []}
    for i in range(4):
        params["cls_hidden"].append((
            conv_w(keys[i], channels, channels),
            jnp.zeros((1, channels), jnp.float32),      # conv bias = 0
            jnp.ones((1, channels), jnp.float32),       # GN weight = 1
            jnp.zeros((1, channels), jnp.float32),      # GN bias = 0
        ))
        params["reg_hidden"].append((
            conv_w(keys[4 + i], channels, channels),
            jnp.zeros((1, channels), jnp.float32),
            jnp.ones((1, channels), jnp.float32),
            jnp.zeros((1, channels), jnp.float32),
        ))
    pi = 0.01
    cls_bias = -math.log((1.0 - pi) / pi)
    params["cls_final_w"] = conv_w(keys[8], channels, num_class)
    params["cls_final_b"] = jnp.full((1, num_class), cls_bias, jnp.float32)
    params["reg_final_w"] = conv_w(keys[9], channels, 4 + 1)
    params["reg_final_b"] = jnp.zeros((1, 4 + 1), jnp.float32)
    return params


# --------------------------- pure-JAX reference -------------------------------


def _fcos_head_reference(x_nchw, params, im_h, im_w, *, num_class, norm,
                         groups=32):
    B, C, H, W = x_nchw.shape
    stride = (im_h - 1) // (H - 1)
    cg = C // groups

    def conv(h, w, b):
        y = lax.conv_general_dilated(
            h, w, (1, 1), "SAME",
            dimension_numbers=("NHWC", "HWIO", "NHWC"),
            precision=lax.Precision.HIGHEST)
        return y + b.reshape(1, 1, 1, -1)

    def gn(h, g, t):
        hg = h.reshape(B, H * W, groups, cg)
        mu = hg.mean(axis=(1, 3), keepdims=True)
        var = ((hg - mu) ** 2).mean(axis=(1, 3), keepdims=True)
        hg = (hg - mu) / jnp.sqrt(var + 1e-5)
        return (hg.reshape(B, H, W, C) * g.reshape(1, 1, 1, C)
                + t.reshape(1, 1, 1, C))

    def tower(hidden, wf, bf):
        h = jnp.transpose(x_nchw, (0, 2, 3, 1)).astype(jnp.float32)
        for (w, b, g, t) in hidden:
            h = jnp.maximum(gn(conv(h, w, b), g, t), 0.0)
        return conv(h, wf, bf)

    cls = tower(params["cls_hidden"], params["cls_final_w"],
                params["cls_final_b"])
    reg = tower(params["reg_hidden"], params["reg_final_w"],
                params["reg_final_b"])
    cls_s = cls.reshape(B, H * W, num_class)
    reg_raw = reg[..., :4].reshape(B, H * W, 4)
    ctr_s = jax.nn.sigmoid(reg[..., 4].reshape(B, H * W))
    yy = jnp.arange(H, dtype=jnp.float32) * float(stride)
    xx = jnp.arange(W, dtype=jnp.float32) * float(stride)
    cy = jnp.repeat(yy, W)
    cx = jnp.tile(xx, H)
    cen4 = jnp.stack([cy, cx, cy, cx], axis=1)
    reg_s = cen4[None] + reg_raw * float(norm * stride)
    return cls_s, reg_s, ctr_s


# ----------------------------------- demo -------------------------------------


if __name__ == "__main__":
    B, C, H, W = 2, 32, 16, 16          # channels divisible by 32 (GroupNorm)
    num_class, norm = 8, 4
    im_h = im_w = 61                    # stride = (61-1)//(16-1) = 4

    key = jax.random.PRNGKey(0)
    kx, kp = jax.random.split(key)
    x_nchw = jax.random.normal(kx, (B, C, H, W), jnp.float32)
    params = init_params(kp, C, num_class)

    cls_s, reg_s, ctr_s = fcos_head_forward(
        x_nchw, params, im_h, im_w, num_class=num_class, norm=norm)
    jax.block_until_ready((cls_s, reg_s, ctr_s))

    assert cls_s.shape == (B, H * W, num_class)
    assert reg_s.shape == (B, H * W, 4)
    assert ctr_s.shape == (B, H * W)
    assert bool(jnp.all(jnp.isfinite(cls_s)))
    assert bool(jnp.all(jnp.isfinite(reg_s)))
    assert bool(jnp.all(jnp.isfinite(ctr_s)))

    # Numerical check against a pure-JAX f32 reference (kernel uses bf16 MXU
    # operands and bf16 activation storage -> loose but meaningful tolerances).
    cls_r, reg_r, ctr_r = _fcos_head_reference(
        x_nchw, params, im_h, im_w, num_class=num_class, norm=norm)
    assert float(jnp.max(jnp.abs(cls_s - cls_r))) < 8e-2
    assert float(jnp.max(jnp.abs(reg_s - reg_r))) < 4e-1
    assert float(jnp.max(jnp.abs(ctr_s - ctr_r))) < 2e-2

    print("KERNEL_OK")
</pallas_src>

<mosaic_0001>
module attributes {stable_mosaic.version = 11 : i64} {
  func.func @_fcos_tower_kernel(%arg0: i32, %arg1: i32, %arg2: i32, %arg3: memref<1x328x128xbf16, #tpu.memory_space<vmem>>, %arg4: memref<1x1x1152x128xbf16, #tpu.memory_space<vmem>>, %arg5: memref<1x1x1x128xf32, #tpu.memory_space<vmem>>, %arg6: memref<1x1x1x128xf32, #tpu.memory_space<vmem>>, %arg7: memref<1x1x1x128xf32, #tpu.memory_space<vmem>>, %arg8: memref<128x128xf32, #tpu.memory_space<vmem>>, %arg9: memref<288x1xf32, #tpu.memory_space<vmem>>, %arg10: memref<1x1x288x128xbf16, #tpu.memory_space<vmem>>, %arg11: memref<328x128xbf16, #tpu.memory_space<vmem>>, %arg12: memref<328x128xbf16, #tpu.memory_space<vmem>>, %arg13: memref<288x1152xbf16, #tpu.memory_space<vmem>>) attributes {dimension_semantics = [#tpu.dimension_semantics<parallel>, #tpu.dimension_semantics<parallel>, #tpu.dimension_semantics<arbitrary>], iteration_bounds = array<i64: 2, 2, 5>, scalar_prefetch = 0 : i64, scratch_operands = 3 : i64, tpu.core_type = #tpu.core_type<tc>, window_params = [{transform_indices = @transform_0, window_bounds = array<i64: 1, 328, 128>}, {transform_indices = @transform_1, window_bounds = array<i64: 1, 1, 1152, 128>}, {transform_indices = @transform_2, window_bounds = array<i64: 1, 1, 1, 128>}, {transform_indices = @transform_3, window_bounds = array<i64: 1, 1, 1, 128>}, {transform_indices = @transform_4, window_bounds = array<i64: 1, 1, 1, 128>}, {pipeline_mode = #tpu.pipeline_mode<synchronous>, transform_indices = @transform_5, window_bounds = array<i64: 128, 128>}, {pipeline_mode = #tpu.pipeline_mode<synchronous>, transform_indices = @transform_6, window_bounds = array<i64: 288, 1>}, {transform_indices = @transform_7, window_bounds = array<i64: 1, 1, 288, 128>}]} {
    %c2_i32 = arith.constant 2 : i32
    %c0_i32 = arith.constant 0 : i32
    %0 = arith.cmpi eq, %c2_i32, %c0_i32 : i32
    %c1_i32 = arith.constant 1 : i32
    %1 = arith.select %0, %c1_i32, %c2_i32 : i32
    %2 = arith.remsi %arg2, %1 : i32
    %c0_i32_0 = arith.constant 0 : i32
    %3 = arith.cmpi ne, %2, %c0_i32_0 : i32
    %c0_i32_1 = arith.constant 0 : i32
    %4 = arith.cmpi slt, %2, %c0_i32_1 : i32
    %c0_i32_2 = arith.constant 0 : i32
    %5 = arith.cmpi slt, %1, %c0_i32_2 : i32
    %6 = arith.xori %4, %5 : i1
    %7 = arith.andi %6, %3 : i1
    %8 = arith.addi %2, %1 : i32
    %9 = arith.select %7, %8, %2 : i32
    %c0_i32_3 = arith.constant 0 : i32
    %10 = arith.cmpi eq, %9, %c0_i32_3 : i32
    %c0_i32_4 = arith.constant 0 : i32
    %11 = arith.cmpi eq, %arg2, %c0_i32_4 : i32
    %12 = arith.extui %11 : i1 to i32
    %c0_i32_5 = arith.constant 0 : i32
    %13 = arith.cmpi ne, %12, %c0_i32_5 : i32
    scf.if %13 {
      %c0_20 = arith.constant 0 : index
      %c0_21 = arith.constant 0 : index
      %c0_22 = arith.constant 0 : index
      %33 = vector.load %arg3[%c0_20, %c0_21, %c0_22] : memref<1x328x128xbf16, #tpu.memory_space<vmem>>, vector<1x328x128xbf16>
      %34 = vector.shape_cast %33 : vector<1x328x128xbf16> to vector<328x128xbf16>
      %c0_23 = arith.constant 0 : index
      %c0_24 = arith.constant 0 : index
      %35 = vector.load %arg12[%c0_23, %c0_24] : memref<328x128xbf16, #tpu.memory_space<vmem>>, vector<328x128xbf16>
      tpu.vector_store %arg12[%c0_23, %c0_24], %34 {strides = array<i32>} : memref<328x128xbf16, #tpu.memory_space<vmem>>, vector<328x128xbf16>,
      %cst_25 = arith.constant 0.000000e+00 : bf16
      %36 = vector.broadcast %cst_25 : bf16 to vector<19x128xbf16>
      %c0_26 = arith.constant 0 : index
      %c0_27 = arith.constant 0 : index
      %37 = vector.load %arg11[%c0_26, %c0_27] : memref<328x128xbf16, #tpu.memory_space<vmem>>, vector<19x128xbf16>
      tpu.vector_store %arg11[%c0_26, %c0_27], %36 {strides = array<i32>} : memref<328x128xbf16, #tpu.memory_space<vmem>>, vector<19x128xbf16>,
      %cst_28 = arith.constant 0.000000e+00 : bf16
      %38 = vector.broadcast %cst_28 : bf16 to vector<21x128xbf16>
      %c307 = arith.constant 307 : index
      %c0_29 = arith.constant 0 : index
      %39 = vector.load %arg11[%c307, %c0_29] : memref<328x128xbf16, #tpu.memory_space<vmem>>, vector<21x128xbf16>
      tpu.vector_store %arg11[%c307, %c0_29], %38 {strides = array<i32>} : memref<328x128xbf16, #tpu.memory_space<vmem>>, vector<21x128xbf16>,
    } else {
    }
    %14 = arith.extui %10 : i1 to i32
    %c0_i32_6 = arith.constant 0 : i32
    %15 = arith.cmpi ne, %14, %c0_i32_6 : i32
    scf.if %15 {
      %c0_20 = arith.constant 0 : index
      %c0_21 = arith.constant 0 : index
      %33 = vector.load %arg12[%c0_20, %c0_21] : memref<328x128xbf16, #tpu.memory_space<vmem>>, vector<288x128xbf16>
      %c0_22 = arith.constant 0 : index
      %c0_23 = arith.constant 0 : index
      %34 = vector.load %arg13[%c0_22, %c0_23] : memref<288x1152xbf16, #tpu.memory_space<vmem>>, vector<288x128xbf16>
      tpu.vector_store %arg13[%c0_22, %c0_23], %33 {strides = array<i32>} : memref<288x1152xbf16, #tpu.memory_space<vmem>>, vector<288x128xbf16>,
      %c1 = arith.constant 1 : index
      %c0_24 = arith.constant 0 : index
      %35 = vector.load %arg12[%c1, %c0_24] : memref<328x128xbf16, #tpu.memory_space<vmem>>, vector<288x128xbf16>
      %c0_25 = arith.constant 0 : index
      %c128 = arith.constant 128 : index
      %36 = vector.load %arg13[%c0_25, %c128] : memref<288x1152xbf16, #tpu.memory_space<vmem>>, vector<288x128xbf16>
      tpu.vector_store %arg13[%c0_25, %c128], %35 {strides = array<i32>} : memref<288x1152xbf16, #tpu.memory_space<vmem>>, vector<288x128xbf16>,
      %c2 = arith.constant 2 : index
      %c0_26 = arith.constant 0 : index
      %37 = vector.load %arg12[%c2, %c0_26] : memref<328x128xbf16, #tpu.memory_space<vmem>>, vector<288x128xbf16>
      %c0_27 = arith.constant 0 : index
      %c256 = arith.constant 256 : index
      %38 = vector.load %arg13[%c0_27, %c256] : memref<288x1152xbf16, #tpu.memory_space<vmem>>, vector<288x128xbf16>
      tpu.vector_store %arg13[%c0_27, %c256], %37 {strides = array<i32>} : memref<288x1152xbf16, #tpu.memory_space<vmem>>, vector<288x128xbf16>,
      %c18 = arith.constant 18 : index
      %c0_28 = arith.constant 0 : index
      %39 = vector.load %arg12[%c18, %c0_28] : memref<328x128xbf16, #tpu.memory_space<vmem>>, vector<288x128xbf16>
      %c0_29 = arith.constant 0 : index
      %c384 = arith.constant 384 : index
      %40 = vector.load %arg13[%c0_29, %c384] : memref<288x1152xbf16, #tpu.memory_space<vmem>>, vector<288x128xbf16>
      tpu.vector_store %arg13[%c0_29, %c384], %39 {strides = array<i32>} : memref<288x1152xbf16, #tpu.memory_space<vmem>>, vector<288x128xbf16>,
      %c19 = arith.constant 19 : index
      %c0_30 = arith.constant 0 : index
      %41 = vector.load %arg12[%c19, %c0_30] : memref<328x128xbf16, #tpu.memory_space<vmem>>, vector<288x128xbf16>
      %c0_31 = arith.constant 0 : index
      %c512 = arith.constant 512 : index
      %42 = vector.load %arg13[%c0_31, %c512] : memref<288x1152xbf16, #tpu.memory_space<vmem>>, vector<288x128xbf16>
      tpu.vector_store %arg13[%c0_31, %c512], %41 {strides = array<i32>} : memref<288x1152xbf16, #tpu.memory_space<vmem>>, vector<288x128xbf16>,
      %c20 = arith.constant 20 : index
      %c0_32 = arith.constant 0 : index
      %43 = vector.load %arg12[%c20, %c0_32] : memref<328x128xbf16, #tpu.memory_space<vmem>>, vector<288x128xbf16>
      %c0_33 = arith.constant 0 : index
      %c640 = arith.constant 640 : index
      %44 = vector.load %arg13[%c0_33, %c640] : memref<288x1152xbf16, #tpu.memory_space<vmem>>, vector<288x128xbf16>
      tpu.vector_store %arg13[%c0_33, %c640], %43 {strides = array<i32>} : memref<288x1152xbf16, #tpu.memory_space<vmem>>, vector<288x128xbf16>,
      %c36 = arith.constant 36 : index
      %c0_34 = arith.constant 0 : index
      %45 = vector.load %arg12[%c36, %c0_34] : memref<328x128xbf16, #tpu.memory_space<vmem>>, vector<288x128xbf16>
      %c0_35 = arith.constant 0 : index
      %c768 = arith.constant 768 : index
      %46 = vector.load %arg13[%c0_35, %c768] : memref<288x1152xbf16, #tpu.memory_space<vmem>>, vector<288x128xbf16>
      tpu.vector_store %arg13[%c0_35, %c768], %45 {strides = array<i32>} : memref<288x1152xbf16, #tpu.memory_space<vmem>>, vector<288x128xbf16>,
      %c37 = arith.constant 37 : index
      %c0_36 = arith.constant 0 : index
      %47 = vector.load %arg12[%c37, %c0_36] : memref<328x128xbf16, #tpu.memory_space<vmem>>, vector<288x128xbf16>
      %c0_37 = arith.constant 0 : index
      %c896 = arith.constant 896 : index
      %48 = vector.load %arg13[%c0_37, %c896] : memref<288x1152xbf16, #tpu.memory_space<vmem>>, vector<288x128xbf16>
      tpu.vector_store %arg13[%c0_37, %c896], %47 {strides = array<i32>} : memref<288x1152xbf16, #tpu.memory_space<vmem>>, vector<288x128xbf16>,
      %c38 = arith.constant 38 : index
      %c0_38 = arith.constant 0 : index
      %49 = vector.load %arg12[%c38, %c0_38] : memref<328x128xbf16, #tpu.memory_space<vmem>>, vector<288x128xbf16>
      %c0_39 = arith.constant 0 : index
      %c1024 = arith.constant 1024 : index
      %50 = vector.load %arg13[%c0_39, %c1024] : memref<288x1152xbf16, #tpu.memory_space<vmem>>, vector<288x128xbf16>
      tpu.vector_store %arg13[%c0_39, %c1024], %49 {strides = array<i32>} : memref<288x1152xbf16, #tpu.memory_space<vmem>>, vector<288x128xbf16>,
    } else {
    }
    %true = arith.constant true
    %16 = arith.xori %10, %true : i1
    %17 = arith.extui %16 : i1 to i32
    %c0_i32_7 = arith.constant 0 : i32
    %18 = arith.cmpi ne, %17, %c0_i32_7 : i32
    scf.if %18 {
      %c0_20 = arith.constant 0 : index
      %c0_21 = arith.constant 0 : index
      %33 = vector.load %arg11[%c0_20, %c0_21] : memref<328x128xbf16, #tpu.memory_space<vmem>>, vector<288x128xbf16>
      %c0_22 = arith.constant 0 : index
      %c0_23 = arith.constant 0 : index
      %34 = vector.load %arg13[%c0_22, %c0_23] : memref<288x1152xbf16, #tpu.memory_space<vmem>>, vector<288x128xbf16>
      tpu.vector_store %arg13[%c0_22, %c0_23], %33 {strides = array<i32>} : memref<288x1152xbf16, #tpu.memory_space<vmem>>, vector<288x128xbf16>,
      %c1 = arith.constant 1 : index
      %c0_24 = arith.constant 0 : index
      %35 = vector.load %arg11[%c1, %c0_24] : memref<328x128xbf16, #tpu.memory_space<vmem>>, vector<288x128xbf16>
      %c0_25 = arith.constant 0 : index
      %c128 = arith.constant 128 : index
      %36 = vector.load %arg13[%c0_25, %c128] : memref<288x1152xbf16, #tpu.memory_space<vmem>>, vector<288x128xbf16>
      tpu.vector_store %arg13[%c0_25, %c128], %35 {strides = array<i32>} : memref<288x1152xbf16, #tpu.memory_space<vmem>>, vector<288x128xbf16>,
      %c2 = arith.constant 2 : index
      %c0_26 = arith.constant 0 : index
      %37 = vector.load %arg11[%c2, %c0_26] : memref<328x128xbf16, #tpu.memory_space<vmem>>, vector<288x128xbf16>
      %c0_27 = arith.constant 0 : index
      %c256 = arith.constant 256 : index
      %38 = vector.load %arg13[%c0_27, %c256] : memref<288x1152xbf16, #tpu.memory_space<vmem>>, vector<288x128xbf16>
      tpu.vector_store %arg13[%c0_27, %c256], %37 {strides = array<i32>} : memref<288x1152xbf16, #tpu.memory_space<vmem>>, vector<288x128xbf16>,
      %c18 = arith.constant 18 : index
      %c0_28 = arith.constant 0 : index
      %39 = vector.load %arg11[%c18, %c0_28] : memref<328x128xbf16, #tpu.memory_space<vmem>>, vector<288x128xbf16>
      %c0_29 = arith.constant 0 : index
      %c384 = arith.constant 384 : index
      %40 = vector.load %arg13[%c0_29, %c384] : memref<288x1152xbf16, #tpu.memory_space<vmem>>, vector<288x128xbf16>
      tpu.vector_store %arg13[%c0_29, %c384], %39 {strides = array<i32>} : memref<288x1152xbf16, #tpu.memory_space<vmem>>, vector<288x128xbf16>,
      %c19 = arith.constant 19 : index
      %c0_30 = arith.constant 0 : index
      %41 = vector.load %arg11[%c19, %c0_30] : memref<328x128xbf16, #tpu.memory_space<vmem>>, vector<288x128xbf16>
      %c0_31 = arith.constant 0 : index
      %c512 = arith.constant 512 : index
      %42 = vector.load %arg13[%c0_31, %c512] : memref<288x1152xbf16, #tpu.memory_space<vmem>>, vector<288x128xbf16>
      tpu.vector_store %arg13[%c0_31, %c512], %41 {strides = array<i32>} : memref<288x1152xbf16, #tpu.memory_space<vmem>>, vector<288x128xbf16>,
      %c20 = arith.constant 20 : index
      %c0_32 = arith.constant 0 : index
      %43 = vector.load %arg11[%c20, %c0_32] : memref<328x128xbf16, #tpu.memory_space<vmem>>, vector<288x128xbf16>
      %c0_33 = arith.constant 0 : index
      %c640 = arith.constant 640 : index
      %44 = vector.load %arg13[%c0_33, %c640] : memref<288x1152xbf16, #tpu.memory_space<vmem>>, vector<288x128xbf16>
      tpu.vector_store %arg13[%c0_33, %c640], %43 {strides = array<i32>} : memref<288x1152xbf16, #tpu.memory_space<vmem>>, vector<288x128xbf16>,
      %c36 = arith.constant 36 : index
      %c0_34 = arith.constant 0 : index
      %45 = vector.load %arg11[%c36, %c0_34] : memref<328x128xbf16, #tpu.memory_space<vmem>>, vector<288x128xbf16>
      %c0_35 = arith.constant 0 : index
      %c768 = arith.constant 768 : index
      %46 = vector.load %arg13[%c0_35, %c768] : memref<288x1152xbf16, #tpu.memory_space<vmem>>, vector<288x128xbf16>
      tpu.vector_store %arg13[%c0_35, %c768], %45 {strides = array<i32>} : memref<288x1152xbf16, #tpu.memory_space<vmem>>, vector<288x128xbf16>,
      %c37 = arith.constant 37 : index
      %c0_36 = arith.constant 0 : index
      %47 = vector.load %arg11[%c37, %c0_36] : memref<328x128xbf16, #tpu.memory_space<vmem>>, vector<288x128xbf16>
      %c0_37 = arith.constant 0 : index
      %c896 = arith.constant 896 : index
      %48 = vector.load %arg13[%c0_37, %c896] : memref<288x1152xbf16, #tpu.memory_space<vmem>>, vector<288x128xbf16>
      tpu.vector_store %arg13[%c0_37, %c896], %47 {strides = array<i32>} : memref<288x1152xbf16, #tpu.memory_space<vmem>>, vector<288x128xbf16>,
      %c38 = arith.constant 38 : index
      %c0_38 = arith.constant 0 : index
      %49 = vector.load %arg11[%c38, %c0_38] : memref<328x128xbf16, #tpu.memory_space<vmem>>, vector<288x128xbf16>
      %c0_39 = arith.constant 0 : index
      %c1024 = arith.constant 1024 : index
      %50 = vector.load %arg13[%c0_39, %c1024] : memref<288x1152xbf16, #tpu.memory_space<vmem>>, vector<288x128xbf16>
      tpu.vector_store %arg13[%c0_39, %c1024], %49 {strides = array<i32>} : memref<288x1152xbf16, #tpu.memory_space<vmem>>, vector<288x128xbf16>,
    } else {
    }
    %c0 = arith.constant 0 : index
    %c0_8 = arith.constant 0 : index
    %19 = vector.load %arg13[%c0, %c0_8] : memref<288x1152xbf16, #tpu.memory_space<vmem>>, vector<288x1152xbf16>
    %c0_9 = arith.constant 0 : index
    %c0_10 = arith.constant 0 : index
    %c0_11 = arith.constant 0 : index
    %c0_12 = arith.constant 0 : index
    %20 = vector.load %arg4[%c0_9, %c0_10, %c0_11, %c0_12] : memref<1x1x1152x128xbf16, #tpu.memory_space<vmem>>, vector<1x1x1152x128xbf16>
    %21 = vector.shape_cast %20 : vector<1x1x1152x128xbf16> to vector<1152x128xbf16>
    %cst = arith.constant dense<0.000000e+00> : vector<288x128xf32>
    %22 = tpu.matmul %19, %21, %cst {dimension_numbers = #tpu.dot_dimension_numbers<[1], [0], [0], [1], [0, 0, 1, 1], [], []>} : vector<288x1152xbf16>, vector<1152x128xbf16>, vector<288x128xf32> -> vector<288x128xf32>
    %c0_13 = arith.constant 0 : index
    %c0_14 = arith.constant 0 : index
    %c0_15 = arith.constant 0 : index
    %c0_16 = arith.constant 0 : index
    %23 = vector.load %arg5[%c0_13, %c0_14, %c0_15, %c0_16] : memref<1x1x1x128xf32, #tpu.memory_space<vmem>>, vector<1x1x1x128xf32>
    %24 = vector.shape_cast %23 : vector<1x1x1x128xf32> to vector<1x128xf32>
    %25 = vector.broadcast %24 : vector<1x128xf32> to vector<288x128xf32>
    %26 = arith.addf %22, %25 : vector<288x128xf32>
    %c4_i32 = arith.constant 4 : i32
    %27 = arith.cmpi slt, %arg2, %c4_i32 : i32
    %28 = arith.extui %27 : i1 to i32
    %c0_i32_17 = arith.constant 0 : i32
    %29 = arith.cmpi ne, %28, %c0_i32_17 : i32
    scf.if %29 {
      %c0_20 = arith.constant 0 : index
      %c0_21 = arith.constant 0 : index
      %33 = vector.load %arg9[%c0_20, %c0_21] : memref<288x1xf32, #tpu.memory_space<vmem>>, vector<288x1xf32>
      %34 = vector.broadcast %33 : vector<288x1xf32> to vector<288x128xf32>
      %35 = arith.mulf %26, %34 : vector<288x128xf32>
      %cst_22 = arith.constant dense<0.000000e+00> : vector<128xf32>
      %36 = vector.multi_reduction <add>, %35, %cst_22 [0] : vector<288x128xf32> to vector<128xf32>
      %37 = vector.shape_cast %36 : vector<128xf32> to vector<1x128xf32>
      %cst_23 = arith.constant 3.906250e-03 : f32
      %38 = vector.broadcast %cst_23 : f32 to vector<1x128xf32>
      %39 = arith.mulf %37, %38 : vector<1x128xf32>
      %c0_24 = arith.constant 0 : index
      %c0_25 = arith.constant 0 : index
      %40 = vector.load %arg8[%c0_24, %c0_25] : memref<128x128xf32, #tpu.memory_space<vmem>>, vector<128x128xf32>
      %cst_26 = arith.constant dense<0.000000e+00> : vector<1x128xf32>
      %41 = tpu.matmul %39, %40, %cst_26 {dimension_numbers = #tpu.dot_dimension_numbers<[1], [0], [0], [1], [0, 0, 1, 1], [], []>} : vector<1x128xf32>, vector<128x128xf32>, vector<1x128xf32> -> vector<1x128xf32>
      %42 = vector.broadcast %41 : vector<1x128xf32> to vector<288x128xf32>
      %43 = arith.subf %26, %42 : vector<288x128xf32>
      %44 = arith.mulf %43, %43 : vector<288x128xf32>
      %45 = vector.broadcast %33 : vector<288x1xf32> to vector<288x128xf32>
      %46 = arith.mulf %44, %45 : vector<288x128xf32>
      %cst_27 = arith.constant dense<0.000000e+00> : vector<128xf32>
      %47 = vector.multi_reduction <add>, %46, %cst_27 [0] : vector<288x128xf32> to vector<128xf32>
      %48 = vector.shape_cast %47 : vector<128xf32> to vector<1x128xf32>
      %cst_28 = arith.constant 3.906250e-03 : f32
      %49 = vector.broadcast %cst_28 : f32 to vector<1x128xf32>
      %50 = arith.mulf %48, %49 : vector<1x128xf32>
      %c0_29 = arith.constant 0 : index
      %c0_30 = arith.constant 0 : index
      %51 = vector.load %arg8[%c0_29, %c0_30] : memref<128x128xf32, #tpu.memory_space<vmem>>, vector<128x128xf32>
      %cst_31 = arith.constant dense<0.000000e+00> : vector<1x128xf32>
      %52 = tpu.matmul %50, %51, %cst_31 {dimension_numbers = #tpu.dot_dimension_numbers<[1], [0], [0], [1], [0, 0, 1, 1], [], []>} : vector<1x128xf32>, vector<128x128xf32>, vector<1x128xf32> -> vector<1x128xf32>
      %cst_32 = arith.constant 9.99999974E-6 : f32
      %53 = vector.broadcast %cst_32 : f32 to vector<1x128xf32>
      %54 = arith.addf %52, %53 : vector<1x128xf32>
      %55 = math.rsqrt %54 : vector<1x128xf32>
      %56 = vector.broadcast %55 : vector<1x128xf32> to vector<288x128xf32>
      %57 = arith.mulf %43, %56 : vector<288x128xf32>
      %c0_33 = arith.constant 0 : index
      %c0_34 = arith.constant 0 : index
      %c0_35 = arith.constant 0 : index
      %c0_36 = arith.constant 0 : index
      %58 = vector.load %arg6[%c0_33, %c0_34, %c0_35, %c0_36] : memref<1x1x1x128xf32, #tpu.memory_space<vmem>>, vector<1x1x1x128xf32>
      %59 = vector.shape_cast %58 : vector<1x1x1x128xf32> to vector<1x128xf32>
      %60 = vector.broadcast %59 : vector<1x128xf32> to vector<288x128xf32>
      %61 = arith.mulf %57, %60 : vector<288x128xf32>
      %c0_37 = arith.constant 0 : index
      %c0_38 = arith.constant 0 : index
      %c0_39 = arith.constant 0 : index
      %c0_40 = arith.constant 0 : index
      %62 = vector.load %arg7[%c0_37, %c0_38, %c0_39, %c0_40] : memref<1x1x1x128xf32, #tpu.memory_space<vmem>>, vector<1x1x1x128xf32>
      %63 = vector.shape_cast %62 : vector<1x1x1x128xf32> to vector<1x128xf32>
      %64 = vector.broadcast %63 : vector<1x128xf32> to vector<288x128xf32>
      %65 = arith.addf %61, %64 : vector<288x128xf32>
      %cst_41 = arith.constant 0.000000e+00 : f32
      %66 = vector.broadcast %cst_41 : f32 to vector<288x128xf32>
      %67 = arith.maximumf %65, %66 : vector<288x128xf32>
      %68 = vector.broadcast %33 : vector<288x1xf32> to vector<288x128xf32>
      %69 = arith.mulf %67, %68 : vector<288x128xf32>
      %70 = arith.truncf %69 : vector<288x128xf32> to vector<288x128xbf16>
      %71 = arith.extui %10 : i1 to i32
      %c0_i32_42 = arith.constant 0 : i32
      %72 = arith.cmpi ne, %71, %c0_i32_42 : i32
      scf.if %72 {
        %c19 = arith.constant 19 : index
        %c0_45 = arith.constant 0 : index
        %76 = vector.load %arg11[%c19, %c0_45] : memref<328x128xbf16, #tpu.memory_space<vmem>>, vector<288x128xbf16>
        tpu.vector_store %arg11[%c19, %c0_45], %70 {strides = array<i32>} : memref<328x128xbf16, #tpu.memory_space<vmem>>, vector<288x128xbf16>,
      } else {
      }
      %true_43 = arith.constant true
      %73 = arith.xori %10, %true_43 : i1
      %74 = arith.extui %73 : i1 to i32
      %c0_i32_44 = arith.constant 0 : i32
      %75 = arith.cmpi ne, %74, %c0_i32_44 : i32
      scf.if %75 {
        %c19 = arith.constant 19 : index
        %c0_45 = arith.constant 0 : index
        %76 = vector.load %arg12[%c19, %c0_45] : memref<328x128xbf16, #tpu.memory_space<vmem>>, vector<288x128xbf16>
        tpu.vector_store %arg12[%c19, %c0_45], %70 {strides = array<i32>} : memref<328x128xbf16, #tpu.memory_space<vmem>>, vector<288x128xbf16>,
      } else {
      }
    } else {
    }
    %c4_i32_18 = arith.constant 4 : i32
    %30 = arith.cmpi eq, %arg2, %c4_i32_18 : i32
    %31 = arith.extui %30 : i1 to i32
    %c0_i32_19 = arith.constant 0 : i32
    %32 = arith.cmpi ne, %31, %c0_i32_19 : i32
    scf.if %32 {
      %33 = arith.truncf %26 : vector<288x128xf32> to vector<288x128xbf16>
      %c0_20 = arith.constant 0 : index
      %c0_21 = arith.constant 0 : index
      %c0_22 = arith.constant 0 : index
      %c0_23 = arith.constant 0 : index
      %34 = vector.load %arg10[%c0_20, %c0_21, %c0_22, %c0_23] : memref<1x1x288x128xbf16, #tpu.memory_space<vmem>>, vector<1x1x288x128xbf16>
      %35 = vector.shape_cast %34 : vector<1x1x288x128xbf16> to vector<288x128xbf16>
      %36 = vector.shape_cast %33 : vector<288x128xbf16> to vector<1x1x288x128xbf16>
      tpu.vector_store %arg10[%c0_20, %c0_21, %c0_22, %c0_23], %36 {strides = array<i32>} : memref<1x1x288x128xbf16, #tpu.memory_space<vmem>>, vector<1x1x288x128xbf16>,
    } else {
    }
    return
  }
  func.func @transform_0(%arg0: i32, %arg1: i32, %arg2: i32) -> (i32, i32, i32) {
    %c0_i32 = arith.constant 0 : i32
    %c0_i32_0 = arith.constant 0 : i32
    %c0_i32_1 = arith.constant 0 : i32
    return %arg1, %c0_i32, %c0_i32_0 : i32, i32, i32
  }
  func.func @transform_1(%arg0: i32, %arg1: i32, %arg2: i32) -> (i32, i32, i32, i32) {
    %c0_i32 = arith.constant 0 : i32
    %c0_i32_0 = arith.constant 0 : i32
    %c0_i32_1 = arith.constant 0 : i32
    return %arg0, %arg2, %c0_i32, %c0_i32_0 : i32, i32, i32, i32
  }
  func.func @transform_2(%arg0: i32, %arg1: i32, %arg2: i32) -> (i32, i32, i32, i32) {
    %c0_i32 = arith.constant 0 : i32
    %c0_i32_0 = arith.constant 0 : i32
    %c0_i32_1 = arith.constant 0 : i32
    return %arg0, %arg2, %c0_i32, %c0_i32_0 : i32, i32, i32, i32
  }
  func.func @transform_3(%arg0: i32, %arg1: i32, %arg2: i32) -> (i32, i32, i32, i32) {
    %c0_i32 = arith.constant 0 : i32
    %c0_i32_0 = arith.constant 0 : i32
    %c0_i32_1 = arith.constant 0 : i32
    return %arg0, %arg2, %c0_i32, %c0_i32_0 : i32, i32, i32, i32
  }
  func.func @transform_4(%arg0: i32, %arg1: i32, %arg2: i32) -> (i32, i32, i32, i32) {
    %c0_i32 = arith.constant 0 : i32
    %c0_i32_0 = arith.constant 0 : i32
    %c0_i32_1 = arith.constant 0 : i32
    return %arg0, %arg2, %c0_i32, %c0_i32_0 : i32, i32, i32, i32
  }
  func.func @transform_5(%arg0: i32, %arg1: i32, %arg2: i32) -> (i32, i32) {
    %c0_i32 = arith.constant 0 : i32
    %c0_i32_0 = arith.constant 0 : i32
    %c0_i32_1 = arith.constant 0 : i32
    return %c0_i32, %c0_i32_0 : i32, i32
  }
  func.func @transform_6(%arg0: i32, %arg1: i32, %arg2: i32) -> (i32, i32) {
    %c0_i32 = arith.constant 0 : i32
    %c0_i32_0 = arith.constant 0 : i32
    %c0_i32_1 = arith.constant 0 : i32
    return %c0_i32, %c0_i32_0 : i32, i32
  }
  func.func @transform_7(%arg0: i32, %arg1: i32, %arg2: i32) -> (i32, i32, i32, i32) {
    %c0_i32 = arith.constant 0 : i32
    %c0_i32_0 = arith.constant 0 : i32
    %c0_i32_1 = arith.constant 0 : i32
    return %arg0, %arg1, %c0_i32, %c0_i32_0 : i32, i32, i32, i32
  }
}

</mosaic_0001>

<bundles_post_ra>
// kernel: tpu_custom_call.1
= control target key start
LH: loop header
LB: loop body
LE: loop exit
PB: predicated region body
PF: predicated region fallthrough
CT: control target
= control target key end

     0   :  { %s13707_s0 = inlined_call_operand.hbm [shape: bf16[2,328,128], index: 0, kind: input, shape index: {}]   ;;  %s13708_s1 = inlined_call_operand.hbm [shape: bf16[2,5,1152,128], index: 1, kind: input, shape index: {}]   ;;  %s13709_s2 = inlined_call_operand.hbm [shape: f32[2,5,1,128], index: 2, kind: input, shape index: {}]   ;;  %s13710_s3 = inlined_call_operand.hbm [shape: f32[2,5,1,128], index: 3, kind: input, shape index: {}]   ;;  %s13711_s4 = inlined_call_operand.hbm [shape: f32[2,5,1,128], index: 4, kind: input, shape index: {}]   ;;  %s13712_s5 = inlined_call_operand.hbm [shape: f32[128,128], index: 5, kind: input, shape index: {}]   ;;  %s13713_s6 = inlined_call_operand.vmem [shape: f32[288,1], index: 6, kind: input, shape index: {}]   ;;  %s13714_s7 = inlined_call_operand.hbm [shape: bf16[2,2,288,128], index: 7, kind: output, shape index: {}]  }
   0x1   :  { %13851 = sst [smem:[#allocation111_spill]] %s13707_s0 }
   0x2   :  { %13852 = sst [smem:[#allocation112_spill]] %s13708_s1 }
   0x3   :  { %13853 = sst [smem:[#allocation113_spill]] %s13709_s2 }
   0x4   :  { %13854 = sst [smem:[#allocation114_spill]] %s13710_s3 }
   0x5   :  { %13855 = sst [smem:[#allocation115_spill]] %s13711_s4 }
   0x6   :  { %13856 = sst [smem:[#allocation116_spill]] %s13712_s5 }
   0x7   :  { %13857 = sst [smem:[#allocation117_spill]] %s13713_s6 }
   0x8   :  { %13858 = sst [smem:[#allocation118_spill]] %s13714_s7 }
   0x9   :  { %12 = vsyncpa [#allocation6], 0 }
   0xa   :  { %14 = vsyncpa [#allocation6 + $0x1], 0 }
   0xb   :  { %15 = vsyncpa [#allocation9], 0 }
   0xc   :  { %17 = vsyncpa [#allocation9 + $0x1], 0 }
   0xd   :  { %18 = vsyncpa [#allocation12], 0 }
   0xe   :  { %20 = vsyncpa [#allocation12 + $0x1], 0 }
   0xf   :  { %21 = vsyncpa [#allocation15], 0 }
  0x10   :  { %22 = vsyncpa [#allocation7], 0 }
  0x11   :  { %24 = vsyncpa [#allocation7 + $0x1], 0  ;;  %s11108_s24 = smov 0   ;;  %s11110_s25 = smov 0  }
  0x12   :  { %s11112_s26 = smov 0   ;;  %s11114_s27 = smov 0  }
  0x13   :  { %s11116_s28 = smov 0   ;;  %s11118_s29 = smov 0  }
  0x14   :  { %s11120_s30 = smov 0   ;;  %s11122_s8 = smov 0  }
  0x15   :  { %s11124_s9 = smov 0   ;;  %s11126_s10 = smov 0  }
  0x16   :  { %s11128_s11 = smov 0   ;;  %s11130_s12 = smov 0  }
  0x17   :  { %s11132_s13 = smov 0   ;;  %s11134_s14 = smov 0  }
  0x18   :  { %s11136_s15 = smov 0   ;;  %s11138_s16 = smov 0  }
  0x19 LB: > { %13859 = sst [smem:[#allocation22_spill]] %s10987_s24  ;;  %s42_s17 = sadd.s32 1, %s11035_s13  ;;  %s11047_s16 = sphi %s11138_s16, %s30_s16   ;;  %s11043_s15 = sphi %s11136_s15, %s14132_s15   ;;  %s11039_s14 = sphi %s11134_s14, %s14131_s14   ;;  %s11035_s13 = sphi %s11132_s13, %s14130_s13   ;;  %s11031_s12 = sphi %s11130_s12, %s14129_s12   ;;  %s11027_s11 = sphi %s11128_s11, %s14128_s11   ;;  %s11023_s10 = sphi %s11126_s10, %s14127_s10   ;;  %s11019_s9 = sphi %s11124_s9, %s14121_s9   ;;  %s11015_s8 = sphi %s11122_s8, %s14120_s8   ;;  %s11011_s30 = sphi %s11120_s30, %s14119_s30   ;;  %s11007_s29 = sphi %s11118_s29, %s14126_s29   ;;  %s11003_s28 = sphi %s11116_s28, %s14118_s28   ;;  %s10999_s27 = sphi %s11114_s27, %s14117_s27   ;;  %s10995_s26 = sphi %s11112_s26, %s14125_s26   ;;  %s10991_s25 = sphi %s11110_s25, %s14124_s25   ;;  %s10987_s24 = sphi %s11108_s24, %s14116_s24  }
  0x1a   : > { %13860 = sst [smem:[#allocation23_spill]] %s10991_s25  ;;  %p11190_p0 = scmp.ge.s32.totalorder %s42_s17, 5 }
  0x1b   : > { %13861 = sst [smem:[#allocation24_spill]] %s11003_s28  ;;  %p13726_p1 = scmp.eq.s32.totalorder %s11047_s16, 0 }
  0x1c   : > { %13862 = sst [smem:[#allocation25_spill]] %s11007_s29  ;;  %p91_p2 = scmp.ne.s32.totalorder %s11007_s29, %s11003_s28 }
  0x1d   : > { %13863 = sst [smem:[#allocation26_spill]] %s11015_s8  ;;  %s14134_s17 = smov (%p11190_p0, %s42_s17), 0 }
  0x1e   : > { %13864 = sst [smem:[#allocation27_spill]] %s11019_s9  ;;  %p93_p3 = por %p91_p2, %p13726_p1 }
  0x1f   : > { %13865 = sst [smem:[#allocation28_spill]] %s11023_s10  ;;  %p13725_p4 = scmp.lt.s32.totalorder %s11047_s16, 20 }
  0x20   : > { %13866 = sst [smem:[#allocation29_spill]] %s11027_s11  ;;  %s11209_s23 = sand.u32 1, %s11007_s29  }
  0x21   : > { %13867 = sst [smem:[#allocation30_spill]] %s11031_s12  ;;  %s10083_s18 = smul.u32 576, %s11209_s23 }
  0x22   : > { %13868 = sst [smem:[#allocation31_spill]] %s11047_s16  ;;  %s10084_s7 = smul.u32 144, %s11035_s13 }
  0x23   : > { %s13869_s19 = scalar_select %p11190_p0, 1, 0 }
  0x24   : > { %13871 = sst [smem:[#allocation33_spill]] %s14134_s17  ;;  %p11215_p5 = pnand %p13725_p4, %p93_p3 }
  0x25   : > { %13870 = sst [smem:[#allocation32_spill]] %s13869_s19  ;;  %s10085_s12 = smul.u32 720, %s11043_s15 }
  0x26   : > { %s13872_s20 = scalar_select %p11215_p5, 1, 0 }
  0x27   : > { %s316_s11 = scalar_lea.vmem [#allocation8], %s10083_s18  ;;  %s322_s10 = sadd.s32 %s10085_s12, %s10084_s7 }
  0x28   : > { %s325_s6 = sshll.u32 %s316_s11, 4  ;;  %s8872_s21 = sshll.u32 %s322_s10, 6  ;;  %s11220_s6 = int_to_ptr.vmem [resolvable:$true] %s325_s6 }
  0x29   : > { %s10086_s4 = smul.u32 5, %s11043_s15  ;;  %s13873_s1 = sld [smem:[#allocation112_spill]] }
  0x2a   : > { %s13874_s29 = sand.u32 1, %s11047_s16   ;;  %p11236_p7 = pneg %p11215_p5 }
  0x2b   : > { %s11230_s17 = scalar_lea.sflag [#allocation9], %s13874_s29 }
  0x2c   : > { %s13875_s7 = scalar_select %p11236_p7, 1, 0 }
  0x2f   : > { %s11226_s0 = scalar_lea.hbm %s13873_s1, %s8872_s21  ;;  %s10700_s11 = scalar_lea.hbm %s13873_s1, 92160 }
  0x30   : > { %s10695_s9 = scalar_lea.hbm %s11226_s0, 9216  ;;  %p10701_p10 = scmp.lt.u32.totalorder %s11226_s0, %s13873_s1 }
  0x31   : > { %p10696_p6 = scmp.ne.s32.totalorder %s11226_s0, %s10695_s9  ;;  %p10702_p11 = scmp.lt.u32.totalorder %s10700_s11, %s10695_s9 }
  0x32   : > { %p10704_p13 = scmp.lt.u32.totalorder %s10695_s9, %s11226_s0 }
  0x33   : > { %p10698_p8 = pnand %p11236_p7, %p10696_p6  ;;  %p10703_p12 = por %p10702_p11, %p10701_p10 }
  0x35   : > { %p10699_p9 = pneg %p10698_p8  ;;  %p10705_p2 = por %p10704_p13, %p10703_p12 }
  0x37   : > { %p10706_p3 = pnand %p10705_p2, %p10699_p9 }
  0x39   : > { %10709 = shalt.err (!%p10706_p3)
}
  0x3a   : > { %s10710_s29 = scalar_lea.vmem %s11220_s6, 9216  ;;  %s11049_s21 = smov [#allocation8]  }
  0x3b   : > { %p10711_p6 = scmp.ne.s32.totalorder %s11220_s6, %s10710_s29  ;;  %s10715_s22 = sshll.u32 %s11049_s21, 4  ;;  %s10716_s22 = int_to_ptr.vmem [resolvable:$false] %s10715_s22 }
  0x3c   : > { %s10717_s2 = scalar_lea.vmem %s10716_s22, 18432  ;;  %p10718_p1 = scmp.lt.s32.totalorder %s11220_s6, %s10716_s22 }
  0x3d   : > { %p10713_p8 = pnand %p10711_p6, %p11236_p7  ;;  %p10719_p0 = scmp.lt.s32.totalorder %s10717_s2, %s10710_s29 }
  0x3f   : > { %p10714_p4 = pneg %p10713_p8  ;;  %p10720_p10 = por %p10719_p0, %p10718_p1 }
  0x41   : > { %p10721_p11 = pnand %p10720_p10, %p10714_p4 }
  0x43   : > { %10724 = shalt.err (!%p10721_p11)
}
  0x44   : > { %s13729_s9 = smov 64   ;;  %s13732_s10 = smov 4  }
  0x45   : > { %10120 = dma.hbm_to_vmem [thread:$0]  (!%p11215_p5), %s11226_s0, 9216, %s11220_s6, %s11230_s17, %s13729_s9, %s13729_s9, %s13732_s10  }
  0x46   : > { %s343_s11 = sadd.s32 %s11035_s13, %s10086_s4  ;;  %s357_s18 = scalar_lea.vmem [#allocation11], %s11209_s23 }
  0x47   : > { %s11266_s12 = sshll.u32 %s343_s11, 4  ;;  %s366_s29 = sshll.u32 %s357_s18, 4  ;;  %s367_s29 = int_to_ptr.vmem [resolvable:$true] %s366_s29 }
  0x48   : > { %s13876_s3 = sld [smem:[#allocation114_spill]]  ;;  %s13877_s1 = sand.u32 1, %s11047_s16  }
  0x49   : > { %s11277_s19 = scalar_lea.sflag [#allocation12], %s13877_s1 }
  0x4e   : > { %s11273_s2 = scalar_lea.hbm %s13876_s3, %s11266_s12  ;;  %s10730_s11 = scalar_lea.hbm %s13876_s3, 160 }
  0x4f   : > { %s10725_s0 = scalar_lea.hbm %s11273_s2, 16  ;;  %p10731_p9 = scmp.lt.u32.totalorder %s11273_s2, %s13876_s3 }
  0x50   : > { %p10726_p0 = scmp.ne.s32.totalorder %s11273_s2, %s10725_s0  ;;  %p10732_p12 = scmp.lt.u32.totalorder %s10730_s11, %s10725_s0 }
  0x51   : > { %p10734_p2 = scmp.lt.u32.totalorder %s10725_s0, %s11273_s2 }
  0x52   : > { %p10728_p1 = pnand %p10726_p0, %p11236_p7  ;;  %p10733_p13 = por %p10732_p12, %p10731_p9 }
  0x54   : > { %p10729_p4 = pneg %p10728_p1  ;;  %p10735_p3 = por %p10734_p2, %p10733_p13 }
  0x56   : > { %p10736_p6 = pnand %p10735_p3, %p10729_p4 }
  0x58   : > { %10739 = shalt.err (!%p10736_p6)
}
  0x59   : > { %s10740_s1 = scalar_lea.vmem %s367_s29, 16  ;;  %s11052_s22 = smov [#allocation11]  }
  0x5a   : > { %p10741_p8 = scmp.ne.s32.totalorder %s367_s29, %s10740_s1  ;;  %s10745_s9 = sshll.u32 %s11052_s22, 4  ;;  %s10746_s9 = int_to_ptr.vmem [resolvable:$false] %s10745_s9 }
  0x5b   : > { %s10747_s4 = scalar_lea.vmem %s10746_s9, 32  ;;  %p10748_p0 = scmp.lt.s32.totalorder %s367_s29, %s10746_s9 }
  0x5c   : > { %p10743_p10 = pnand %p10741_p8, %p11236_p7  ;;  %p10749_p1 = scmp.lt.s32.totalorder %s10747_s4, %s10740_s1 }
  0x5e   : > { %p10744_p11 = pneg %p10743_p10  ;;  %p10750_p5 = por %p10749_p1, %p10748_p0 }
  0x60   : > { %p10751_p9 = pnand %p10750_p5, %p10744_p11 }
  0x62   : > { %10754 = shalt.err (!%p10751_p9)
}
  0x63   : > { %p13878_p12 = scmp.ne.s32.totalorder %s13872_s20, 0  ;;  %s11298_s9 = sadd.s32 4294967295, %s11047_s16  }
  0x64   : > { %13879 = sst [smem:[#allocation34_spill]] %s11298_s9  ;;  %s8867_s0 = sadd.s32 4294967294, %s11047_s16  }
  0x65   : > { %10126 = dma.hbm_to_vmem [thread:$0]  (!%p13878_p12), %s11273_s2, 16, %s367_s29, %s11277_s19  }
  0x66   : > { %p69_p5 = scmp.ne.s32.totalorder %s11015_s8, %s11011_s30  ;;  %p13735_p4 = scmp.eq.s32.totalorder %s11298_s9, 0 }
  0x67   : > { %p97_p13 = scmp.ne.s32.totalorder %s11003_s28, %s10999_s27  ;;  %p248_p2 = scmp.ne.s32.totalorder %s10995_s26, %s10991_s25 }
  0x68   : > { %p11310_p3 = por %p13735_p4, %p69_p5  ;;  %p249_p6 = scmp.eq.s32.totalorder %s11298_s9, 19 }
  0x69   : > { %p11317_p8 = por %p97_p13, %p13735_p4  ;;  %p254_p10 = scmp.ne.s32.totalorder %s10991_s25, %s10987_s24 }
  0x6a   : > { %s13880_s6 = scalar_select %p11310_p3, 1, 0 }
  0x6b   : > { %s13882_s29 = scalar_select %p11317_p8, 1, 0 }
  0x6c   : > { %13881 = sst [smem:[#allocation35_spill]] %s13880_s6  ;;  %p11323_p11 = por %p249_p6, %p248_p2 }
  0x6d   : > { %13883 = sst [smem:[#allocation36_spill]] %s13882_s29  ;;  %p255_p0 = scmp.eq.s32.totalorder %s8867_s0, 19 }
  0x6e   : > { %s13884_s2 = scalar_select %p11323_p11, 1, 0 }
  0x6f   : > { %p8868_p1 = scmp.ge.s32.totalorder %s11047_s16, 1  ;;  %p262_p9 = scmp.lt.s32.totalorder %s11047_s16, 21 }
  0x70   : > { %13885 = sst [smem:[#allocation37_spill]] %s13884_s2  ;;  %p11329_p12 = por %p255_p0, %p254_p10 }
  0x71   : > { %p11333_p5 = pnand %p8868_p1, %p262_p9  ;;  %s11053_s11 = smov [#allocation14]  }
  0x72   : > { %s13886_s27 = scalar_select %p11329_p12, 1, 0 }
  0x73   : > { %s13888_s30 = scalar_select %p11333_p5, 1, 0 }
  0x74   : > { %13887 = sst [smem:[#allocation38_spill]] %s13886_s27  ;;  %s274_s18 = sshll.u32 %s11053_s11, 4  ;;  %s275_s18 = int_to_ptr.vmem [resolvable:$true] %s274_s18 }
  0x75   : > { %13889 = sst [smem:[#allocation39_spill]] %s13888_s30  ;;  %p10110_p13 = pneg %p11333_p5 }
  0x76   : > { %s45_s1 = sadd.s32 1, %s11039_s14  ;;  %s13891_s5 = sld [smem:[#allocation116_spill]] }
  0x77   : > { %p11341_p2 = pnand %p10110_p13, %p13735_p4 }
  0x79   : > { %p10757_p10 = pneg %p11341_p2 }
  0x7c   : > { %s10755_s0 = scalar_lea.hbm %s13891_s5, 2048 }
  0x7d   : > { %p10756_p6 = scmp.ne.s32.totalorder %s13891_s5, %s10755_s0  ;;  %p10762_p9 = scmp.lt.u32.totalorder %s10755_s0, %s13891_s5 }
  0x7f   : > { %p10758_p0 = pnand %p10757_p10, %p10756_p6 }
  0x81   : > { %p10759_p1 = pneg %p10758_p0 }
  0x83   : > { %p10764_p13 = pnand %p10762_p9, %p10759_p1 }
  0x85   : > { %10767 = shalt.err (!%p10764_p13)
}
  0x86   : > { %s10768_s24 = scalar_lea.vmem %s275_s18, 2048  ;;  %p10776_p8 = scmp.lt.s32.totalorder %s275_s18, %s275_s18 }
  0x87   : > { %p10769_p4 = scmp.ne.s32.totalorder %s275_s18, %s10768_s24  ;;  %p10777_p3 = scmp.lt.s32.totalorder %s10768_s24, %s10768_s24 }
  0x89   : > { %p10771_p12 = pnand %p10769_p4, %p10757_p10  ;;  %p10778_p5 = por %p10777_p3, %p10776_p8 }
  0x8b   : > { %p10772_p11 = pneg %p10771_p12 }
  0x8d   : > { %p10779_p7 = pnand %p10778_p5, %p10772_p11 }
  0x8f   : > { %10782 = shalt.err (!%p10779_p7)
}
  0x90   : > { %s11054_s3 = smov 128   ;;  %s13892_s10 = sld [smem:[#allocation32_spill]] }
  0x91   : > { %s13893_s22 = sld [smem:[#allocation27_spill]]  ;;  %s11055_s27 = smov 8  }
  0x92   : > { %10113 = dma.hbm_to_vmem [thread:$0]  (!%p11341_p2), %s13891_s5, 2048, %s275_s18, [#allocation15], %s11054_s3, %s11054_s3, %s11055_s27  }
  0x93   : > { %s13895_s11 = sld [smem:[#allocation33_spill]]  ;;  %s238_s2 = sadd.s32 1, %s10995_s26 }
  0x94   : > { %p13896_p3 = scmp.eq.s32.totalorder %s11047_s16, 0  ;;  %s13898_s21 = sadd.s32 1, %s11043_s15 }
  0x95   : > { %s13899_s18 = sld [smem:[#allocation25_spill]]  ;;  %p13900_p2 = scmp.lt.s32.totalorder %s11047_s16, 20 }
  0x96   : > { %p13894_p7 = scmp.ne.s32.totalorder %s13892_s10, 0  ;;  %s10082_s29 = smul.u32 2624, %s11039_s14 }
  0x97   : > { %s56_s0 = sadd.s32 1, %s13893_s22  ;;  %p63_p12 = scmp.ne.s32.totalorder %s13893_s22, %s11015_s8 }
  0x98   : > { %s14136_s1 = smov (!%p13894_p7, %s45_s1), %s11039_s14  ;;  %s291_s25 = sand.u32 1, %s13893_s22  }
  0x99   : > { %p47_p4 = scmp.ge.s32.totalorder %s14136_s1, 2  ;;  %p65_p8 = por %p13896_p3, %p63_p12 }
  0x9a   : > { %s10081_s10 = smul.u32 164, %s291_s25  ;;  %s13903_s4 = ssub.s32 %s11035_s13, %s13895_s11 }
  0x9b   : > { %s14138_s1 = smov (%p47_p4, %s14136_s1), 0  ;;  %s14140_s21 = smov (!%p47_p4, %s13898_s21), %s11043_s15 }
  0x9c   : > { %13897 = sst [smem:[#allocation40_spill]] %s14138_s1  ;;  %s53_s3 = ssub.s32 %s11039_s14, %s14138_s1 }
  0x9d   : > { %p51_p11 = scmp.ge.s32.totalorder %s14140_s21, 2  ;;  %p54_p5 = scmp.eq.s32.totalorder %s53_s3, 0 }
  0x9e   : > { %p11381_p6 = pnand %p13900_p2, %p65_p8  ;;  %s295_s28 = scalar_lea.vmem [#allocation5], %s10081_s10 }
  0x9f   : > { %s14142_s21 = smov (%p51_p11, %s14140_s21), 0  ;;  %s14144_s22 = smov (!%p54_p5, %s13893_s22), %s56_s0 }
  0xa0   : > { %13902 = sst [smem:[#allocation41_spill]] %s14144_s22  ;;  %s79_s24 = ssub.s32 %s11043_s15, %s14142_s21 }
  0xa1   : > { %s81_s5 = sor.u32 %s13903_s4, %s79_s24  ;;  %s235_s1 = sor.u32 %s79_s24, %s53_s3 }
  0xa2   : > { %p82_p10 = scmp.eq.s32.totalorder %s81_s5, 0  ;;  %p236_p0 = scmp.eq.s32.totalorder %s235_s1, 0 }
  0xa3   : > { %s302_s16 = sshll.u32 %s295_s28, 4  ;;  %s13904_s9 = sadd.s32 1, %s13899_s18  ;;  %s11409_s16 = int_to_ptr.vmem [resolvable:$true] %s302_s16 }
  0xa4   : > { %s14146_s18 = smov (!%p82_p10, %s13899_s18), %s13904_s9  ;;  %s13905_s0 = sld [smem:[#allocation111_spill]] }
  0xa5   : > { %s11402_s6 = scalar_select %p236_p0, %s10995_s26, %s238_s2  }
  0xa6   : > { %s11411_s5 = scalar_lea.sflag [#allocation6], %s291_s25  ;;  %p10785_p9 = pneg %p11381_p6 }
  0xaa   : > { %s11407_s22 = scalar_lea.hbm %s13905_s0, %s10082_s29  ;;  %s10788_s9 = scalar_lea.hbm %s13905_s0, 5248 }
  0xab   : > { %s10783_s1 = scalar_lea.hbm %s11407_s22, 2624  ;;  %p10789_p12 = scmp.lt.u32.totalorder %s11407_s22, %s13905_s0 }
  0xac   : > { %p10784_p1 = scmp.ne.s32.totalorder %s11407_s22, %s10783_s1  ;;  %p10790_p4 = scmp.lt.u32.totalorder %s10788_s9, %s10783_s1 }
  0xad   : > { %p10792_p8 = scmp.lt.u32.totalorder %s10783_s1, %s11407_s22 }
  0xae   : > { %p10786_p13 = pnand %p10785_p9, %p10784_p1  ;;  %p10791_p3 = por %p10790_p4, %p10789_p12 }
  0xb0   : > { %p10787_p7 = pneg %p10786_p13  ;;  %p10793_p11 = por %p10792_p8, %p10791_p3 }
  0xb2   : > { %p10794_p5 = pnand %p10793_p11, %p10787_p7 }
  0xb4   : > { %10797 = shalt.err (!%p10794_p5)
}
  0xb5   : > { %s10798_s25 = scalar_lea.vmem %s11409_s16, 2624  ;;  %s11056_s30 = smov [#allocation5]  }
  0xb6   : > { %p10799_p2 = scmp.ne.s32.totalorder %s11409_s16, %s10798_s25  ;;  %s10803_s11 = sshll.u32 %s11056_s30, 4  ;;  %s10804_s11 = int_to_ptr.vmem [resolvable:$false] %s10803_s11 }
  0xb7   : > { %s10805_s3 = scalar_lea.vmem %s10804_s11, 5248  ;;  %p10806_p1 = scmp.lt.s32.totalorder %s11409_s16, %s10804_s11 }
  0xb8   : > { %p10801_p10 = pnand %p10799_p2, %p10785_p9  ;;  %p10807_p13 = scmp.lt.s32.totalorder %s10805_s3, %s10798_s25 }
  0xba   : > { %p10802_p0 = pneg %p10801_p10  ;;  %p10808_p12 = por %p10807_p13, %p10806_p1 }
  0xbc   : > { %p10809_p4 = pnand %p10808_p12, %p10802_p0 }
  0xbe   : > { %10812 = shalt.err (!%p10809_p4)
}
  0xbf   : > { %s13906_s10 = smov 4   ;;  %s13907_s24 = smov 64  }
  0xc0   : > { %10117 = dma.hbm_to_vmem [thread:$0]  (!%p11381_p6), %s11407_s22, 2624, %s11409_s16, %s11411_s5, %s13907_s24, %s13907_s24, %s13906_s10  }
  0xc1   : > { %s13908_s28 = sld [smem:[#allocation113_spill]]  ;;  %s338_s27 = scalar_lea.vmem [#allocation10], %s11209_s23 }
  0xc2   : > { %s347_s9 = sshll.u32 %s338_s27, 4  ;;  %p13910_p7 = scmp.ne.s32.totalorder %s13875_s7, 0  ;;  %s348_s9 = int_to_ptr.vmem [resolvable:$true] %s347_s9 }
  0xc7   : > { %s13909_s2 = smov %s13908_s28  ;;  %s11446_s8 = scalar_lea.hbm %s13908_s28, %s11266_s12 }
  0xc8   : > { %s10813_s29 = scalar_lea.hbm %s11446_s8, 16  ;;  %s10818_s16 = scalar_lea.hbm %s13909_s2, 160 }
  0xc9   : > { %p10814_p9 = scmp.ne.s32.totalorder %s11446_s8, %s10813_s29  ;;  %p10819_p6 = scmp.lt.u32.totalorder %s11446_s8, %s13909_s2 }
  0xca   : > { %p10820_p11 = scmp.lt.u32.totalorder %s10818_s16, %s10813_s29  ;;  %p10822_p2 = scmp.lt.u32.totalorder %s10813_s29, %s11446_s8 }
  0xcb   : > { %p10816_p3 = pnand %p10814_p9, %p13910_p7 }
  0xcc   : > { %p10821_p5 = por %p10820_p11, %p10819_p6 }
  0xcd   : > { %p10817_p8 = pneg %p10816_p3 }
  0xce   : > { %p10823_p10 = por %p10822_p2, %p10821_p5 }
  0xd0   : > { %p10824_p0 = pnand %p10823_p10, %p10817_p8 }
  0xd2   : > { %10827 = shalt.err (!%p10824_p0)
}
  0xd3   : > { %s10828_s11 = scalar_lea.vmem %s348_s9, 16  ;;  %s11057_s3 = smov [#allocation10]  }
  0xd4   : > { %p10829_p1 = scmp.ne.s32.totalorder %s348_s9, %s10828_s11  ;;  %s10833_s10 = sshll.u32 %s11057_s3, 4  ;;  %s10834_s10 = int_to_ptr.vmem [resolvable:$false] %s10833_s10 }
  0xd5   : > { %s10835_s24 = scalar_lea.vmem %s10834_s10, 32  ;;  %p10836_p4 = scmp.lt.s32.totalorder %s348_s9, %s10834_s10 }
  0xd6   : > { %p10831_p13 = pnand %p10829_p1, %p13910_p7  ;;  %p10837_p9 = scmp.lt.s32.totalorder %s10835_s24, %s10828_s11 }
  0xd8   : > { %p10832_p12 = pneg %p10831_p13  ;;  %p10838_p3 = por %p10837_p9, %p10836_p4 }
  0xda   : > { %p10839_p6 = pnand %p10838_p3, %p10832_p12 }
  0xdc   : > { %10842 = shalt.err (!%p10839_p6)
}
  0xdd   : > { %p13911_p11 = scmp.ne.s32.totalorder %s13872_s20, 0  ;;  %s13912_s28 = sld [smem:[#allocation115_spill]] }
  0xde   : > { %s376_s29 = scalar_lea.vmem [#allocation13], %s11209_s23 }
  0xdf   : > { %10123 = dma.hbm_to_vmem [thread:$0]  (!%p13911_p11), %s11446_s8, 16, %s348_s9, %s11230_s17  }
  0xe0   : > { %s385_s25 = sshll.u32 %s376_s29, 4  ;;  %s386_s25 = int_to_ptr.vmem [resolvable:$true] %s385_s25 }
  0xe3   : > { %s13913_s22 = smov %s13912_s28  ;;  %s11471_s27 = scalar_lea.hbm %s13912_s28, %s11266_s12 }
  0xe4   : > { %s10843_s30 = scalar_lea.hbm %s11471_s27, 16  ;;  %s10848_s17 = scalar_lea.hbm %s13913_s22, 160 }
  0xe5   : > { %p10844_p8 = scmp.ne.s32.totalorder %s11471_s27, %s10843_s30  ;;  %p10849_p10 = scmp.lt.u32.totalorder %s11471_s27, %s13913_s22 }
  0xe6   : > { %p10850_p0 = scmp.lt.u32.totalorder %s10848_s17, %s10843_s30  ;;  %p10852_p13 = scmp.lt.u32.totalorder %s10843_s30, %s11471_s27 }
  0xe7   : > { %p10846_p5 = pnand %p10844_p8, %p13910_p7 }
  0xe8   : > { %p10851_p1 = por %p10850_p0, %p10849_p10 }
  0xe9   : > { %p10847_p2 = pneg %p10846_p5 }
  0xea   : > { %p10853_p12 = por %p10852_p13, %p10851_p1 }
  0xec   : > { %p10854_p4 = pnand %p10853_p12, %p10847_p2 }
  0xee   : > { %10857 = shalt.err (!%p10854_p4)
}
  0xef   : > { %s10858_s23 = scalar_lea.vmem %s386_s25, 16  ;;  %s11058_s12 = smov [#allocation13]  }
  0xf0   : > { %p10859_p9 = scmp.ne.s32.totalorder %s386_s25, %s10858_s23  ;;  %s10863_s11 = sshll.u32 %s11058_s12, 4  ;;  %s10864_s11 = int_to_ptr.vmem [resolvable:$false] %s10863_s11 }
  0xf1   : > { %s10865_s3 = scalar_lea.vmem %s10864_s11, 32  ;;  %p10866_p8 = scmp.lt.s32.totalorder %s386_s25, %s10864_s11 }
  0xf2   : > { %p10861_p3 = pnand %p10859_p9, %p13910_p7  ;;  %p10867_p5 = scmp.lt.s32.totalorder %s10865_s3, %s10858_s23 }
  0xf4   : > { %p10862_p6 = pneg %p10861_p3  ;;  %p10868_p11 = por %p10867_p5, %p10866_p8 }
  0xf6   : > { %p10869_p0 = pnand %p10868_p11, %p10862_p6 }
  0xf8   : > { %10872 = shalt.err (!%p10869_p0)
}
  0xf9   : > { %p13914_p10 = scmp.ne.s32.totalorder %s13872_s20, 0  ;;  %s13915_s10 = sld [smem:[#allocation39_spill]] }
  0xfb   : > { %10129 = dma.hbm_to_vmem [thread:$0]  (!%p13914_p10), %s11471_s27, 16, %s386_s25, %s11277_s19  }
  0xff   : > { %p13916_p2 = scmp.ne.s32.totalorder %s13915_s10, 0 }
 0x101   : > { %394 = sbr.rel (%p13916_p2) target bundleno = 2216 (0x8a8), region = 48 }
 0x108   : > { %s13917_s7 = sld [smem:[#allocation26_spill]]  ;;  %s13918_s24 = sld [smem:[#allocation35_spill]] }
 0x10e   : > { %s396_s4 = sand.u32 1, %s13917_s7   ;;  %p13919_p7 = scmp.ne.s32.totalorder %s13918_s24, 0 }
 0x10f   : > { %s10089_s1 = smul.u32 164, %s396_s4  ;;  %s397_s28 = scalar_lea.sflag [#allocation6], %s396_s4 }
 0x111   : > { %s11495_s29 = scalar_lea.vmem [#allocation5], %s10089_s1 }
 0x112   : > { %10966 = dma.done.wait (%p13919_p7), %s397_s28, 2624  }
 0x113   : > { %10968 = vsyncadd (%p13919_p7), %s397_s28, 4294964672  ;;  %s13920_s30 = sld [smem:[#allocation34_spill]]  ;;  %s13921_s20 = sld [smem:[#allocation24_spill]] }
 0x114   : > { %s13922_s16 = sld [smem:[#allocation36_spill]] }
 0x119   : > { %s405_s5 = sand.u32 1, %s13920_s30   ;;  %s11503_s19 = sand.u32 1, %s13921_s20  }
 0x11a   : > { %s10090_s27 = smul.u32 576, %s11503_s19  ;;  %s406_s25 = scalar_lea.sflag [#allocation9], %s405_s5 }
 0x11b   : > { %p13923_p11 = scmp.ne.s32.totalorder %s13922_s16, 0 }
 0x11c   : > { %s11506_s17 = scalar_lea.vmem [#allocation8], %s10090_s27 }
 0x11d   : > { %10970 = dma.done.wait (%p13923_p11), %s406_s25, 9232  }
 0x11e   : > { %10972 = vsyncadd (%p13923_p11), %s406_s25, 4294958064  ;;  %s417_s8 = scalar_lea.vmem [#allocation10], %s11503_s19  ;;  %s423_s9 = scalar_lea.sflag [#allocation12], %s405_s5 }
 0x11f   : > { %s425_s23 = scalar_lea.vmem [#allocation11], %s11503_s19 }
 0x120   : > { %10974 = dma.done.wait (%p13923_p11), %s423_s9, 32  }
 0x121   : > { %10976 = vsyncadd (%p13923_p11), %s423_s9, 4294967264  ;;  %s433_s12 = scalar_lea.vmem [#allocation13], %s11503_s19  ;;  %p13924_p1 = scmp.eq.s32.totalorder %s13920_s30, 0 }
 0x123   : > { %10978 = dma.done.wait (%p13924_p1), [#allocation15], 2048   ;;  %p13925_p13 = pmov %p13924_p1 }
 0x124   : > { %s13926_s11 = sld [smem:[#allocation23_spill]]  ;;  %s13927_s3 = sld [smem:[#allocation28_spill]] }
 0x125   : > { %10980 = vsyncadd (%p13925_p13), [#allocation15], 4294965248 }
 0x12a   : > { %s482_s10 = sand.u32 1, %s13926_s11   ;;  %p486_p12 = scmp.lt.s32.totalorder %s13927_s3, 0 }
 0x12b   : > { %s10091_s7 = smul.u32 144, %s482_s10  ;;  %s487_s24 = ssub.s32 0, %s13927_s3 }
 0x12c   : > { %s8878_s4 = smin.u32 %s13927_s3, %s487_s24  ;;  %p8881_p9 = scmp.ne.s32.totalorder %s13927_s3, 0 }
 0x12d   : > { %s489_s1 = sand.u32 1, %s8878_s4   ;;  %s11531_s30 = scalar_lea.vmem [#allocation16], %s10091_s7  ;;  %v503_v0 = vld [vmem:[%s11495_s29] sm:$0xff] (!%p8881_p9)   ;;  %v505_v1 = vld [vmem:[%s11495_s29 + $0x8] sm:$0xff] (!%p8881_p9)   ;;  %v507_v2 = vld [vmem:[%s11495_s29 + $0x10] sm:$0xff] (!%p8881_p9)   ;;  %v11059_v6 = vmov (!%p8881_p9), 0  }
 0x12e   : > { %s490_s28 = ssub.s32 0, %s489_s1  ;;  %502 = sbr.rel (%p8881_p9) target bundleno = 318 (0x13e), region = 76  ;;  %544 = vst [vmem:[#allocation3] sm:$0xff] (!%p8881_p9), %v503_v0   ;;  %546 = vst [vmem:[#allocation3 + $0x8] sm:$0xff] (!%p8881_p9), %v505_v1   ;;  %v509_v3 = vld [vmem:[%s11495_s29 + $0x18] sm:$0xff] (!%p8881_p9)   ;;  %v511_v4 = vld [vmem:[%s11495_s29 + $0x20] sm:$0xff] (!%p8881_p9)  }
 0x12f   : > { %s14148_s28 = smov (!%p486_p12, %s490_s28), %s489_s1  ;;  %548 = vst [vmem:[#allocation3 + $0x10] sm:$0xff] (!%p8881_p9), %v507_v2   ;;  %v513_v5 = vld [vmem:[%s11495_s29 + $0x28] sm:$0xff] (!%p8881_p9)   ;;  %585 = vst [vmem:[#allocation2] sm:$0xf] (!%p8881_p9), %v11059_v6  ;;  %v515_v7 = vld [vmem:[%s11495_s29 + $0x30] sm:$0xff] (!%p8881_p9)   ;;  %vm587_vm0 = vcmask (!%p8881_p9), 1041408  }
 0x130   : > { %p8880_p4 = scmp.lt.s32.totalorder %s14148_s28, 0  ;;  %s496_s20 = sadd.s32 2, %s14148_s28  ;;  %586 = vst [vmem:[#allocation2 + $0x4] sm:$0xf] (!%p8881_p9), %v11059_v6  ;;  %599 = vst [vmem:[#allocation2 + $0x9c] sm:$0xf] (!%p8881_p9), %v11059_v6 }
 0x131   : > { %600 = vst [vmem:[#allocation2 + $0xa0] sm:$0xf] (!%p8881_p9), %v11059_v6  ;;  %550 = vst [vmem:[#allocation3 + $0x18] sm:$0xff] (!%p8881_p9), %v509_v3   ;;  %v517_v8 = vld [vmem:[%s11495_s29 + $0x38] sm:$0xff] (!%p8881_p9)   ;;  %v519_v9 = vld [vmem:[%s11495_s29 + $0x40] sm:$0xff] (!%p8881_p9)   ;;  %vm593_vm2 = vcmask (!%p8881_p9), 1043457  }
 0x132   : > { %s14150_s20 = smov (!%p8880_p4, %s496_s20), %s14148_s28  ;;  %552 = vst [vmem:[#allocation3 + $0x20] sm:$0xff] (!%p8881_p9), %v511_v4   ;;  %554 = vst [vmem:[#allocation3 + $0x28] sm:$0xff] (!%p8881_p9), %v513_v5   ;;  %v521_v10 = vld [vmem:[%s11495_s29 + $0x48] sm:$0xff] (!%p8881_p9)   ;;  %v523_v11 = vld [vmem:[%s11495_s29 + $0x50] sm:$0xff] (!%p8881_p9)   ;;  %vm588_vm1 = vsmask.f32 (!%p8881_p9), 1280 }
 0x133   : > { %556 = vst [vmem:[#allocation3 + $0x30] sm:$0xff] (!%p8881_p9), %v515_v7   ;;  %558 = vst [vmem:[#allocation3 + $0x38] sm:$0xff] (!%p8881_p9), %v517_v8   ;;  %v525_v12 = vld [vmem:[%s11495_s29 + $0x58] sm:$0xff] (!%p8881_p9)   ;;  %v527_v13 = vld [vmem:[%s11495_s29 + $0x60] sm:$0xff] (!%p8881_p9)   ;;  %vm594_vm3 = vsmask.f32 (!%p8881_p9), 7942 }
 0x134   : > { %560 = vst [vmem:[#allocation3 + $0x40] sm:$0xff] (!%p8881_p9), %v519_v9   ;;  %562 = vst [vmem:[#allocation3 + $0x48] sm:$0xff] (!%p8881_p9), %v521_v10   ;;  %v529_v14 = vld [vmem:[%s11495_s29 + $0x68] sm:$0xff] (!%p8881_p9)   ;;  %v531_v15 = vld [vmem:[%s11495_s29 + $0x70] sm:$0xff] (!%p8881_p9)  }
 0x135   : > { %564 = vst [vmem:[#allocation3 + $0x50] sm:$0xff] %v523_v11   ;;  %566 = vst [vmem:[#allocation3 + $0x58] sm:$0xff] %v525_v12   ;;  %v533_v16 = vld [vmem:[%s11495_s29 + $0x78] sm:$0xff]   ;;  %v535_v17 = vld [vmem:[%s11495_s29 + $0x80] sm:$0xff]  }
 0x136   : > { %568 = vst [vmem:[#allocation3 + $0x60] sm:$0xff] %v527_v13   ;;  %570 = vst [vmem:[#allocation3 + $0x68] sm:$0xff] %v529_v14   ;;  %v537_v18 = vld [vmem:[%s11495_s29 + $0x88] sm:$0xff]   ;;  %v539_v19 = vld [vmem:[%s11495_s29 + $0x90] sm:$0xff]  }
 0x137   : > { %572 = vst [vmem:[#allocation3 + $0x70] sm:$0xff] %v531_v15   ;;  %574 = vst [vmem:[#allocation3 + $0x78] sm:$0xff] %v533_v16   ;;  %v541_v20 = vld [vmem:[%s11495_s29 + $0x98] sm:$0xff]   ;;  %v543_v21 = vld [vmem:[%s11495_s29 + $0xa0] sm:$0xf] }
 0x138   : > { %576 = vst [vmem:[#allocation3 + $0x80] sm:$0xff] %v535_v17   ;;  %578 = vst [vmem:[#allocation3 + $0x88] sm:$0xff] %v537_v18   ;;  %v590_v22 = vld [vmem:[#allocation2 + $0x8] sm:$0x3]  ;;  %v596_v23 = vld [vmem:[#allocation2 + $0x98] sm:$0xe] }
 0x139   : > { %580 = vst [vmem:[#allocation3 + $0x90] sm:$0xff] %v539_v19   ;;  %582 = vst [vmem:[#allocation3 + $0x98] sm:$0xff] %v541_v20  }
 0x13a   : > { %584 = vst [vmem:[#allocation3 + $0xa0] sm:$0xf] %v543_v21  ;;  %vm589_vm4 = vmand %vm587_vm0, %vm588_vm1 }
 0x13b   : > { %v591_v24 = vsel %vm589_vm4, 0, %v590_v22  ;;  %vm595_vm5 = vmand %vm593_vm2, %vm594_vm3 }
 0x13c   : > { %592 = vst [vmem:[#allocation2 + $0x8] sm:$0x3] %v591_v24  ;;  %v597_v25 = vsel %vm595_vm5, 0, %v596_v23 }
 0x13d   : > { %598 = vst [vmem:[#allocation2 + $0x98] sm:$0xe] %v597_v25 }
 0x13e PF: > { %p8882_p3 = scmp.ne.s32.totalorder %s14150_s20, 0 }
 0x13f   : > { %v10279_v26 = vld [vmem:[#allocation3] sm:$0xff] (!%p8882_p3)   ;;  %v10280_v27 = vld [vmem:[#allocation3 + $0x8] sm:$0xff] (!%p8882_p3)   ;;  %v10281_v28 = vld [vmem:[#allocation3 + $0x10] sm:$0xff] (!%p8882_p3)   ;;  %vm896_vm6 = vsmask.f32 (!%p8882_p3), 7424  ;;  %vm1211_vm7 = vcmask (!%p8882_p3), 1046528  }
 0x140   : > { %603 = sbr.rel (%p8882_p3) target bundleno = 457 (0x1c9), region = 80  ;;  %748 = vst [vmem:[#allocation4] sm:$0xff] (!%p8882_p3), %v10279_v26  ;;  %749 = vst [vmem:[#allocation4 + $0x48] sm:$0xff] (!%p8882_p3), %v10280_v27  ;;  %v10291_v38 = vld [vmem:[#allocation3 + $0x60] sm:$0xff] (!%p8882_p3)   ;;  %v10292_v39 = vld [vmem:[#allocation3 + $0x68] sm:$0xff] (!%p8882_p3)   ;;  %vm1955_vm9 = vcmask (!%p8882_p3), 1045504  }
 0x141   : > { %v10282_v29 = vld [vmem:[#allocation3 + $0x18] sm:$0xff] (!%p8882_p3)   ;;  %750 = vst [vmem:[#allocation4 + $0x90] sm:$0xff] (!%p8882_p3), %v10281_v28  ;;  %760 = vst [vmem:[#allocation4 + $0x360] sm:$0xff] (!%p8882_p3), %v10291_v38  ;;  %v10293_v40 = vld [vmem:[#allocation3 + $0x70] sm:$0xff] (!%p8882_p3)   ;;  %vm1618_vm8 = vsmask.f32 (!%p8882_p3), 6400 }
 0x142   : > { %v10283_v30 = vld [vmem:[#allocation3 + $0x20] sm:$0xff] (!%p8882_p3)   ;;  %751 = vst [vmem:[#allocation4 + $0xd8] sm:$0xff] (!%p8882_p3), %v10282_v29  ;;  %v10284_v31 = vld [vmem:[#allocation3 + $0x28] sm:$0xff] (!%p8882_p3)   ;;  %761 = vst [vmem:[#allocation4 + $0x3a8] sm:$0xff] (!%p8882_p3), %v10292_v39  ;;  %vm2362_vm10 = vsmask.f32 (!%p8882_p3), 5376 }
 0x143   : > { %752 = vst [vmem:[#allocation4 + $0x120] sm:$0xff] (!%p8882_p3), %v10283_v30  ;;  %v10285_v32 = vld [vmem:[#allocation3 + $0x30] sm:$0xff] (!%p8882_p3)   ;;  %753 = vst [vmem:[#allocation4 + $0x168] sm:$0xff] (!%p8882_p3), %v10284_v31  ;;  %v10286_v33 = vld [vmem:[#allocation3 + $0x38] sm:$0xff] (!%p8882_p3)   ;;  %vm2699_vm11 = vcmask (!%p8882_p3), 1044480  }
 0x144   : > { %754 = vst [vmem:[#allocation4 + $0x1b0] sm:$0xff] (!%p8882_p3), %v10285_v32  ;;  %v10287_v34 = vld [vmem:[#allocation3 + $0x40] sm:$0xff] (!%p8882_p3)   ;;  %755 = vst [vmem:[#allocation4 + $0x1f8] sm:$0xff] (!%p8882_p3), %v10286_v33  ;;  %v10288_v35 = vld [vmem:[#allocation3 + $0x48] sm:$0xff] (!%p8882_p3)  }
 0x145   : > { %756 = vst [vmem:[#allocation4 + $0x240] sm:$0xff] (!%p8882_p3), %v10287_v34  ;;  %v10289_v36 = vld [vmem:[#allocation3 + $0x50] sm:$0xff] (!%p8882_p3)   ;;  %757 = vst [vmem:[#allocation4 + $0x288] sm:$0xff] (!%p8882_p3), %v10288_v35  ;;  %v10290_v37 = vld [vmem:[#allocation3 + $0x58] sm:$0xff] (!%p8882_p3)  }
 0x146   : > { %758 = vst [vmem:[#allocation4 + $0x2d0] sm:$0xff] (!%p8882_p3), %v10289_v36  ;;  %759 = vst [vmem:[#allocation4 + $0x318] sm:$0xff] (!%p8882_p3), %v10290_v37  ;;  %v10294_v41 = vld [vmem:[#allocation3 + $0x78] sm:$0xff] (!%p8882_p3)   ;;  %v10295_v42 = vld [vmem:[#allocation3 + $0x80] sm:$0xff] (!%p8882_p3)  }
 0x147   : > { %762 = vst [vmem:[#allocation4 + $0x3f0] sm:$0xff] %v10293_v40  ;;  %763 = vst [vmem:[#allocation4 + $0x438] sm:$0xff] %v10294_v41  ;;  %v10296_v43 = vld [vmem:[#allocation3 + $0x88] sm:$0xff]   ;;  %v10297_v44 = vld [vmem:[#allocation3] sm:$0xff]  }
 0x148   : > { %764 = vst [vmem:[#allocation4 + $0x480] sm:$0xff] %v10295_v42  ;;  %765 = vst [vmem:[#allocation4 + $0x4c8] sm:$0xff] %v10296_v43  ;;  %v10298_v45 = vld [vmem:[#allocation3 + $0x8] sm:$0xff]   ;;  %v10299_v46 = vld [vmem:[#allocation3 + $0x10] sm:$0xff]   ;;  %v898_v47 = vshrl.u32 %v10297_v44, 16  ;;  %v900_v48 = vshll.u32 %v10297_v44, 16 }
 0x149   : > { %v905_v49 = vshll.u32 %v10298_v45, 16  ;;  %v909_v50 = vshrl.u32 %v10298_v45, 16  ;;  %v913_v51 = vshll.u32 %v10299_v46, 16  ;;  %v10300_v52 = vld [vmem:[#allocation3 + $0x18] sm:$0xff]   ;;  %v917_v53 = vshrl.u32 %v10299_v46, 16  ;;  %v10301_v54 = vld [vmem:[#allocation3 + $0x20] sm:$0xff]  }
 0x14a   : > { %v902_v55 = vrot.slane %v900_v48, 1  ;;  %v921_v58 = vshll.u32 %v10300_v52, 16  ;;  %v925_v59 = vshrl.u32 %v10300_v52, 16  ;;  %v929_v60 = vshll.u32 %v10301_v54, 16  ;;  %v10302_v63 = vld [vmem:[#allocation3 + $0x28] sm:$0xff]   ;;  %v10303_v4 = vld [vmem:[#allocation3 + $0x30] sm:$0xff]  }
 0x14b   : > { %v907_v56 = vrot.slane %v905_v49, 1  ;;  %v915_v57 = vrot.slane %v913_v51, 1  ;;  %v933_v0 = vshrl.u32 %v10301_v54, 16  ;;  %v10304_v5 = vld [vmem:[#allocation3 + $0x38] sm:$0xff]   ;;  %v937_v8 = vshll.u32 %v10302_v63, 16  ;;  %v10305_v14 = vld [vmem:[#allocation3 + $0x40] sm:$0xff]  }
 0x14c   : > { %v903_v61 = vor.u32 %v902_v55, %v898_v47  ;;  %v923_v2 = vrot.slane %v921_v58, 1  ;;  %v931_v3 = vrot.slane %v929_v60, 1  ;;  %v941_v9 = vshrl.u32 %v10302_v63, 16  ;;  %v10306_v22 = vld [vmem:[#allocation3 + $0x48] sm:$0xff]   ;;  %v10307_v27 = vld [vmem:[#allocation3 + $0x50] sm:$0xff]   ;;  %v10308_v32 = vld [vmem:[#allocation3 + $0x58] sm:$0xff]  }
 0x14d   : > { %v911_v62 = vor.u32 %v909_v50, %v907_v56  ;;  %v919_v1 = vor.u32 %v917_v53, %v915_v57  ;;  %v945_v13 = vshll.u32 %v10303_v4, 16  ;;  %v939_v15 = vrot.slane %v937_v8, 1  ;;  %v10309_v41 = vld [vmem:[#allocation3 + $0x60] sm:$0xff]   ;;  %v10310_v42 = vld [vmem:[#allocation3 + $0x68] sm:$0xff]   ;;  %v10311_v53 = vld [vmem:[#allocation3 + $0x70] sm:$0xff]  }
 0x14e   : > { %v908_v6 = vsel %vm896_vm6, %v903_v61, %v907_v56  ;;  %v927_v11 = vor.u32 %v925_v59, %v923_v2  ;;  %v935_v12 = vor.u32 %v933_v0, %v931_v3  ;;  %v949_v16 = vshrl.u32 %v10303_v4, 16  ;;  %v10312_v58 = vld [vmem:[#allocation3 + $0x78] sm:$0xff]   ;;  %v10313_v63 = vld [vmem:[#allocation3 + $0x80] sm:$0xff]  }
 0x14f   : > { %v916_v7 = vsel %vm896_vm6, %v911_v62, %v915_v57  ;;  %1063 = vst [vmem:[#allocation4 + $0x8] sm:$0xff] %v908_v6  ;;  %v924_v10 = vsel %vm896_vm6, %v919_v1, %v923_v2  ;;  %v953_v17 = vshll.u32 %v10304_v5, 16  ;;  %v957_v18 = vshrl.u32 %v10304_v5, 16 }
 0x150   : > { %1064 = vst [vmem:[#allocation4 + $0x50] sm:$0xff] %v916_v7  ;;  %1065 = vst [vmem:[#allocation4 + $0x98] sm:$0xff] %v924_v10  ;;  %v932_v19 = vsel %vm896_vm6, %v927_v11, %v931_v3  ;;  %v947_v20 = vrot.slane %v945_v13, 1  ;;  %v961_v21 = vshll.u32 %v10305_v14, 16  ;;  %v965_v23 = vshrl.u32 %v10305_v14, 16  ;;  %v10314_v7 = vld [vmem:[#allocation3 + $0x88] sm:$0xff]  }
 0x151   : > { %1066 = vst [vmem:[#allocation4 + $0xe0] sm:$0xff] %v932_v19  ;;  %v940_v24 = vsel %vm896_vm6, %v935_v12, %v939_v15  ;;  %v943_v25 = vor.u32 %v941_v9, %v939_v15  ;;  %v955_v26 = vrot.slane %v953_v17, 1  ;;  %v969_v30 = vshll.u32 %v10306_v22, 16  ;;  %v10315_v11 = vld [vmem:[#allocation3 + $0x90] ss:$0 sps:$4 sm:$0x11]  }
 0x152   : > { %1067 = vst [vmem:[#allocation4 + $0x128] sm:$0xff] %v940_v24  ;;  %v951_v28 = vor.u32 %v949_v16, %v947_v20  ;;  %v963_v29 = vrot.slane %v961_v21, 1  ;;  %v973_v31 = vshrl.u32 %v10306_v22, 16  ;;  %v977_v35 = vshll.u32 %v10307_v27, 16  ;;  %v10316_v19 = vld [vmem:[#allocation3] sm:$0xfe]  }
 0x153   : > { %v948_v33 = vsel %vm896_vm6, %v943_v25, %v947_v20  ;;  %v959_v34 = vor.u32 %v957_v18, %v955_v26  ;;  %v981_v36 = vshrl.u32 %v10307_v27, 16  ;;  %v971_v39 = vrot.slane %v969_v30, 1  ;;  %v10318_v27 = vld [vmem:[#allocation3 + $0x10] sm:$0xff]  }
 0x154   : > { %1068 = vst [vmem:[#allocation4 + $0x170] sm:$0xff] %v948_v33  ;;  %v956_v37 = vsel %vm896_vm6, %v951_v28, %v955_v26  ;;  %v967_v38 = vor.u32 %v965_v23, %v963_v29  ;;  %v985_v40 = vshll.u32 %v10308_v32, 16  ;;  %v979_v44 = vrot.slane %v977_v35, 1  ;;  %v10317_v23 = vld [vmem:[#allocation3 + $0x8] sm:$0xff]   ;;  %v10319_v28 = vld [vmem:[#allocation3 + $0x18] sm:$0xff]  }
 0x155   : > { %1069 = vst [vmem:[#allocation4 + $0x1b8] sm:$0xff] %v956_v37  ;;  %v964_v43 = vsel %vm896_vm6, %v959_v34, %v963_v29  ;;  %v989_v45 = vshrl.u32 %v10308_v32, 16  ;;  %v975_v47 = vor.u32 %v973_v31, %v971_v39  ;;  %v993_v49 = vshll.u32 %v10309_v41, 16  ;;  %v10320_v32 = vld [vmem:[#allocation3 + $0x20] sm:$0xff]  }
 0x156   : > { %1070 = vst [vmem:[#allocation4 + $0x200] sm:$0xff] %v964_v43  ;;  %v972_v46 = vsel %vm896_vm6, %v967_v38, %v971_v39  ;;  %v987_v48 = vrot.slane %v985_v40, 1  ;;  %v983_v50 = vor.u32 %v981_v36, %v979_v44  ;;  %v997_v51 = vshrl.u32 %v10309_v41, 16  ;;  %v10321_v38 = vld [vmem:[#allocation3 + $0x28] sm:$0xff]   ;;  %v10322_v41 = vld [vmem:[#allocation3 + $0x30] sm:$0xff]  }
 0x157   : > { %1071 = vst [vmem:[#allocation4 + $0x248] sm:$0xff] %v972_v46  ;;  %v1001_v52 = vshll.u32 %v10310_v42, 16  ;;  %v1005_v54 = vshrl.u32 %v10310_v42, 16  ;;  %v980_v55 = vsel %vm896_vm6, %v975_v47, %v979_v44  ;;  %v995_v57 = vrot.slane %v993_v49, 1  ;;  %v10323_v44 = vld [vmem:[#allocation3 + $0x38] sm:$0xff]   ;;  %v10324_v46 = vld [vmem:[#allocation3 + $0x40] sm:$0xff]  }
 0x158   : > { %v991_v56 = vor.u32 %v989_v45, %v987_v48  ;;  %1072 = vst [vmem:[#allocation4 + $0x290] sm:$0xff] %v980_v55  ;;  %v988_v59 = vsel %vm896_vm6, %v983_v50, %v987_v48  ;;  %v1009_v61 = vshll.u32 %v10311_v53, 16  ;;  %v1013_v62 = vshrl.u32 %v10311_v53, 16  ;;  %v10325_v49 = vld [vmem:[#allocation3 + $0x48] sm:$0xff]   ;;  %v10327_v55 = vld [vmem:[#allocation3 + $0x58] sm:$0xff]  }
 0x159   : > { %v1003_v60 = vrot.slane %v1001_v52, 1  ;;  %1073 = vst [vmem:[#allocation4 + $0x2d8] sm:$0xff] %v988_v59  ;;  %v999_v1 = vor.u32 %v997_v51, %v995_v57  ;;  %v1017_v2 = vshll.u32 %v10312_v58, 16  ;;  %v1021_v3 = vshrl.u32 %v10312_v58, 16  ;;  %v10326_v52 = vld [vmem:[#allocation3 + $0x50] sm:$0xff]   ;;  %v10328_v58 = vld [vmem:[#allocation3 + $0x60] sm:$0xff]  }
 0x15a   : > { %v996_v0 = vsel %vm896_vm6, %v991_v56, %v995_v57  ;;  %v1011_v5 = vrot.slane %v1009_v61, 1  ;;  %v1025_v6 = vshll.u32 %v10313_v63, 16  ;;  %v1029_v8 = vshrl.u32 %v10313_v63, 16  ;;  %v10329_v61 = vld [vmem:[#allocation3 + $0x68] sm:$0xff]  }
 0x15b   : > { %1074 = vst [vmem:[#allocation4 + $0x320] sm:$0xff] %v996_v0  ;;  %v1007_v4 = vor.u32 %v1005_v54, %v1003_v60  ;;  %v1004_v9 = vsel %vm896_vm6, %v999_v1, %v1003_v60  ;;  %v1019_v10 = vrot.slane %v1017_v2, 1  ;;  %v1033_v15 = vshll.u32 %v10314_v7, 16  ;;  %v10330_v0 = vld [vmem:[#allocation3 + $0x70] sm:$0xff]  }
 0x15c   : > { %1075 = vst [vmem:[#allocation4 + $0x368] sm:$0xff] %v1004_v9  ;;  %v1015_v13 = vor.u32 %v1013_v62, %v1011_v5  ;;  %v1027_v14 = vrot.slane %v1025_v6, 1  ;;  %v1037_v17 = vshrl.u32 %v10314_v7, 16  ;;  %v1041_v18 = vshll.u32 %v10315_v11, 16  ;;  %v10332_v6 = vld [vmem:[#allocation3 + $0x80] sm:$0xff]   ;;  %v10333_v9 = vld [vmem:[#allocation3 + $0x88] sm:$0xff]  }
 0x15d   : > { %v1012_v12 = vsel %vm896_vm6, %v1007_v4, %v1011_v5  ;;  %v1023_v16 = vor.u32 %v1021_v3, %v1019_v10  ;;  %v1035_v22 = vrot.slane %v1033_v15, 1  ;;  %v1212_v26 = vrot.slane %v10316_v19, 1  ;;  %v10331_v3 = vld [vmem:[#allocation3 + $0x78] sm:$0xff]   ;;  %v10336_v15 = vld [vmem:[#allocation3 + $0x10] sm:$0xff]  }
 0x15e   : > { %1076 = vst [vmem:[#allocation4 + $0x3b0] sm:$0xff] %v1012_v12  ;;  %v1020_v20 = vsel %vm896_vm6, %v1015_v13, %v1019_v10  ;;  %v1031_v21 = vor.u32 %v1029_v8, %v1027_v14  ;;  %v1043_v25 = vrot.slane %v1041_v18, 1  ;;  %v1213_v31 = vrot.slane %v10317_v23, 1  ;;  %v10334_v12 = vld [vmem:[#allocation3 + $0x90] ss:$0 sps:$4 sm:$0x11]  }
 0x15f   : > { %1077 = vst [vmem:[#allocation4 + $0x3f8] sm:$0xff] %v1020_v20  ;;  %v1028_v24 = vsel %vm896_vm6, %v1023_v16, %v1027_v14  ;;  %v1039_v30 = vor.u32 %v1037_v17, %v1035_v22  ;;  %v1215_v33 = vrot.slane %v10318_v27, 1  ;;  %v1217_v34 = vrot.slane %v10319_v28, 1  ;;  %v10335_v18 = vld [vmem:[#allocation3 + $0x8] sm:$0xfe]   ;;  %v10337_v19 = vld [vmem:[#allocation3 + $0x18] sm:$0xff]  }
 0x160   : > { %1078 = vst [vmem:[#allocation4 + $0x440] sm:$0xff] %v1028_v24  ;;  %v1036_v29 = vsel %vm896_vm6, %v1031_v21, %v1035_v22  ;;  %v1214_v36 = vsel %vm1211_vm7, %v1212_v26, %v1213_v31  ;;  %v1219_v37 = vrot.slane %v10320_v32, 1  ;;  %v1221_v43 = vrot.slane %v10321_v38, 1  ;;  %v10338_v22 = vld [vmem:[#allocation3 + $0x20] sm:$0xff]   ;;  %v10339_v27 = vld [vmem:[#allocation3 + $0x28] sm:$0xff]  }
 0x161   : > { %1079 = vst [vmem:[#allocation4 + $0x488] sm:$0xff] %v1036_v29  ;;  %v1044_v35 = vsel %vm896_vm6, %v1039_v30, %v1043_v25  ;;  %1267 = vst [vmem:[#allocation4 + $0x10] sm:$0xff] %v1214_v36  ;;  %v1216_v39 = vsel %vm1211_vm7, %v1213_v31, %v1215_v33  ;;  %v1218_v40 = vsel %vm1211_vm7, %v1215_v33, %v1217_v34  ;;  %v1223_v45 = vrot.slane %v10322_v41, 1  ;;  %v10340_v30 = vld [vmem:[#allocation3 + $0x30] sm:$0xff]   ;;  %v10341_v33 = vld [vmem:[#allocation3 + $0x38] sm:$0xff]  }
 0x162   : > { %1080 = vst [vmem:[#allocation4 + $0x4d0] sm:$0xff] %v1044_v35  ;;  %1268 = vst [vmem:[#allocation4 + $0x58] sm:$0xff] %v1216_v39  ;;  %v1220_v42 = vsel %vm1211_vm7, %v1217_v34, %v1219_v37  ;;  %v1222_v47 = vsel %vm1211_vm7, %v1219_v37, %v1221_v43  ;;  %v1225_v48 = vrot.slane %v10323_v44, 1  ;;  %v1227_v51 = vrot.slane %v10324_v46, 1  ;;  %v10342_v35 = vld [vmem:[#allocation3 + $0x40] sm:$0xff]   ;;  %v10343_v38 = vld [vmem:[#allocation3 + $0x48] sm:$0xff]  }
 0x163   : > { %1269 = vst [vmem:[#allocation4 + $0xa0] sm:$0xff] %v1218_v40  ;;  %1270 = vst [vmem:[#allocation4 + $0xe8] sm:$0xff] %v1220_v42  ;;  %v1224_v50 = vsel %vm1211_vm7, %v1221_v43, %v1223_v45  ;;  %v1229_v54 = vrot.slane %v10325_v49, 1  ;;  %v1231_v57 = vrot.slane %v10326_v52, 1  ;;  %v1233_v60 = vrot.slane %v10327_v55, 1  ;;  %v10344_v41 = vld [vmem:[#allocation3 + $0x50] sm:$0xff]  }
 0x164   : > { %1271 = vst [vmem:[#allocation4 + $0x130] sm:$0xff] %v1222_v47  ;;  %1272 = vst [vmem:[#allocation4 + $0x178] sm:$0xff] %v1224_v50  ;;  %v1226_v53 = vsel %vm1211_vm7, %v1223_v45, %v1225_v48  ;;  %v1228_v56 = vsel %vm1211_vm7, %v1225_v48, %v1227_v51  ;;  %v1235_v63 = vrot.slane %v10328_v58, 1  ;;  %v1237_v2 = vrot.slane %v10329_v61, 1  ;;  %v10345_v44 = vld [vmem:[#allocation3 + $0x58] sm:$0xff]   ;;  %v10346_v47 = vld [vmem:[#allocation3 + $0x60] sm:$0xff]  }
 0x165   : > { %1273 = vst [vmem:[#allocation4 + $0x1c0] sm:$0xff] %v1226_v53  ;;  %1274 = vst [vmem:[#allocation4 + $0x208] sm:$0xff] %v1228_v56  ;;  %v1230_v59 = vsel %vm1211_vm7, %v1227_v51, %v1229_v54  ;;  %v1232_v62 = vsel %vm1211_vm7, %v1229_v54, %v1231_v57  ;;  %v1234_v1 = vsel %vm1211_vm7, %v1231_v57, %v1233_v60  ;;  %v1239_v5 = vrot.slane %v10330_v0, 1  ;;  %v10347_v50 = vld [vmem:[#allocation3 + $0x68] sm:$0xff]   ;;  %v10348_v53 = vld [vmem:[#allocation3 + $0x70] sm:$0xff]  }
 0x166   : > { %1275 = vst [vmem:[#allocation4 + $0x250] sm:$0xff] %v1230_v59  ;;  %1276 = vst [vmem:[#allocation4 + $0x298] sm:$0xff] %v1232_v62  ;;  %v1236_v4 = vsel %vm1211_vm7, %v1233_v60, %v1235_v63  ;;  %v1238_v7 = vsel %vm1211_vm7, %v1235_v63, %v1237_v2  ;;  %v1241_v8 = vrot.slane %v10331_v3, 1  ;;  %v1243_v11 = vrot.slane %v10332_v6, 1  ;;  %v10349_v56 = vld [vmem:[#allocation3 + $0x78] sm:$0xff]   ;;  %v10350_v59 = vld [vmem:[#allocation3 + $0x80] sm:$0xff]  }
 0x167   : > { %1277 = vst [vmem:[#allocation4 + $0x2e0] sm:$0xff] %v1234_v1  ;;  %1278 = vst [vmem:[#allocation4 + $0x328] sm:$0xff] %v1236_v4  ;;  %v1240_v10 = vsel %vm1211_vm7, %v1237_v2, %v1239_v5  ;;  %v1245_v14 = vrot.slane %v10333_v9, 1  ;;  %v1247_v17 = vrot.slane %v10334_v12, 1  ;;  %v1416_v21 = vrot.slane %v10336_v15, 1  ;;  %v10351_v62 = vld [vmem:[#allocation3 + $0x88] sm:$0xff]  }
 0x168   : > { %1279 = vst [vmem:[#allocation4 + $0x370] sm:$0xff] %v1238_v7  ;;  %1280 = vst [vmem:[#allocation4 + $0x3b8] sm:$0xff] %v1240_v10  ;;  %v1242_v13 = vsel %vm1211_vm7, %v1239_v5, %v1241_v8  ;;  %v1244_v16 = vsel %vm1211_vm7, %v1241_v8, %v1243_v11  ;;  %v1415_v24 = vrot.slane %v10335_v18, 1  ;;  %v1418_v25 = vrot.slane %v10337_v19, 1  ;;  %v10352_v1 = vld [vmem:[#allocation3 + $0x90] sm:$0xff]   ;;  %v10356_v10 = vld [vmem:[#allocation3 + $0x18] sm:$0xff]  }
 0x169   : > { %1281 = vst [vmem:[#allocation4 + $0x400] sm:$0xff] %v1242_v13  ;;  %1282 = vst [vmem:[#allocation4 + $0x448] sm:$0xff] %v1244_v16  ;;  %v1246_v20 = vsel %vm1211_vm7, %v1243_v11, %v1245_v14  ;;  %v1248_v23 = vsel %vm1211_vm7, %v1245_v14, %v1247_v17  ;;  %v1420_v26 = vrot.slane %v10338_v22, 1  ;;  %v1422_v32 = vrot.slane %v10339_v27, 1  ;;  %v10355_v7 = vld [vmem:[#allocation3 + $0x10] sm:$0xff]  }
 0x16a   : > { %1283 = vst [vmem:[#allocation4 + $0x490] sm:$0xff] %v1246_v20  ;;  %1284 = vst [vmem:[#allocation4 + $0x4d8] sm:$0xff] %v1248_v23  ;;  %v1417_v28 = vsel %vm1211_vm7, %v1415_v24, %v1416_v21  ;;  %v1419_v29 = vsel %vm1211_vm7, %v1416_v21, %v1418_v25  ;;  %v1424_v34 = vrot.slane %v10340_v30, 1  ;;  %v1426_v37 = vrot.slane %v10341_v33, 1  ;;  %v10354_v12 = vld [vmem:[#allocation3 + $0x8] sm:$0xfe]  }
 0x16b   : > { %1470 = vst [vmem:[#allocation4 + $0x18] sm:$0xff] %v1417_v28  ;;  %1471 = vst [vmem:[#allocation4 + $0x60] sm:$0xff] %v1419_v29  ;;  %v1421_v31 = vsel %vm1211_vm7, %v1418_v25, %v1420_v26  ;;  %v1423_v36 = vsel %vm1211_vm7, %v1420_v26, %v1422_v32  ;;  %v1428_v40 = vrot.slane %v10342_v35, 1  ;;  %v1430_v43 = vrot.slane %v10343_v38, 1  ;;  %v10357_v24 = vld [vmem:[#allocation3 + $0x20] sm:$0xff]   ;;  %v10358_v25 = vld [vmem:[#allocation3 + $0x28] sm:$0xff]  }
 0x16c   : > { %1472 = vst [vmem:[#allocation4 + $0xa8] sm:$0xff] %v1421_v31  ;;  %1473 = vst [vmem:[#allocation4 + $0xf0] sm:$0xff] %v1423_v36  ;;  %v1425_v39 = vsel %vm1211_vm7, %v1422_v32, %v1424_v34  ;;  %v1427_v42 = vsel %vm1211_vm7, %v1424_v34, %v1426_v37  ;;  %v1432_v46 = vrot.slane %v10344_v41, 1  ;;  %v1434_v49 = vrot.slane %v10345_v44, 1  ;;  %v10359_v33 = vld [vmem:[#allocation3 + $0x30] sm:$0xff]   ;;  %v10360_v36 = vld [vmem:[#allocation3 + $0x38] sm:$0xff]  }
 0x16d   : > { %1474 = vst [vmem:[#allocation4 + $0x138] sm:$0xff] %v1425_v39  ;;  %1475 = vst [vmem:[#allocation4 + $0x180] sm:$0xff] %v1427_v42  ;;  %v1429_v45 = vsel %vm1211_vm7, %v1426_v37, %v1428_v40  ;;  %v1431_v48 = vsel %vm1211_vm7, %v1428_v40, %v1430_v43  ;;  %v1436_v52 = vrot.slane %v10346_v47, 1  ;;  %v1438_v55 = vrot.slane %v10347_v50, 1  ;;  %v10361_v41 = vld [vmem:[#allocation3 + $0x40] sm:$0xff]  }
 0x16e   : > { %1476 = vst [vmem:[#allocation4 + $0x1c8] sm:$0xff] %v1429_v45  ;;  %1477 = vst [vmem:[#allocation4 + $0x210] sm:$0xff] %v1431_v48  ;;  %v1433_v51 = vsel %vm1211_vm7, %v1430_v43, %v1432_v46  ;;  %v1435_v54 = vsel %vm1211_vm7, %v1432_v46, %v1434_v49  ;;  %v1440_v58 = vrot.slane %v10348_v53, 1  ;;  %v1442_v61 = vrot.slane %v10349_v56, 1  ;;  %v10362_v46 = vld [vmem:[#allocation3 + $0x48] sm:$0xff]   ;;  %v10364_v56 = vld [vmem:[#allocation3 + $0x58] sm:$0xff]  }
 0x16f   : > { %1478 = vst [vmem:[#allocation4 + $0x258] sm:$0xff] %v1433_v51  ;;  %1479 = vst [vmem:[#allocation4 + $0x2a0] sm:$0xff] %v1435_v54  ;;  %v1437_v57 = vsel %vm1211_vm7, %v1434_v49, %v1436_v52  ;;  %v1439_v60 = vsel %vm1211_vm7, %v1436_v52, %v1438_v55  ;;  %v1444_v0 = vrot.slane %v10350_v59, 1  ;;  %v1446_v3 = vrot.slane %v10351_v62, 1  ;;  %v10363_v51 = vld [vmem:[#allocation3 + $0x50] sm:$0xff]  }
 0x170   : > { %1480 = vst [vmem:[#allocation4 + $0x2e8] sm:$0xff] %v1437_v57  ;;  %1481 = vst [vmem:[#allocation4 + $0x330] sm:$0xff] %v1439_v60  ;;  %v1441_v63 = vsel %vm1211_vm7, %v1438_v55, %v1440_v58  ;;  %v1443_v2 = vsel %vm1211_vm7, %v1440_v58, %v1442_v61  ;;  %v10353_v4 = vld [vmem:[#allocation3 + $0x98] ss:$0 sps:$4 sm:$0x11]   ;;  %v1448_v6 = vrot.slane %v10352_v1, 1 }
 0x171   : > { %1482 = vst [vmem:[#allocation4 + $0x378] sm:$0xff] %v1441_v63  ;;  %1483 = vst [vmem:[#allocation4 + $0x3c0] sm:$0xff] %v1443_v2  ;;  %v1445_v5 = vsel %vm1211_vm7, %v1442_v61, %v1444_v0  ;;  %v1447_v8 = vsel %vm1211_vm7, %v1444_v0, %v1446_v3  ;;  %v1450_v9 = vrot.slane %v10353_v4, 1  ;;  %v1628_v13 = vshrl.u32 %v10355_v7, 16  ;;  %v10365_v61 = vld [vmem:[#allocation3 + $0x60] sm:$0xff]  }
 0x172   : > { %1484 = vst [vmem:[#allocation4 + $0x408] sm:$0xff] %v1445_v5  ;;  %1485 = vst [vmem:[#allocation4 + $0x450] sm:$0xff] %v1447_v8  ;;  %v1449_v11 = vsel %vm1211_vm7, %v1446_v3, %v1448_v6  ;;  %v1631_v14 = vshll.u32 %v10355_v7, 16  ;;  %v1637_v16 = vshrl.u32 %v10356_v10, 16  ;;  %v1640_v17 = vshll.u32 %v10356_v10, 16 }
 0x173   : > { %1486 = vst [vmem:[#allocation4 + $0x498] sm:$0xff] %v1449_v11  ;;  %v1451_v15 = vsel %vm1211_vm7, %v1448_v6, %v1450_v9  ;;  %v1620_v18 = vshrl.u32 %v10354_v12, 16  ;;  %v1623_v19 = vshll.u32 %v10354_v12, 16  ;;  %v1630_v20 = vrot.slane %v1628_v13, 1  ;;  %v10366_v6 = vld [vmem:[#allocation3 + $0x68] sm:$0xff]  }
 0x174   : > { %1487 = vst [vmem:[#allocation4 + $0x4e0] sm:$0xff] %v1451_v15  ;;  %v1633_v21 = vrot.slane %v1631_v14, 2  ;;  %v1639_v22 = vrot.slane %v1637_v16, 1  ;;  %v1642_v23 = vrot.slane %v1640_v17, 2  ;;  %v1646_v30 = vshrl.u32 %v10357_v24, 16  ;;  %v10367_v15 = vld [vmem:[#allocation3 + $0x70] sm:$0xff]  }
 0x175   : > { %v1622_v26 = vrot.slane %v1620_v18, 1  ;;  %v1625_v27 = vrot.slane %v1623_v19, 2  ;;  %v1649_v31 = vshll.u32 %v10357_v24, 16  ;;  %v1655_v32 = vshrl.u32 %v10358_v25, 16 }
 0x176   : > { %v1634_v28 = vor.u32 %v1633_v21, %v1630_v20  ;;  %v1643_v29 = vor.u32 %v1642_v23, %v1639_v22  ;;  %v1658_v35 = vshll.u32 %v10358_v25, 16  ;;  %v1648_v38 = vrot.slane %v1646_v30, 1  ;;  %v10368_v20 = vld [vmem:[#allocation3 + $0x78] sm:$0xff]  }
 0x177   : > { %v1626_v34 = vor.u32 %v1625_v27, %v1622_v26  ;;  %v1651_v39 = vrot.slane %v1649_v31, 2  ;;  %v1657_v40 = vrot.slane %v1655_v32, 1  ;;  %v1664_v44 = vshrl.u32 %v10359_v33, 16 }
 0x178   : > { %v1644_v37 = vsel %vm1618_vm8, %v1634_v28, %v1643_v29  ;;  %v1660_v43 = vrot.slane %v1658_v35, 2  ;;  %v1667_v45 = vshll.u32 %v10359_v33, 16  ;;  %v1673_v48 = vshrl.u32 %v10360_v36, 16 }
 0x179   : > { %v1635_v42 = vsel %vm1618_vm8, %v1626_v34, %v1634_v28  ;;  %1808 = vst [vmem:[#allocation4 + $0x68] sm:$0xff] %v1644_v37  ;;  %v1652_v47 = vor.u32 %v1651_v39, %v1648_v38  ;;  %v1676_v49 = vshll.u32 %v10360_v36, 16  ;;  %v1682_v50 = vshrl.u32 %v10361_v41, 16  ;;  %v10369_v37 = vld [vmem:[#allocation3 + $0x80] sm:$0xff]  }
 0x17a   : > { %1807 = vst [vmem:[#allocation4 + $0x20] sm:$0xff] %v1635_v42  ;;  %v1661_v52 = vor.u32 %v1660_v43, %v1657_v40  ;;  %v1666_v53 = vrot.slane %v1664_v44, 1  ;;  %v1669_v54 = vrot.slane %v1667_v45, 2  ;;  %v1685_v55 = vshll.u32 %v10361_v41, 16  ;;  %v10370_v45 = vld [vmem:[#allocation3 + $0x88] sm:$0xff]  }
 0x17b   : > { %v1653_v57 = vsel %vm1618_vm8, %v1643_v29, %v1652_v47  ;;  %v1675_v58 = vrot.slane %v1673_v48, 1  ;;  %v1678_v59 = vrot.slane %v1676_v49, 2  ;;  %v1684_v60 = vrot.slane %v1682_v50, 1 }
 0x17c   : > { %1809 = vst [vmem:[#allocation4 + $0xb0] sm:$0xff] %v1653_v57  ;;  %v1662_v62 = vsel %vm1618_vm8, %v1652_v47, %v1661_v52  ;;  %v1670_v63 = vor.u32 %v1669_v54, %v1666_v53  ;;  %v1687_v0 = vrot.slane %v1685_v55, 2  ;;  %v1691_v1 = vshrl.u32 %v10362_v46, 16 }
 0x17d   : > { %1810 = vst [vmem:[#allocation4 + $0xf8] sm:$0xff] %v1662_v62  ;;  %v1679_v2 = vor.u32 %v1678_v59, %v1675_v58  ;;  %v1694_v3 = vshll.u32 %v10362_v46, 16  ;;  %v1700_v4 = vshrl.u32 %v10363_v51, 16  ;;  %v1703_v5 = vshll.u32 %v10363_v51, 16  ;;  %v10371_v46 = vld [vmem:[#allocation3 + $0x90] sm:$0xff]  }
 0x17e   : > { %v1671_v7 = vsel %vm1618_vm8, %v1661_v52, %v1670_v63  ;;  %v1688_v8 = vor.u32 %v1687_v0, %v1684_v60  ;;  %v1693_v9 = vrot.slane %v1691_v1, 1  ;;  %v1709_v10 = vshrl.u32 %v10364_v56, 16  ;;  %v10374_v51 = vld [vmem:[#allocation3 + $0x10] sm:$0xff]   ;;  %v10372_v60 = vld [vmem:[#allocation3 + $0x98] ss:$0 sps:$4 sm:$0x33]  }
 0x17f   : > { %1811 = vst [vmem:[#allocation4 + $0x140] sm:$0xff] %v1671_v7  ;;  %v1680_v11 = vsel %vm1618_vm8, %v1670_v63, %v1679_v2  ;;  %v1696_v12 = vrot.slane %v1694_v3, 2  ;;  %v1702_v13 = vrot.slane %v1700_v4, 1  ;;  %v1705_v14 = vrot.slane %v1703_v5, 2  ;;  %v10373_v7 = vld [vmem:[#allocation3 + $0x8] sm:$0xfc]  }
 0x180   : > { %1812 = vst [vmem:[#allocation4 + $0x188] sm:$0xff] %v1680_v11  ;;  %v1689_v16 = vsel %vm1618_vm8, %v1679_v2, %v1688_v8  ;;  %v1711_v17 = vrot.slane %v1709_v10, 1  ;;  %v1712_v18 = vshll.u32 %v10364_v56, 16  ;;  %v1718_v19 = vshrl.u32 %v10365_v61, 16  ;;  %v10375_v11 = vld [vmem:[#allocation3 + $0x18] sm:$0xff]  }
 0x181   : > { %1813 = vst [vmem:[#allocation4 + $0x1d0] sm:$0xff] %v1689_v16  ;;  %v1697_v21 = vor.u32 %v1696_v12, %v1693_v9  ;;  %v1706_v22 = vor.u32 %v1705_v14, %v1702_v13  ;;  %v1721_v23 = vshll.u32 %v10365_v61, 16  ;;  %v1727_v24 = vshrl.u32 %v10366_v6, 16  ;;  %v10376_v16 = vld [vmem:[#allocation3 + $0x20] sm:$0xff]  }
 0x182   : > { %v1714_v25 = vrot.slane %v1712_v18, 2  ;;  %v1720_v26 = vrot.slane %v1718_v19, 1  ;;  %v1730_v27 = vshll.u32 %v10366_v6, 16  ;;  %v1736_v28 = vshrl.u32 %v10367_v15, 16  ;;  %v10377_v19 = vld [vmem:[#allocation3 + $0x28] sm:$0xff]  }
 0x183   : > { %v1698_v29 = vsel %vm1618_vm8, %v1688_v8, %v1697_v21  ;;  %v1707_v30 = vsel %vm1618_vm8, %v1697_v21, %v1706_v22  ;;  %v1723_v31 = vrot.slane %v1721_v23, 2  ;;  %v1729_v32 = vrot.slane %v1727_v24, 1  ;;  %v10378_v24 = vld [vmem:[#allocation3 + $0x30] sm:$0xff]  }
 0x184   : > { %1814 = vst [vmem:[#allocation4 + $0x218] sm:$0xff] %v1698_v29  ;;  %1815 = vst [vmem:[#allocation4 + $0x260] sm:$0xff] %v1707_v30  ;;  %v1715_v33 = vor.u32 %v1714_v25, %v1711_v17  ;;  %v1732_v34 = vrot.slane %v1730_v27, 2  ;;  %v1738_v35 = vrot.slane %v1736_v28, 1  ;;  %v1739_v36 = vshll.u32 %v10367_v15, 16  ;;  %v10379_v27 = vld [vmem:[#allocation3 + $0x38] sm:$0xff]  }
 0x185   : > { %v1724_v38 = vor.u32 %v1723_v31, %v1720_v26  ;;  %v1745_v39 = vshrl.u32 %v10368_v20, 16  ;;  %v1748_v40 = vshll.u32 %v10368_v20, 16  ;;  %v1754_v44 = vshrl.u32 %v10369_v37, 16  ;;  %v10380_v31 = vld [vmem:[#allocation3 + $0x40] sm:$0xff]  }
 0x186   : > { %v1716_v41 = vsel %vm1618_vm8, %v1706_v22, %v1715_v33  ;;  %v1733_v42 = vor.u32 %v1732_v34, %v1729_v32  ;;  %v1741_v43 = vrot.slane %v1739_v36, 2  ;;  %v1757_v50 = vshll.u32 %v10369_v37, 16  ;;  %v10381_v34 = vld [vmem:[#allocation3 + $0x48] sm:$0xff]   ;;  %v10382_v37 = vld [vmem:[#allocation3 + $0x50] sm:$0xff]  }
 0x187   : > { %1816 = vst [vmem:[#allocation4 + $0x2a8] sm:$0xff] %v1716_v41  ;;  %v1725_v47 = vsel %vm1618_vm8, %v1715_v33, %v1724_v38  ;;  %v1747_v48 = vrot.slane %v1745_v39, 1  ;;  %v1750_v49 = vrot.slane %v1748_v40, 2  ;;  %v1756_v54 = vrot.slane %v1754_v44, 1  ;;  %v10383_v40 = vld [vmem:[#allocation3 + $0x58] sm:$0xff]  }
 0x188   : > { %1817 = vst [vmem:[#allocation4 + $0x2f0] sm:$0xff] %v1725_v47  ;;  %v1734_v52 = vsel %vm1618_vm8, %v1724_v38, %v1733_v42  ;;  %v1742_v53 = vor.u32 %v1741_v43, %v1738_v35  ;;  %v1763_v55 = vshrl.u32 %v10370_v45, 16  ;;  %v1759_v57 = vrot.slane %v1757_v50, 2  ;;  %v10384_v43 = vld [vmem:[#allocation3 + $0x60] sm:$0xff]  }
 0x189   : > { %1818 = vst [vmem:[#allocation4 + $0x338] sm:$0xff] %v1734_v52  ;;  %v1751_v56 = vor.u32 %v1750_v49, %v1747_v48  ;;  %v1766_v58 = vshll.u32 %v10370_v45, 16  ;;  %v1772_v59 = vshrl.u32 %v10371_v46, 16  ;;  %v1775_v63 = vshll.u32 %v10371_v46, 16  ;;  %v10385_v46 = vld [vmem:[#allocation3 + $0x68] sm:$0xff]   ;;  %v10386_v49 = vld [vmem:[#allocation3 + $0x70] sm:$0xff]  }
 0x18a   : > { %v1743_v61 = vsel %vm1618_vm8, %v1733_v42, %v1742_v53  ;;  %v1765_v62 = vrot.slane %v1763_v55, 1  ;;  %v1760_v1 = vor.u32 %v1759_v57, %v1756_v54  ;;  %v1781_v5 = vshrl.u32 %v10372_v60, 16  ;;  %v10387_v52 = vld [vmem:[#allocation3 + $0x78] sm:$0xff]   ;;  %v10388_v55 = vld [vmem:[#allocation3 + $0x80] sm:$0xff]  }
 0x18b   : > { %1819 = vst [vmem:[#allocation4 + $0x380] sm:$0xff] %v1743_v61  ;;  %v1752_v0 = vsel %vm1618_vm8, %v1742_v53, %v1751_v56  ;;  %v1768_v2 = vrot.slane %v1766_v58, 2  ;;  %v1774_v3 = vrot.slane %v1772_v59, 1  ;;  %v1777_v4 = vrot.slane %v1775_v63, 2  ;;  %v10389_v58 = vld [vmem:[#allocation3 + $0x88] sm:$0xff]   ;;  %v10390_v61 = vld [vmem:[#allocation3 + $0x90] sm:$0xff]  }
 0x18c   : > { %1820 = vst [vmem:[#allocation4 + $0x3c8] sm:$0xff] %v1752_v0  ;;  %v1784_v6 = vshll.u32 %v10372_v60, 16  ;;  %v1957_v8 = vrot.slane %v10374_v51, 2  ;;  %v1761_v9 = vsel %vm1618_vm8, %v1751_v56, %v1760_v1  ;;  %v1783_v13 = vrot.slane %v1781_v5, 1  ;;  %v10393_v0 = vld [vmem:[#allocation3 + $0x18] sm:$0xff]  }
 0x18d   : > { %v1769_v10 = vor.u32 %v1768_v2, %v1765_v62  ;;  %1821 = vst [vmem:[#allocation4 + $0x410] sm:$0xff] %v1761_v9  ;;  %v1778_v12 = vor.u32 %v1777_v4, %v1774_v3  ;;  %v1956_v15 = vrot.slane %v10373_v7, 2  ;;  %v1959_v18 = vrot.slane %v10375_v11, 2  ;;  %v10391_v3 = vld [vmem:[#allocation3 + $0x98] ss:$0 sps:$4 sm:$0x33]  }
 0x18e   : > { %v1786_v14 = vrot.slane %v1784_v6, 2  ;;  %v1961_v23 = vrot.slane %v10376_v16, 2  ;;  %v1963_v26 = vrot.slane %v10377_v19, 2  ;;  %v1965_v30 = vrot.slane %v10378_v24, 2  ;;  %v10392_v7 = vld [vmem:[#allocation3 + $0x10] sm:$0xfc]  }
 0x18f   : > { %v1770_v17 = vsel %vm1618_vm8, %v1760_v1, %v1769_v10  ;;  %v1779_v20 = vsel %vm1618_vm8, %v1769_v10, %v1778_v12  ;;  %v1958_v22 = vsel %vm1955_vm9, %v1956_v15, %v1957_v8  ;;  %v1960_v25 = vsel %vm1955_vm9, %v1957_v8, %v1959_v18  ;;  %v10394_v9 = vld [vmem:[#allocation3 + $0x20] sm:$0xff]  }
 0x190   : > { %1822 = vst [vmem:[#allocation4 + $0x458] sm:$0xff] %v1770_v17  ;;  %v1787_v21 = vor.u32 %v1786_v14, %v1783_v13  ;;  %1823 = vst [vmem:[#allocation4 + $0x4a0] sm:$0xff] %v1779_v20  ;;  %v1962_v29 = vsel %vm1955_vm9, %v1959_v18, %v1961_v23  ;;  %v1964_v32 = vsel %vm1955_vm9, %v1961_v23, %v1963_v26  ;;  %v1967_v33 = vrot.slane %v10379_v27, 2  ;;  %v10396_v14 = vld [vmem:[#allocation3 + $0x30] sm:$0xff]   ;;  %v10397_v17 = vld [vmem:[#allocation3 + $0x38] sm:$0xff]  }
 0x191   : > { %2011 = vst [vmem:[#allocation4 + $0x28] sm:$0xff] %v1958_v22  ;;  %2012 = vst [vmem:[#allocation4 + $0x70] sm:$0xff] %v1960_v25  ;;  %v1966_v35 = vsel %vm1955_vm9, %v1963_v26, %v1965_v30  ;;  %v1969_v36 = vrot.slane %v10380_v31, 2  ;;  %v1971_v39 = vrot.slane %v10381_v34, 2  ;;  %v1973_v42 = vrot.slane %v10382_v37, 2  ;;  %v10398_v20 = vld [vmem:[#allocation3 + $0x40] sm:$0xff]  }
 0x192   : > { %v1788_v28 = vsel %vm1618_vm8, %v1778_v12, %v1787_v21  ;;  %2013 = vst [vmem:[#allocation4 + $0xb8] sm:$0xff] %v1962_v29  ;;  %2014 = vst [vmem:[#allocation4 + $0x100] sm:$0xff] %v1964_v32  ;;  %v1968_v38 = vsel %vm1955_vm9, %v1965_v30, %v1967_v33  ;;  %v1975_v45 = vrot.slane %v10383_v40, 2  ;;  %v1977_v48 = vrot.slane %v10384_v43, 2  ;;  %v10395_v12 = vld [vmem:[#allocation3 + $0x28] sm:$0xff]   ;;  %v10400_v26 = vld [vmem:[#allocation3 + $0x50] sm:$0xff]  }
 0x193   : > { %1824 = vst [vmem:[#allocation4 + $0x4e8] sm:$0xff] %v1788_v28  ;;  %2015 = vst [vmem:[#allocation4 + $0x148] sm:$0xff] %v1966_v35  ;;  %v1970_v41 = vsel %vm1955_vm9, %v1967_v33, %v1969_v36  ;;  %v1972_v44 = vsel %vm1955_vm9, %v1969_v36, %v1971_v39  ;;  %v1974_v47 = vsel %vm1955_vm9, %v1971_v39, %v1973_v42  ;;  %v1979_v51 = vrot.slane %v10385_v46, 2  ;;  %v10399_v23 = vld [vmem:[#allocation3 + $0x48] sm:$0xff]   ;;  %v10401_v29 = vld [vmem:[#allocation3 + $0x58] sm:$0xff]  }
 0x194   : > { %2016 = vst [vmem:[#allocation4 + $0x190] sm:$0xff] %v1968_v38  ;;  %2017 = vst [vmem:[#allocation4 + $0x1d8] sm:$0xff] %v1970_v41  ;;  %v1976_v50 = vsel %vm1955_vm9, %v1973_v42, %v1975_v45  ;;  %v1978_v53 = vsel %vm1955_vm9, %v1975_v45, %v1977_v48  ;;  %v1981_v54 = vrot.slane %v10386_v49, 2  ;;  %v1983_v57 = vrot.slane %v10387_v52, 2  ;;  %v10402_v32 = vld [vmem:[#allocation3 + $0x60] sm:$0xff]   ;;  %v10403_v35 = vld [vmem:[#allocation3 + $0x68] sm:$0xff]  }
 0x195   : > { %2018 = vst [vmem:[#allocation4 + $0x220] sm:$0xff] %v1972_v44  ;;  %2019 = vst [vmem:[#allocation4 + $0x268] sm:$0xff] %v1974_v47  ;;  %v1980_v56 = vsel %vm1955_vm9, %v1977_v48, %v1979_v51  ;;  %v1985_v60 = vrot.slane %v10388_v55, 2  ;;  %v1987_v63 = vrot.slane %v10389_v58, 2  ;;  %v1989_v2 = vrot.slane %v10390_v61, 2  ;;  %v10404_v38 = vld [vmem:[#allocation3 + $0x70] sm:$0xff]  }
 0x196   : > { %2020 = vst [vmem:[#allocation4 + $0x2b0] sm:$0xff] %v1976_v50  ;;  %2021 = vst [vmem:[#allocation4 + $0x2f8] sm:$0xff] %v1978_v53  ;;  %v1982_v59 = vsel %vm1955_vm9, %v1979_v51, %v1981_v54  ;;  %v1984_v62 = vsel %vm1955_vm9, %v1981_v54, %v1983_v57  ;;  %v1991_v6 = vrot.slane %v10391_v3, 2  ;;  %v2160_v8 = vrot.slane %v10393_v0, 2  ;;  %v10405_v41 = vld [vmem:[#allocation3 + $0x78] sm:$0xff]   ;;  %v10406_v44 = vld [vmem:[#allocation3 + $0x80] sm:$0xff]  }
 0x197   : > { %2022 = vst [vmem:[#allocation4 + $0x340] sm:$0xff] %v1980_v56  ;;  %2023 = vst [vmem:[#allocation4 + $0x388] sm:$0xff] %v1982_v59  ;;  %v1986_v1 = vsel %vm1955_vm9, %v1983_v57, %v1985_v60  ;;  %v1988_v4 = vsel %vm1955_vm9, %v1985_v60, %v1987_v63  ;;  %v1990_v5 = vsel %vm1955_vm9, %v1987_v63, %v1989_v2  ;;  %v2159_v11 = vrot.slane %v10392_v7, 2  ;;  %v10407_v47 = vld [vmem:[#allocation3 + $0x88] sm:$0xff]   ;;  %v10408_v50 = vld [vmem:[#allocation3 + $0x90] sm:$0xff]  }
 0x198   : > { %2024 = vst [vmem:[#allocation4 + $0x3d0] sm:$0xff] %v1984_v62  ;;  %2025 = vst [vmem:[#allocation4 + $0x418] sm:$0xff] %v1986_v1  ;;  %v1992_v10 = vsel %vm1955_vm9, %v1989_v2, %v1991_v6  ;;  %v2162_v13 = vrot.slane %v10394_v9, 2  ;;  %v2164_v16 = vrot.slane %v10395_v12, 2  ;;  %v2166_v19 = vrot.slane %v10396_v14, 2  ;;  %v10409_v53 = vld [vmem:[#allocation3 + $0x98] sm:$0xff]  }
 0x199   : > { %2026 = vst [vmem:[#allocation4 + $0x460] sm:$0xff] %v1988_v4  ;;  %2027 = vst [vmem:[#allocation4 + $0x4a8] sm:$0xff] %v1990_v5  ;;  %v2161_v15 = vsel %vm1955_vm9, %v2159_v11, %v2160_v8  ;;  %v2168_v22 = vrot.slane %v10397_v17, 2  ;;  %v2170_v25 = vrot.slane %v10398_v20, 2  ;;  %v2172_v28 = vrot.slane %v10399_v23, 2  ;;  %v10412_v59 = vld [vmem:[#allocation3 + $0x18] sm:$0xff]  }
 0x19a   : > { %2028 = vst [vmem:[#allocation4 + $0x4f0] sm:$0xff] %v1992_v10  ;;  %2214 = vst [vmem:[#allocation4 + $0x30] sm:$0xff] %v2161_v15  ;;  %v2163_v18 = vsel %vm1955_vm9, %v2160_v8, %v2162_v13  ;;  %v2165_v21 = vsel %vm1955_vm9, %v2162_v13, %v2164_v16  ;;  %v2167_v24 = vsel %vm1955_vm9, %v2164_v16, %v2166_v19  ;;  %v2174_v31 = vrot.slane %v10400_v26, 2  ;;  %v10410_v56 = vld [vmem:[#allocation3 + $0xa0] ss:$0 sps:$4 sm:$0x33]  }
 0x19b   : > { %2215 = vst [vmem:[#allocation4 + $0x78] sm:$0xff] %v2163_v18  ;;  %2216 = vst [vmem:[#allocation4 + $0xc0] sm:$0xff] %v2165_v21  ;;  %v2169_v27 = vsel %vm1955_vm9, %v2166_v19, %v2168_v22  ;;  %v2171_v30 = vsel %vm1955_vm9, %v2168_v22, %v2170_v25  ;;  %v2173_v33 = vsel %vm1955_vm9, %v2170_v25, %v2172_v28  ;;  %v2176_v34 = vrot.slane %v10401_v29, 2  ;;  %v10411_v62 = vld [vmem:[#allocation3 + $0x10] sm:$0xfc]   ;;  %v10413_v63 = vld [vmem:[#allocation3 + $0x20] sm:$0xff]  }
 0x19c   : > { %2217 = vst [vmem:[#allocation4 + $0x108] sm:$0xff] %v2167_v24  ;;  %2218 = vst [vmem:[#allocation4 + $0x150] sm:$0xff] %v2169_v27  ;;  %v2175_v36 = vsel %vm1955_vm9, %v2172_v28, %v2174_v31  ;;  %v2178_v37 = vrot.slane %v10402_v32, 2  ;;  %v2180_v40 = vrot.slane %v10403_v35, 2  ;;  %v2182_v43 = vrot.slane %v10404_v38, 2  ;;  %v10414_v7 = vld [vmem:[#allocation3 + $0x28] sm:$0xff]  }
 0x19d   : > { %2219 = vst [vmem:[#allocation4 + $0x198] sm:$0xff] %v2171_v30  ;;  %2220 = vst [vmem:[#allocation4 + $0x1e0] sm:$0xff] %v2173_v33  ;;  %v2177_v39 = vsel %vm1955_vm9, %v2174_v31, %v2176_v34  ;;  %v2184_v46 = vrot.slane %v10405_v41, 2  ;;  %v2186_v49 = vrot.slane %v10406_v44, 2  ;;  %v2188_v52 = vrot.slane %v10407_v47, 2  ;;  %v10415_v11 = vld [vmem:[#allocation3 + $0x30] sm:$0xff]  }
 0x19e   : > { %2221 = vst [vmem:[#allocation4 + $0x228] sm:$0xff] %v2175_v36  ;;  %2222 = vst [vmem:[#allocation4 + $0x270] sm:$0xff] %v2177_v39  ;;  %v2179_v42 = vsel %vm1955_vm9, %v2176_v34, %v2178_v37  ;;  %v2181_v45 = vsel %vm1955_vm9, %v2178_v37, %v2180_v40  ;;  %v2183_v48 = vsel %vm1955_vm9, %v2180_v40, %v2182_v43  ;;  %v2190_v55 = vrot.slane %v10408_v50, 2  ;;  %v10416_v23 = vld [vmem:[#allocation3 + $0x38] sm:$0xff]   ;;  %v10417_v26 = vld [vmem:[#allocation3 + $0x40] sm:$0xff]  }
 0x19f   : > { %2223 = vst [vmem:[#allocation4 + $0x2b8] sm:$0xff] %v2179_v42  ;;  %2224 = vst [vmem:[#allocation4 + $0x300] sm:$0xff] %v2181_v45  ;;  %v2185_v51 = vsel %vm1955_vm9, %v2182_v43, %v2184_v46  ;;  %v2187_v54 = vsel %vm1955_vm9, %v2184_v46, %v2186_v49  ;;  %v2189_v57 = vsel %vm1955_vm9, %v2186_v49, %v2188_v52  ;;  %v2192_v58 = vrot.slane %v10409_v53, 2  ;;  %v10418_v31 = vld [vmem:[#allocation3 + $0x48] sm:$0xff]   ;;  %v10419_v40 = vld [vmem:[#allocation3 + $0x50] sm:$0xff]  }
 0x1a0   : > { %2225 = vst [vmem:[#allocation4 + $0x348] sm:$0xff] %v2183_v48  ;;  %2226 = vst [vmem:[#allocation4 + $0x390] sm:$0xff] %v2185_v51  ;;  %v2191_v60 = vsel %vm1955_vm9, %v2188_v52, %v2190_v55  ;;  %v2194_v61 = vrot.slane %v10410_v56, 2  ;;  %v2372_v1 = vshrl.u32 %v10412_v59, 16  ;;  %v2375_v2 = vshll.u32 %v10412_v59, 16  ;;  %v10420_v45 = vld [vmem:[#allocation3 + $0x58] sm:$0xff]  }
 0x1a1   : > { %2227 = vst [vmem:[#allocation4 + $0x3d8] sm:$0xff] %v2187_v54  ;;  %2228 = vst [vmem:[#allocation4 + $0x420] sm:$0xff] %v2189_v57  ;;  %v2193_v0 = vsel %vm1955_vm9, %v2190_v55, %v2192_v58  ;;  %v2364_v4 = vshrl.u32 %v10411_v62, 16  ;;  %v2367_v5 = vshll.u32 %v10411_v62, 16  ;;  %v2381_v6 = vshrl.u32 %v10413_v63, 16  ;;  %v10421_v50 = vld [vmem:[#allocation3 + $0x60] sm:$0xff]  }
 0x1a2   : > { %2229 = vst [vmem:[#allocation4 + $0x468] sm:$0xff] %v2191_v60  ;;  %2230 = vst [vmem:[#allocation4 + $0x4b0] sm:$0xff] %v2193_v0  ;;  %v2195_v3 = vsel %vm1955_vm9, %v2192_v58, %v2194_v61  ;;  %v2374_v8 = vrot.slane %v2372_v1, 2  ;;  %v2377_v9 = vrot.slane %v2375_v2, 3  ;;  %v2384_v10 = vshll.u32 %v10413_v63, 16  ;;  %v10422_v55 = vld [vmem:[#allocation3 + $0x68] sm:$0xff]  }
 0x1a3   : > { %2231 = vst [vmem:[#allocation4 + $0x4f8] sm:$0xff] %v2195_v3  ;;  %v2366_v12 = vrot.slane %v2364_v4, 2  ;;  %v2369_v13 = vrot.slane %v2367_v5, 3  ;;  %v2383_v14 = vrot.slane %v2381_v6, 2  ;;  %v2390_v15 = vshrl.u32 %v10414_v7, 16  ;;  %v10423_v3 = vld [vmem:[#allocation3 + $0x70] sm:$0xff]  }
 0x1a4   : > { %v2378_v16 = vor.u32 %v2377_v9, %v2374_v8  ;;  %v2386_v17 = vrot.slane %v2384_v10, 3  ;;  %v2393_v18 = vshll.u32 %v10414_v7, 16  ;;  %v2399_v21 = vshrl.u32 %v10415_v11, 16 }
 0x1a5   : > { %v2370_v19 = vor.u32 %v2369_v13, %v2366_v12  ;;  %v2392_v20 = vrot.slane %v2390_v15, 2  ;;  %v2402_v22 = vshll.u32 %v10415_v11, 16  ;;  %v2408_v30 = vshrl.u32 %v10416_v23, 16  ;;  %v10424_v12 = vld [vmem:[#allocation3 + $0x78] sm:$0xff]  }
 0x1a6   : > { %v2387_v24 = vor.u32 %v2386_v17, %v2383_v14  ;;  %v2395_v25 = vrot.slane %v2393_v18, 3  ;;  %v2401_v28 = vrot.slane %v2399_v21, 2  ;;  %v2411_v34 = vshll.u32 %v10416_v23, 16  ;;  %v10425_v17 = vld [vmem:[#allocation3 + $0x80] sm:$0xff]  }
 0x1a7   : > { %v2379_v27 = vsel %vm2362_vm10, %v2370_v19, %v2378_v16  ;;  %v2404_v29 = vrot.slane %v2402_v22, 3  ;;  %v2417_v35 = vshrl.u32 %v10417_v26, 16  ;;  %v2410_v37 = vrot.slane %v2408_v30, 2 }
 0x1a8   : > { %2551 = vst [vmem:[#allocation4 + $0x38] sm:$0xff] %v2379_v27  ;;  %v2388_v32 = vsel %vm2362_vm10, %v2378_v16, %v2387_v24  ;;  %v2396_v33 = vor.u32 %v2395_v25, %v2392_v20  ;;  %v2420_v38 = vshll.u32 %v10417_v26, 16  ;;  %v2426_v39 = vshrl.u32 %v10418_v31, 16  ;;  %v10426_v26 = vld [vmem:[#allocation3 + $0x88] sm:$0xff]  }
 0x1a9   : > { %2552 = vst [vmem:[#allocation4 + $0x80] sm:$0xff] %v2388_v32  ;;  %v2405_v36 = vor.u32 %v2404_v29, %v2401_v28  ;;  %v2413_v42 = vrot.slane %v2411_v34, 3  ;;  %v2419_v43 = vrot.slane %v2417_v35, 2  ;;  %v2429_v44 = vshll.u32 %v10418_v31, 16  ;;  %v10427_v34 = vld [vmem:[#allocation3 + $0x90] sm:$0xff]   ;;  %v10428_v35 = vld [vmem:[#allocation3 + $0x98] sm:$0xff]  }
 0x1aa   : > { %v2397_v41 = vsel %vm2362_vm10, %v2387_v24, %v2396_v33  ;;  %v2422_v47 = vrot.slane %v2420_v38, 3  ;;  %v2428_v48 = vrot.slane %v2426_v39, 2  ;;  %v2435_v49 = vshrl.u32 %v10419_v40, 16  ;;  %v10431_v39 = vld [vmem:[#allocation3 + $0x18] sm:$0xff]  }
 0x1ab   : > { %2553 = vst [vmem:[#allocation4 + $0xc8] sm:$0xff] %v2397_v41  ;;  %v2406_v46 = vsel %vm2362_vm10, %v2396_v33, %v2405_v36  ;;  %v2414_v51 = vor.u32 %v2413_v42, %v2410_v37  ;;  %v2431_v52 = vrot.slane %v2429_v44, 3  ;;  %v2438_v53 = vshll.u32 %v10419_v40, 16 }
 0x1ac   : > { %2554 = vst [vmem:[#allocation4 + $0x110] sm:$0xff] %v2406_v46  ;;  %v2444_v54 = vshrl.u32 %v10420_v45, 16  ;;  %v2423_v56 = vor.u32 %v2422_v47, %v2419_v43  ;;  %v2437_v57 = vrot.slane %v2435_v49, 2  ;;  %v2447_v58 = vshll.u32 %v10420_v45, 16 }
 0x1ad   : > { %v2415_v59 = vsel %vm2362_vm10, %v2405_v36, %v2414_v51  ;;  %v2432_v60 = vor.u32 %v2431_v52, %v2428_v48  ;;  %v2440_v61 = vrot.slane %v2438_v53, 3  ;;  %v2453_v1 = vshrl.u32 %v10421_v50, 16  ;;  %v10429_v48 = vld [vmem:[#allocation3 + $0xa0] ss:$0 sps:$4 sm:$0x77]  }
 0x1ae   : > { %v2446_v62 = vrot.slane %v2444_v54, 2  ;;  %2555 = vst [vmem:[#allocation4 + $0x158] sm:$0xff] %v2415_v59  ;;  %v2424_v63 = vsel %vm2362_vm10, %v2414_v51, %v2423_v56  ;;  %v2449_v0 = vrot.slane %v2447_v58, 3  ;;  %v2456_v2 = vshll.u32 %v10421_v50, 16  ;;  %v10432_v53 = vld [vmem:[#allocation3 + $0x20] sm:$0xff]  }
 0x1af   : > { %2556 = vst [vmem:[#allocation4 + $0x1a0] sm:$0xff] %v2424_v63  ;;  %v2433_v4 = vsel %vm2362_vm10, %v2423_v56, %v2432_v60  ;;  %v2441_v5 = vor.u32 %v2440_v61, %v2437_v57  ;;  %v2462_v6 = vshrl.u32 %v10422_v55, 16  ;;  %v2465_v7 = vshll.u32 %v10422_v55, 16  ;;  %v10430_v61 = vld [vmem:[#allocation3 + $0x10] sm:$0xf8]   ;;  %v10433_v63 = vld [vmem:[#allocation3 + $0x28] sm:$0xff]  }
 0x1b0   : > { %2557 = vst [vmem:[#allocation4 + $0x1e8] sm:$0xff] %v2433_v4  ;;  %v2450_v8 = vor.u32 %v2449_v0, %v2446_v62  ;;  %v2455_v9 = vrot.slane %v2453_v1, 2  ;;  %v2458_v10 = vrot.slane %v2456_v2, 3  ;;  %v2471_v11 = vshrl.u32 %v10423_v3, 16 }
 0x1b1   : > { %v2442_v13 = vsel %vm2362_vm10, %v2432_v60, %v2441_v5  ;;  %v2464_v14 = vrot.slane %v2462_v6, 2  ;;  %v2467_v15 = vrot.slane %v2465_v7, 3  ;;  %v2474_v16 = vshll.u32 %v10423_v3, 16 }
 0x1b2   : > { %2558 = vst [vmem:[#allocation4 + $0x230] sm:$0xff] %v2442_v13  ;;  %v2451_v18 = vsel %vm2362_vm10, %v2441_v5, %v2450_v8  ;;  %v2459_v19 = vor.u32 %v2458_v10, %v2455_v9  ;;  %v2473_v20 = vrot.slane %v2471_v11, 2  ;;  %v2480_v21 = vshrl.u32 %v10424_v12, 16  ;;  %v10434_v9 = vld [vmem:[#allocation3 + $0x30] sm:$0xff]   ;;  %v10435_v13 = vld [vmem:[#allocation3 + $0x38] sm:$0xff]  }
 0x1b3   : > { %2559 = vst [vmem:[#allocation4 + $0x278] sm:$0xff] %v2451_v18  ;;  %v2468_v22 = vor.u32 %v2467_v15, %v2464_v14  ;;  %v2476_v23 = vrot.slane %v2474_v16, 3  ;;  %v2483_v24 = vshll.u32 %v10424_v12, 16  ;;  %v2489_v25 = vshrl.u32 %v10425_v17, 16  ;;  %v10436_v16 = vld [vmem:[#allocation3 + $0x40] sm:$0xff]  }
 0x1b4   : > { %v2460_v27 = vsel %vm2362_vm10, %v2450_v8, %v2459_v19  ;;  %v2482_v28 = vrot.slane %v2480_v21, 2  ;;  %v2492_v29 = vshll.u32 %v10425_v17, 16  ;;  %v2498_v37 = vshrl.u32 %v10426_v26, 16 }
 0x1b5   : > { %2560 = vst [vmem:[#allocation4 + $0x2c0] sm:$0xff] %v2460_v27  ;;  %v2469_v30 = vsel %vm2362_vm10, %v2459_v19, %v2468_v22  ;;  %v2477_v31 = vor.u32 %v2476_v23, %v2473_v20  ;;  %v2485_v32 = vrot.slane %v2483_v24, 3  ;;  %v2491_v33 = vrot.slane %v2489_v25, 2  ;;  %v10437_v19 = vld [vmem:[#allocation3 + $0x48] sm:$0xff]   ;;  %v10439_v25 = vld [vmem:[#allocation3 + $0x58] sm:$0xff]  }
 0x1b6   : > { %2561 = vst [vmem:[#allocation4 + $0x308] sm:$0xff] %v2469_v30  ;;  %v2494_v36 = vrot.slane %v2492_v29, 3  ;;  %v2501_v38 = vshll.u32 %v10426_v26, 16  ;;  %v2507_v42 = vshrl.u32 %v10427_v34, 16  ;;  %v2510_v43 = vshll.u32 %v10427_v34, 16  ;;  %v10442_v34 = vld [vmem:[#allocation3 + $0x70] sm:$0xff]  }
 0x1b7   : > { %v2478_v40 = vsel %vm2362_vm10, %v2468_v22, %v2477_v31  ;;  %v2486_v41 = vor.u32 %v2485_v32, %v2482_v28  ;;  %v2500_v45 = vrot.slane %v2498_v37, 2  ;;  %v2516_v47 = vshrl.u32 %v10428_v35, 16  ;;  %v10438_v22 = vld [vmem:[#allocation3 + $0x50] sm:$0xff]   ;;  %v10440_v28 = vld [vmem:[#allocation3 + $0x60] sm:$0xff]   ;;  %v10443_v37 = vld [vmem:[#allocation3 + $0x78] sm:$0xff]  }
 0x1b8   : > { %2562 = vst [vmem:[#allocation4 + $0x350] sm:$0xff] %v2478_v40  ;;  %v2495_v44 = vor.u32 %v2494_v36, %v2491_v33  ;;  %v2503_v46 = vrot.slane %v2501_v38, 3  ;;  %v2509_v50 = vrot.slane %v2507_v42, 2  ;;  %v2512_v51 = vrot.slane %v2510_v43, 3  ;;  %v10444_v40 = vld [vmem:[#allocation3 + $0x80] sm:$0xff]   ;;  %v10445_v43 = vld [vmem:[#allocation3 + $0x88] sm:$0xff]  }
 0x1b9   : > { %v2487_v49 = vsel %vm2362_vm10, %v2477_v31, %v2486_v41  ;;  %v2519_v52 = vshll.u32 %v10428_v35, 16  ;;  %v2518_v56 = vrot.slane %v2516_v47, 2  ;;  %v2525_v57 = vshrl.u32 %v10429_v48, 16  ;;  %v10441_v31 = vld [vmem:[#allocation3 + $0x68] sm:$0xff]  }
 0x1ba   : > { %2563 = vst [vmem:[#allocation4 + $0x398] sm:$0xff] %v2487_v49  ;;  %v2496_v54 = vsel %vm2362_vm10, %v2486_v41, %v2495_v44  ;;  %v2504_v55 = vor.u32 %v2503_v46, %v2500_v45  ;;  %v2513_v58 = vor.u32 %v2512_v51, %v2509_v50  ;;  %v2528_v60 = vshll.u32 %v10429_v48, 16  ;;  %v10446_v46 = vld [vmem:[#allocation3 + $0x90] sm:$0xff]   ;;  %v10447_v49 = vld [vmem:[#allocation3 + $0x98] sm:$0xff]  }
 0x1bb   : > { %2564 = vst [vmem:[#allocation4 + $0x3e0] sm:$0xff] %v2496_v54  ;;  %v2521_v59 = vrot.slane %v2519_v52, 3  ;;  %v2701_v62 = vrot.slane %v10431_v39, 3  ;;  %v2527_v1 = vrot.slane %v2525_v57, 2  ;;  %v2703_v2 = vrot.slane %v10432_v53, 3 }
 0x1bc   : > { %v2505_v0 = vsel %vm2362_vm10, %v2495_v44, %v2504_v55  ;;  %v2514_v3 = vsel %vm2362_vm10, %v2504_v55, %v2513_v58  ;;  %v2530_v5 = vrot.slane %v2528_v60, 3  ;;  %v2700_v6 = vrot.slane %v10430_v61, 3  ;;  %v10448_v52 = vld [vmem:[#allocation3 + $0xa0] ss:$0 sps:$4 sm:$0x77]  }
 0x1bd   : > { %2565 = vst [vmem:[#allocation4 + $0x428] sm:$0xff] %v2505_v0  ;;  %v2522_v4 = vor.u32 %v2521_v59, %v2518_v56  ;;  %2566 = vst [vmem:[#allocation4 + $0x470] sm:$0xff] %v2514_v3  ;;  %v2704_v7 = vsel %vm2699_vm11, %v2701_v62, %v2703_v2  ;;  %v2705_v8 = vrot.slane %v10433_v63, 3  ;;  %v2707_v15 = vrot.slane %v10434_v9, 3 }
 0x1be   : > { %v2531_v11 = vor.u32 %v2530_v5, %v2527_v1  ;;  %v2702_v12 = vsel %vm2699_vm11, %v2700_v6, %v2701_v62  ;;  %2756 = vst [vmem:[#allocation4 + $0x88] sm:$0xff] %v2704_v7  ;;  %v2709_v18 = vrot.slane %v10435_v13, 3  ;;  %v2711_v21 = vrot.slane %v10436_v16, 3 }
 0x1bf   : > { %v2523_v10 = vsel %vm2362_vm10, %v2513_v58, %v2522_v4  ;;  %2755 = vst [vmem:[#allocation4 + $0x40] sm:$0xff] %v2702_v12  ;;  %v2706_v14 = vsel %vm2699_vm11, %v2703_v2, %v2705_v8  ;;  %v2708_v20 = vsel %vm2699_vm11, %v2705_v8, %v2707_v15  ;;  %v2713_v24 = vrot.slane %v10437_v19, 3 }
 0x1c0   : > { %2567 = vst [vmem:[#allocation4 + $0x4b8] sm:$0xff] %v2523_v10  ;;  %v2532_v17 = vsel %vm2362_vm10, %v2522_v4, %v2531_v11  ;;  %2757 = vst [vmem:[#allocation4 + $0xd0] sm:$0xff] %v2706_v14  ;;  %v2710_v23 = vsel %vm2699_vm11, %v2707_v15, %v2709_v18  ;;  %v2712_v26 = vsel %vm2699_vm11, %v2709_v18, %v2711_v21  ;;  %v2715_v27 = vrot.slane %v10438_v22, 3 }
 0x1c1   : > { %2568 = vst [vmem:[#allocation4 + $0x500] sm:$0xff] %v2532_v17  ;;  %2758 = vst [vmem:[#allocation4 + $0x118] sm:$0xff] %v2708_v20  ;;  %v2714_v29 = vsel %vm2699_vm11, %v2711_v21, %v2713_v24  ;;  %v2717_v30 = vrot.slane %v10439_v25, 3  ;;  %v2719_v33 = vrot.slane %v10440_v28, 3  ;;  %v2721_v36 = vrot.slane %v10441_v31, 3 }
 0x1c2   : > { %2759 = vst [vmem:[#allocation4 + $0x160] sm:$0xff] %v2710_v23  ;;  %2760 = vst [vmem:[#allocation4 + $0x1a8] sm:$0xff] %v2712_v26  ;;  %v2716_v32 = vsel %vm2699_vm11, %v2713_v24, %v2715_v27  ;;  %v2723_v39 = vrot.slane %v10442_v34, 3  ;;  %v2725_v42 = vrot.slane %v10443_v37, 3  ;;  %v2727_v45 = vrot.slane %v10444_v40, 3 }
 0x1c3   : > { %2761 = vst [vmem:[#allocation4 + $0x1f0] sm:$0xff] %v2714_v29  ;;  %2762 = vst [vmem:[#allocation4 + $0x238] sm:$0xff] %v2716_v32  ;;  %v2718_v35 = vsel %vm2699_vm11, %v2715_v27, %v2717_v30  ;;  %v2720_v38 = vsel %vm2699_vm11, %v2717_v30, %v2719_v33  ;;  %v2722_v41 = vsel %vm2699_vm11, %v2719_v33, %v2721_v36  ;;  %v2729_v48 = vrot.slane %v10445_v43, 3 }
 0x1c4   : > { %2763 = vst [vmem:[#allocation4 + $0x280] sm:$0xff] %v2718_v35  ;;  %2764 = vst [vmem:[#allocation4 + $0x2c8] sm:$0xff] %v2720_v38  ;;  %v2724_v44 = vsel %vm2699_vm11, %v2721_v36, %v2723_v39  ;;  %v2726_v47 = vsel %vm2699_vm11, %v2723_v39, %v2725_v42  ;;  %v2728_v50 = vsel %vm2699_vm11, %v2725_v42, %v2727_v45  ;;  %v2731_v51 = vrot.slane %v10446_v46, 3 }
 0x1c5   : > { %2765 = vst [vmem:[#allocation4 + $0x310] sm:$0xff] %v2722_v41  ;;  %2766 = vst [vmem:[#allocation4 + $0x358] sm:$0xff] %v2724_v44  ;;  %v2730_v53 = vsel %vm2699_vm11, %v2727_v45, %v2729_v48  ;;  %v2733_v54 = vrot.slane %v10447_v49, 3  ;;  %v2735_v56 = vrot.slane %v10448_v52, 3 }
 0x1c6   : > { %2767 = vst [vmem:[#allocation4 + $0x3a0] sm:$0xff] %v2726_v47  ;;  %2768 = vst [vmem:[#allocation4 + $0x3e8] sm:$0xff] %v2728_v50  ;;  %v2732_v55 = vsel %vm2699_vm11, %v2729_v48, %v2731_v51 }
 0x1c7   : > { %2769 = vst [vmem:[#allocation4 + $0x430] sm:$0xff] %v2730_v53  ;;  %2770 = vst [vmem:[#allocation4 + $0x478] sm:$0xff] %v2732_v55  ;;  %v2734_v57 = vsel %vm2699_vm11, %v2731_v51, %v2733_v54  ;;  %v2736_v58 = vsel %vm2699_vm11, %v2733_v54, %v2735_v56 }
 0x1c8   : > { %2771 = vst [vmem:[#allocation4 + $0x4c0] sm:$0xff] %v2734_v57  ;;  %2772 = vst [vmem:[#allocation4 + $0x508] sm:$0xff] %v2736_v58 }
 0x1c9 PF: > { %p9053_p6 = scmp.eq.s32.totalorder %s14150_s20, 0 }
 0x1ca   : > { %v10449_v59 = vld [vmem:[#allocation2] sm:$0xff] (!%p9053_p6)   ;;  %v10450_v60 = vld [vmem:[#allocation2 + $0x8] sm:$0xff] (!%p9053_p6)   ;;  %v10451_v61 = vld [vmem:[#allocation2 + $0x10] sm:$0xff] (!%p9053_p6)   ;;  %vm3069_vm12 = vsmask.f32 (!%p9053_p6), 7424  ;;  %vm3384_vm13 = vcmask (!%p9053_p6), 1046528  }
 0x1cb   : > { %2776 = sbr.rel (%p9053_p6) target bundleno = 596 (0x254), region = 84  ;;  %2921 = vst [vmem:[#allocation4] sm:$0xff] (!%p9053_p6), %v10449_v59  ;;  %2922 = vst [vmem:[#allocation4 + $0x48] sm:$0xff] (!%p9053_p6), %v10450_v60  ;;  %v10452_v62 = vld [vmem:[#allocation2 + $0x18] sm:$0xff] (!%p9053_p6)   ;;  %v10453_v63 = vld [vmem:[#allocation2 + $0x20] sm:$0xff] (!%p9053_p6)   ;;  %vm4128_vm15 = vcmask (!%p9053_p6), 1045504  }
 0x1cc   : > { %2923 = vst [vmem:[#allocation4 + $0x90] sm:$0xff] (!%p9053_p6), %v10451_v61  ;;  %2924 = vst [vmem:[#allocation4 + $0xd8] sm:$0xff] (!%p9053_p6), %v10452_v62  ;;  %v10454_v0 = vld [vmem:[#allocation2 + $0x28] sm:$0xff] (!%p9053_p6)   ;;  %v10455_v1 = vld [vmem:[#allocation2 + $0x30] sm:$0xff] (!%p9053_p6)   ;;  %vm3791_vm14 = vsmask.f32 (!%p9053_p6), 6400 }
 0x1cd   : > { %2925 = vst [vmem:[#allocation4 + $0x120] sm:$0xff] (!%p9053_p6), %v10453_v63  ;;  %2926 = vst [vmem:[#allocation4 + $0x168] sm:$0xff] (!%p9053_p6), %v10454_v0  ;;  %v10456_v2 = vld [vmem:[#allocation2 + $0x38] sm:$0xff] (!%p9053_p6)   ;;  %v10457_v3 = vld [vmem:[#allocation2 + $0x40] sm:$0xff] (!%p9053_p6)   ;;  %vm4535_vm0 = vsmask.f32 (!%p9053_p6), 5376 }
 0x1ce   : > { %2927 = vst [vmem:[#allocation4 + $0x1b0] sm:$0xff] (!%p9053_p6), %v10455_v1  ;;  %2928 = vst [vmem:[#allocation4 + $0x1f8] sm:$0xff] (!%p9053_p6), %v10456_v2  ;;  %v10458_v4 = vld [vmem:[#allocation2 + $0x48] sm:$0xff] (!%p9053_p6)   ;;  %v10459_v5 = vld [vmem:[#allocation2 + $0x50] sm:$0xff] (!%p9053_p6)   ;;  %vm4872_vm1 = vcmask (!%p9053_p6), 1044480  }
 0x1cf   : > { %2929 = vst [vmem:[#allocation4 + $0x240] sm:$0xff] (!%p9053_p6), %v10457_v3  ;;  %2930 = vst [vmem:[#allocation4 + $0x288] sm:$0xff] (!%p9053_p6), %v10458_v4  ;;  %v10460_v6 = vld [vmem:[#allocation2 + $0x58] sm:$0xff] (!%p9053_p6)   ;;  %v10461_v7 = vld [vmem:[#allocation2 + $0x60] sm:$0xff] (!%p9053_p6)  }
 0x1d0   : > { %2931 = vst [vmem:[#allocation4 + $0x2d0] sm:$0xff] (!%p9053_p6), %v10459_v5  ;;  %2932 = vst [vmem:[#allocation4 + $0x318] sm:$0xff] (!%p9053_p6), %v10460_v6  ;;  %v10462_v8 = vld [vmem:[#allocation2 + $0x68] sm:$0xff] (!%p9053_p6)   ;;  %v10463_v9 = vld [vmem:[#allocation2 + $0x70] sm:$0xff] (!%p9053_p6)  }
 0x1d1   : > { %2933 = vst [vmem:[#allocation4 + $0x360] sm:$0xff] (!%p9053_p6), %v10461_v7  ;;  %2934 = vst [vmem:[#allocation4 + $0x3a8] sm:$0xff] (!%p9053_p6), %v10462_v8  ;;  %v10464_v10 = vld [vmem:[#allocation2 + $0x78] sm:$0xff] (!%p9053_p6)   ;;  %v10465_v11 = vld [vmem:[#allocation2 + $0x80] sm:$0xff] (!%p9053_p6)  }
 0x1d2   : > { %2935 = vst [vmem:[#allocation4 + $0x3f0] sm:$0xff] %v10463_v9  ;;  %2936 = vst [vmem:[#allocation4 + $0x438] sm:$0xff] %v10464_v10  ;;  %v10466_v12 = vld [vmem:[#allocation2 + $0x88] sm:$0xff]   ;;  %v10467_v13 = vld [vmem:[#allocation2] sm:$0xff]  }
 0x1d3   : > { %2937 = vst [vmem:[#allocation4 + $0x480] sm:$0xff] %v10465_v11  ;;  %2938 = vst [vmem:[#allocation4 + $0x4c8] sm:$0xff] %v10466_v12  ;;  %v10468_v14 = vld [vmem:[#allocation2 + $0x8] sm:$0xff]   ;;  %v10469_v15 = vld [vmem:[#allocation2 + $0x10] sm:$0xff]   ;;  %v3071_v16 = vshrl.u32 %v10467_v13, 16  ;;  %v3073_v17 = vshll.u32 %v10467_v13, 16 }
 0x1d4   : > { %v3078_v18 = vshll.u32 %v10468_v14, 16  ;;  %v3082_v19 = vshrl.u32 %v10468_v14, 16  ;;  %v3086_v20 = vshll.u32 %v10469_v15, 16  ;;  %v10470_v21 = vld [vmem:[#allocation2 + $0x18] sm:$0xff]   ;;  %v3090_v22 = vshrl.u32 %v10469_v15, 16  ;;  %v10471_v23 = vld [vmem:[#allocation2 + $0x20] sm:$0xff]  }
 0x1d5   : > { %v3075_v24 = vrot.slane %v3073_v17, 1  ;;  %v3094_v27 = vshll.u32 %v10470_v21, 16  ;;  %v3098_v28 = vshrl.u32 %v10470_v21, 16  ;;  %v3102_v29 = vshll.u32 %v10471_v23, 16  ;;  %v10472_v32 = vld [vmem:[#allocation2 + $0x28] sm:$0xff]   ;;  %v10473_v37 = vld [vmem:[#allocation2 + $0x30] sm:$0xff]  }
 0x1d6   : > { %v3080_v25 = vrot.slane %v3078_v18, 1  ;;  %v3088_v26 = vrot.slane %v3086_v20, 1  ;;  %v3106_v33 = vshrl.u32 %v10471_v23, 16  ;;  %v10474_v38 = vld [vmem:[#allocation2 + $0x38] sm:$0xff]   ;;  %v3110_v41 = vshll.u32 %v10472_v32, 16  ;;  %v10475_v47 = vld [vmem:[#allocation2 + $0x40] sm:$0xff]  }
 0x1d7   : > { %v3076_v30 = vor.u32 %v3075_v24, %v3071_v16  ;;  %v3096_v35 = vrot.slane %v3094_v27, 1  ;;  %v3104_v36 = vrot.slane %v3102_v29, 1  ;;  %v3114_v42 = vshrl.u32 %v10472_v32, 16  ;;  %v10476_v55 = vld [vmem:[#allocation2 + $0x48] sm:$0xff]   ;;  %v10477_v60 = vld [vmem:[#allocation2 + $0x50] sm:$0xff]   ;;  %v10478_v1 = vld [vmem:[#allocation2 + $0x58] sm:$0xff]  }
 0x1d8   : > { %v3084_v31 = vor.u32 %v3082_v19, %v3080_v25  ;;  %v3092_v34 = vor.u32 %v3090_v22, %v3088_v26  ;;  %v3118_v46 = vshll.u32 %v10473_v37, 16  ;;  %v3112_v48 = vrot.slane %v3110_v41, 1  ;;  %v10479_v10 = vld [vmem:[#allocation2 + $0x60] sm:$0xff]   ;;  %v10480_v11 = vld [vmem:[#allocation2 + $0x68] sm:$0xff]   ;;  %v10481_v22 = vld [vmem:[#allocation2 + $0x70] sm:$0xff]  }
 0x1d9   : > { %v3081_v39 = vsel %vm3069_vm12, %v3076_v30, %v3080_v25  ;;  %v3100_v44 = vor.u32 %v3098_v28, %v3096_v35  ;;  %v3108_v45 = vor.u32 %v3106_v33, %v3104_v36  ;;  %v3122_v49 = vshrl.u32 %v10473_v37, 16  ;;  %v10482_v27 = vld [vmem:[#allocation2 + $0x78] sm:$0xff]   ;;  %v10483_v32 = vld [vmem:[#allocation2 + $0x80] sm:$0xff]  }
 0x1da   : > { %v3089_v40 = vsel %vm3069_vm12, %v3084_v31, %v3088_v26  ;;  %3236 = vst [vmem:[#allocation4 + $0x8] sm:$0xff] %v3081_v39  ;;  %v3097_v43 = vsel %vm3069_vm12, %v3092_v34, %v3096_v35  ;;  %v3126_v50 = vshll.u32 %v10474_v38, 16  ;;  %v3130_v51 = vshrl.u32 %v10474_v38, 16 }
 0x1db   : > { %3237 = vst [vmem:[#allocation4 + $0x50] sm:$0xff] %v3089_v40  ;;  %3238 = vst [vmem:[#allocation4 + $0x98] sm:$0xff] %v3097_v43  ;;  %v3105_v52 = vsel %vm3069_vm12, %v3100_v44, %v3104_v36  ;;  %v3120_v53 = vrot.slane %v3118_v46, 1  ;;  %v3134_v54 = vshll.u32 %v10475_v47, 16  ;;  %v3138_v56 = vshrl.u32 %v10475_v47, 16  ;;  %v10484_v40 = vld [vmem:[#allocation2 + $0x88] sm:$0xff]  }
 0x1dc   : > { %3239 = vst [vmem:[#allocation4 + $0xe0] sm:$0xff] %v3105_v52  ;;  %v3113_v57 = vsel %vm3069_vm12, %v3108_v45, %v3112_v48  ;;  %v3116_v58 = vor.u32 %v3114_v42, %v3112_v48  ;;  %v3128_v59 = vrot.slane %v3126_v50, 1  ;;  %v3142_v63 = vshll.u32 %v10476_v55, 16  ;;  %v10485_v44 = vld [vmem:[#allocation2 + $0x90] ss:$0 sps:$4 sm:$0x11]  }
 0x1dd   : > { %3240 = vst [vmem:[#allocation4 + $0x128] sm:$0xff] %v3113_v57  ;;  %v3124_v61 = vor.u32 %v3122_v49, %v3120_v53  ;;  %v3136_v62 = vrot.slane %v3134_v54, 1  ;;  %v3146_v0 = vshrl.u32 %v10476_v55, 16  ;;  %v3150_v4 = vshll.u32 %v10477_v60, 16  ;;  %v10486_v52 = vld [vmem:[#allocation2] sm:$0xfe]  }
 0x1de   : > { %v3121_v2 = vsel %vm3069_vm12, %v3116_v58, %v3120_v53  ;;  %v3132_v3 = vor.u32 %v3130_v51, %v3128_v59  ;;  %v3154_v5 = vshrl.u32 %v10477_v60, 16  ;;  %v3144_v8 = vrot.slane %v3142_v63, 1  ;;  %v10488_v60 = vld [vmem:[#allocation2 + $0x10] sm:$0xff]  }
 0x1df   : > { %3241 = vst [vmem:[#allocation4 + $0x170] sm:$0xff] %v3121_v2  ;;  %v3129_v6 = vsel %vm3069_vm12, %v3124_v61, %v3128_v59  ;;  %v3140_v7 = vor.u32 %v3138_v56, %v3136_v62  ;;  %v3158_v9 = vshll.u32 %v10478_v1, 16  ;;  %v3152_v13 = vrot.slane %v3150_v4, 1  ;;  %v10487_v56 = vld [vmem:[#allocation2 + $0x8] sm:$0xff]   ;;  %v10489_v61 = vld [vmem:[#allocation2 + $0x18] sm:$0xff]  }
 0x1e0   : > { %3242 = vst [vmem:[#allocation4 + $0x1b8] sm:$0xff] %v3129_v6  ;;  %v3137_v12 = vsel %vm3069_vm12, %v3132_v3, %v3136_v62  ;;  %v3162_v14 = vshrl.u32 %v10478_v1, 16  ;;  %v3148_v16 = vor.u32 %v3146_v0, %v3144_v8  ;;  %v3166_v18 = vshll.u32 %v10479_v10, 16  ;;  %v10490_v1 = vld [vmem:[#allocation2 + $0x20] sm:$0xff]  }
 0x1e1   : > { %3243 = vst [vmem:[#allocation4 + $0x200] sm:$0xff] %v3137_v12  ;;  %v3145_v15 = vsel %vm3069_vm12, %v3140_v7, %v3144_v8  ;;  %v3160_v17 = vrot.slane %v3158_v9, 1  ;;  %v3156_v19 = vor.u32 %v3154_v5, %v3152_v13  ;;  %v3170_v20 = vshrl.u32 %v10479_v10, 16  ;;  %v10491_v7 = vld [vmem:[#allocation2 + $0x28] sm:$0xff]   ;;  %v10492_v10 = vld [vmem:[#allocation2 + $0x30] sm:$0xff]  }
 0x1e2   : > { %3244 = vst [vmem:[#allocation4 + $0x248] sm:$0xff] %v3145_v15  ;;  %v3174_v21 = vshll.u32 %v10480_v11, 16  ;;  %v3178_v23 = vshrl.u32 %v10480_v11, 16  ;;  %v3153_v24 = vsel %vm3069_vm12, %v3148_v16, %v3152_v13  ;;  %v3168_v26 = vrot.slane %v3166_v18, 1  ;;  %v10493_v13 = vld [vmem:[#allocation2 + $0x38] sm:$0xff]   ;;  %v10494_v15 = vld [vmem:[#allocation2 + $0x40] sm:$0xff]  }
 0x1e3   : > { %v3164_v25 = vor.u32 %v3162_v14, %v3160_v17  ;;  %3245 = vst [vmem:[#allocation4 + $0x290] sm:$0xff] %v3153_v24  ;;  %v3161_v28 = vsel %vm3069_vm12, %v3156_v19, %v3160_v17  ;;  %v3182_v30 = vshll.u32 %v10481_v22, 16  ;;  %v3186_v31 = vshrl.u32 %v10481_v22, 16  ;;  %v10495_v18 = vld [vmem:[#allocation2 + $0x48] sm:$0xff]   ;;  %v10497_v24 = vld [vmem:[#allocation2 + $0x58] sm:$0xff]  }
 0x1e4   : > { %v3176_v29 = vrot.slane %v3174_v21, 1  ;;  %3246 = vst [vmem:[#allocation4 + $0x2d8] sm:$0xff] %v3161_v28  ;;  %v3172_v34 = vor.u32 %v3170_v20, %v3168_v26  ;;  %v3190_v35 = vshll.u32 %v10482_v27, 16  ;;  %v3194_v36 = vshrl.u32 %v10482_v27, 16  ;;  %v10496_v21 = vld [vmem:[#allocation2 + $0x50] sm:$0xff]   ;;  %v10498_v27 = vld [vmem:[#allocation2 + $0x60] sm:$0xff]  }
 0x1e5   : > { %v3169_v33 = vsel %vm3069_vm12, %v3164_v25, %v3168_v26  ;;  %v3184_v38 = vrot.slane %v3182_v30, 1  ;;  %v3198_v39 = vshll.u32 %v10483_v32, 16  ;;  %v3202_v41 = vshrl.u32 %v10483_v32, 16  ;;  %v10499_v30 = vld [vmem:[#allocation2 + $0x68] sm:$0xff]  }
 0x1e6   : > { %3247 = vst [vmem:[#allocation4 + $0x320] sm:$0xff] %v3169_v33  ;;  %v3180_v37 = vor.u32 %v3178_v23, %v3176_v29  ;;  %v3177_v42 = vsel %vm3069_vm12, %v3172_v34, %v3176_v29  ;;  %v3192_v43 = vrot.slane %v3190_v35, 1  ;;  %v3206_v48 = vshll.u32 %v10484_v40, 16  ;;  %v10500_v33 = vld [vmem:[#allocation2 + $0x70] sm:$0xff]  }
 0x1e7   : > { %3248 = vst [vmem:[#allocation4 + $0x368] sm:$0xff] %v3177_v42  ;;  %v3188_v46 = vor.u32 %v3186_v31, %v3184_v38  ;;  %v3200_v47 = vrot.slane %v3198_v39, 1  ;;  %v3210_v50 = vshrl.u32 %v10484_v40, 16  ;;  %v3214_v51 = vshll.u32 %v10485_v44, 16  ;;  %v10502_v39 = vld [vmem:[#allocation2 + $0x80] sm:$0xff]   ;;  %v10503_v42 = vld [vmem:[#allocation2 + $0x88] sm:$0xff]  }
 0x1e8   : > { %v3185_v45 = vsel %vm3069_vm12, %v3180_v37, %v3184_v38  ;;  %v3196_v49 = vor.u32 %v3194_v36, %v3192_v43  ;;  %v3208_v55 = vrot.slane %v3206_v48, 1  ;;  %v3385_v59 = vrot.slane %v10486_v52, 1  ;;  %v10501_v36 = vld [vmem:[#allocation2 + $0x78] sm:$0xff]   ;;  %v10506_v48 = vld [vmem:[#allocation2 + $0x10] sm:$0xff]  }
 0x1e9   : > { %3249 = vst [vmem:[#allocation4 + $0x3b0] sm:$0xff] %v3185_v45  ;;  %v3193_v53 = vsel %vm3069_vm12, %v3188_v46, %v3192_v43  ;;  %v3204_v54 = vor.u32 %v3202_v41, %v3200_v47  ;;  %v3216_v58 = vrot.slane %v3214_v51, 1  ;;  %v3386_v0 = vrot.slane %v10487_v56, 1  ;;  %v10504_v45 = vld [vmem:[#allocation2 + $0x90] ss:$0 sps:$4 sm:$0x11]  }
 0x1ea   : > { %3250 = vst [vmem:[#allocation4 + $0x3f8] sm:$0xff] %v3193_v53  ;;  %v3201_v57 = vsel %vm3069_vm12, %v3196_v49, %v3200_v47  ;;  %v3212_v63 = vor.u32 %v3210_v50, %v3208_v55  ;;  %v3388_v2 = vrot.slane %v10488_v60, 1  ;;  %v3390_v3 = vrot.slane %v10489_v61, 1  ;;  %v10505_v51 = vld [vmem:[#allocation2 + $0x8] sm:$0xfe]   ;;  %v10507_v52 = vld [vmem:[#allocation2 + $0x18] sm:$0xff]  }
 0x1eb   : > { %3251 = vst [vmem:[#allocation4 + $0x440] sm:$0xff] %v3201_v57  ;;  %v3209_v62 = vsel %vm3069_vm12, %v3204_v54, %v3208_v55  ;;  %v3387_v5 = vsel %vm3384_vm13, %v3385_v59, %v3386_v0  ;;  %v3392_v6 = vrot.slane %v10490_v1, 1  ;;  %v3394_v12 = vrot.slane %v10491_v7, 1  ;;  %v10508_v55 = vld [vmem:[#allocation2 + $0x20] sm:$0xff]   ;;  %v10509_v60 = vld [vmem:[#allocation2 + $0x28] sm:$0xff]  }
 0x1ec   : > { %3252 = vst [vmem:[#allocation4 + $0x488] sm:$0xff] %v3209_v62  ;;  %v3217_v4 = vsel %vm3069_vm12, %v3212_v63, %v3216_v58  ;;  %3440 = vst [vmem:[#allocation4 + $0x10] sm:$0xff] %v3387_v5  ;;  %v3389_v8 = vsel %vm3384_vm13, %v3386_v0, %v3388_v2  ;;  %v3391_v9 = vsel %vm3384_vm13, %v3388_v2, %v3390_v3  ;;  %v3396_v14 = vrot.slane %v10492_v10, 1  ;;  %v10510_v63 = vld [vmem:[#allocation2 + $0x30] sm:$0xff]   ;;  %v10511_v2 = vld [vmem:[#allocation2 + $0x38] sm:$0xff]  }
 0x1ed   : > { %3253 = vst [vmem:[#allocation4 + $0x4d0] sm:$0xff] %v3217_v4  ;;  %3441 = vst [vmem:[#allocation4 + $0x58] sm:$0xff] %v3389_v8  ;;  %v3393_v11 = vsel %vm3384_vm13, %v3390_v3, %v3392_v6  ;;  %v3395_v16 = vsel %vm3384_vm13, %v3392_v6, %v3394_v12  ;;  %v3398_v17 = vrot.slane %v10493_v13, 1  ;;  %v3400_v20 = vrot.slane %v10494_v15, 1  ;;  %v10512_v4 = vld [vmem:[#allocation2 + $0x40] sm:$0xff]   ;;  %v10513_v7 = vld [vmem:[#allocation2 + $0x48] sm:$0xff]  }
 0x1ee   : > { %3442 = vst [vmem:[#allocation4 + $0xa0] sm:$0xff] %v3391_v9  ;;  %3443 = vst [vmem:[#allocation4 + $0xe8] sm:$0xff] %v3393_v11  ;;  %v3397_v19 = vsel %vm3384_vm13, %v3394_v12, %v3396_v14  ;;  %v3402_v23 = vrot.slane %v10495_v18, 1  ;;  %v3404_v26 = vrot.slane %v10496_v21, 1  ;;  %v3406_v29 = vrot.slane %v10497_v24, 1  ;;  %v10514_v10 = vld [vmem:[#allocation2 + $0x50] sm:$0xff]  }
 0x1ef   : > { %3444 = vst [vmem:[#allocation4 + $0x130] sm:$0xff] %v3395_v16  ;;  %3445 = vst [vmem:[#allocation4 + $0x178] sm:$0xff] %v3397_v19  ;;  %v3399_v22 = vsel %vm3384_vm13, %v3396_v14, %v3398_v17  ;;  %v3401_v25 = vsel %vm3384_vm13, %v3398_v17, %v3400_v20  ;;  %v3408_v32 = vrot.slane %v10498_v27, 1  ;;  %v3410_v35 = vrot.slane %v10499_v30, 1  ;;  %v10515_v13 = vld [vmem:[#allocation2 + $0x58] sm:$0xff]   ;;  %v10516_v16 = vld [vmem:[#allocation2 + $0x60] sm:$0xff]  }
 0x1f0   : > { %3446 = vst [vmem:[#allocation4 + $0x1c0] sm:$0xff] %v3399_v22  ;;  %3447 = vst [vmem:[#allocation4 + $0x208] sm:$0xff] %v3401_v25  ;;  %v3403_v28 = vsel %vm3384_vm13, %v3400_v20, %v3402_v23  ;;  %v3405_v31 = vsel %vm3384_vm13, %v3402_v23, %v3404_v26  ;;  %v3407_v34 = vsel %vm3384_vm13, %v3404_v26, %v3406_v29  ;;  %v3412_v38 = vrot.slane %v10500_v33, 1  ;;  %v10517_v19 = vld [vmem:[#allocation2 + $0x68] sm:$0xff]   ;;  %v10518_v22 = vld [vmem:[#allocation2 + $0x70] sm:$0xff]  }
 0x1f1   : > { %3448 = vst [vmem:[#allocation4 + $0x250] sm:$0xff] %v3403_v28  ;;  %3449 = vst [vmem:[#allocation4 + $0x298] sm:$0xff] %v3405_v31  ;;  %v3409_v37 = vsel %vm3384_vm13, %v3406_v29, %v3408_v32  ;;  %v3411_v40 = vsel %vm3384_vm13, %v3408_v32, %v3410_v35  ;;  %v3414_v41 = vrot.slane %v10501_v36, 1  ;;  %v3416_v44 = vrot.slane %v10502_v39, 1  ;;  %v10519_v25 = vld [vmem:[#allocation2 + $0x78] sm:$0xff]   ;;  %v10520_v28 = vld [vmem:[#allocation2 + $0x80] sm:$0xff]  }
 0x1f2   : > { %3450 = vst [vmem:[#allocation4 + $0x2e0] sm:$0xff] %v3407_v34  ;;  %3451 = vst [vmem:[#allocation4 + $0x328] sm:$0xff] %v3409_v37  ;;  %v3413_v43 = vsel %vm3384_vm13, %v3410_v35, %v3412_v38  ;;  %v3418_v47 = vrot.slane %v10503_v42, 1  ;;  %v3420_v50 = vrot.slane %v10504_v45, 1  ;;  %v3589_v54 = vrot.slane %v10506_v48, 1  ;;  %v10521_v31 = vld [vmem:[#allocation2 + $0x88] sm:$0xff]  }
 0x1f3   : > { %3452 = vst [vmem:[#allocation4 + $0x370] sm:$0xff] %v3411_v40  ;;  %3453 = vst [vmem:[#allocation4 + $0x3b8] sm:$0xff] %v3413_v43  ;;  %v3415_v46 = vsel %vm3384_vm13, %v3412_v38, %v3414_v41  ;;  %v3417_v49 = vsel %vm3384_vm13, %v3414_v41, %v3416_v44  ;;  %v3588_v57 = vrot.slane %v10505_v51, 1  ;;  %v3591_v58 = vrot.slane %v10507_v52, 1  ;;  %v10522_v34 = vld [vmem:[#allocation2 + $0x90] sm:$0xff]   ;;  %v10526_v43 = vld [vmem:[#allocation2 + $0x18] sm:$0xff]  }
 0x1f4   : > { %3454 = vst [vmem:[#allocation4 + $0x400] sm:$0xff] %v3415_v46  ;;  %3455 = vst [vmem:[#allocation4 + $0x448] sm:$0xff] %v3417_v49  ;;  %v3419_v53 = vsel %vm3384_vm13, %v3416_v44, %v3418_v47  ;;  %v3421_v56 = vsel %vm3384_vm13, %v3418_v47, %v3420_v50  ;;  %v3593_v59 = vrot.slane %v10508_v55, 1  ;;  %v3595_v1 = vrot.slane %v10509_v60, 1  ;;  %v10525_v40 = vld [vmem:[#allocation2 + $0x10] sm:$0xff]  }
 0x1f5   : > { %3456 = vst [vmem:[#allocation4 + $0x490] sm:$0xff] %v3419_v53  ;;  %3457 = vst [vmem:[#allocation4 + $0x4d8] sm:$0xff] %v3421_v56  ;;  %v3590_v61 = vsel %vm3384_vm13, %v3588_v57, %v3589_v54  ;;  %v3592_v62 = vsel %vm3384_vm13, %v3589_v54, %v3591_v58  ;;  %v3597_v3 = vrot.slane %v10510_v63, 1  ;;  %v3599_v6 = vrot.slane %v10511_v2, 1  ;;  %v10524_v45 = vld [vmem:[#allocation2 + $0x8] sm:$0xfe]  }
 0x1f6   : > { %3643 = vst [vmem:[#allocation4 + $0x18] sm:$0xff] %v3590_v61  ;;  %3644 = vst [vmem:[#allocation4 + $0x60] sm:$0xff] %v3592_v62  ;;  %v3594_v0 = vsel %vm3384_vm13, %v3591_v58, %v3593_v59  ;;  %v3596_v5 = vsel %vm3384_vm13, %v3593_v59, %v3595_v1  ;;  %v3601_v9 = vrot.slane %v10512_v4, 1  ;;  %v3603_v12 = vrot.slane %v10513_v7, 1  ;;  %v10527_v57 = vld [vmem:[#allocation2 + $0x20] sm:$0xff]   ;;  %v10528_v58 = vld [vmem:[#allocation2 + $0x28] sm:$0xff]  }
 0x1f7   : > { %3645 = vst [vmem:[#allocation4 + $0xa8] sm:$0xff] %v3594_v0  ;;  %3646 = vst [vmem:[#allocation4 + $0xf0] sm:$0xff] %v3596_v5  ;;  %v3598_v8 = vsel %vm3384_vm13, %v3595_v1, %v3597_v3  ;;  %v3600_v11 = vsel %vm3384_vm13, %v3597_v3, %v3599_v6  ;;  %v3605_v15 = vrot.slane %v10514_v10, 1  ;;  %v3607_v18 = vrot.slane %v10515_v13, 1  ;;  %v10529_v2 = vld [vmem:[#allocation2 + $0x30] sm:$0xff]   ;;  %v10530_v5 = vld [vmem:[#allocation2 + $0x38] sm:$0xff]  }
 0x1f8   : > { %3647 = vst [vmem:[#allocation4 + $0x138] sm:$0xff] %v3598_v8  ;;  %3648 = vst [vmem:[#allocation4 + $0x180] sm:$0xff] %v3600_v11  ;;  %v3602_v14 = vsel %vm3384_vm13, %v3599_v6, %v3601_v9  ;;  %v3604_v17 = vsel %vm3384_vm13, %v3601_v9, %v3603_v12  ;;  %v3609_v21 = vrot.slane %v10516_v16, 1  ;;  %v3611_v24 = vrot.slane %v10517_v19, 1  ;;  %v10531_v10 = vld [vmem:[#allocation2 + $0x40] sm:$0xff]  }
 0x1f9   : > { %3649 = vst [vmem:[#allocation4 + $0x1c8] sm:$0xff] %v3602_v14  ;;  %3650 = vst [vmem:[#allocation4 + $0x210] sm:$0xff] %v3604_v17  ;;  %v3606_v20 = vsel %vm3384_vm13, %v3603_v12, %v3605_v15  ;;  %v3608_v23 = vsel %vm3384_vm13, %v3605_v15, %v3607_v18  ;;  %v3613_v27 = vrot.slane %v10518_v22, 1  ;;  %v3615_v30 = vrot.slane %v10519_v25, 1  ;;  %v10532_v15 = vld [vmem:[#allocation2 + $0x48] sm:$0xff]   ;;  %v10534_v25 = vld [vmem:[#allocation2 + $0x58] sm:$0xff]  }
 0x1fa   : > { %3651 = vst [vmem:[#allocation4 + $0x258] sm:$0xff] %v3606_v20  ;;  %3652 = vst [vmem:[#allocation4 + $0x2a0] sm:$0xff] %v3608_v23  ;;  %v3610_v26 = vsel %vm3384_vm13, %v3607_v18, %v3609_v21  ;;  %v3612_v29 = vsel %vm3384_vm13, %v3609_v21, %v3611_v24  ;;  %v3617_v33 = vrot.slane %v10520_v28, 1  ;;  %v3619_v36 = vrot.slane %v10521_v31, 1  ;;  %v10533_v20 = vld [vmem:[#allocation2 + $0x50] sm:$0xff]  }
 0x1fb   : > { %3653 = vst [vmem:[#allocation4 + $0x2e8] sm:$0xff] %v3610_v26  ;;  %3654 = vst [vmem:[#allocation4 + $0x330] sm:$0xff] %v3612_v29  ;;  %v3614_v32 = vsel %vm3384_vm13, %v3611_v24, %v3613_v27  ;;  %v3616_v35 = vsel %vm3384_vm13, %v3613_v27, %v3615_v30  ;;  %v10523_v37 = vld [vmem:[#allocation2 + $0x98] ss:$0 sps:$4 sm:$0x11]   ;;  %v3621_v39 = vrot.slane %v10522_v34, 1 }
 0x1fc   : > { %3655 = vst [vmem:[#allocation4 + $0x378] sm:$0xff] %v3614_v32  ;;  %3656 = vst [vmem:[#allocation4 + $0x3c0] sm:$0xff] %v3616_v35  ;;  %v3618_v38 = vsel %vm3384_vm13, %v3615_v30, %v3617_v33  ;;  %v3620_v41 = vsel %vm3384_vm13, %v3617_v33, %v3619_v36  ;;  %v3623_v42 = vrot.slane %v10523_v37, 1  ;;  %v3801_v46 = vshrl.u32 %v10525_v40, 16  ;;  %v10535_v30 = vld [vmem:[#allocation2 + $0x60] sm:$0xff]  }
 0x1fd   : > { %3657 = vst [vmem:[#allocation4 + $0x408] sm:$0xff] %v3618_v38  ;;  %3658 = vst [vmem:[#allocation4 + $0x450] sm:$0xff] %v3620_v41  ;;  %v3622_v44 = vsel %vm3384_vm13, %v3619_v36, %v3621_v39  ;;  %v3804_v47 = vshll.u32 %v10525_v40, 16  ;;  %v3810_v49 = vshrl.u32 %v10526_v43, 16  ;;  %v3813_v50 = vshll.u32 %v10526_v43, 16 }
 0x1fe   : > { %3659 = vst [vmem:[#allocation4 + $0x498] sm:$0xff] %v3622_v44  ;;  %v3624_v48 = vsel %vm3384_vm13, %v3621_v39, %v3623_v42  ;;  %v3793_v51 = vshrl.u32 %v10524_v45, 16  ;;  %v3796_v52 = vshll.u32 %v10524_v45, 16  ;;  %v3803_v53 = vrot.slane %v3801_v46, 1  ;;  %v10536_v39 = vld [vmem:[#allocation2 + $0x68] sm:$0xff]  }
 0x1ff   : > { %3660 = vst [vmem:[#allocation4 + $0x4e0] sm:$0xff] %v3624_v48  ;;  %v3806_v54 = vrot.slane %v3804_v47, 2  ;;  %v3812_v55 = vrot.slane %v3810_v49, 1  ;;  %v3815_v56 = vrot.slane %v3813_v50, 2  ;;  %v3819_v63 = vshrl.u32 %v10527_v57, 16  ;;  %v10537_v48 = vld [vmem:[#allocation2 + $0x70] sm:$0xff]  }
 0x200   : > { %v3795_v59 = vrot.slane %v3793_v51, 1  ;;  %v3798_v60 = vrot.slane %v3796_v52, 2  ;;  %v3822_v0 = vshll.u32 %v10527_v57, 16  ;;  %v3828_v1 = vshrl.u32 %v10528_v58, 16 }
 0x201   : > { %v3807_v61 = vor.u32 %v3806_v54, %v3803_v53  ;;  %v3816_v62 = vor.u32 %v3815_v56, %v3812_v55  ;;  %v3831_v4 = vshll.u32 %v10528_v58, 16  ;;  %v3821_v7 = vrot.slane %v3819_v63, 1  ;;  %v10538_v53 = vld [vmem:[#allocation2 + $0x78] sm:$0xff]  }
 0x202   : > { %v3799_v3 = vor.u32 %v3798_v60, %v3795_v59  ;;  %v3824_v8 = vrot.slane %v3822_v0, 2  ;;  %v3830_v9 = vrot.slane %v3828_v1, 1  ;;  %v3837_v13 = vshrl.u32 %v10529_v2, 16 }
 0x203   : > { %v3817_v6 = vsel %vm3791_vm14, %v3807_v61, %v3816_v62  ;;  %v3833_v12 = vrot.slane %v3831_v4, 2  ;;  %v3840_v14 = vshll.u32 %v10529_v2, 16  ;;  %v3846_v17 = vshrl.u32 %v10530_v5, 16 }
 0x204   : > { %v3808_v11 = vsel %vm3791_vm14, %v3799_v3, %v3807_v61  ;;  %3981 = vst [vmem:[#allocation4 + $0x68] sm:$0xff] %v3817_v6  ;;  %v3825_v16 = vor.u32 %v3824_v8, %v3821_v7  ;;  %v3849_v18 = vshll.u32 %v10530_v5, 16  ;;  %v3855_v19 = vshrl.u32 %v10531_v10, 16  ;;  %v10539_v6 = vld [vmem:[#allocation2 + $0x80] sm:$0xff]  }
 0x205   : > { %3980 = vst [vmem:[#allocation4 + $0x20] sm:$0xff] %v3808_v11  ;;  %v3834_v21 = vor.u32 %v3833_v12, %v3830_v9  ;;  %v3839_v22 = vrot.slane %v3837_v13, 1  ;;  %v3842_v23 = vrot.slane %v3840_v14, 2  ;;  %v3858_v24 = vshll.u32 %v10531_v10, 16  ;;  %v10540_v14 = vld [vmem:[#allocation2 + $0x88] sm:$0xff]  }
 0x206   : > { %v3826_v26 = vsel %vm3791_vm14, %v3816_v62, %v3825_v16  ;;  %v3848_v27 = vrot.slane %v3846_v17, 1  ;;  %v3851_v28 = vrot.slane %v3849_v18, 2  ;;  %v3857_v29 = vrot.slane %v3855_v19, 1 }
 0x207   : > { %3982 = vst [vmem:[#allocation4 + $0xb0] sm:$0xff] %v3826_v26  ;;  %v3835_v31 = vsel %vm3791_vm14, %v3825_v16, %v3834_v21  ;;  %v3843_v32 = vor.u32 %v3842_v23, %v3839_v22  ;;  %v3860_v33 = vrot.slane %v3858_v24, 2  ;;  %v3864_v34 = vshrl.u32 %v10532_v15, 16 }
 0x208   : > { %3983 = vst [vmem:[#allocation4 + $0xf8] sm:$0xff] %v3835_v31  ;;  %v3852_v35 = vor.u32 %v3851_v28, %v3848_v27  ;;  %v3867_v36 = vshll.u32 %v10532_v15, 16  ;;  %v3873_v37 = vshrl.u32 %v10533_v20, 16  ;;  %v3876_v38 = vshll.u32 %v10533_v20, 16  ;;  %v10541_v15 = vld [vmem:[#allocation2 + $0x90] sm:$0xff]  }
 0x209   : > { %v3844_v40 = vsel %vm3791_vm14, %v3834_v21, %v3843_v32  ;;  %v3861_v41 = vor.u32 %v3860_v33, %v3857_v29  ;;  %v3866_v42 = vrot.slane %v3864_v34, 1  ;;  %v3882_v43 = vshrl.u32 %v10534_v25, 16  ;;  %v10544_v20 = vld [vmem:[#allocation2 + $0x10] sm:$0xff]   ;;  %v10542_v29 = vld [vmem:[#allocation2 + $0x98] ss:$0 sps:$4 sm:$0x33]  }
 0x20a   : > { %3984 = vst [vmem:[#allocation4 + $0x140] sm:$0xff] %v3844_v40  ;;  %v3853_v44 = vsel %vm3791_vm14, %v3843_v32, %v3852_v35  ;;  %v3869_v45 = vrot.slane %v3867_v36, 2  ;;  %v3875_v46 = vrot.slane %v3873_v37, 1  ;;  %v3878_v47 = vrot.slane %v3876_v38, 2  ;;  %v10543_v40 = vld [vmem:[#allocation2 + $0x8] sm:$0xfc]  }
 0x20b   : > { %3985 = vst [vmem:[#allocation4 + $0x188] sm:$0xff] %v3853_v44  ;;  %v3862_v49 = vsel %vm3791_vm14, %v3852_v35, %v3861_v41  ;;  %v3884_v50 = vrot.slane %v3882_v43, 1  ;;  %v3885_v51 = vshll.u32 %v10534_v25, 16  ;;  %v3891_v52 = vshrl.u32 %v10535_v30, 16  ;;  %v10545_v44 = vld [vmem:[#allocation2 + $0x18] sm:$0xff]  }
 0x20c   : > { %3986 = vst [vmem:[#allocation4 + $0x1d0] sm:$0xff] %v3862_v49  ;;  %v3870_v54 = vor.u32 %v3869_v45, %v3866_v42  ;;  %v3879_v55 = vor.u32 %v3878_v47, %v3875_v46  ;;  %v3894_v56 = vshll.u32 %v10535_v30, 16  ;;  %v3900_v57 = vshrl.u32 %v10536_v39, 16  ;;  %v10546_v49 = vld [vmem:[#allocation2 + $0x20] sm:$0xff]  }
 0x20d   : > { %v3887_v58 = vrot.slane %v3885_v51, 2  ;;  %v3893_v59 = vrot.slane %v3891_v52, 1  ;;  %v3903_v60 = vshll.u32 %v10536_v39, 16  ;;  %v3909_v61 = vshrl.u32 %v10537_v48, 16  ;;  %v10547_v52 = vld [vmem:[#allocation2 + $0x28] sm:$0xff]  }
 0x20e   : > { %v3871_v62 = vsel %vm3791_vm14, %v3861_v41, %v3870_v54  ;;  %v3880_v63 = vsel %vm3791_vm14, %v3870_v54, %v3879_v55  ;;  %v3896_v0 = vrot.slane %v3894_v56, 2  ;;  %v3902_v1 = vrot.slane %v3900_v57, 1  ;;  %v10548_v57 = vld [vmem:[#allocation2 + $0x30] sm:$0xff]  }
 0x20f   : > { %3987 = vst [vmem:[#allocation4 + $0x218] sm:$0xff] %v3871_v62  ;;  %3988 = vst [vmem:[#allocation4 + $0x260] sm:$0xff] %v3880_v63  ;;  %v3888_v2 = vor.u32 %v3887_v58, %v3884_v50  ;;  %v3905_v3 = vrot.slane %v3903_v60, 2  ;;  %v3911_v4 = vrot.slane %v3909_v61, 1  ;;  %v3912_v5 = vshll.u32 %v10537_v48, 16  ;;  %v10549_v60 = vld [vmem:[#allocation2 + $0x38] sm:$0xff]  }
 0x210   : > { %v3897_v7 = vor.u32 %v3896_v0, %v3893_v59  ;;  %v3918_v8 = vshrl.u32 %v10538_v53, 16  ;;  %v3921_v9 = vshll.u32 %v10538_v53, 16  ;;  %v3927_v13 = vshrl.u32 %v10539_v6, 16  ;;  %v10550_v0 = vld [vmem:[#allocation2 + $0x40] sm:$0xff]  }
 0x211   : > { %v3889_v10 = vsel %vm3791_vm14, %v3879_v55, %v3888_v2  ;;  %v3906_v11 = vor.u32 %v3905_v3, %v3902_v1  ;;  %v3914_v12 = vrot.slane %v3912_v5, 2  ;;  %v3930_v19 = vshll.u32 %v10539_v6, 16  ;;  %v10551_v3 = vld [vmem:[#allocation2 + $0x48] sm:$0xff]   ;;  %v10552_v6 = vld [vmem:[#allocation2 + $0x50] sm:$0xff]  }
 0x212   : > { %3989 = vst [vmem:[#allocation4 + $0x2a8] sm:$0xff] %v3889_v10  ;;  %v3898_v16 = vsel %vm3791_vm14, %v3888_v2, %v3897_v7  ;;  %v3920_v17 = vrot.slane %v3918_v8, 1  ;;  %v3923_v18 = vrot.slane %v3921_v9, 2  ;;  %v3929_v23 = vrot.slane %v3927_v13, 1  ;;  %v10553_v9 = vld [vmem:[#allocation2 + $0x58] sm:$0xff]  }
 0x213   : > { %3990 = vst [vmem:[#allocation4 + $0x2f0] sm:$0xff] %v3898_v16  ;;  %v3907_v21 = vsel %vm3791_vm14, %v3897_v7, %v3906_v11  ;;  %v3915_v22 = vor.u32 %v3914_v12, %v3911_v4  ;;  %v3936_v24 = vshrl.u32 %v10540_v14, 16  ;;  %v3932_v26 = vrot.slane %v3930_v19, 2  ;;  %v10554_v12 = vld [vmem:[#allocation2 + $0x60] sm:$0xff]  }
 0x214   : > { %3991 = vst [vmem:[#allocation4 + $0x338] sm:$0xff] %v3907_v21  ;;  %v3924_v25 = vor.u32 %v3923_v18, %v3920_v17  ;;  %v3939_v27 = vshll.u32 %v10540_v14, 16  ;;  %v3945_v28 = vshrl.u32 %v10541_v15, 16  ;;  %v3948_v32 = vshll.u32 %v10541_v15, 16  ;;  %v10555_v15 = vld [vmem:[#allocation2 + $0x68] sm:$0xff]   ;;  %v10556_v18 = vld [vmem:[#allocation2 + $0x70] sm:$0xff]  }
 0x215   : > { %v3916_v30 = vsel %vm3791_vm14, %v3906_v11, %v3915_v22  ;;  %v3938_v31 = vrot.slane %v3936_v24, 1  ;;  %v3933_v34 = vor.u32 %v3932_v26, %v3929_v23  ;;  %v3954_v38 = vshrl.u32 %v10542_v29, 16  ;;  %v10557_v21 = vld [vmem:[#allocation2 + $0x78] sm:$0xff]   ;;  %v10558_v24 = vld [vmem:[#allocation2 + $0x80] sm:$0xff]  }
 0x216   : > { %3992 = vst [vmem:[#allocation4 + $0x380] sm:$0xff] %v3916_v30  ;;  %v3925_v33 = vsel %vm3791_vm14, %v3915_v22, %v3924_v25  ;;  %v3941_v35 = vrot.slane %v3939_v27, 2  ;;  %v3947_v36 = vrot.slane %v3945_v28, 1  ;;  %v3950_v37 = vrot.slane %v3948_v32, 2  ;;  %v10559_v27 = vld [vmem:[#allocation2 + $0x88] sm:$0xff]   ;;  %v10560_v30 = vld [vmem:[#allocation2 + $0x90] sm:$0xff]  }
 0x217   : > { %3993 = vst [vmem:[#allocation4 + $0x3c8] sm:$0xff] %v3925_v33  ;;  %v3957_v39 = vshll.u32 %v10542_v29, 16  ;;  %v4130_v41 = vrot.slane %v10544_v20, 2  ;;  %v3934_v42 = vsel %vm3791_vm14, %v3924_v25, %v3933_v34  ;;  %v3956_v46 = vrot.slane %v3954_v38, 1  ;;  %v10563_v33 = vld [vmem:[#allocation2 + $0x18] sm:$0xff]  }
 0x218   : > { %v3942_v43 = vor.u32 %v3941_v35, %v3938_v31  ;;  %3994 = vst [vmem:[#allocation4 + $0x410] sm:$0xff] %v3934_v42  ;;  %v3951_v45 = vor.u32 %v3950_v37, %v3947_v36  ;;  %v4129_v48 = vrot.slane %v10543_v40, 2  ;;  %v4132_v51 = vrot.slane %v10545_v44, 2  ;;  %v10561_v36 = vld [vmem:[#allocation2 + $0x98] ss:$0 sps:$4 sm:$0x33]  }
 0x219   : > { %v3959_v47 = vrot.slane %v3957_v39, 2  ;;  %v4134_v56 = vrot.slane %v10546_v49, 2  ;;  %v4136_v59 = vrot.slane %v10547_v52, 2  ;;  %v4138_v63 = vrot.slane %v10548_v57, 2  ;;  %v10562_v40 = vld [vmem:[#allocation2 + $0x10] sm:$0xfc]  }
 0x21a   : > { %v3943_v50 = vsel %vm3791_vm14, %v3933_v34, %v3942_v43  ;;  %v3952_v53 = vsel %vm3791_vm14, %v3942_v43, %v3951_v45  ;;  %v4131_v55 = vsel %vm4128_vm15, %v4129_v48, %v4130_v41  ;;  %v4133_v58 = vsel %vm4128_vm15, %v4130_v41, %v4132_v51  ;;  %v10564_v42 = vld [vmem:[#allocation2 + $0x20] sm:$0xff]  }
 0x21b   : > { %3995 = vst [vmem:[#allocation4 + $0x458] sm:$0xff] %v3943_v50  ;;  %v3960_v54 = vor.u32 %v3959_v47, %v3956_v46  ;;  %3996 = vst [vmem:[#allocation4 + $0x4a0] sm:$0xff] %v3952_v53  ;;  %v4135_v62 = vsel %vm4128_vm15, %v4132_v51, %v4134_v56  ;;  %v4137_v1 = vsel %vm4128_vm15, %v4134_v56, %v4136_v59  ;;  %v4140_v2 = vrot.slane %v10549_v60, 2  ;;  %v10566_v47 = vld [vmem:[#allocation2 + $0x30] sm:$0xff]   ;;  %v10567_v50 = vld [vmem:[#allocation2 + $0x38] sm:$0xff]  }
 0x21c   : > { %4184 = vst [vmem:[#allocation4 + $0x28] sm:$0xff] %v4131_v55  ;;  %4185 = vst [vmem:[#allocation4 + $0x70] sm:$0xff] %v4133_v58  ;;  %v4139_v4 = vsel %vm4128_vm15, %v4136_v59, %v4138_v63  ;;  %v4142_v5 = vrot.slane %v10550_v0, 2  ;;  %v4144_v8 = vrot.slane %v10551_v3, 2  ;;  %v4146_v11 = vrot.slane %v10552_v6, 2  ;;  %v10568_v53 = vld [vmem:[#allocation2 + $0x40] sm:$0xff]  }
 0x21d   : > { %v3961_v61 = vsel %vm3791_vm14, %v3951_v45, %v3960_v54  ;;  %4186 = vst [vmem:[#allocation4 + $0xb8] sm:$0xff] %v4135_v62  ;;  %4187 = vst [vmem:[#allocation4 + $0x100] sm:$0xff] %v4137_v1  ;;  %v4141_v7 = vsel %vm4128_vm15, %v4138_v63, %v4140_v2  ;;  %v4148_v14 = vrot.slane %v10553_v9, 2  ;;  %v4150_v17 = vrot.slane %v10554_v12, 2  ;;  %v10565_v45 = vld [vmem:[#allocation2 + $0x28] sm:$0xff]   ;;  %v10570_v59 = vld [vmem:[#allocation2 + $0x50] sm:$0xff]  }
 0x21e   : > { %3997 = vst [vmem:[#allocation4 + $0x4e8] sm:$0xff] %v3961_v61  ;;  %4188 = vst [vmem:[#allocation4 + $0x148] sm:$0xff] %v4139_v4  ;;  %v4143_v10 = vsel %vm4128_vm15, %v4140_v2, %v4142_v5  ;;  %v4145_v13 = vsel %vm4128_vm15, %v4142_v5, %v4144_v8  ;;  %v4147_v16 = vsel %vm4128_vm15, %v4144_v8, %v4146_v11  ;;  %v4152_v20 = vrot.slane %v10555_v15, 2  ;;  %v10569_v56 = vld [vmem:[#allocation2 + $0x48] sm:$0xff]   ;;  %v10571_v62 = vld [vmem:[#allocation2 + $0x58] sm:$0xff]  }
 0x21f   : > { %4189 = vst [vmem:[#allocation4 + $0x190] sm:$0xff] %v4141_v7  ;;  %4190 = vst [vmem:[#allocation4 + $0x1d8] sm:$0xff] %v4143_v10  ;;  %v4149_v19 = vsel %vm4128_vm15, %v4146_v11, %v4148_v14  ;;  %v4151_v22 = vsel %vm4128_vm15, %v4148_v14, %v4150_v17  ;;  %v4154_v23 = vrot.slane %v10556_v18, 2  ;;  %v4156_v26 = vrot.slane %v10557_v21, 2  ;;  %v10572_v1 = vld [vmem:[#allocation2 + $0x60] sm:$0xff]   ;;  %v10573_v4 = vld [vmem:[#allocation2 + $0x68] sm:$0xff]  }
 0x220   : > { %4191 = vst [vmem:[#allocation4 + $0x220] sm:$0xff] %v4145_v13  ;;  %4192 = vst [vmem:[#allocation4 + $0x268] sm:$0xff] %v4147_v16  ;;  %v4153_v25 = vsel %vm4128_vm15, %v4150_v17, %v4152_v20  ;;  %v4158_v29 = vrot.slane %v10558_v24, 2  ;;  %v4160_v32 = vrot.slane %v10559_v27, 2  ;;  %v4162_v35 = vrot.slane %v10560_v30, 2  ;;  %v10574_v7 = vld [vmem:[#allocation2 + $0x70] sm:$0xff]  }
 0x221   : > { %4193 = vst [vmem:[#allocation4 + $0x2b0] sm:$0xff] %v4149_v19  ;;  %4194 = vst [vmem:[#allocation4 + $0x2f8] sm:$0xff] %v4151_v22  ;;  %v4155_v28 = vsel %vm4128_vm15, %v4152_v20, %v4154_v23  ;;  %v4157_v31 = vsel %vm4128_vm15, %v4154_v23, %v4156_v26  ;;  %v4164_v39 = vrot.slane %v10561_v36, 2  ;;  %v4333_v41 = vrot.slane %v10563_v33, 2  ;;  %v10575_v10 = vld [vmem:[#allocation2 + $0x78] sm:$0xff]   ;;  %v10576_v13 = vld [vmem:[#allocation2 + $0x80] sm:$0xff]  }
 0x222   : > { %4195 = vst [vmem:[#allocation4 + $0x340] sm:$0xff] %v4153_v25  ;;  %4196 = vst [vmem:[#allocation4 + $0x388] sm:$0xff] %v4155_v28  ;;  %v4159_v34 = vsel %vm4128_vm15, %v4156_v26, %v4158_v29  ;;  %v4161_v37 = vsel %vm4128_vm15, %v4158_v29, %v4160_v32  ;;  %v4163_v38 = vsel %vm4128_vm15, %v4160_v32, %v4162_v35  ;;  %v4332_v44 = vrot.slane %v10562_v40, 2  ;;  %v10577_v16 = vld [vmem:[#allocation2 + $0x88] sm:$0xff]   ;;  %v10578_v19 = vld [vmem:[#allocation2 + $0x90] sm:$0xff]  }
 0x223   : > { %4197 = vst [vmem:[#allocation4 + $0x3d0] sm:$0xff] %v4157_v31  ;;  %4198 = vst [vmem:[#allocation4 + $0x418] sm:$0xff] %v4159_v34  ;;  %v4165_v43 = vsel %vm4128_vm15, %v4162_v35, %v4164_v39  ;;  %v4335_v46 = vrot.slane %v10564_v42, 2  ;;  %v4337_v49 = vrot.slane %v10565_v45, 2  ;;  %v4339_v52 = vrot.slane %v10566_v47, 2  ;;  %v10579_v22 = vld [vmem:[#allocation2 + $0x98] sm:$0xff]  }
 0x224   : > { %4199 = vst [vmem:[#allocation4 + $0x460] sm:$0xff] %v4161_v37  ;;  %4200 = vst [vmem:[#allocation4 + $0x4a8] sm:$0xff] %v4163_v38  ;;  %v4334_v48 = vsel %vm4128_vm15, %v4332_v44, %v4333_v41  ;;  %v4341_v55 = vrot.slane %v10567_v50, 2  ;;  %v4343_v58 = vrot.slane %v10568_v53, 2  ;;  %v4345_v61 = vrot.slane %v10569_v56, 2  ;;  %v10582_v28 = vld [vmem:[#allocation2 + $0x18] sm:$0xff]  }
 0x225   : > { %4201 = vst [vmem:[#allocation4 + $0x4f0] sm:$0xff] %v4165_v43  ;;  %4387 = vst [vmem:[#allocation4 + $0x30] sm:$0xff] %v4334_v48  ;;  %v4336_v51 = vsel %vm4128_vm15, %v4333_v41, %v4335_v46  ;;  %v4338_v54 = vsel %vm4128_vm15, %v4335_v46, %v4337_v49  ;;  %v4340_v57 = vsel %vm4128_vm15, %v4337_v49, %v4339_v52  ;;  %v4347_v0 = vrot.slane %v10570_v59, 2  ;;  %v10580_v25 = vld [vmem:[#allocation2 + $0xa0] ss:$0 sps:$4 sm:$0x33]  }
 0x226   : > { %4388 = vst [vmem:[#allocation4 + $0x78] sm:$0xff] %v4336_v51  ;;  %4389 = vst [vmem:[#allocation4 + $0xc0] sm:$0xff] %v4338_v54  ;;  %v4342_v60 = vsel %vm4128_vm15, %v4339_v52, %v4341_v55  ;;  %v4344_v63 = vsel %vm4128_vm15, %v4341_v55, %v4343_v58  ;;  %v4346_v2 = vsel %vm4128_vm15, %v4343_v58, %v4345_v61  ;;  %v4349_v3 = vrot.slane %v10571_v62, 2  ;;  %v10581_v31 = vld [vmem:[#allocation2 + $0x10] sm:$0xfc]   ;;  %v10583_v32 = vld [vmem:[#allocation2 + $0x20] sm:$0xff]  }
 0x227   : > { %4390 = vst [vmem:[#allocation4 + $0x108] sm:$0xff] %v4340_v57  ;;  %4391 = vst [vmem:[#allocation4 + $0x150] sm:$0xff] %v4342_v60  ;;  %v4348_v5 = vsel %vm4128_vm15, %v4345_v61, %v4347_v0  ;;  %v4351_v6 = vrot.slane %v10572_v1, 2  ;;  %v4353_v9 = vrot.slane %v10573_v4, 2  ;;  %v4355_v12 = vrot.slane %v10574_v7, 2  ;;  %v10584_v40 = vld [vmem:[#allocation2 + $0x28] sm:$0xff]  }
 0x228   : > { %4392 = vst [vmem:[#allocation4 + $0x198] sm:$0xff] %v4344_v63  ;;  %4393 = vst [vmem:[#allocation4 + $0x1e0] sm:$0xff] %v4346_v2  ;;  %v4350_v8 = vsel %vm4128_vm15, %v4347_v0, %v4349_v3  ;;  %v4357_v15 = vrot.slane %v10575_v10, 2  ;;  %v4359_v18 = vrot.slane %v10576_v13, 2  ;;  %v4361_v21 = vrot.slane %v10577_v16, 2  ;;  %v10585_v44 = vld [vmem:[#allocation2 + $0x30] sm:$0xff]  }
 0x229   : > { %4394 = vst [vmem:[#allocation4 + $0x228] sm:$0xff] %v4348_v5  ;;  %4395 = vst [vmem:[#allocation4 + $0x270] sm:$0xff] %v4350_v8  ;;  %v4352_v11 = vsel %vm4128_vm15, %v4349_v3, %v4351_v6  ;;  %v4354_v14 = vsel %vm4128_vm15, %v4351_v6, %v4353_v9  ;;  %v4356_v17 = vsel %vm4128_vm15, %v4353_v9, %v4355_v12  ;;  %v4363_v24 = vrot.slane %v10578_v19, 2  ;;  %v10586_v56 = vld [vmem:[#allocation2 + $0x38] sm:$0xff]   ;;  %v10587_v59 = vld [vmem:[#allocation2 + $0x40] sm:$0xff]  }
 0x22a   : > { %4396 = vst [vmem:[#allocation4 + $0x2b8] sm:$0xff] %v4352_v11  ;;  %4397 = vst [vmem:[#allocation4 + $0x300] sm:$0xff] %v4354_v14  ;;  %v4358_v20 = vsel %vm4128_vm15, %v4355_v12, %v4357_v15  ;;  %v4360_v23 = vsel %vm4128_vm15, %v4357_v15, %v4359_v18  ;;  %v4362_v26 = vsel %vm4128_vm15, %v4359_v18, %v4361_v21  ;;  %v4365_v27 = vrot.slane %v10579_v22, 2  ;;  %v10588_v0 = vld [vmem:[#allocation2 + $0x48] sm:$0xff]   ;;  %v10589_v9 = vld [vmem:[#allocation2 + $0x50] sm:$0xff]  }
 0x22b   : > { %4398 = vst [vmem:[#allocation4 + $0x348] sm:$0xff] %v4356_v17  ;;  %4399 = vst [vmem:[#allocation4 + $0x390] sm:$0xff] %v4358_v20  ;;  %v4364_v29 = vsel %vm4128_vm15, %v4361_v21, %v4363_v24  ;;  %v4367_v30 = vrot.slane %v10580_v25, 2  ;;  %v4545_v34 = vshrl.u32 %v10582_v28, 16  ;;  %v4548_v35 = vshll.u32 %v10582_v28, 16  ;;  %v10590_v14 = vld [vmem:[#allocation2 + $0x58] sm:$0xff]  }
 0x22c   : > { %4400 = vst [vmem:[#allocation4 + $0x3d8] sm:$0xff] %v4360_v23  ;;  %4401 = vst [vmem:[#allocation4 + $0x420] sm:$0xff] %v4362_v26  ;;  %v4366_v33 = vsel %vm4128_vm15, %v4363_v24, %v4365_v27  ;;  %v4537_v37 = vshrl.u32 %v10581_v31, 16  ;;  %v4540_v38 = vshll.u32 %v10581_v31, 16  ;;  %v4554_v39 = vshrl.u32 %v10583_v32, 16  ;;  %v10591_v19 = vld [vmem:[#allocation2 + $0x60] sm:$0xff]  }
 0x22d   : > { %4402 = vst [vmem:[#allocation4 + $0x468] sm:$0xff] %v4364_v29  ;;  %4403 = vst [vmem:[#allocation4 + $0x4b0] sm:$0xff] %v4366_v33  ;;  %v4368_v36 = vsel %vm4128_vm15, %v4365_v27, %v4367_v30  ;;  %v4547_v41 = vrot.slane %v4545_v34, 2  ;;  %v4550_v42 = vrot.slane %v4548_v35, 3  ;;  %v4557_v43 = vshll.u32 %v10583_v32, 16  ;;  %v10592_v24 = vld [vmem:[#allocation2 + $0x68] sm:$0xff]  }
 0x22e   : > { %4404 = vst [vmem:[#allocation4 + $0x4f8] sm:$0xff] %v4368_v36  ;;  %v4539_v45 = vrot.slane %v4537_v37, 2  ;;  %v4542_v46 = vrot.slane %v4540_v38, 3  ;;  %v4556_v47 = vrot.slane %v4554_v39, 2  ;;  %v4563_v48 = vshrl.u32 %v10584_v40, 16  ;;  %v10593_v36 = vld [vmem:[#allocation2 + $0x70] sm:$0xff]  }
 0x22f   : > { %v4551_v49 = vor.u32 %v4550_v42, %v4547_v41  ;;  %v4559_v50 = vrot.slane %v4557_v43, 3  ;;  %v4566_v51 = vshll.u32 %v10584_v40, 16  ;;  %v4572_v54 = vshrl.u32 %v10585_v44, 16 }
 0x230   : > { %v4543_v52 = vor.u32 %v4542_v46, %v4539_v45  ;;  %v4565_v53 = vrot.slane %v4563_v48, 2  ;;  %v4575_v55 = vshll.u32 %v10585_v44, 16  ;;  %v4581_v63 = vshrl.u32 %v10586_v56, 16  ;;  %v10594_v45 = vld [vmem:[#allocation2 + $0x78] sm:$0xff]  }
 0x231   : > { %v4560_v57 = vor.u32 %v4559_v50, %v4556_v47  ;;  %v4568_v58 = vrot.slane %v4566_v51, 3  ;;  %v4574_v61 = vrot.slane %v4572_v54, 2  ;;  %v4584_v3 = vshll.u32 %v10586_v56, 16  ;;  %v10595_v50 = vld [vmem:[#allocation2 + $0x80] sm:$0xff]  }
 0x232   : > { %v4552_v60 = vsel %vm4535_vm0, %v4543_v52, %v4551_v49  ;;  %v4577_v62 = vrot.slane %v4575_v55, 3  ;;  %v4590_v4 = vshrl.u32 %v10587_v59, 16  ;;  %v4583_v6 = vrot.slane %v4581_v63, 2 }
 0x233   : > { %4724 = vst [vmem:[#allocation4 + $0x38] sm:$0xff] %v4552_v60  ;;  %v4561_v1 = vsel %vm4535_vm0, %v4551_v49, %v4560_v57  ;;  %v4569_v2 = vor.u32 %v4568_v58, %v4565_v53  ;;  %v4593_v7 = vshll.u32 %v10587_v59, 16  ;;  %v4599_v8 = vshrl.u32 %v10588_v0, 16  ;;  %v10596_v59 = vld [vmem:[#allocation2 + $0x88] sm:$0xff]  }
 0x234   : > { %4725 = vst [vmem:[#allocation4 + $0x80] sm:$0xff] %v4561_v1  ;;  %v4578_v5 = vor.u32 %v4577_v62, %v4574_v61  ;;  %v4586_v11 = vrot.slane %v4584_v3, 3  ;;  %v4592_v12 = vrot.slane %v4590_v4, 2  ;;  %v4602_v13 = vshll.u32 %v10588_v0, 16  ;;  %v10597_v3 = vld [vmem:[#allocation2 + $0x90] sm:$0xff]   ;;  %v10598_v4 = vld [vmem:[#allocation2 + $0x98] sm:$0xff]  }
 0x235   : > { %v4570_v10 = vsel %vm4535_vm0, %v4560_v57, %v4569_v2  ;;  %v4595_v16 = vrot.slane %v4593_v7, 3  ;;  %v4601_v17 = vrot.slane %v4599_v8, 2  ;;  %v4608_v18 = vshrl.u32 %v10589_v9, 16  ;;  %v10601_v8 = vld [vmem:[#allocation2 + $0x18] sm:$0xff]  }
 0x236   : > { %4726 = vst [vmem:[#allocation4 + $0xc8] sm:$0xff] %v4570_v10  ;;  %v4579_v15 = vsel %vm4535_vm0, %v4569_v2, %v4578_v5  ;;  %v4587_v20 = vor.u32 %v4586_v11, %v4583_v6  ;;  %v4604_v21 = vrot.slane %v4602_v13, 3  ;;  %v4611_v22 = vshll.u32 %v10589_v9, 16 }
 0x237   : > { %4727 = vst [vmem:[#allocation4 + $0x110] sm:$0xff] %v4579_v15  ;;  %v4617_v23 = vshrl.u32 %v10590_v14, 16  ;;  %v4596_v25 = vor.u32 %v4595_v16, %v4592_v12  ;;  %v4610_v26 = vrot.slane %v4608_v18, 2  ;;  %v4620_v27 = vshll.u32 %v10590_v14, 16 }
 0x238   : > { %v4588_v28 = vsel %vm4535_vm0, %v4578_v5, %v4587_v20  ;;  %v4605_v29 = vor.u32 %v4604_v21, %v4601_v17  ;;  %v4613_v30 = vrot.slane %v4611_v22, 3  ;;  %v4626_v34 = vshrl.u32 %v10591_v19, 16  ;;  %v10599_v17 = vld [vmem:[#allocation2 + $0xa0] ss:$0 sps:$4 sm:$0x77]  }
 0x239   : > { %v4619_v31 = vrot.slane %v4617_v23, 2  ;;  %4728 = vst [vmem:[#allocation4 + $0x158] sm:$0xff] %v4588_v28  ;;  %v4597_v32 = vsel %vm4535_vm0, %v4587_v20, %v4596_v25  ;;  %v4622_v33 = vrot.slane %v4620_v27, 3  ;;  %v4629_v35 = vshll.u32 %v10591_v19, 16  ;;  %v10602_v22 = vld [vmem:[#allocation2 + $0x20] sm:$0xff]  }
 0x23a   : > { %4729 = vst [vmem:[#allocation4 + $0x1a0] sm:$0xff] %v4597_v32  ;;  %v4606_v37 = vsel %vm4535_vm0, %v4596_v25, %v4605_v29  ;;  %v4614_v38 = vor.u32 %v4613_v30, %v4610_v26  ;;  %v4635_v39 = vshrl.u32 %v10592_v24, 16  ;;  %v4638_v40 = vshll.u32 %v10592_v24, 16  ;;  %v10600_v30 = vld [vmem:[#allocation2 + $0x10] sm:$0xf8]   ;;  %v10603_v32 = vld [vmem:[#allocation2 + $0x28] sm:$0xff]  }
 0x23b   : > { %4730 = vst [vmem:[#allocation4 + $0x1e8] sm:$0xff] %v4606_v37  ;;  %v4623_v41 = vor.u32 %v4622_v33, %v4619_v31  ;;  %v4628_v42 = vrot.slane %v4626_v34, 2  ;;  %v4631_v43 = vrot.slane %v4629_v35, 3  ;;  %v4644_v44 = vshrl.u32 %v10593_v36, 16 }
 0x23c   : > { %v4615_v46 = vsel %vm4535_vm0, %v4605_v29, %v4614_v38  ;;  %v4637_v47 = vrot.slane %v4635_v39, 2  ;;  %v4640_v48 = vrot.slane %v4638_v40, 3  ;;  %v4647_v49 = vshll.u32 %v10593_v36, 16 }
 0x23d   : > { %4731 = vst [vmem:[#allocation4 + $0x230] sm:$0xff] %v4615_v46  ;;  %v4624_v51 = vsel %vm4535_vm0, %v4614_v38, %v4623_v41  ;;  %v4632_v52 = vor.u32 %v4631_v43, %v4628_v42  ;;  %v4646_v53 = vrot.slane %v4644_v44, 2  ;;  %v4653_v54 = vshrl.u32 %v10594_v45, 16  ;;  %v10604_v42 = vld [vmem:[#allocation2 + $0x30] sm:$0xff]   ;;  %v10605_v46 = vld [vmem:[#allocation2 + $0x38] sm:$0xff]  }
 0x23e   : > { %4732 = vst [vmem:[#allocation4 + $0x278] sm:$0xff] %v4624_v51  ;;  %v4641_v55 = vor.u32 %v4640_v48, %v4637_v47  ;;  %v4649_v56 = vrot.slane %v4647_v49, 3  ;;  %v4656_v57 = vshll.u32 %v10594_v45, 16  ;;  %v4662_v58 = vshrl.u32 %v10595_v50, 16  ;;  %v10606_v49 = vld [vmem:[#allocation2 + $0x40] sm:$0xff]  }
 0x23f   : > { %v4633_v60 = vsel %vm4535_vm0, %v4623_v41, %v4632_v52  ;;  %v4655_v61 = vrot.slane %v4653_v54, 2  ;;  %v4665_v62 = vshll.u32 %v10595_v50, 16  ;;  %v4671_v6 = vshrl.u32 %v10596_v59, 16 }
 0x240   : > { %4733 = vst [vmem:[#allocation4 + $0x2c0] sm:$0xff] %v4633_v60  ;;  %v4642_v63 = vsel %vm4535_vm0, %v4632_v52, %v4641_v55  ;;  %v4650_v0 = vor.u32 %v4649_v56, %v4646_v53  ;;  %v4658_v1 = vrot.slane %v4656_v57, 3  ;;  %v4664_v2 = vrot.slane %v4662_v58, 2  ;;  %v10607_v52 = vld [vmem:[#allocation2 + $0x48] sm:$0xff]   ;;  %v10609_v58 = vld [vmem:[#allocation2 + $0x58] sm:$0xff]  }
 0x241   : > { %4734 = vst [vmem:[#allocation4 + $0x308] sm:$0xff] %v4642_v63  ;;  %v4667_v5 = vrot.slane %v4665_v62, 3  ;;  %v4674_v7 = vshll.u32 %v10596_v59, 16  ;;  %v4680_v11 = vshrl.u32 %v10597_v3, 16  ;;  %v4683_v12 = vshll.u32 %v10597_v3, 16  ;;  %v10612_v3 = vld [vmem:[#allocation2 + $0x70] sm:$0xff]  }
 0x242   : > { %v4651_v9 = vsel %vm4535_vm0, %v4641_v55, %v4650_v0  ;;  %v4659_v10 = vor.u32 %v4658_v1, %v4655_v61  ;;  %v4673_v14 = vrot.slane %v4671_v6, 2  ;;  %v4689_v16 = vshrl.u32 %v10598_v4, 16  ;;  %v10608_v55 = vld [vmem:[#allocation2 + $0x50] sm:$0xff]   ;;  %v10610_v61 = vld [vmem:[#allocation2 + $0x60] sm:$0xff]   ;;  %v10613_v6 = vld [vmem:[#allocation2 + $0x78] sm:$0xff]  }
 0x243   : > { %4735 = vst [vmem:[#allocation4 + $0x350] sm:$0xff] %v4651_v9  ;;  %v4668_v13 = vor.u32 %v4667_v5, %v4664_v2  ;;  %v4676_v15 = vrot.slane %v4674_v7, 3  ;;  %v4682_v19 = vrot.slane %v4680_v11, 2  ;;  %v4685_v20 = vrot.slane %v4683_v12, 3  ;;  %v10614_v9 = vld [vmem:[#allocation2 + $0x80] sm:$0xff]   ;;  %v10615_v12 = vld [vmem:[#allocation2 + $0x88] sm:$0xff]  }
 0x244   : > { %v4660_v18 = vsel %vm4535_vm0, %v4650_v0, %v4659_v10  ;;  %v4692_v21 = vshll.u32 %v10598_v4, 16  ;;  %v4691_v25 = vrot.slane %v4689_v16, 2  ;;  %v4698_v26 = vshrl.u32 %v10599_v17, 16  ;;  %v10611_v0 = vld [vmem:[#allocation2 + $0x68] sm:$0xff]  }
 0x245   : > { %4736 = vst [vmem:[#allocation4 + $0x398] sm:$0xff] %v4660_v18  ;;  %v4669_v23 = vsel %vm4535_vm0, %v4659_v10, %v4668_v13  ;;  %v4677_v24 = vor.u32 %v4676_v15, %v4673_v14  ;;  %v4686_v27 = vor.u32 %v4685_v20, %v4682_v19  ;;  %v4701_v29 = vshll.u32 %v10599_v17, 16  ;;  %v10616_v15 = vld [vmem:[#allocation2 + $0x90] sm:$0xff]   ;;  %v10617_v18 = vld [vmem:[#allocation2 + $0x98] sm:$0xff]  }
 0x246   : > { %4737 = vst [vmem:[#allocation4 + $0x3e0] sm:$0xff] %v4669_v23  ;;  %v4694_v28 = vrot.slane %v4692_v21, 3  ;;  %v4874_v31 = vrot.slane %v10601_v8, 3  ;;  %v4700_v34 = vrot.slane %v4698_v26, 2  ;;  %v4876_v35 = vrot.slane %v10602_v22, 3 }
 0x247   : > { %v4678_v33 = vsel %vm4535_vm0, %v4668_v13, %v4677_v24  ;;  %v4687_v36 = vsel %vm4535_vm0, %v4677_v24, %v4686_v27  ;;  %v4703_v38 = vrot.slane %v4701_v29, 3  ;;  %v4873_v39 = vrot.slane %v10600_v30, 3  ;;  %v10618_v21 = vld [vmem:[#allocation2 + $0xa0] ss:$0 sps:$4 sm:$0x77]  }
 0x248   : > { %4738 = vst [vmem:[#allocation4 + $0x428] sm:$0xff] %v4678_v33  ;;  %v4695_v37 = vor.u32 %v4694_v28, %v4691_v25  ;;  %4739 = vst [vmem:[#allocation4 + $0x470] sm:$0xff] %v4687_v36  ;;  %v4877_v40 = vsel %vm4872_vm1, %v4874_v31, %v4876_v35  ;;  %v4878_v41 = vrot.slane %v10603_v32, 3  ;;  %v4880_v48 = vrot.slane %v10604_v42, 3 }
 0x249   : > { %v4704_v44 = vor.u32 %v4703_v38, %v4700_v34  ;;  %v4875_v45 = vsel %vm4872_vm1, %v4873_v39, %v4874_v31  ;;  %4929 = vst [vmem:[#allocation4 + $0x88] sm:$0xff] %v4877_v40  ;;  %v4882_v51 = vrot.slane %v10605_v46, 3  ;;  %v4884_v54 = vrot.slane %v10606_v49, 3 }
 0x24a   : > { %v4696_v43 = vsel %vm4535_vm0, %v4686_v27, %v4695_v37  ;;  %4928 = vst [vmem:[#allocation4 + $0x40] sm:$0xff] %v4875_v45  ;;  %v4879_v47 = vsel %vm4872_vm1, %v4876_v35, %v4878_v41  ;;  %v4881_v53 = vsel %vm4872_vm1, %v4878_v41, %v4880_v48  ;;  %v4886_v57 = vrot.slane %v10607_v52, 3 }
 0x24b   : > { %4740 = vst [vmem:[#allocation4 + $0x4b8] sm:$0xff] %v4696_v43  ;;  %v4705_v50 = vsel %vm4535_vm0, %v4695_v37, %v4704_v44  ;;  %4930 = vst [vmem:[#allocation4 + $0xd0] sm:$0xff] %v4879_v47  ;;  %v4883_v56 = vsel %vm4872_vm1, %v4880_v48, %v4882_v51  ;;  %v4885_v59 = vsel %vm4872_vm1, %v4882_v51, %v4884_v54  ;;  %v4888_v60 = vrot.slane %v10608_v55, 3 }
 0x24c   : > { %4741 = vst [vmem:[#allocation4 + $0x500] sm:$0xff] %v4705_v50  ;;  %4931 = vst [vmem:[#allocation4 + $0x118] sm:$0xff] %v4881_v53  ;;  %v4887_v62 = vsel %vm4872_vm1, %v4884_v54, %v4886_v57  ;;  %v4890_v63 = vrot.slane %v10609_v58, 3  ;;  %v4892_v2 = vrot.slane %v10610_v61, 3  ;;  %v4894_v5 = vrot.slane %v10611_v0, 3 }
 0x24d   : > { %4932 = vst [vmem:[#allocation4 + $0x160] sm:$0xff] %v4883_v56  ;;  %4933 = vst [vmem:[#allocation4 + $0x1a8] sm:$0xff] %v4885_v59  ;;  %v4889_v1 = vsel %vm4872_vm1, %v4886_v57, %v4888_v60  ;;  %v4896_v8 = vrot.slane %v10612_v3, 3  ;;  %v4898_v11 = vrot.slane %v10613_v6, 3  ;;  %v4900_v14 = vrot.slane %v10614_v9, 3 }
 0x24e   : > { %4934 = vst [vmem:[#allocation4 + $0x1f0] sm:$0xff] %v4887_v62  ;;  %4935 = vst [vmem:[#allocation4 + $0x238] sm:$0xff] %v4889_v1  ;;  %v4891_v4 = vsel %vm4872_vm1, %v4888_v60, %v4890_v63  ;;  %v4893_v7 = vsel %vm4872_vm1, %v4890_v63, %v4892_v2  ;;  %v4895_v10 = vsel %vm4872_vm1, %v4892_v2, %v4894_v5  ;;  %v4902_v17 = vrot.slane %v10615_v12, 3 }
 0x24f   : > { %4936 = vst [vmem:[#allocation4 + $0x280] sm:$0xff] %v4891_v4  ;;  %4937 = vst [vmem:[#allocation4 + $0x2c8] sm:$0xff] %v4893_v7  ;;  %v4897_v13 = vsel %vm4872_vm1, %v4894_v5, %v4896_v8  ;;  %v4899_v16 = vsel %vm4872_vm1, %v4896_v8, %v4898_v11  ;;  %v4901_v19 = vsel %vm4872_vm1, %v4898_v11, %v4900_v14  ;;  %v4904_v20 = vrot.slane %v10616_v15, 3 }
 0x250   : > { %4938 = vst [vmem:[#allocation4 + $0x310] sm:$0xff] %v4895_v10  ;;  %4939 = vst [vmem:[#allocation4 + $0x358] sm:$0xff] %v4897_v13  ;;  %v4903_v22 = vsel %vm4872_vm1, %v4900_v14, %v4902_v17  ;;  %v4906_v23 = vrot.slane %v10617_v18, 3  ;;  %v4908_v25 = vrot.slane %v10618_v21, 3 }
 0x251   : > { %4940 = vst [vmem:[#allocation4 + $0x3a0] sm:$0xff] %v4899_v16  ;;  %4941 = vst [vmem:[#allocation4 + $0x3e8] sm:$0xff] %v4901_v19  ;;  %v4905_v24 = vsel %vm4872_vm1, %v4902_v17, %v4904_v20 }
 0x252   : > { %4942 = vst [vmem:[#allocation4 + $0x430] sm:$0xff] %v4903_v22  ;;  %4943 = vst [vmem:[#allocation4 + $0x478] sm:$0xff] %v4905_v24  ;;  %v4907_v26 = vsel %vm4872_vm1, %v4904_v20, %v4906_v23  ;;  %v4909_v27 = vsel %vm4872_vm1, %v4906_v23, %v4908_v25 }
 0x253   : > { %4944 = vst [vmem:[#allocation4 + $0x4c0] sm:$0xff] %v4907_v26  ;;  %4945 = vst [vmem:[#allocation4 + $0x508] sm:$0xff] %v4909_v27 }
 0x254 PF: > { %v10619_v28 = vld [vmem:[%s11506_s17] sm:$0xff]   ;;  %v11060_v29 = vmov 0   ;;  %v10621_v31 = vld [vmem:[%s11506_s17 + $0x8] sm:$0xff]   ;;  %v10623_v33 = vld [vmem:[%s11506_s17 + $0x10] sm:$0xff]   ;;  %s13966_s29 = sld [smem:[#allocation28_spill]] }
 0x255   : > { %5691 = vmatprep.subr.bf16.mxu1 %v11060_v29  ;;  %5868 = vmatprep.subr.bf16.mxu0 %v11060_v29  ;;  %v10620_v30 = vld [vmem:[%s11506_s17 + $0x80] sm:$0xff]   ;;  %v10622_v32 = vld [vmem:[%s11506_s17 + $0x88] sm:$0xff]   ;;  %v10624_v34 = vld [vmem:[%s11506_s17 + $0x90] sm:$0xff]  }
 0x256   : > { %5692 = vmatpush1.bf16.msra.mxu1 %v10619_v28  ;;  %5869 = vmatpush1.bf16.msra.mxu0 %v10620_v30  ;;  %v10625_v35 = vld [vmem:[%s11506_s17 + $0x18] sm:$0xff]   ;;  %v10627_v37 = vld [vmem:[%s11506_s17 + $0x20] sm:$0xff]   ;;  %v10629_v39 = vld [vmem:[%s11506_s17 + $0x28] sm:$0xff]  }
 0x257   : > { %5693 = vmatprep.subr.bf16.mxu1 %v11060_v29  ;;  %5870 = vmatprep.subr.bf16.mxu0 %v11060_v29  ;;  %v10626_v36 = vld [vmem:[%s11506_s17 + $0x98] sm:$0xff]   ;;  %v10628_v38 = vld [vmem:[%s11506_s17 + $0xa0] sm:$0xff]   ;;  %v10630_v40 = vld [vmem:[%s11506_s17 + $0xa8] sm:$0xff]  }
 0x258   : > { %v10631_v41 = vld [vmem:[%s11506_s17 + $0x30] sm:$0xff]   ;;  %v10633_v43 = vld [vmem:[%s11506_s17 + $0x38] sm:$0xff]   ;;  %v10635_v45 = vld [vmem:[%s11506_s17 + $0x40] sm:$0xff]  }
 0x259   : > { %v10632_v42 = vld [vmem:[%s11506_s17 + $0xb0] sm:$0xff]   ;;  %v10634_v44 = vld [vmem:[%s11506_s17 + $0xb8] sm:$0xff]   ;;  %v10636_v46 = vld [vmem:[%s11506_s17 + $0xc0] sm:$0xff]  }
 0x25a   : > { %5694 = vmatpush1.bf16.msra.mxu1 %v10621_v31  ;;  %5871 = vmatpush1.bf16.msra.mxu0 %v10622_v32  ;;  %v4947_v47 = vld [vmem:[#allocation4 + $0x8] sm:$0xff]  ;;  %v4949_v48 = vld [vmem:[#allocation4 + $0x18] sm:$0xff]  ;;  %v10637_v49 = vld [vmem:[%s11506_s17 + $0x48] sm:$0xff]   ;;  %p9297_p8 = scmp.ge.s32.totalorder %s13966_s29, 4 }
 0x25b   : > { %5695 = vmatprep.subr.bf16.mxu1 %v11060_v29  ;;  %5872 = vmatprep.subr.bf16.mxu0 %v11060_v29  ;;  %v10638_v50 = vld [vmem:[%s11506_s17 + $0xc8] sm:$0xff]   ;;  %v10639_v51 = vld [vmem:[%s11506_s17 + $0x50] sm:$0xff]   ;;  %v10641_v53 = vld [vmem:[%s11506_s17 + $0x58] sm:$0xff]  }
 0x25c   : > { %5723 = vmatprep.mubr.bf16.mxu1 %v4947_v47  ;;  %5900 = vmatprep.mubr.bf16.mxu0 %v4949_v48  ;;  %v10640_v52 = vld [vmem:[%s11506_s17 + $0xd0] sm:$0xff]   ;;  %v10642_v54 = vld [vmem:[%s11506_s17 + $0xd8] sm:$0xff]   ;;  %v10643_v55 = vld [vmem:[%s11506_s17 + $0x60] sm:$0xff]  }
 0x25d   : > { %v10644_v56 = vld [vmem:[%s11506_s17 + $0xe0] sm:$0xff]   ;;  %v10645_v57 = vld [vmem:[%s11506_s17 + $0x68] sm:$0xff]   ;;  %v10647_v59 = vld [vmem:[%s11506_s17 + $0x70] sm:$0xff]  }
 0x25e   : > { %5696 = vmatpush1.bf16.msra.mxu1 %v10623_v33  ;;  %5873 = vmatpush1.bf16.msra.mxu0 %v10624_v34  ;;  %v10646_v58 = vld [vmem:[%s11506_s17 + $0xe8] sm:$0xff]   ;;  %v10648_v60 = vld [vmem:[%s11506_s17 + $0xf0] sm:$0xff]   ;;  %v10649_v61 = vld [vmem:[%s11506_s17 + $0x78] sm:$0xff]  }
 0x25f   : > { %5697 = vmatprep.subr.bf16.mxu1 %v11060_v29  ;;  %5874 = vmatprep.subr.bf16.mxu0 %v11060_v29  ;;  %v10650_v62 = vld [vmem:[%s11506_s17 + $0xf8] sm:$0xff]   ;;  %v4946_v63 = vld [vmem:[#allocation4] sm:$0xff]  ;;  %v10651_v1 = vld [vmem:[%s11506_s17 + $0x100] sm:$0xff]  }
 0x260   : > { %v4948_v0 = vld [vmem:[#allocation4 + $0x10] sm:$0xff]  ;;  %v4958_v3 = vld [vmem:[#allocation4 + $0x60] sm:$0xff]  ;;  %v11920_v4 = vld [vmem:[%s11506_s17 + $0x180] sm:$0xff]  }
 0x261   : > { %v4956_v2 = vld [vmem:[#allocation4 + $0x50] sm:$0xff]  ;;  %v10652_v5 = vld [vmem:[%s11506_s17 + $0x108] sm:$0xff]   ;;  %v4955_v7 = vld [vmem:[#allocation4 + $0x48] sm:$0xff] }
 0x262   : > { %5698 = vmatpush1.bf16.msra.mxu1 %v10625_v35  ;;  %5875 = vmatpush1.bf16.msra.mxu0 %v10626_v36  ;;  %v11926_v6 = vld [vmem:[%s11506_s17 + $0x188] sm:$0xff]   ;;  %v4957_v8 = vld [vmem:[#allocation4 + $0x58] sm:$0xff]  ;;  %v10654_v10 = vld [vmem:[%s11506_s17 + $0x110] sm:$0xff]  }
 0x263   : > { %5699 = vmatprep.subr.bf16.mxu1 %v11060_v29  ;;  %5876 = vmatprep.subr.bf16.mxu0 %v11060_v29  ;;  %v4965_v9 = vld [vmem:[#allocation4 + $0x98] sm:$0xff]  ;;  %v4967_v11 = vld [vmem:[#allocation4 + $0xa8] sm:$0xff]  ;;  %v10656_v13 = vld [vmem:[%s11506_s17 + $0x118] sm:$0xff]  }
 0x264   : > { %v11933_v12 = vld [vmem:[%s11506_s17 + $0x190] sm:$0xff]   ;;  %v11940_v14 = vld [vmem:[%s11506_s17 + $0x198] sm:$0xff]   ;;  %v4966_v16 = vld [vmem:[#allocation4 + $0xa0] sm:$0xff] }
 0x265   : > { %v4964_v15 = vld [vmem:[#allocation4 + $0x90] sm:$0xff]  ;;  %v4974_v17 = vld [vmem:[#allocation4 + $0xe0] sm:$0xff]  ;;  %v10658_v18 = vld [vmem:[%s11506_s17 + $0x120] sm:$0xff]  }
 0x266   : > { %5700 = vmatpush1.bf16.msra.mxu1 %v10627_v37  ;;  %5877 = vmatpush1.bf16.msra.mxu0 %v10628_v38  ;;  %v4976_v19 = vld [vmem:[#allocation4 + $0xf0] sm:$0xff]  ;;  %v11947_v20 = vld [vmem:[%s11506_s17 + $0x1a0] sm:$0xff]   ;;  %v10660_v21 = vld [vmem:[%s11506_s17 + $0x128] sm:$0xff]  }
 0x267   : > { %5701 = vmatprep.subr.bf16.mxu1 %v11060_v29  ;;  %5878 = vmatprep.subr.bf16.mxu0 %v11060_v29  ;;  %v4973_v22 = vld [vmem:[#allocation4 + $0xd8] sm:$0xff]  ;;  %v11954_v23 = vld [vmem:[%s11506_s17 + $0x1a8] sm:$0xff]   ;;  %v4975_v24 = vld [vmem:[#allocation4 + $0xe8] sm:$0xff] }
 0x268   : > { %v4983_v25 = vld [vmem:[#allocation4 + $0x128] sm:$0xff]  ;;  %v4985_v27 = vld [vmem:[#allocation4 + $0x138] sm:$0xff]  ;;  %v10664_v30 = vld [vmem:[%s11506_s17 + $0x138] sm:$0xff]  }
 0x269   : > { %v10662_v26 = vld [vmem:[%s11506_s17 + $0x130] sm:$0xff]   ;;  %v4982_v31 = vld [vmem:[#allocation4 + $0x120] sm:$0xff]  ;;  %v11968_v32 = vld [vmem:[%s11506_s17 + $0x1b8] sm:$0xff]  }
 0x26a   : > { %5702 = vmatpush1.bf16.msra.mxu1 %v10629_v39  ;;  %5879 = vmatpush1.bf16.msra.mxu0 %v10630_v40  ;;  %v11961_v28 = vld [vmem:[%s11506_s17 + $0x1b0] sm:$0xff]   ;;  %v4984_v33 = vld [vmem:[#allocation4 + $0x130] sm:$0xff]  ;;  %v10666_v35 = vld [vmem:[%s11506_s17 + $0x140] sm:$0xff]  }
 0x26b   : > { %5703 = vmatprep.subr.bf16.mxu1 %v11060_v29  ;;  %5880 = vmatprep.subr.bf16.mxu0 %v11060_v29  ;;  %v4992_v34 = vld [vmem:[#allocation4 + $0x170] sm:$0xff]  ;;  %v4994_v36 = vld [vmem:[#allocation4 + $0x180] sm:$0xff]  ;;  %v11973_v37 = vld [vmem:[%s11506_s17 + $0x1c0] sm:$0xff]  }
 0x26c   : > { %v10668_v38 = vld [vmem:[%s11506_s17 + $0x148] sm:$0xff]   ;;  %v4991_v40 = vld [vmem:[#allocation4 + $0x168] sm:$0xff]  ;;  %v11996_v47 = vld [vmem:[%s11506_s17 + $0x1d8] sm:$0xff]  }
 0x26d   : > { %v11982_v39 = vld [vmem:[%s11506_s17 + $0x1c8] sm:$0xff]   ;;  %v5000_v48 = vld [vmem:[#allocation4 + $0x1b0] sm:$0xff] }
 0x26e   : > { %5704 = vmatpush1.bf16.msra.mxu1 %v10631_v41  ;;  %5881 = vmatpush1.bf16.msra.mxu0 %v10632_v42  ;;  %v4993_v41 = vld [vmem:[#allocation4 + $0x178] sm:$0xff] }
 0x26f   : > { %5705 = vmatprep.subr.bf16.mxu1 %v11060_v29  ;;  %5882 = vmatprep.subr.bf16.mxu0 %v11060_v29  ;;  %v5001_v42 = vld [vmem:[#allocation4 + $0x1b8] sm:$0xff] }
 0x272   : > { %5706 = vmatpush1.bf16.msra.mxu1 %v10633_v43  ;;  %5883 = vmatpush1.bf16.msra.mxu0 %v10634_v44  ;;  %v10670_v43 = vld [vmem:[%s11506_s17 + $0x150] sm:$0xff]  }
 0x273   : > { %5707 = vmatprep.subr.bf16.mxu1 %v11060_v29  ;;  %5884 = vmatprep.subr.bf16.mxu0 %v11060_v29  ;;  %v5003_v44 = vld [vmem:[#allocation4 + $0x1c8] sm:$0xff] }
 0x276   : > { %5708 = vmatpush1.bf16.msra.mxu1 %v10635_v45  ;;  %5885 = vmatpush1.bf16.msra.mxu0 %v10636_v46  ;;  %v11989_v45 = vld [vmem:[%s11506_s17 + $0x1d0] sm:$0xff]   ;;  %v10672_v46 = vld [vmem:[%s11506_s17 + $0x158] sm:$0xff]  }
 0x277   : > { %5709 = vmatprep.subr.bf16.mxu1 %v11060_v29  ;;  %5886 = vmatprep.subr.bf16.mxu0 %v11060_v29 }
 0x27a   : > { %5710 = vmatpush1.bf16.msra.mxu1 %v10637_v49  ;;  %5887 = vmatpush1.bf16.msra.mxu0 %v10638_v50  ;;  %v5002_v49 = vld [vmem:[#allocation4 + $0x1c0] sm:$0xff] }
 0x27b   : > { %5711 = vmatprep.subr.bf16.mxu1 %v11060_v29  ;;  %5888 = vmatprep.subr.bf16.mxu0 %v11060_v29  ;;  %v5010_v50 = vld [vmem:[#allocation4 + $0x200] sm:$0xff] }
 0x27e   : > { %5712 = vmatpush1.bf16.msra.mxu1 %v10639_v51  ;;  %5889 = vmatpush1.bf16.msra.mxu0 %v10640_v52  ;;  %v10674_v51 = vld [vmem:[%s11506_s17 + $0x160] sm:$0xff]   ;;  %v5012_v52 = vld [vmem:[#allocation4 + $0x210] sm:$0xff] }
 0x27f   : > { %5713 = vmatprep.subr.bf16.mxu1 %v11060_v29  ;;  %5890 = vmatprep.subr.bf16.mxu0 %v11060_v29 }
 0x282   : > { %5714 = vmatpush1.bf16.msra.mxu1 %v10641_v53  ;;  %5891 = vmatpush1.bf16.msra.mxu0 %v10642_v54  ;;  %v12003_v53 = vld [vmem:[%s11506_s17 + $0x1e0] sm:$0xff]   ;;  %v10676_v54 = vld [vmem:[%s11506_s17 + $0x168] sm:$0xff]  }
 0x283   : > { %5715 = vmatprep.subr.bf16.mxu1 %v11060_v29  ;;  %5892 = vmatprep.subr.bf16.mxu0 %v11060_v29 }
 0x286   : > { %5716 = vmatpush1.bf16.msra.mxu1 %v10643_v55  ;;  %5893 = vmatpush1.bf16.msra.mxu0 %v10644_v56  ;;  %v12010_v55 = vld [vmem:[%s11506_s17 + $0x1e8] sm:$0xff]   ;;  %v5009_v56 = vld [vmem:[#allocation4 + $0x1f8] sm:$0xff] }
 0x287   : > { %5717 = vmatprep.subr.bf16.mxu1 %v11060_v29  ;;  %5894 = vmatprep.subr.bf16.mxu0 %v11060_v29 }
 0x28a   : > { %5718 = vmatpush1.bf16.msra.mxu1 %v10645_v57  ;;  %5895 = vmatpush1.bf16.msra.mxu0 %v10646_v58  ;;  %v5011_v57 = vld [vmem:[#allocation4 + $0x208] sm:$0xff] }
 0x28b   : > { %5719 = vmatprep.subr.bf16.mxu1 %v11060_v29  ;;  %5896 = vmatprep.subr.bf16.mxu0 %v11060_v29  ;;  %v5019_v58 = vld [vmem:[#allocation4 + $0x248] sm:$0xff] }
 0x28e   : > { %5720 = vmatpush1.bf16.msra.mxu1 %v10647_v59  ;;  %5897 = vmatpush1.bf16.msra.mxu0 %v10648_v60  ;;  %v10678_v59 = vld [vmem:[%s11506_s17 + $0x170] sm:$0xff]   ;;  %v5021_v60 = vld [vmem:[#allocation4 + $0x258] sm:$0xff] }
 0x28f   : > { %5721 = vmatprep.subr.bf16.mxu1 %v11060_v29  ;;  %5898 = vmatprep.subr.bf16.mxu0 %v11060_v29 }
 0x292   : > { %5722 = vmatpush1.bf16.msra.mxu1 %v10649_v61  ;;  %5899 = vmatpush1.bf16.msra.mxu0 %v10650_v62  ;;  %v12017_v61 = vld [vmem:[%s11506_s17 + $0x1f0] sm:$0xff]   ;;  %v10680_v62 = vld [vmem:[%s11506_s17 + $0x178] sm:$0xff]  }
 0x293   : > { %9859 = vmatprep.subr.bf16.mxu1 %v11060_v29  ;;  %6045 = vmatprep.subr.bf16.mxu0 %v11060_v29 }
 0x295   : > { %5724 = vmatmul.mubr.bf16.vlgmr.msra.gmra.mrb[0].mxu1 %v4946_v63  ;;  %5901 = vmatmul.mubr.bf16.vlgmr.msra.gmra.mrb[0].mxu0 %v4948_v0  ;;  %v12024_v63 = vld [vmem:[%s11506_s17 + $0x1f8] sm:$0xff]   ;;  %v12028_v0 = vld [vmem:[%s11506_s17 + $0x200] sm:$0xff]  }
 0x296   : > { %5731 = vmatprep.mubr.bf16.mxu1 %v4956_v2  ;;  %6046 = vmatpush1.bf16.msra.mxu0 %v10651_v1  ;;  %v5018_v1 = vld [vmem:[#allocation4 + $0x240] sm:$0xff]  ;;  %v5020_v2 = vld [vmem:[#allocation4 + $0x250] sm:$0xff] }
 0x297   : > { %5908 = vmatprep.mubr.bf16.mxu0 %v4958_v3  ;;  %6047 = vmatprep.subr.bf16.mxu0 %v11060_v29  ;;  %v5028_v3 = vld [vmem:[#allocation4 + $0x290] sm:$0xff] }
 0x298   : > { %9875 = vmatpush1.bf16.msra.mxu1 %v11920_v4 }
 0x299   : > { %9860 = vmatprep.subr.bf16.mxu1 %v11060_v29 }
 0x29a   : > { %6048 = vmatpush1.bf16.msra.mxu0 %v10652_v5  ;;  %v5030_v5 = vld [vmem:[#allocation4 + $0x2a0] sm:$0xff] }
 0x29b   : > { %6049 = vmatprep.subr.bf16.mxu0 %v11060_v29 }
 0x29c   : > { %9876 = vmatpush1.bf16.msra.mxu1 %v11926_v6 }
 0x29d   : > { %5732 = vmatmul.mubr.bf16.gmra.mrb[4].mxu1 %v4955_v7  ;;  %9861 = vmatprep.subr.bf16.mxu1 %v11060_v29  ;;  %v5027_v7 = vld [vmem:[#allocation4 + $0x288] sm:$0xff] }
 0x29e   : > { %5909 = vmatmul.mubr.bf16.gmra.mrb[4].mxu0 %v4957_v8  ;;  %5739 = vmatprep.mubr.bf16.mxu1 %v4965_v9  ;;  %v5029_v8 = vld [vmem:[#allocation4 + $0x298] sm:$0xff] }
 0x29f   : > { %5916 = vmatprep.mubr.bf16.mxu0 %v4967_v11  ;;  %6050 = vmatpush1.bf16.msra.mxu0 %v10654_v10  ;;  %v5037_v9 = vld [vmem:[#allocation4 + $0x2d8] sm:$0xff]  ;;  %v5039_v10 = vld [vmem:[#allocation4 + $0x2e8] sm:$0xff]  ;;  %v5036_v11 = vld [vmem:[#allocation4 + $0x2d0] sm:$0xff] }
 0x2a0   : > { %6051 = vmatprep.subr.bf16.mxu0 %v11060_v29  ;;  %9877 = vmatpush1.bf16.msra.mxu1 %v11933_v12 }
 0x2a1   : > { %9862 = vmatprep.subr.bf16.mxu1 %v11060_v29 }
 0x2a3   : > { %6052 = vmatpush1.bf16.msra.mxu0 %v10656_v13  ;;  %v5038_v13 = vld [vmem:[#allocation4 + $0x2e0] sm:$0xff] }
 0x2a4   : > { %6053 = vmatprep.subr.bf16.mxu0 %v11060_v29  ;;  %9878 = vmatpush1.bf16.msra.mxu1 %v11940_v14 }
 0x2a5   : > { %5740 = vmatmul.mubr.bf16.gmra.mrb[8].mxu1 %v4964_v15  ;;  %9863 = vmatprep.subr.bf16.mxu1 %v11060_v29  ;;  %v5046_v15 = vld [vmem:[#allocation4 + $0x320] sm:$0xff] }
 0x2a6   : > { %5917 = vmatmul.mubr.bf16.gmra.mrb[8].mxu0 %v4966_v16  ;;  %5747 = vmatprep.mubr.bf16.mxu1 %v4974_v17  ;;  %v5048_v16 = vld [vmem:[#allocation4 + $0x330] sm:$0xff]  ;;  %v5045_v17 = vld [vmem:[#allocation4 + $0x318] sm:$0xff] }
 0x2a7   : > { %5924 = vmatprep.mubr.bf16.mxu0 %v4976_v19  ;;  %6054 = vmatpush1.bf16.msra.mxu0 %v10658_v18  ;;  %v5047_v18 = vld [vmem:[#allocation4 + $0x328] sm:$0xff] }
 0x2a8   : > { %6055 = vmatprep.subr.bf16.mxu0 %v11060_v29  ;;  %9879 = vmatpush1.bf16.msra.mxu1 %v11947_v20  ;;  %v5055_v19 = vld [vmem:[#allocation4 + $0x368] sm:$0xff] }
 0x2a9   : > { %9864 = vmatprep.subr.bf16.mxu1 %v11060_v29 }
 0x2ab   : > { %6056 = vmatpush1.bf16.msra.mxu0 %v10660_v21  ;;  %v5057_v21 = vld [vmem:[#allocation4 + $0x378] sm:$0xff] }
 0x2ac   : > { %6057 = vmatprep.subr.bf16.mxu0 %v11060_v29  ;;  %9880 = vmatpush1.bf16.msra.mxu1 %v11954_v23 }
 0x2ad   : > { %5748 = vmatmul.mubr.bf16.gmra.mrb[12].mxu1 %v4973_v22  ;;  %9865 = vmatprep.subr.bf16.mxu1 %v11060_v29  ;;  %v5054_v22 = vld [vmem:[#allocation4 + $0x360] sm:$0xff] }
 0x2ae   : > { %5925 = vmatmul.mubr.bf16.gmra.mrb[12].mxu0 %v4975_v24  ;;  %5755 = vmatprep.mubr.bf16.mxu1 %v4983_v25  ;;  %v5056_v24 = vld [vmem:[#allocation4 + $0x370] sm:$0xff] }
 0x2af   : > { %5932 = vmatprep.mubr.bf16.mxu0 %v4985_v27  ;;  %6058 = vmatpush1.bf16.msra.mxu0 %v10662_v26  ;;  %v5064_v25 = vld [vmem:[#allocation4 + $0x3b0] sm:$0xff]  ;;  %v5066_v26 = vld [vmem:[#allocation4 + $0x3c0] sm:$0xff]  ;;  %v5063_v27 = vld [vmem:[#allocation4 + $0x3a8] sm:$0xff] }
 0x2b0   : > { %6059 = vmatprep.subr.bf16.mxu0 %v11060_v29  ;;  %9881 = vmatpush1.bf16.msra.mxu1 %v11961_v28 }
 0x2b1   : > { %9866 = vmatprep.subr.bf16.mxu1 %v11060_v29 }
 0x2b3   : > { %6060 = vmatpush1.bf16.msra.mxu0 %v10664_v30  ;;  %v5065_v30 = vld [vmem:[#allocation4 + $0x3b8] sm:$0xff] }
 0x2b4   : > { %6061 = vmatprep.subr.bf16.mxu0 %v11060_v29  ;;  %9882 = vmatpush1.bf16.msra.mxu1 %v11968_v32 }
 0x2b5   : > { %5756 = vmatmul.mubr.bf16.gmra.mrb[16].mxu1 %v4982_v31  ;;  %9867 = vmatprep.subr.bf16.mxu1 %v11060_v29  ;;  %v5073_v31 = vld [vmem:[#allocation4 + $0x3f8] sm:$0xff] }
 0x2b6   : > { %5933 = vmatmul.mubr.bf16.gmra.mrb[16].mxu0 %v4984_v33  ;;  %5763 = vmatprep.mubr.bf16.mxu1 %v4992_v34  ;;  %v5075_v33 = vld [vmem:[#allocation4 + $0x408] sm:$0xff]  ;;  %v5072_v34 = vld [vmem:[#allocation4 + $0x3f0] sm:$0xff] }
 0x2b7   : > { %5940 = vmatprep.mubr.bf16.mxu0 %v4994_v36  ;;  %6062 = vmatpush1.bf16.msra.mxu0 %v10666_v35  ;;  %v5074_v35 = vld [vmem:[#allocation4 + $0x400] sm:$0xff] }
 0x2b8   : > { %6063 = vmatprep.subr.bf16.mxu0 %v11060_v29  ;;  %9883 = vmatpush1.bf16.msra.mxu1 %v11973_v37  ;;  %v5082_v36 = vld [vmem:[#allocation4 + $0x440] sm:$0xff] }
 0x2b9   : > { %9868 = vmatprep.subr.bf16.mxu1 %v11060_v29 }
 0x2bb   : > { %6064 = vmatpush1.bf16.msra.mxu0 %v10668_v38  ;;  %v5084_v38 = vld [vmem:[#allocation4 + $0x450] sm:$0xff] }
 0x2bc   : > { %6065 = vmatprep.subr.bf16.mxu0 %v11060_v29  ;;  %9884 = vmatpush1.bf16.msra.mxu1 %v11982_v39 }
 0x2bd   : > { %5764 = vmatmul.mubr.bf16.gmra.mrb[20].mxu1 %v4991_v40  ;;  %9869 = vmatprep.subr.bf16.mxu1 %v11060_v29  ;;  %v5081_v40 = vld [vmem:[#allocation4 + $0x438] sm:$0xff] }
 0x2be   : > { %5941 = vmatmul.mubr.bf16.gmra.mrb[20].mxu0 %v4993_v41  ;;  %5771 = vmatprep.mubr.bf16.mxu1 %v5001_v42  ;;  %v5083_v41 = vld [vmem:[#allocation4 + $0x448] sm:$0xff] }
 0x2bf   : > { %5948 = vmatprep.mubr.bf16.mxu0 %v5003_v44  ;;  %6066 = vmatpush1.bf16.msra.mxu0 %v10670_v43  ;;  %v5091_v42 = vld [vmem:[#allocation4 + $0x488] sm:$0xff]  ;;  %v5093_v43 = vld [vmem:[#allocation4 + $0x498] sm:$0xff]  ;;  %v5090_v44 = vld [vmem:[#allocation4 + $0x480] sm:$0xff] }
 0x2c0   : > { %6067 = vmatprep.subr.bf16.mxu0 %v11060_v29  ;;  %9885 = vmatpush1.bf16.msra.mxu1 %v11989_v45 }
 0x2c1   : > { %9870 = vmatprep.subr.bf16.mxu1 %v11060_v29 }
 0x2c3   : > { %6068 = vmatpush1.bf16.msra.mxu0 %v10672_v46  ;;  %v5092_v46 = vld [vmem:[#allocation4 + $0x490] sm:$0xff] }
 0x2c4   : > { %6069 = vmatprep.subr.bf16.mxu0 %v11060_v29  ;;  %9886 = vmatpush1.bf16.msra.mxu1 %v11996_v47 }
 0x2c5   : > { %5772 = vmatmul.mubr.bf16.gmra.mrb[24].mxu1 %v5000_v48  ;;  %9871 = vmatprep.subr.bf16.mxu1 %v11060_v29  ;;  %v5100_v48 = vld [vmem:[#allocation4 + $0x4d0] sm:$0xff] }
 0x2c6   : > { %5949 = vmatmul.mubr.bf16.gmra.mrb[24].mxu0 %v5002_v49  ;;  %5779 = vmatprep.mubr.bf16.mxu1 %v5010_v50  ;;  %v5102_v49 = vld [vmem:[#allocation4 + $0x4e0] sm:$0xff]  ;;  %v5099_v50 = vld [vmem:[#allocation4 + $0x4c8] sm:$0xff] }
 0x2c7   : > { %5956 = vmatprep.mubr.bf16.mxu0 %v5012_v52  ;;  %6070 = vmatpush1.bf16.msra.mxu0 %v10674_v51  ;;  %v5101_v51 = vld [vmem:[#allocation4 + $0x4d8] sm:$0xff]  ;;  %v4998_v52 = vld [vmem:[#allocation4 + $0x1a0] sm:$0xff] }
 0x2c8   : > { %6071 = vmatprep.subr.bf16.mxu0 %v11060_v29  ;;  %9887 = vmatpush1.bf16.msra.mxu1 %v12003_v53 }
 0x2c9   : > { %9872 = vmatprep.subr.bf16.mxu1 %v11060_v29 }
 0x2cb   : > { %6072 = vmatpush1.bf16.msra.mxu0 %v10676_v54  ;;  %v4951_v54 = vld [vmem:[#allocation4 + $0x28] sm:$0xff] }
 0x2cc   : > { %6073 = vmatprep.subr.bf16.mxu0 %v11060_v29  ;;  %9888 = vmatpush1.bf16.msra.mxu1 %v12010_v55 }
 0x2cd   : > { %5780 = vmatmul.mubr.bf16.gmra.mrb[28].mxu1 %v5009_v56  ;;  %9873 = vmatprep.subr.bf16.mxu1 %v11060_v29  ;;  %v4997_v56 = vld [vmem:[#allocation4 + $0x198] sm:$0xff] }
 0x2ce   : > { %5957 = vmatmul.mubr.bf16.gmra.mrb[28].mxu0 %v5011_v57  ;;  %5787 = vmatprep.mubr.bf16.mxu1 %v5019_v58  ;;  %v4950_v57 = vld [vmem:[#allocation4 + $0x20] sm:$0xff]  ;;  %v5007_v58 = vld [vmem:[#allocation4 + $0x1e8] sm:$0xff] }
 0x2cf   : > { %5964 = vmatprep.mubr.bf16.mxu0 %v5021_v60  ;;  %6074 = vmatpush1.bf16.msra.mxu0 %v10678_v59  ;;  %v4960_v59 = vld [vmem:[#allocation4 + $0x70] sm:$0xff]  ;;  %v10684_v60 = vld [vmem:[%s11506_s17 + $0x208] sm:$0xff]  }
 0x2d0   : > { %6075 = vmatprep.subr.bf16.mxu0 %v11060_v29  ;;  %9889 = vmatpush1.bf16.msra.mxu1 %v12017_v61 }
 0x2d1   : > { %9874 = vmatprep.subr.bf16.mxu1 %v11060_v29 }
 0x2d3   : > { %6076 = vmatpush1.bf16.msra.mxu0 %v10680_v62  ;;  %v10685_v62 = vld [vmem:[%s11506_s17 + $0x210] sm:$0xff]  }
 0x2d4   : > { %9890 = vmatpush1.bf16.msra.mxu1 %v12024_v63  ;;  %6222 = vmatprep.subr.bf16.mxu0 %v11060_v29 }
 0x2d5   : > { %5788 = vmatmul.mubr.bf16.gmra.mrb[32].mxu1 %v5018_v1  ;;  %9689 = vmatprep.subr.bf16.mxu1 %v12028_v0  ;;  %v5006_v1 = vld [vmem:[#allocation4 + $0x1e0] sm:$0xff] }
 0x2d6   : > { %5965 = vmatmul.mubr.bf16.gmra.mrb[32].mxu0 %v5020_v2  ;;  %5795 = vmatprep.mubr.bf16.mxu1 %v5028_v3  ;;  %v4959_v2 = vld [vmem:[#allocation4 + $0x68] sm:$0xff]  ;;  %v5016_v3 = vld [vmem:[#allocation4 + $0x230] sm:$0xff] }
 0x2d7   : > { %5972 = vmatprep.mubr.bf16.mxu0 %v5030_v5  ;;  %v4969_v5 = vld [vmem:[#allocation4 + $0xb8] sm:$0xff] }
 0x2dd   : > { %5796 = vmatmul.mubr.bf16.gmra.mrb[36].mxu1 %v5027_v7  ;;  %v4968_v7 = vld [vmem:[#allocation4 + $0xb0] sm:$0xff] }
 0x2de   : > { %5973 = vmatmul.mubr.bf16.gmra.mrb[36].mxu0 %v5029_v8  ;;  %5803 = vmatprep.mubr.bf16.mxu1 %v5037_v9  ;;  %v5025_v8 = vld [vmem:[#allocation4 + $0x278] sm:$0xff]  ;;  %v4978_v9 = vld [vmem:[#allocation4 + $0x100] sm:$0xff] }
 0x2df   : > { %5980 = vmatprep.mubr.bf16.mxu0 %v5039_v10  ;;  %v10688_v10 = vld [vmem:[%s11506_s17 + $0x228] sm:$0xff]  }
 0x2e5   : > { %5804 = vmatmul.mubr.bf16.gmra.mrb[40].mxu1 %v5036_v11  ;;  %v5024_v11 = vld [vmem:[#allocation4 + $0x270] sm:$0xff] }
 0x2e6   : > { %5981 = vmatmul.mubr.bf16.gmra.mrb[40].mxu0 %v5038_v13  ;;  %5811 = vmatprep.mubr.bf16.mxu1 %v5046_v15  ;;  %v5034_v13 = vld [vmem:[#allocation4 + $0x2c0] sm:$0xff]  ;;  %v4987_v15 = vld [vmem:[#allocation4 + $0x148] sm:$0xff] }
 0x2e7   : > { %5988 = vmatprep.mubr.bf16.mxu0 %v5048_v16  ;;  %v10690_v16 = vld [vmem:[%s11506_s17 + $0x238] sm:$0xff]  }
 0x2ed   : > { %5812 = vmatmul.mubr.bf16.gmra.mrb[44].mxu1 %v5045_v17  ;;  %v4986_v17 = vld [vmem:[#allocation4 + $0x140] sm:$0xff] }
 0x2ee   : > { %5989 = vmatmul.mubr.bf16.gmra.mrb[44].mxu0 %v5047_v18  ;;  %5819 = vmatprep.mubr.bf16.mxu1 %v5055_v19  ;;  %v5043_v18 = vld [vmem:[#allocation4 + $0x308] sm:$0xff] }
 0x2ef   : > { %5996 = vmatprep.mubr.bf16.mxu0 %v5057_v21  ;;  %v4995_v19 = vld [vmem:[#allocation4 + $0x188] sm:$0xff]  ;;  %v5052_v21 = vld [vmem:[#allocation4 + $0x350] sm:$0xff] }
 0x2f5   : > { %5820 = vmatmul.mubr.bf16.gmra.mrb[48].mxu1 %v5054_v22  ;;  %v5005_v22 = vld [vmem:[#allocation4 + $0x1d8] sm:$0xff] }
 0x2f6   : > { %5997 = vmatmul.mubr.bf16.gmra.mrb[48].mxu0 %v5056_v24  ;;  %5827 = vmatprep.mubr.bf16.mxu1 %v5064_v25  ;;  %v5061_v24 = vld [vmem:[#allocation4 + $0x398] sm:$0xff]  ;;  %v5014_v25 = vld [vmem:[#allocation4 + $0x220] sm:$0xff] }
 0x2f7   : > { %6004 = vmatprep.mubr.bf16.mxu0 %v5066_v26  ;;  %v5070_v26 = vld [vmem:[#allocation4 + $0x3e0] sm:$0xff] }
 0x2fd   : > { %5828 = vmatmul.mubr.bf16.gmra.mrb[52].mxu1 %v5063_v27  ;;  %v5023_v27 = vld [vmem:[#allocation4 + $0x268] sm:$0xff] }
 0x2fe   : > { %6005 = vmatmul.mubr.bf16.gmra.mrb[52].mxu0 %v5065_v30  ;;  %5835 = vmatprep.mubr.bf16.mxu1 %v5073_v31  ;;  %v5079_v30 = vld [vmem:[#allocation4 + $0x428] sm:$0xff]  ;;  %v5032_v31 = vld [vmem:[#allocation4 + $0x2b0] sm:$0xff] }
 0x2ff   : > { %6012 = vmatprep.mubr.bf16.mxu0 %v5075_v33 }
 0x305   : > { %5836 = vmatmul.mubr.bf16.gmra.mrb[56].mxu1 %v5072_v34  ;;  %v5078_v34 = vld [vmem:[#allocation4 + $0x420] sm:$0xff] }
 0x306   : > { %6013 = vmatmul.mubr.bf16.gmra.mrb[56].mxu0 %v5074_v35  ;;  %5843 = vmatprep.mubr.bf16.mxu1 %v5082_v36  ;;  %v5031_v36 = vld [vmem:[#allocation4 + $0x2a8] sm:$0xff] }
 0x307   : > { %6020 = vmatprep.mubr.bf16.mxu0 %v5084_v38  ;;  %v5088_v38 = vld [vmem:[#allocation4 + $0x470] sm:$0xff] }
 0x30d   : > { %5844 = vmatmul.mubr.bf16.gmra.mrb[60].mxu1 %v5081_v40 }
 0x30e   : > { %6021 = vmatmul.mubr.bf16.gmra.mrb[60].mxu0 %v5083_v41  ;;  %5851 = vmatprep.mubr.bf16.mxu1 %v5091_v42  ;;  %v5087_v41 = vld [vmem:[#allocation4 + $0x468] sm:$0xff] }
 0x30f   : > { %6028 = vmatprep.mubr.bf16.mxu0 %v5093_v43  ;;  %v5040_v43 = vld [vmem:[#allocation4 + $0x2f0] sm:$0xff] }
 0x315   : > { %5852 = vmatmul.mubr.bf16.gmra.mrb[64].mxu1 %v5090_v44 }
 0x316   : > { %6029 = vmatmul.mubr.bf16.gmra.mrb[64].mxu0 %v5092_v46  ;;  %5859 = vmatprep.mubr.bf16.mxu1 %v5100_v48  ;;  %v5097_v46 = vld [vmem:[#allocation4 + $0x4b8] sm:$0xff]  ;;  %v5050_v48 = vld [vmem:[#allocation4 + $0x340] sm:$0xff] }
 0x317   : > { %6036 = vmatprep.mubr.bf16.mxu0 %v5102_v49 }
 0x31d   : > { %5860 = vmatmul.mubr.bf16.gmra.mrb[68].mxu1 %v5099_v50 }
 0x31e   : > { %6037 = vmatmul.mubr.bf16.gmra.mrb[68].mxu0 %v5101_v51  ;;  %6294 = vmatprep.mubr.bf16.mxu1 %v4998_v52  ;;  %v5096_v51 = vld [vmem:[#allocation4 + $0x4b0] sm:$0xff] }
 0x31f   : > { %6077 = vmatprep.mubr.bf16.mxu0 %v4951_v54  ;;  %v5049_v54 = vld [vmem:[#allocation4 + $0x338] sm:$0xff] }
 0x325   : > { %6295 = vmatmul.mubr.bf16.vlgmr.msra.gmra.mrb[72].mxu1 %v4997_v56 }
 0x326   : > { %6078 = vmatmul.mubr.bf16.vlgmr.msra.gmra.mrb[0].mxu0 %v4950_v57  ;;  %6302 = vmatprep.mubr.bf16.mxu1 %v5007_v58  ;;  %v5106_v57 = vld [vmem:[#allocation4 + $0x500] sm:$0xff]  ;;  %v5059_v58 = vld [vmem:[#allocation4 + $0x388] sm:$0xff] }
 0x327   : > { %6223 = vmatpush1.bf16.msra.mxu0 %v11920_v4  ;;  %6085 = vmatprep.mubr.bf16.mxu0 %v4960_v59  ;;  %v10686_v4 = vld [vmem:[%s11506_s17 + $0x218] sm:$0xff]  }
 0x328   : > { %6224 = vmatprep.subr.bf16.mxu0 %v11060_v29  ;;  %9690 = vmatpush3.bf16.msra.mxu1 %v12028_v0  ;;  %v10687_v0 = vld [vmem:[%s11506_s17 + $0x220] sm:$0xff]  }
 0x329   : > { %9691 = vmatprep.subr.bf16.mxu1 %v10684_v60 }
 0x32b   : > { %6225 = vmatpush1.bf16.msra.mxu0 %v11926_v6  ;;  %v5015_v6 = vld [vmem:[#allocation4 + $0x228] sm:$0xff] }
 0x32c   : > { %6226 = vmatprep.subr.bf16.mxu0 %v11060_v29  ;;  %9692 = vmatpush3.bf16.msra.mxu1 %v10684_v60 }
 0x32d   : > { %6303 = vmatmul.mubr.bf16.gmra.mrb[76].mxu1 %v5006_v1  ;;  %9693 = vmatprep.subr.bf16.mxu1 %v10685_v62 }
 0x32e   : > { %6086 = vmatmul.mubr.bf16.gmra.mrb[4].mxu0 %v4959_v2  ;;  %6310 = vmatprep.mubr.bf16.mxu1 %v5016_v3  ;;  %v5058_v2 = vld [vmem:[#allocation4 + $0x380] sm:$0xff] }
 0x32f   : > { %6093 = vmatprep.mubr.bf16.mxu0 %v4969_v5  ;;  %6227 = vmatpush1.bf16.msra.mxu0 %v11933_v12  ;;  %v10689_v12 = vld [vmem:[%s11506_s17 + $0x230] sm:$0xff]   ;;  %v4954_v5 = vld [vmem:[#allocation4 + $0x40] sm:$0xff] }
 0x330   : > { %6228 = vmatprep.subr.bf16.mxu0 %v11060_v29  ;;  %9694 = vmatpush3.bf16.msra.mxu1 %v10685_v62  ;;  %v5105_v62 = vld [vmem:[#allocation4 + $0x4f8] sm:$0xff] }
 0x331   : > { %9695 = vmatprep.subr.bf16.mxu1 %v10686_v4 }
 0x333   : > { %6229 = vmatpush1.bf16.msra.mxu0 %v11940_v14  ;;  %v4977_v14 = vld [vmem:[#allocation4 + $0xf8] sm:$0xff] }
 0x334   : > { %6230 = vmatprep.subr.bf16.mxu0 %v11060_v29  ;;  %9696 = vmatpush3.bf16.msra.mxu1 %v10686_v4  ;;  %v5068_v4 = vld [vmem:[#allocation4 + $0x3d0] sm:$0xff] }
 0x335   : > { %6311 = vmatmul.mubr.bf16.gmra.mrb[80].mxu1 %v5015_v6  ;;  %9697 = vmatprep.subr.bf16.mxu1 %v10687_v0 }
 0x336   : > { %6094 = vmatmul.mubr.bf16.gmra.mrb[8].mxu0 %v4968_v7  ;;  %6318 = vmatprep.mubr.bf16.mxu1 %v5025_v8  ;;  %v4963_v7 = vld [vmem:[#allocation4 + $0x88] sm:$0xff] }
 0x337   : > { %6101 = vmatprep.mubr.bf16.mxu0 %v4978_v9  ;;  %6231 = vmatpush1.bf16.msra.mxu0 %v11947_v20  ;;  %v5033_v20 = vld [vmem:[#allocation4 + $0x2b8] sm:$0xff]  ;;  %v5067_v9 = vld [vmem:[#allocation4 + $0x3c8] sm:$0xff] }
 0x338   : > { %6232 = vmatprep.subr.bf16.mxu0 %v11060_v29  ;;  %9698 = vmatpush3.bf16.msra.mxu1 %v10687_v0 }
 0x339   : > { %9699 = vmatprep.subr.bf16.mxu1 %v10688_v10 }
 0x33b   : > { %6233 = vmatpush1.bf16.msra.mxu0 %v11954_v23  ;;  %v4996_v23 = vld [vmem:[#allocation4 + $0x190] sm:$0xff] }
 0x33c   : > { %6234 = vmatprep.subr.bf16.mxu0 %v11060_v29  ;;  %9700 = vmatpush3.bf16.msra.mxu1 %v10688_v10 }
 0x33d   : > { %6319 = vmatmul.mubr.bf16.gmra.mrb[84].mxu1 %v5024_v11  ;;  %9701 = vmatprep.subr.bf16.mxu1 %v10689_v12  ;;  %v5077_v11 = vld [vmem:[#allocation4 + $0x418] sm:$0xff] }
 0x33e   : > { %6102 = vmatmul.mubr.bf16.gmra.mrb[12].mxu0 %v4977_v14  ;;  %6326 = vmatprep.mubr.bf16.mxu1 %v5034_v13 }
 0x33f   : > { %6109 = vmatprep.mubr.bf16.mxu0 %v4987_v15  ;;  %6235 = vmatpush1.bf16.msra.mxu0 %v11961_v28  ;;  %v5042_v28 = vld [vmem:[#allocation4 + $0x300] sm:$0xff]  ;;  %v4981_v15 = vld [vmem:[#allocation4 + $0x118] sm:$0xff] }
 0x340   : > { %6236 = vmatprep.subr.bf16.mxu0 %v11060_v29  ;;  %9702 = vmatpush3.bf16.msra.mxu1 %v10689_v12  ;;  %v4972_v12 = vld [vmem:[#allocation4 + $0xd0] sm:$0xff] }
 0x341   : > { %9703 = vmatprep.subr.bf16.mxu1 %v10690_v16 }
 0x343   : > { %6237 = vmatpush1.bf16.msra.mxu0 %v11968_v32  ;;  %v5051_v32 = vld [vmem:[#allocation4 + $0x348] sm:$0xff] }
 0x344   : > { %6238 = vmatprep.subr.bf16.mxu0 %v11060_v29  ;;  %9704 = vmatpush3.bf16.msra.mxu1 %v10690_v16 }
 0x345   : > { %6327 = vmatmul.mubr.bf16.gmra.mrb[88].mxu1 %v5033_v20  ;;  %v5076_v20 = vld [vmem:[#allocation4 + $0x410] sm:$0xff] }
 0x346   : > { %6110 = vmatmul.mubr.bf16.gmra.mrb[16].mxu0 %v4986_v17  ;;  %6334 = vmatprep.mubr.bf16.mxu1 %v5043_v18  ;;  %v4990_v18 = vld [vmem:[#allocation4 + $0x160] sm:$0xff] }
 0x347   : > { %6117 = vmatprep.mubr.bf16.mxu0 %v4996_v23  ;;  %6239 = vmatpush1.bf16.msra.mxu0 %v11973_v37  ;;  %v5004_v37 = vld [vmem:[#allocation4 + $0x1d0] sm:$0xff]  ;;  %v5086_v23 = vld [vmem:[#allocation4 + $0x460] sm:$0xff] }
 0x348   : > { %6240 = vmatprep.subr.bf16.mxu0 %v11060_v29 }
 0x34b   : > { %6241 = vmatpush1.bf16.msra.mxu0 %v11982_v39  ;;  %v5060_v39 = vld [vmem:[#allocation4 + $0x390] sm:$0xff] }
 0x34c   : > { %6242 = vmatprep.subr.bf16.mxu0 %v11060_v29 }
 0x34d   : > { %6335 = vmatmul.mubr.bf16.gmra.mrb[92].mxu1 %v5042_v28 }
 0x34e   : > { %6118 = vmatmul.mubr.bf16.gmra.mrb[20].mxu0 %v4995_v19  ;;  %6342 = vmatprep.mubr.bf16.mxu1 %v5052_v21  ;;  %v4999_v21 = vld [vmem:[#allocation4 + $0x1a8] sm:$0xff] }
 0x34f   : > { %6125 = vmatprep.mubr.bf16.mxu0 %v5005_v22  ;;  %6243 = vmatpush1.bf16.msra.mxu0 %v11989_v45  ;;  %v5013_v45 = vld [vmem:[#allocation4 + $0x218] sm:$0xff] }
 0x350   : > { %6244 = vmatprep.subr.bf16.mxu0 %v11060_v29 }
 0x353   : > { %6245 = vmatpush1.bf16.msra.mxu0 %v11996_v47  ;;  %v5069_v47 = vld [vmem:[#allocation4 + $0x3d8] sm:$0xff] }
 0x354   : > { %6246 = vmatprep.subr.bf16.mxu0 %v11060_v29 }
 0x355   : > { %6343 = vmatmul.mubr.bf16.gmra.mrb[96].mxu1 %v5051_v32  ;;  %v5085_v32 = vld [vmem:[#allocation4 + $0x458] sm:$0xff] }
 0x356   : > { %6126 = vmatmul.mubr.bf16.gmra.mrb[24].mxu0 %v5004_v37  ;;  %6350 = vmatprep.mubr.bf16.mxu1 %v5061_v24  ;;  %v5008_v24 = vld [vmem:[#allocation4 + $0x1f0] sm:$0xff] }
 0x357   : > { %6133 = vmatprep.mubr.bf16.mxu0 %v5014_v25  ;;  %6247 = vmatpush1.bf16.msra.mxu0 %v12003_v53  ;;  %v5022_v53 = vld [vmem:[#allocation4 + $0x260] sm:$0xff]  ;;  %v5095_v25 = vld [vmem:[#allocation4 + $0x4a8] sm:$0xff] }
 0x358   : > { %6248 = vmatprep.subr.bf16.mxu0 %v11060_v29 }
 0x35b   : > { %6249 = vmatpush1.bf16.msra.mxu0 %v12010_v55 }
 0x35c   : > { %6250 = vmatprep.subr.bf16.mxu0 %v11060_v29 }
 0x35d   : > { %6351 = vmatmul.mubr.bf16.gmra.mrb[100].mxu1 %v5060_v39 }
 0x35e   : > { %6134 = vmatmul.mubr.bf16.gmra.mrb[28].mxu0 %v5013_v45  ;;  %6358 = vmatprep.mubr.bf16.mxu1 %v5070_v26  ;;  %v5017_v26 = vld [vmem:[#allocation4 + $0x238] sm:$0xff] }
 0x35f   : > { %6141 = vmatprep.mubr.bf16.mxu0 %v5023_v27  ;;  %6251 = vmatpush1.bf16.msra.mxu0 %v12017_v61 }
 0x360   : > { %6252 = vmatprep.subr.bf16.mxu0 %v11060_v29  ;;  %v5041_v29 = vld [vmem:[#allocation4 + $0x2f8] sm:$0xff] }
 0x363   : > { %6253 = vmatpush1.bf16.msra.mxu0 %v12024_v63 }
 0x365   : > { %6359 = vmatmul.mubr.bf16.gmra.mrb[104].mxu1 %v5069_v47  ;;  %v5094_v47 = vld [vmem:[#allocation4 + $0x4a0] sm:$0xff] }
 0x366   : > { %6142 = vmatmul.mubr.bf16.gmra.mrb[32].mxu0 %v5022_v53  ;;  %6366 = vmatprep.mubr.bf16.mxu1 %v5079_v30  ;;  %v5026_v30 = vld [vmem:[#allocation4 + $0x280] sm:$0xff] }
 0x367   : > { %6149 = vmatprep.mubr.bf16.mxu0 %v5032_v31  ;;  %v5104_v31 = vld [vmem:[#allocation4 + $0x4f0] sm:$0xff] }
 0x368   : > { %v12072_v55 = vpop.f32.mrb[0].mxu1 }
 0x369   : > { %v5727_v33 = vpop.f32.mrb[1].mxu1 }
 0x36a   : > { %v12074_v35 = vpop.f32.mrb[2].mxu1 }
 0x36b   : > { %v5730_v61 = vpop.f32.mrb[3].mxu1 }
 0x36d   : > { %6367 = vmatmul.mubr.bf16.gmra.mrb[108].mxu1 %v5078_v34 }
 0x36e   : > { %6150 = vmatmul.mubr.bf16.gmra.mrb[36].mxu0 %v5031_v36  ;;  %6374 = vmatprep.mubr.bf16.mxu1 %v5088_v38  ;;  %v5035_v36 = vld [vmem:[#allocation4 + $0x2c8] sm:$0xff] }
 0x36f   : > { %6157 = vmatprep.mubr.bf16.mxu0 %v5041_v29  ;;  %v5103_v38 = vld [vmem:[#allocation4 + $0x4e8] sm:$0xff] }
 0x370   : > { %v12076_v63 = vpop.f32.mrb[4].mxu1 }
 0x371   : > { %v5735_v40 = vpop.f32.mrb[5].mxu1 }
 0x372   : > { %v12078_v42 = vpop.f32.mrb[6].mxu1  ;;  %v5044_v40 = vld [vmem:[#allocation4 + $0x310] sm:$0xff] }
 0x373   : > { %v5738_v44 = vpop.f32.mrb[7].mxu1 }
 0x375   : > { %6375 = vmatmul.mubr.bf16.gmra.mrb[112].mxu1 %v5087_v41  ;;  %v4953_v41 = vld [vmem:[#allocation4 + $0x38] sm:$0xff] }
 0x376   : > { %6158 = vmatmul.mubr.bf16.gmra.mrb[40].mxu0 %v5040_v43  ;;  %6382 = vmatprep.mubr.bf16.mxu1 %v5097_v46  ;;  %v5053_v46 = vld [vmem:[#allocation4 + $0x358] sm:$0xff] }
 0x377   : > { %6165 = vmatprep.mubr.bf16.mxu0 %v5050_v48 }
 0x378   : > { %v12080_v49 = vpop.f32.mrb[8].mxu1 }
 0x379   : > { %v5743_v50 = vpop.f32.mrb[9].mxu1 }
 0x37a   : > { %v12082_v52 = vpop.f32.mrb[10].mxu1  ;;  %v4952_v50 = vld [vmem:[#allocation4 + $0x30] sm:$0xff] }
 0x37b   : > { %v5746_v56 = vpop.f32.mrb[11].mxu1 }
 0x37c   : > { %v4962_v56 = vld [vmem:[#allocation4 + $0x80] sm:$0xff] }
 0x37d   : > { %6383 = vmatmul.mubr.bf16.gmra.mrb[116].mxu1 %v5096_v51 }
 0x37e   : > { %6166 = vmatmul.mubr.bf16.gmra.mrb[44].mxu0 %v5049_v54  ;;  %6390 = vmatprep.mubr.bf16.mxu1 %v5106_v57  ;;  %v5062_v54 = vld [vmem:[#allocation4 + $0x3a0] sm:$0xff] }
 0x37f   : > { %6173 = vmatprep.mubr.bf16.mxu0 %v5059_v58 }
 0x380   : > { %v12084_v59 = vpop.f32.mrb[12].mxu1 }
 0x381   : > { %v5751_v60 = vpop.f32.mrb[13].mxu1 }
 0x382   : > { %v12086_v1 = vpop.f32.mrb[14].mxu1  ;;  %v5071_v60 = vld [vmem:[#allocation4 + $0x3e8] sm:$0xff] }
 0x383   : > { %v5754_v3 = vpop.f32.mrb[15].mxu1 }
 0x385   : > { %6391 = vmatmul.mubr.bf16.gmra.mrb[120].mxu1 %v5105_v62 }
 0x386   : > { %6174 = vmatmul.mubr.bf16.gmra.mrb[48].mxu0 %v5058_v2  ;;  %9705 = vmatprep.mubr.bf16.mxu1 %v4954_v5  ;;  %v4961_v2 = vld [vmem:[#allocation4 + $0x78] sm:$0xff]  ;;  %v5080_v5 = vld [vmem:[#allocation4 + $0x430] sm:$0xff] }
 0x387   : > { %6181 = vmatprep.mubr.bf16.mxu0 %v5068_v4  ;;  %v4971_v4 = vld [vmem:[#allocation4 + $0xc8] sm:$0xff] }
 0x388   : > { %v12088_v0 = vpop.f32.mrb[16].mxu1 }
 0x389   : > { %v5759_v6 = vpop.f32.mrb[17].mxu1 }
 0x38a   : > { %v12090_v8 = vpop.f32.mrb[18].mxu1 }
 0x38b   : > { %13928 = vst [vmem:[#allocation42_spill] sm:$0xff] %v12090_v8  ;;  %v5762_v10 = vpop.f32.mrb[19].mxu1 }
 0x38d   : > { %9706 = vmatmul.mubr.bf16.vlgmr.msra.gmra.mrb[124].mxu1 %v4963_v7 }
 0x38e   : > { %6182 = vmatmul.mubr.bf16.gmra.mrb[52].mxu0 %v5067_v9  ;;  %9709 = vmatprep.mubr.bf16.mxu1 %v4972_v12  ;;  %v5089_v9 = vld [vmem:[#allocation4 + $0x478] sm:$0xff]  ;;  %v4970_v12 = vld [vmem:[#allocation4 + $0xc0] sm:$0xff] }
 0x38f   : > { %6189 = vmatprep.mubr.bf16.mxu0 %v5077_v11 }
 0x390   : > { %v12092_v14 = vpop.f32.mrb[20].mxu1 }
 0x391   : > { %v5767_v13 = vpop.f32.mrb[21].mxu1 }
 0x392   : > { %v12094_v16 = vpop.f32.mrb[22].mxu1  ;;  %v5098_v13 = vld [vmem:[#allocation4 + $0x4c0] sm:$0xff] }
 0x393   : > { %v5770_v17 = vpop.f32.mrb[23].mxu1 }
 0x395   : > { %9710 = vmatmul.mubr.bf16.gmra.mrb[128].mxu1 %v4981_v15  ;;  %v4980_v15 = vld [vmem:[#allocation4 + $0x110] sm:$0xff] }
 0x396   : > { %6190 = vmatmul.mubr.bf16.gmra.mrb[56].mxu0 %v5076_v20  ;;  %9713 = vmatprep.mubr.bf16.mxu1 %v4990_v18  ;;  %v5107_v18 = vld [vmem:[#allocation4 + $0x508] sm:$0xff] }
 0x397   : > { %6197 = vmatprep.mubr.bf16.mxu0 %v5086_v23 }
 0x398   : > { %v12096_v28 = vpop.f32.mrb[24].mxu1 }
 0x399   : > { %v5775_v19 = vpop.f32.mrb[25].mxu1 }
 0x39a   : > { %v12098_v22 = vpop.f32.mrb[26].mxu1  ;;  %v4979_v19 = vld [vmem:[#allocation4 + $0x108] sm:$0xff] }
 0x39b   : > { %v5778_v37 = vpop.f32.mrb[27].mxu1 }
 0x39d   : > { %9714 = vmatmul.mubr.bf16.gmra.mrb[132].mxu1 %v4999_v21 }
 0x39e   : > { %6198 = vmatmul.mubr.bf16.gmra.mrb[60].mxu0 %v5085_v32  ;;  %9717 = vmatprep.mubr.bf16.mxu1 %v5008_v24  ;;  %v4989_v32 = vld [vmem:[#allocation4 + $0x158] sm:$0xff] }
 0x39f   : > { %6205 = vmatprep.mubr.bf16.mxu0 %v5095_v25 }
 0x3a0   : > { %v12100_v39 = vpop.f32.mrb[28].mxu1 }
 0x3a1   : > { %v5783_v45 = vpop.f32.mrb[29].mxu1 }
 0x3a2   : > { %v12102_v27 = vpop.f32.mrb[30].mxu1  ;;  %v4988_v45 = vld [vmem:[#allocation4 + $0x150] sm:$0xff] }
 0x3a3   : > { %v5786_v53 = vpop.f32.mrb[31].mxu1 }
 0x3a5   : > { %9718 = vmatmul.mubr.bf16.gmra.mrb[136].mxu1 %v5017_v26 }
 0x3a6   : > { %6206 = vmatmul.mubr.bf16.gmra.mrb[64].mxu0 %v5094_v47  ;;  %9721 = vmatprep.mubr.bf16.mxu1 %v5026_v30 }
 0x3a7   : > { %6213 = vmatprep.mubr.bf16.mxu0 %v5104_v31 }
 0x3a8   : > { %v12104_v33 = vpop.f32.mrb[32].mxu1 }
 0x3a9   : > { %v5791_v34 = vpop.f32.mrb[33].mxu1 }
 0x3aa   : > { %v12106_v61 = vpop.f32.mrb[34].mxu1 }
 0x3ab   : > { %v5794_v29 = vpop.f32.mrb[35].mxu1 }
 0x3ad   : > { %9722 = vmatmul.mubr.bf16.gmra.mrb[140].mxu1 %v5035_v36 }
 0x3ae   : > { %6214 = vmatmul.mubr.bf16.gmra.mrb[68].mxu0 %v5103_v38  ;;  %9725 = vmatprep.mubr.bf16.mxu1 %v5044_v40 }
 0x3af   : > { %6254 = vmatprep.mubr.bf16.mxu0 %v4953_v41 }
 0x3b0   : > { %v12108_v43 = vpop.f32.mrb[36].mxu1 }
 0x3b1   : > { %v5799_v44 = vpop.f32.mrb[37].mxu1 }
 0x3b2   : > { %v12110_v48 = vpop.f32.mrb[38].mxu1 }
 0x3b3   : > { %v5802_v51 = vpop.f32.mrb[39].mxu1 }
 0x3b5   : > { %9726 = vmatmul.mubr.bf16.gmra.mrb[144].mxu1 %v5053_v46 }
 0x3b6   : > { %6255 = vmatmul.mubr.bf16.vlgmr.msra.gmra.mrb[0].mxu0 %v4952_v50  ;;  %9729 = vmatprep.mubr.bf16.mxu1 %v5062_v54 }
 0x3b7   : > { %6262 = vmatprep.mubr.bf16.mxu0 %v4962_v56 }
 0x3b8   : > { %v12112_v57 = vpop.f32.mrb[40].mxu1 }
 0x3b9   : > { %v5807_v58 = vpop.f32.mrb[41].mxu1 }
 0x3ba   : > { %v12114_v62 = vpop.f32.mrb[42].mxu1 }
 0x3bb   : > { %v5810_v3 = vpop.f32.mrb[43].mxu1 }
 0x3bd   : > { %9730 = vmatmul.mubr.bf16.gmra.mrb[148].mxu1 %v5071_v60 }
 0x3be   : > { %6263 = vmatmul.mubr.bf16.gmra.mrb[4].mxu0 %v4961_v2  ;;  %9733 = vmatprep.mubr.bf16.mxu1 %v5080_v5 }
 0x3bf   : > { %6270 = vmatprep.mubr.bf16.mxu0 %v4971_v4 }
 0x3c0   : > { %v12116_v6 = vpop.f32.mrb[44].mxu1 }
 0x3c1   : > { %v5815_v7 = vpop.f32.mrb[45].mxu1 }
 0x3c2   : > { %v12118_v10 = vpop.f32.mrb[46].mxu1 }
 0x3c3   : > { %v5818_v11 = vpop.f32.mrb[47].mxu1 }
 0x3c5   : > { %9734 = vmatmul.mubr.bf16.gmra.mrb[152].mxu1 %v5089_v9 }
 0x3c6   : > { %6271 = vmatmul.mubr.bf16.gmra.mrb[8].mxu0 %v4970_v12  ;;  %9737 = vmatprep.mubr.bf16.mxu1 %v5098_v13 }
 0x3c7   : > { %6278 = vmatprep.mubr.bf16.mxu0 %v4980_v15 }
 0x3c8   : > { %v12120_v20 = vpop.f32.mrb[48].mxu1 }
 0x3c9   : > { %v5823_v17 = vpop.f32.mrb[49].mxu1 }
 0x3ca   : > { %v12122_v23 = vpop.f32.mrb[50].mxu1 }
 0x3cb   : > { %v5826_v21 = vpop.f32.mrb[51].mxu1 }
 0x3cd   : > { %9738 = vmatmul.mubr.bf16.gmra.mrb[156].mxu1 %v5107_v18 }
 0x3ce   : > { %6279 = vmatmul.mubr.bf16.gmra.mrb[12].mxu0 %v4979_v19 }
 0x3cf   : > { %6286 = vmatprep.mubr.bf16.mxu0 %v4989_v32 }
 0x3d0   : > { %v12124_v37 = vpop.f32.mrb[52].mxu1 }
 0x3d1   : > { %v5831_v24 = vpop.f32.mrb[53].mxu1 }
 0x3d2   : > { %v12126_v25 = vpop.f32.mrb[54].mxu1 }
 0x3d3   : > { %v5834_v26 = vpop.f32.mrb[55].mxu1 }
 0x3d6   : > { %6287 = vmatmul.mubr.bf16.gmra.mrb[16].mxu0 %v4988_v45 }
 0x3d8   : > { %v12128_v47 = vpop.f32.mrb[56].mxu1 }
 0x3d9   : > { %v5839_v53 = vpop.f32.mrb[57].mxu1 }
 0x3da   : > { %v12130_v30 = vpop.f32.mrb[58].mxu1  ;;  %v12152_v53 = vld [vmem:[%s417_s8] ss:$0 sm:$0xff] }
 0x3db   : > { %v5842_v31 = vpop.f32.mrb[59].mxu1 }
 0x3dc   : > { %v5766_v31 = vadd.f32 %v12152_v53, %v12092_v14  ;;  %v5774_v14 = vadd.f32 %v12152_v53, %v12096_v28  ;;  %v5782_v28 = vadd.f32 %v12152_v53, %v12100_v39  ;;  %v5790_v39 = vadd.f32 %v12152_v53, %v12104_v33 }
 0x3dd   : > { %v5798_v33 = vadd.f32 %v12152_v53, %v12108_v43 }
 0x3e0   : > { %v12132_v34 = vpop.f32.mrb[60].mxu1 }
 0x3e1   : > { %v5847_v36 = vpop.f32.mrb[61].mxu1 }
 0x3e2   : > { %v12134_v38 = vpop.f32.mrb[62].mxu1 }
 0x3e3   : > { %v5850_v29 = vpop.f32.mrb[63].mxu1 }
 0x3e8   : > { %v12136_v40 = vpop.f32.mrb[64].mxu1 }
 0x3e9   : > { %v5855_v41 = vpop.f32.mrb[65].mxu1 }
 0x3ea   : > { %v12138_v44 = vpop.f32.mrb[66].mxu1 }
 0x3eb   : > { %v5858_v46 = vpop.f32.mrb[67].mxu1 }
 0x3ec   : > { %v5769_v46 = vadd.f32 %v12152_v53, %v12094_v16  ;;  %v5777_v16 = vadd.f32 %v12152_v53, %v12098_v22  ;;  %v5785_v22 = vadd.f32 %v12152_v53, %v12102_v27  ;;  %v5793_v27 = vadd.f32 %v12152_v53, %v12106_v61 }
 0x3f0   : > { %v12140_v50 = vpop.f32.mrb[68].mxu1 }
 0x3f1   : > { %v5863_v51 = vpop.f32.mrb[69].mxu1 }
 0x3f2   : > { %v12142_v54 = vpop.f32.mrb[70].mxu1 }
 0x3f3   : > { %v5866_v56 = vpop.f32.mrb[71].mxu1 }
 0x3f8   : > { %v6296_v58 = vpop.f32.mrb[72].mxu1 }
 0x3f9   : > { %v6298_v60 = vpop.f32.mrb[73].mxu1 }
 0x3fa   : > { %v6299_v2 = vpop.f32.mrb[74].mxu1 }
 0x3fb   : > { %v6301_v3 = vpop.f32.mrb[75].mxu1 }
 0x400   : > { %v6304_v5 = vpop.f32.mrb[76].mxu1 }
 0x401   : > { %v6306_v4 = vpop.f32.mrb[77].mxu1 }
 0x402   : > { %v6307_v7 = vpop.f32.mrb[78].mxu1 }
 0x403   : > { %v6309_v9 = vpop.f32.mrb[79].mxu1 }
 0x408   : > { %v6312_v12 = vpop.f32.mrb[80].mxu1 }
 0x409   : > { %v6314_v11 = vpop.f32.mrb[81].mxu1 }
 0x40a   : > { %v6315_v13 = vpop.f32.mrb[82].mxu1 }
 0x40b   : > { %v6317_v15 = vpop.f32.mrb[83].mxu1 }
 0x410   : > { %v12144_v17 = vpop.f32.mrb[84].mxu1 }
 0x411   : > { %v6322_v18 = vpop.f32.mrb[85].mxu1 }
 0x412   : > { %v6323_v19 = vpop.f32.mrb[86].mxu1 }
 0x413   : > { %v6325_v21 = vpop.f32.mrb[87].mxu1 }
 0x418   : > { %v12146_v32 = vpop.f32.mrb[88].mxu1 }
 0x419   : > { %v6330_v24 = vpop.f32.mrb[89].mxu1 }
 0x41a   : > { %v12148_v45 = vpop.f32.mrb[90].mxu1 }
 0x41b   : > { %v6333_v26 = vpop.f32.mrb[91].mxu1 }
 0x420   : > { %v12156_v36 = vpop.f32.mrb[92].mxu1 }
 0x421   : > { %v6119_v29 = vpop.f32.mrb[20].mxu0  ;;  %v6338_v41 = vpop.f32.mrb[93].mxu1 }
 0x422   : > { %v9912_v51 = vadd.f32 %v6119_v29, %v5766_v31  ;;  %v6121_v56 = vpop.f32.mrb[21].mxu0  ;;  %v12160_v60 = vpop.f32.mrb[94].mxu1 }
 0x423   : > { %v6122_v3 = vpop.f32.mrb[22].mxu0  ;;  %v6341_v4 = vpop.f32.mrb[95].mxu1 }
 0x424   : > { %v9915_v9 = vadd.f32 %v6122_v3, %v5769_v46  ;;  %v6124_v11 = vpop.f32.mrb[23].mxu0  ;;  %v12162_v15 = vadd.f32 %v9912_v51, %v6296_v58 }
 0x426   : > { %v12164_v18 = vadd.f32 %v9915_v9, %v6299_v2 }
 0x428   : > { %v12168_v21 = vpop.f32.mrb[96].mxu1 }
 0x429   : > { %v6127_v24 = vpop.f32.mrb[24].mxu0  ;;  %v6346_v26 = vpop.f32.mrb[97].mxu1 }
 0x42a   : > { %v9918_v31 = vadd.f32 %v6127_v24, %v5774_v14  ;;  %v6129_v29 = vpop.f32.mrb[25].mxu0  ;;  %v12172_v41 = vpop.f32.mrb[98].mxu1 }
 0x42b   : > { %v6130_v46 = vpop.f32.mrb[26].mxu0  ;;  %v6349_v56 = vpop.f32.mrb[99].mxu1 }
 0x42c   : > { %v9921_v58 = vadd.f32 %v6130_v46, %v5777_v16  ;;  %v6132_v51 = vpop.f32.mrb[27].mxu0  ;;  %v12174_v2 = vadd.f32 %v9918_v31, %v6304_v5 }
 0x42e   : > { %v12176_v3 = vadd.f32 %v9921_v58, %v6307_v7 }
 0x430   : > { %v12180_v4 = vpop.f32.mrb[100].mxu1 }
 0x431   : > { %v6135_v9 = vpop.f32.mrb[28].mxu0  ;;  %v6354_v11 = vpop.f32.mrb[101].mxu1 }
 0x432   : > { %v9924_v14 = vadd.f32 %v6135_v9, %v5782_v28  ;;  %v6137_v24 = vpop.f32.mrb[29].mxu0  ;;  %v12184_v26 = vpop.f32.mrb[102].mxu1 }
 0x433   : > { %v6138_v16 = vpop.f32.mrb[30].mxu0  ;;  %v6357_v29 = vpop.f32.mrb[103].mxu1 }
 0x434   : > { %v9927_v5 = vadd.f32 %v6138_v16, %v5785_v22  ;;  %v6140_v31 = vpop.f32.mrb[31].mxu0  ;;  %v12186_v7 = vadd.f32 %v9924_v14, %v6312_v12 }
 0x435   : > { %v5801_v31 = vadd.f32 %v12152_v53, %v12110_v48 }
 0x436   : > { %v12188_v46 = vadd.f32 %v9927_v5, %v6315_v13 }
 0x438   : > { %v12192_v56 = vpop.f32.mrb[104].mxu1 }
 0x439   : > { %v6143_v58 = vpop.f32.mrb[32].mxu0  ;;  %v6362_v51 = vpop.f32.mrb[105].mxu1 }
 0x43a   : > { %v9930_v28 = vadd.f32 %v6143_v58, %v5790_v39  ;;  %v6145_v9 = vpop.f32.mrb[33].mxu0  ;;  %v12196_v11 = vpop.f32.mrb[106].mxu1 }
 0x43b   : > { %v6146_v22 = vpop.f32.mrb[34].mxu0  ;;  %v6365_v24 = vpop.f32.mrb[107].mxu1 }
 0x43c   : > { %v9933_v12 = vadd.f32 %v6146_v22, %v5793_v27  ;;  %v6148_v14 = vpop.f32.mrb[35].mxu0  ;;  %v12199_v13 = vadd.f32 %v9930_v28, %v12144_v17  ;;  %v5806_v22 = vadd.f32 %v12152_v53, %v12112_v57 }
 0x43d   : > { %v5809_v14 = vadd.f32 %v12152_v53, %v12114_v62 }
 0x43e   : > { %v12201_v16 = vadd.f32 %v9933_v12, %v6323_v19 }
 0x440   : > { %v12205_v29 = vpop.f32.mrb[108].mxu1 }
 0x441   : > { %v6151_v5 = vpop.f32.mrb[36].mxu0  ;;  %v6370_v61 = vpop.f32.mrb[109].mxu1 }
 0x442   : > { %v9936_v39 = vadd.f32 %v6151_v5, %v5798_v33  ;;  %v6153_v58 = vpop.f32.mrb[37].mxu0  ;;  %v12209_v51 = vpop.f32.mrb[110].mxu1 }
 0x443   : > { %v6154_v27 = vpop.f32.mrb[38].mxu0  ;;  %v6373_v9 = vpop.f32.mrb[111].mxu1 }
 0x444   : > { %v9939_v17 = vadd.f32 %v6154_v27, %v5801_v31  ;;  %v6156_v28 = vpop.f32.mrb[39].mxu0  ;;  %v12212_v19 = vadd.f32 %v9936_v39, %v12146_v32  ;;  %v5814_v27 = vadd.f32 %v12152_v53, %v12116_v6 }
 0x445   : > { %v5817_v28 = vadd.f32 %v12152_v53, %v12118_v10 }
 0x446   : > { %v12215_v43 = vadd.f32 %v9939_v17, %v12148_v45 }
 0x448   : > { %v12219_v24 = vpop.f32.mrb[112].mxu1 }
 0x449   : > { %v6159_v48 = vpop.f32.mrb[40].mxu0  ;;  %v6378_v12 = vpop.f32.mrb[113].mxu1 }
 0x44a   : > { %v9942_v33 = vadd.f32 %v6159_v48, %v5806_v22  ;;  %v6161_v5 = vpop.f32.mrb[41].mxu0  ;;  %v12223_v61 = vpop.f32.mrb[114].mxu1 }
 0x44b   : > { %v6162_v31 = vpop.f32.mrb[42].mxu0  ;;  %v6381_v32 = vpop.f32.mrb[115].mxu1 }
 0x44c   : > { %v9945_v39 = vadd.f32 %v6162_v31, %v5809_v14  ;;  %v6164_v58 = vpop.f32.mrb[43].mxu0  ;;  %v12226_v45 = vadd.f32 %v9942_v33, %v12156_v36  ;;  %v5822_v31 = vadd.f32 %v12152_v53, %v12120_v20 }
 0x44d   : > { %v5825_v58 = vadd.f32 %v12152_v53, %v12122_v23 }
 0x44e   : > { %v12229_v57 = vadd.f32 %v9945_v39, %v12160_v60 }
 0x450   : > { %v12233_v9 = vpop.f32.mrb[116].mxu1 }
 0x451   : > { %v6167_v62 = vpop.f32.mrb[44].mxu0  ;;  %v6386_v17 = vpop.f32.mrb[117].mxu1 }
 0x452   : > { %v9948_v22 = vadd.f32 %v6167_v62, %v5814_v27  ;;  %v6169_v48 = vpop.f32.mrb[45].mxu0  ;;  %v12237_v12 = vpop.f32.mrb[118].mxu1 }
 0x453   : > { %v6170_v14 = vpop.f32.mrb[46].mxu0  ;;  %v6389_v36 = vpop.f32.mrb[119].mxu1 }
 0x454   : > { %v9951_v33 = vadd.f32 %v6170_v14, %v5817_v28  ;;  %v6172_v5 = vpop.f32.mrb[47].mxu0  ;;  %v12240_v60 = vadd.f32 %v9948_v22, %v12168_v21  ;;  %v5830_v14 = vadd.f32 %v12152_v53, %v12124_v37 }
 0x455   : > { %v5833_v5 = vadd.f32 %v12152_v53, %v12126_v25 }
 0x456   : > { %v12243_v6 = vadd.f32 %v9951_v33, %v12172_v41 }
 0x458   : > { %v12247_v32 = vpop.f32.mrb[120].mxu1 }
 0x459   : > { %v6175_v10 = vpop.f32.mrb[48].mxu0  ;;  %v6394_v39 = vpop.f32.mrb[121].mxu1 }
 0x45a   : > { %v9954_v27 = vadd.f32 %v6175_v10, %v5822_v31  ;;  %v6177_v62 = vpop.f32.mrb[49].mxu0  ;;  %v12251_v17 = vpop.f32.mrb[122].mxu1 }
 0x45b   : > { %v6178_v28 = vpop.f32.mrb[50].mxu0  ;;  %v6397_v21 = vpop.f32.mrb[123].mxu1 }
 0x45c   : > { %v9957_v22 = vadd.f32 %v6178_v28, %v5825_v58  ;;  %v6180_v48 = vpop.f32.mrb[51].mxu0  ;;  %v12254_v41 = vadd.f32 %v9954_v27, %v12180_v4  ;;  %v5838_v28 = vadd.f32 %v12152_v53, %v12128_v47 }
 0x45d   : > { %v5841_v48 = vadd.f32 %v12152_v53, %v12130_v30 }
 0x45e   : > { %v12257_v20 = vadd.f32 %v9957_v22, %v12184_v26 }
 0x460   : > { %v12261_v36 = vpop.f32.mrb[124].mxu1 }
 0x461   : > { %v6183_v23 = vpop.f32.mrb[52].mxu0  ;;  %v12263_v33 = vpop.f32.mrb[125].mxu1 }
 0x462   : > { %v9960_v31 = vadd.f32 %v6183_v23, %v5830_v14  ;;  %v6185_v10 = vpop.f32.mrb[53].mxu0  ;;  %v12267_v39 = vpop.f32.mrb[126].mxu1 }
 0x463   : > { %v6186_v4 = vpop.f32.mrb[54].mxu0  ;;  %v12269_v58 = vpop.f32.mrb[127].mxu1 }
 0x464   : > { %v9963_v26 = vadd.f32 %v6186_v4, %v5833_v5  ;;  %v6188_v27 = vpop.f32.mrb[55].mxu0  ;;  %v12272_v62 = vadd.f32 %v9960_v31, %v12192_v56 }
 0x466   : > { %v12275_v37 = vadd.f32 %v9963_v26, %v12196_v11  ;;  %v5846_v26 = vadd.f32 %v12152_v53, %v12132_v34 }
 0x468   : > { %v12279_v21 = vpop.f32.mrb[128].mxu1 }
 0x469   : > { %v6191_v25 = vpop.f32.mrb[56].mxu0  ;;  %v12281_v22 = vpop.f32.mrb[129].mxu1 }
 0x46a   : > { %v9966_v14 = vadd.f32 %v6191_v25, %v5838_v28  ;;  %v6193_v23 = vpop.f32.mrb[57].mxu0  ;;  %v12285_v5 = vpop.f32.mrb[130].mxu1 }
 0x46b   : > { %v6194_v56 = vpop.f32.mrb[58].mxu0  ;;  %v12287_v31 = vpop.f32.mrb[131].mxu1 }
 0x46c   : > { %v9969_v11 = vadd.f32 %v6194_v56, %v5841_v48  ;;  %v6196_v10 = vpop.f32.mrb[59].mxu0  ;;  %v12290_v4 = vadd.f32 %v9966_v14, %v12205_v29  ;;  %v5849_v48 = vadd.f32 %v12152_v53, %v12134_v38  ;;  %v5854_v38 = vadd.f32 %v12152_v53, %v12136_v40 }
 0x46e   : > { %v12293_v47 = vadd.f32 %v9969_v11, %v12209_v51 }
 0x470   : > { %v9715_v27 = vpop.f32.mrb[132].mxu1 }
 0x471   : > { %v6199_v30 = vpop.f32.mrb[60].mxu0  ;;  %v12298_v28 = vadd.f32 %v12162_v15, %v9715_v27  ;;  %v12300_v25 = vpop.f32.mrb[133].mxu1 }
 0x472   : > { %v9972_v23 = vadd.f32 %v6199_v30, %v5846_v26  ;;  %v6201_v56 = vpop.f32.mrb[61].mxu0  ;;  %v9716_v29 = vpop.f32.mrb[134].mxu1 }
 0x473   : > { %13929 = vst [vmem:[#allocation43_spill] sm:$0xff] %v12298_v28  ;;  %v6202_v14 = vpop.f32.mrb[62].mxu0  ;;  %v12305_v51 = vadd.f32 %v12164_v18, %v9716_v29  ;;  %v12307_v11 = vpop.f32.mrb[135].mxu1  ;;  %v5857_v56 = vadd.f32 %v12152_v53, %v12138_v44 }
 0x474   : > { %v9975_v34 = vadd.f32 %v6202_v14, %v5849_v48  ;;  %v6204_v10 = vpop.f32.mrb[63].mxu0  ;;  %v12310_v8 = vadd.f32 %v9972_v23, %v12219_v24 }
 0x475   : > { %13930 = vst [vmem:[#allocation44_spill] sm:$0xff] %v12305_v51 }
 0x476   : > { %v12313_v15 = vadd.f32 %v9975_v34, %v12223_v61 }
 0x478   : > { %v9719_v26 = vpop.f32.mrb[136].mxu1 }
 0x479   : > { %v6207_v27 = vpop.f32.mrb[64].mxu0  ;;  %v12318_v30 = vadd.f32 %v12186_v7, %v9719_v26  ;;  %v6481_v18 = vpop.f32.mrb[137].mxu1 }
 0x47a   : > { %v9978_v48 = vadd.f32 %v6207_v27, %v5854_v38  ;;  %v6209_v29 = vpop.f32.mrb[65].mxu0  ;;  %v12323_v24 = vadd.f32 %v12174_v2, %v6481_v18  ;;  %v9720_v23 = vpop.f32.mrb[138].mxu1  ;;  %v5862_v2 = vadd.f32 %v12152_v53, %v12140_v50 }
 0x47b   : > { %13931 = vst [vmem:[#allocation45_spill] sm:$0xff] %v12318_v30  ;;  %v6210_v61 = vpop.f32.mrb[66].mxu0  ;;  %v12326_v14 = vadd.f32 %v12188_v46, %v9720_v23  ;;  %v6484_v40 = vpop.f32.mrb[139].mxu1 }
 0x47c   : > { %13932 = vst [vmem:[#allocation46_spill] sm:$0xff] %v12323_v24  ;;  %v9981_v34 = vadd.f32 %v6210_v61, %v5857_v56  ;;  %v6212_v10 = vpop.f32.mrb[67].mxu0  ;;  %v12329_v7 = vadd.f32 %v12176_v3, %v6484_v40  ;;  %v12332_v26 = vadd.f32 %v9978_v48, %v12233_v9  ;;  %v5865_v56 = vadd.f32 %v12152_v53, %v12142_v54 }
 0x47d   : > { %13933 = vst [vmem:[#allocation47_spill] sm:$0xff] %v12326_v14 }
 0x47e   : > { %13934 = vst [vmem:[#allocation48_spill] sm:$0xff] %v12329_v7  ;;  %v12335_v44 = vadd.f32 %v9981_v34, %v12237_v12 }
 0x480   : > { %v9723_v38 = vpop.f32.mrb[140].mxu1 }
 0x481   : > { %v6215_v27 = vpop.f32.mrb[68].mxu0  ;;  %v12340_v46 = vadd.f32 %v12212_v19, %v9723_v38  ;;  %v6497_v18 = vpop.f32.mrb[141].mxu1 }
 0x482   : > { %v9984_v3 = vadd.f32 %v6215_v27, %v5862_v2  ;;  %v6217_v29 = vpop.f32.mrb[69].mxu0  ;;  %v12345_v9 = vadd.f32 %v12199_v13, %v6497_v18  ;;  %v9724_v48 = vpop.f32.mrb[142].mxu1  ;;  %v5726_v13 = vadd.f32 %v12152_v53, %v12072_v55  ;;  %v5729_v27 = vadd.f32 %v12152_v53, %v12074_v35 }
 0x483   : > { %13935 = vst [vmem:[#allocation49_spill] sm:$0xff] %v12340_v46  ;;  %v6218_v12 = vpop.f32.mrb[70].mxu0  ;;  %v12348_v23 = vadd.f32 %v12215_v43, %v9724_v48  ;;  %v6500_v50 = vpop.f32.mrb[143].mxu1 }
 0x484   : > { %13936 = vst [vmem:[#allocation50_spill] sm:$0xff] %v12345_v9  ;;  %v9987_v61 = vadd.f32 %v6218_v12, %v5865_v56  ;;  %v6220_v40 = vpop.f32.mrb[71].mxu0  ;;  %v12351_v19 = vadd.f32 %v12201_v16, %v6500_v50  ;;  %v9985_v34 = vadd.f32 %v9984_v3, %v12247_v32 }
 0x485   : > { %13937 = vst [vmem:[#allocation51_spill] sm:$0xff] %v12348_v23 }
 0x486   : > { %13938 = vst [vmem:[#allocation52_spill] sm:$0xff] %v12351_v19  ;;  %v12355_v54 = vadd.f32 %v9987_v61, %v12251_v17 }
 0x488   : > { %v9727_v10 = vpop.f32.mrb[144].mxu1 }
 0x489   : > { %v6256_v2 = vpop.f32.mrb[0].mxu0  ;;  %v12360_v38 = vadd.f32 %v12240_v60, %v9727_v10  ;;  %v6513_v43 = vpop.f32.mrb[145].mxu1 }
 0x48a   : > { %v9892_v18 = vadd.f32 %v6256_v2, %v5726_v13  ;;  %v6258_v16 = vpop.f32.mrb[1].mxu0  ;;  %v12365_v56 = vadd.f32 %v12226_v45, %v6513_v43  ;;  %v9728_v32 = vpop.f32.mrb[146].mxu1  ;;  %v5734_v45 = vadd.f32 %v12152_v53, %v12076_v63 }
 0x48b   : > { %13939 = vst [vmem:[#allocation53_spill] sm:$0xff] %v12360_v38  ;;  %v6259_v17 = vpop.f32.mrb[2].mxu0  ;;  %v12368_v3 = vadd.f32 %v12243_v6, %v9728_v32  ;;  %v6516_v55 = vpop.f32.mrb[147].mxu1 }
 0x48c   : > { %13940 = vst [vmem:[#allocation54_spill] sm:$0xff] %v12365_v56  ;;  %v12371_v29 = vadd.f32 %v9892_v18, %v12263_v33  ;;  %v9894_v60 = vadd.f32 %v6259_v17, %v5729_v27  ;;  %v6261_v48 = vpop.f32.mrb[3].mxu0  ;;  %v12374_v12 = vadd.f32 %v12229_v57, %v6516_v55  ;;  %v5737_v33 = vadd.f32 %v12152_v53, %v12078_v42 }
 0x48d   : > { %13941 = vst [vmem:[#allocation55_spill] sm:$0xff] %v12368_v3 }
 0x48e   : > { %13942 = vst [vmem:[#allocation56_spill] sm:$0xff] %v12371_v29  ;;  %13943 = vst [vmem:[#allocation57_spill] sm:$0xff] %v12374_v12  ;;  %v12377_v35 = vadd.f32 %v9894_v60, %v12269_v58 }
 0x490   : > { %13944 = vst [vmem:[#allocation58_spill] sm:$0xff] %v12377_v35  ;;  %v9731_v50 = vpop.f32.mrb[148].mxu1 }
 0x491   : > { %v6264_v61 = vpop.f32.mrb[4].mxu0  ;;  %v12382_v6 = vadd.f32 %v12272_v62, %v9731_v50  ;;  %v6529_v40 = vpop.f32.mrb[149].mxu1 }
 0x492   : > { %v9896_v13 = vadd.f32 %v6264_v61, %v5734_v45  ;;  %v6266_v10 = vpop.f32.mrb[5].mxu0  ;;  %v12387_v57 = vadd.f32 %v12254_v41, %v6529_v40  ;;  %v9732_v2 = vpop.f32.mrb[150].mxu1  ;;  %v5742_v41 = vadd.f32 %v12152_v53, %v12080_v49 }
 0x493   : > { %13945 = vst [vmem:[#allocation59_spill] sm:$0xff] %v12382_v6  ;;  %v6267_v58 = vpop.f32.mrb[6].mxu0  ;;  %v12390_v43 = vadd.f32 %v12275_v37, %v9732_v2  ;;  %v6532_v63 = vpop.f32.mrb[151].mxu1 }
 0x494   : > { %13946 = vst [vmem:[#allocation60_spill] sm:$0xff] %v12387_v57  ;;  %v12393_v27 = vadd.f32 %v9896_v13, %v12261_v36  ;;  %v9898_v62 = vadd.f32 %v6267_v58, %v5737_v33  ;;  %v6269_v18 = vpop.f32.mrb[7].mxu0  ;;  %v12396_v16 = vadd.f32 %v12257_v20, %v6532_v63  ;;  %v5745_v36 = vadd.f32 %v12152_v53, %v12082_v52 }
 0x495   : > { %13947 = vst [vmem:[#allocation61_spill] sm:$0xff] %v12390_v43 }
 0x496   : > { %13948 = vst [vmem:[#allocation62_spill] sm:$0xff] %v12393_v27  ;;  %13949 = vst [vmem:[#allocation63_spill] sm:$0xff] %v12396_v16  ;;  %v12399_v42 = vadd.f32 %v9898_v62, %v12267_v39 }
 0x498   : > { %13950 = vst [vmem:[#allocation64_spill] sm:$0xff] %v12399_v42  ;;  %v9735_v32 = vpop.f32.mrb[152].mxu1 }
 0x499   : > { %v6272_v17 = vpop.f32.mrb[8].mxu0  ;;  %v12404_v37 = vadd.f32 %v12310_v8, %v9735_v32  ;;  %v6545_v55 = vpop.f32.mrb[153].mxu1 }
 0x49a   : > { %v9900_v60 = vadd.f32 %v6272_v17, %v5742_v41  ;;  %v6274_v48 = vpop.f32.mrb[9].mxu0  ;;  %v12409_v20 = vadd.f32 %v12290_v4, %v6545_v55  ;;  %v9736_v45 = vpop.f32.mrb[154].mxu1  ;;  %v5750_v4 = vadd.f32 %v12152_v53, %v12084_v59 }
 0x49b   : > { %13951 = vst [vmem:[#allocation65_spill] sm:$0xff] %v12404_v37  ;;  %v6275_v39 = vpop.f32.mrb[10].mxu0  ;;  %v12412_v50 = vadd.f32 %v12313_v15, %v9736_v45  ;;  %v6548_v49 = vpop.f32.mrb[155].mxu1 }
 0x49c   : > { %13952 = vst [vmem:[#allocation66_spill] sm:$0xff] %v12409_v20  ;;  %v12415_v61 = vadd.f32 %v9900_v60, %v12281_v22  ;;  %v9902_v8 = vadd.f32 %v6275_v39, %v5745_v36  ;;  %v6277_v40 = vpop.f32.mrb[11].mxu0  ;;  %v12418_v33 = vadd.f32 %v12293_v47, %v6548_v49  ;;  %v5753_v22 = vadd.f32 %v12152_v53, %v12086_v1  ;;  %v13963_v36 = vld [vmem:[#allocation42_spill] sm:$0xff] }
 0x49d   : > { %13953 = vst [vmem:[#allocation67_spill] sm:$0xff] %v12412_v50 }
 0x49e   : > { %13954 = vst [vmem:[#allocation68_spill] sm:$0xff] %v12415_v61  ;;  %13955 = vst [vmem:[#allocation69_spill] sm:$0xff] %v12418_v33  ;;  %v12421_v52 = vadd.f32 %v9902_v8, %v12287_v31 }
 0x4a0   : > { %13956 = vst [vmem:[#allocation70_spill] sm:$0xff] %v12421_v52  ;;  %v9739_v13 = vpop.f32.mrb[156].mxu1 }
 0x4a1   : > { %v6280_v10 = vpop.f32.mrb[12].mxu0  ;;  %v12425_v2 = vadd.f32 %v9985_v34, %v9739_v13  ;;  %v6561_v15 = vpop.f32.mrb[157].mxu1 }
 0x4a2   : > { %v9904_v58 = vadd.f32 %v6280_v10, %v5750_v4  ;;  %v6282_v63 = vpop.f32.mrb[13].mxu0  ;;  %v12430_v62 = vadd.f32 %v12332_v26, %v6561_v15  ;;  %v9740_v47 = vpop.f32.mrb[158].mxu1  ;;  %v5758_v26 = vadd.f32 %v12152_v53, %v12088_v0 }
 0x4a3   : > { %13957 = vst [vmem:[#allocation71_spill] sm:$0xff] %v12425_v2  ;;  %v6283_v18 = vpop.f32.mrb[14].mxu0  ;;  %v12433_v31 = vadd.f32 %v12355_v54, %v9740_v47  ;;  %v6564_v41 = vpop.f32.mrb[159].mxu1  ;;  %v5761_v54 = vadd.f32 %v12152_v53, %v13963_v36 }
 0x4a4   : > { %13958 = vst [vmem:[#allocation72_spill] sm:$0xff] %v12430_v62  ;;  %v12436_v59 = vadd.f32 %v9904_v58, %v12279_v21  ;;  %v9906_v34 = vadd.f32 %v6283_v18, %v5753_v22  ;;  %v6285_v32 = vpop.f32.mrb[15].mxu0  ;;  %v12439_v17 = vadd.f32 %v12335_v44, %v6564_v41 }
 0x4a5   : > { %13959 = vst [vmem:[#allocation73_spill] sm:$0xff] %v12433_v31 }
 0x4a6   : > { %13960 = vst [vmem:[#allocation74_spill] sm:$0xff] %v12436_v59  ;;  %13961 = vst [vmem:[#allocation75_spill] sm:$0xff] %v12439_v17  ;;  %v12442_v1 = vadd.f32 %v9906_v34, %v12285_v5 }
 0x4a8   : > { %13962 = vst [vmem:[#allocation76_spill] sm:$0xff] %v12442_v1 }
 0x4a9   : > { %v6288_v55 = vpop.f32.mrb[16].mxu0 }
 0x4aa   : > { %v9908_v60 = vadd.f32 %v6288_v55, %v5758_v26  ;;  %v6290_v48 = vpop.f32.mrb[17].mxu0  ;;  %6579 = sbr.rel (%p9297_p8) target bundleno = 2163 (0x873), region = 88 }
 0x4ab   : > { %v6291_v45 = vpop.f32.mrb[18].mxu0 }
 0x4ac   : > { %v12449_v21 = vadd.f32 %v9908_v60, %v12300_v25  ;;  %v9910_v39 = vadd.f32 %v6291_v45, %v5761_v54  ;;  %v6293_v49 = vpop.f32.mrb[19].mxu0 }
 0x4ae   : > { %13964 = vst [vmem:[#allocation42_spill] sm:$0xff] %v12449_v21  ;;  %v12452_v44 = vadd.f32 %v9910_v39, %v12307_v11 }
 0x4b0   : > { %13965 = vst [vmem:[#allocation77_spill] sm:$0xff] %v12452_v44 }
 0x4b1   : > { %s13967_s27 = sld [smem:[#allocation117_spill]]  ;;  %v11061_v5 = vmov 0   ;;  %vm11063_vm2 = vmmov 0   ;;  %vm7893_vm3 = vcmask (!%p8882_p3), 1043457   ;;  %vm7894_vm4 = vsmask.f32 (!%p8882_p3), 7942 }
 0x4b2   : > { %10692 = vset.pattern.permute.xlu1 %v11061_v5  ;;  %10691 = vset.pattern.permute.xlu0 %v11061_v5  ;;  %vm7494_vm5 = vsmask.f32 (!%p8882_p3), 1280  ;;  %vm7495_vm6 = vsmask.f32 (!%p8882_p3), 5392  ;;  %vm13252_vm7 = vmand (!%p8882_p3), %vm7893_vm3, %vm7894_vm4  ;;  %vm7934_vm9 = vcmask (!%p8882_p3), 1041408  }
 0x4b3   : > { %vm13262_vm8 = vmor (!%p8882_p3), %vm7494_vm5, %vm7495_vm6 }
 0x4b4   : > { %vm7935_vm10 = vmand (!%p8882_p3), %vm7934_vm9, %vm7494_vm5 }
 0x4b7   : > { %s13968_s17 = smov %s13967_s27  ;;  %v6582_v0 = vld [vmem:[%s13967_s27 + $0x10] sm:$0xff] }
 0x4b8   : > { %v6580_v53 = vld [vmem:[%s13968_s17] sm:$0xff]  ;;  %6628 = vperm.xlu1 %10692, %v6582_v0   ;;  %v6583_v25 = vld [vmem:[%s13968_s17 + $0x18] sm:$0xff]  ;;  %v6581_v11 = vld [vmem:[%s13968_s17 + $0x8] sm:$0xff] }
 0x4b9   : > { %6618 = vperm.xlu0 %10691, %v6580_v53   ;;  %v6585_v8 = vld [vmem:[%s13968_s17 + $0x28] sm:$0xff]  ;;  %v6584_v40 = vld [vmem:[%s13968_s17 + $0x20] sm:$0xff]  ;;  %v6587_v4 = vld [vmem:[%s13968_s17 + $0x38] sm:$0xff] }
 0x4ba   : > { %v6586_v13 = vld [vmem:[%s13968_s17 + $0x30] sm:$0xff]  ;;  %v6589_v10 = vld [vmem:[%s13968_s17 + $0x48] sm:$0xff]  ;;  %v6588_v15 = vld [vmem:[%s13968_s17 + $0x40] sm:$0xff] }
 0x4bb   : > { %v6591_v22 = vld [vmem:[%s13968_s17 + $0x58] sm:$0xff]  ;;  %v6590_v58 = vld [vmem:[%s13968_s17 + $0x50] sm:$0xff]  ;;  %v6593_v63 = vld [vmem:[%s13968_s17 + $0x68] sm:$0xff] }
 0x4bc   : > { %6633 = vperm.xlu1 %10692, %v6583_v25   ;;  %v6592_v47 = vld [vmem:[%s13968_s17 + $0x60] sm:$0xff]  ;;  %v6595_v18 = vld [vmem:[%s13968_s17 + $0x78] sm:$0xff]  ;;  %v6594_v41 = vld [vmem:[%s13968_s17 + $0x70] sm:$0xff] }
 0x4bd   : > { %6623 = vperm.xlu0 %10691, %v6581_v11   ;;  %v6597_v34 = vld [vmem:[%s13968_s17 + $0x88] sm:$0xff]  ;;  %v6596_v32 = vld [vmem:[%s13968_s17 + $0x80] sm:$0xff]  ;;  %v6599_v26 = vld [vmem:[%s13968_s17 + $0x98] sm:$0xff] }
 0x4be   : > { %v6598_v55 = vld [vmem:[%s13968_s17 + $0x90] sm:$0xff]  ;;  %v6601_v36 = vld [vmem:[%s13968_s17 + $0xa8] sm:$0xff]  ;;  %v6600_v54 = vld [vmem:[%s13968_s17 + $0xa0] sm:$0xff] }
 0x4bf   : > { %v6603_v60 = vld [vmem:[%s13968_s17 + $0xb8] sm:$0xff]  ;;  %v6602_v48 = vld [vmem:[%s13968_s17 + $0xb0] sm:$0xff]  ;;  %v6605_v45 = vld [vmem:[%s13968_s17 + $0xc8] sm:$0xff] }
 0x4c0   : > { %6643 = vperm.xlu1 %10692, %v6585_v8   ;;  %v6604_v39 = vld [vmem:[%s13968_s17 + $0xc0] sm:$0xff]  ;;  %v6607_v49 = vld [vmem:[%s13968_s17 + $0xd8] sm:$0xff]  ;;  %v6606_v0 = vld [vmem:[%s13968_s17 + $0xd0] sm:$0xff] }
 0x4c1   : > { %6638 = vperm.xlu0 %10691, %v6584_v40   ;;  %v6609_v53 = vld [vmem:[%s13968_s17 + $0xe8] sm:$0xff]  ;;  %v6608_v5 = vld [vmem:[%s13968_s17 + $0xe0] sm:$0xff]  ;;  %v6611_v8 = vld [vmem:[%s13968_s17 + $0xf8] sm:$0xff] }
 0x4c2   : > { %v6874_v25 = vld [vmem:[#allocation14] sm:$0xff]  ;;  %v6875_v11 = vld [vmem:[#allocation14 + $0x8] sm:$0xff] }
 0x4c3   : > { %v6610_v40 = vld [vmem:[%s13968_s17 + $0xf0] sm:$0xff] }
 0x4c4   : > { %6653 = vperm.xlu1 %10692, %v6587_v4   ;;  %v9812_v4 = vpack.c.bf16 %v6875_v11, %v6874_v25  ;;  %v11064_v25 = vmov 0.0   ;;  %v6888_v11 = vld [vmem:[#allocation14 + $0x70] sm:$0xff] }
 0x4c5   : > { %6648 = vperm.xlu0 %10691, %v6586_v13   ;;  %v11062_v13 = vmov 0.0|0.0   ;;  %9773 = vmatprep.mubr.msk.f32.mxu0 %vm11063_vm2, %v11064_v25 }
 0x4c6   : > { %9811 = vmatprep.subr.bf16.mxu0 %v11062_v13  ;;  %9835 = vmatprep.subr.bf16.mxu1 %v11062_v13 }
 0x4c7   : > { %9813 = vmatpush3.bf16.msra.mxu0 %v9812_v4  ;;  %9837 = vmatpush3.bf16.msra.mxu1 %v9812_v4 }
 0x4c8   : > { %6663 = vperm.xlu1 %10692, %v6589_v10   ;;  %v6876_v10 = vld [vmem:[#allocation14 + $0x10] sm:$0xff]  ;;  %9814 = vmatprep.subr.bf16.mxu0 %v11062_v13 }
 0x4c9   : > { %6658 = vperm.xlu0 %10691, %v6588_v15   ;;  %v6877_v15 = vld [vmem:[#allocation14 + $0x18] sm:$0xff]  ;;  %9838 = vmatprep.subr.bf16.mxu1 %v11062_v13 }
 0x4ca   : > { %9808 = vmatprep.mubr.msk.f32.mxu1 %vm11063_vm2, %v11064_v25 }
 0x4cc   : > { %6673 = vperm.xlu1 %10692, %v6591_v22   ;;  %v6613_v22 = vld [vmem:[%s13968_s17 + $0x108] sm:$0xff] }
 0x4cd   : > { %6668 = vperm.xlu0 %10691, %v6590_v58   ;;  %v6612_v58 = vld [vmem:[%s13968_s17 + $0x100] sm:$0xff] }
 0x4d0   : > { %6683 = vperm.xlu1 %10692, %v6593_v63   ;;  %v9815_v63 = vpack.c.bf16 %v6877_v15, %v6876_v10 }
 0x4d1   : > { %6678 = vperm.xlu0 %10691, %v6592_v47   ;;  %v6878_v47 = vld [vmem:[#allocation14 + $0x20] sm:$0xff] }
 0x4d2   : > { %9816 = vmatpush3.bf16.msra.mxu0 %v9815_v63  ;;  %9840 = vmatpush3.bf16.msra.mxu1 %v9815_v63 }
 0x4d3   : > { %9817 = vmatprep.subr.bf16.mxu0 %v11062_v13  ;;  %9841 = vmatprep.subr.bf16.mxu1 %v11062_v13 }
 0x4d4   : > { %6693 = vperm.xlu1 %10692, %v6595_v18   ;;  %v6879_v18 = vld [vmem:[#allocation14 + $0x28] sm:$0xff] }
 0x4d5   : > { %6688 = vperm.xlu0 %10691, %v6594_v41   ;;  %v6615_v41 = vld [vmem:[%s13968_s17 + $0x118] sm:$0xff] }
 0x4d8   : > { %6703 = vperm.xlu1 %10692, %v6597_v34   ;;  %v6614_v34 = vld [vmem:[%s13968_s17 + $0x110] sm:$0xff] }
 0x4d9   : > { %6698 = vperm.xlu0 %10691, %v6596_v32   ;;  %v9818_v32 = vpack.c.bf16 %v6879_v18, %v6878_v47 }
 0x4db   : > { %9819 = vmatpush3.bf16.msra.mxu0 %v9818_v32  ;;  %9843 = vmatpush3.bf16.msra.mxu1 %v9818_v32 }
 0x4dc   : > { %6713 = vperm.xlu1 %10692, %v6599_v26   ;;  %v6880_v26 = vld [vmem:[#allocation14 + $0x30] sm:$0xff]  ;;  %9820 = vmatprep.subr.bf16.mxu0 %v11062_v13 }
 0x4dd   : > { %6708 = vperm.xlu0 %10691, %v6598_v55   ;;  %v6881_v55 = vld [vmem:[#allocation14 + $0x38] sm:$0xff]  ;;  %9844 = vmatprep.subr.bf16.mxu1 %v11062_v13 }
 0x4e0   : > { %6723 = vperm.xlu1 %10692, %v6601_v36   ;;  %v9821_v36 = vpack.c.bf16 %v6881_v55, %v6880_v26 }
 0x4e1   : > { %6718 = vperm.xlu0 %10691, %v6600_v54   ;;  %v6882_v54 = vld [vmem:[#allocation14 + $0x40] sm:$0xff] }
 0x4e2   : > { %9822 = vmatpush3.bf16.msra.mxu0 %v9821_v36  ;;  %9846 = vmatpush3.bf16.msra.mxu1 %v9821_v36 }
 0x4e3   : > { %9823 = vmatprep.subr.bf16.mxu0 %v11062_v13  ;;  %9847 = vmatprep.subr.bf16.mxu1 %v11062_v13 }
 0x4e4   : > { %6733 = vperm.xlu1 %10692, %v6603_v60   ;;  %v6883_v60 = vld [vmem:[#allocation14 + $0x48] sm:$0xff] }
 0x4e5   : > { %6728 = vperm.xlu0 %10691, %v6602_v48   ;;  %v9824_v48 = vpack.c.bf16 %v6883_v60, %v6882_v54 }
 0x4e7   : > { %9825 = vmatpush3.bf16.msra.mxu0 %v9824_v48  ;;  %9849 = vmatpush3.bf16.msra.mxu1 %v9824_v48 }
 0x4e8   : > { %6743 = vperm.xlu1 %10692, %v6605_v45   ;;  %9826 = vmatprep.subr.bf16.mxu0 %v11062_v13  ;;  %v6884_v45 = vld [vmem:[#allocation14 + $0x50] sm:$0xff] }
 0x4e9   : > { %6738 = vperm.xlu0 %10691, %v6604_v39   ;;  %v6885_v39 = vld [vmem:[#allocation14 + $0x58] sm:$0xff]  ;;  %9850 = vmatprep.subr.bf16.mxu1 %v11062_v13 }
 0x4ec   : > { %6753 = vperm.xlu1 %10692, %v6607_v49   ;;  %v9827_v49 = vpack.c.bf16 %v6885_v39, %v6884_v45 }
 0x4ed   : > { %6748 = vperm.xlu0 %10691, %v6606_v0   ;;  %v6886_v0 = vld [vmem:[#allocation14 + $0x60] sm:$0xff] }
 0x4ee   : > { %9828 = vmatpush3.bf16.msra.mxu0 %v9827_v49  ;;  %9852 = vmatpush3.bf16.msra.mxu1 %v9827_v49 }
 0x4ef   : > { %9829 = vmatprep.subr.bf16.mxu0 %v11062_v13  ;;  %9853 = vmatprep.subr.bf16.mxu1 %v11062_v13 }
 0x4f0   : > { %6763 = vperm.xlu1 %10692, %v6609_v53   ;;  %v6887_v53 = vld [vmem:[#allocation14 + $0x68] sm:$0xff] }
 0x4f1   : > { %6758 = vperm.xlu0 %10691, %v6608_v5   ;;  %v9830_v5 = vpack.c.bf16 %v6887_v53, %v6886_v0 }
 0x4f3   : > { %9831 = vmatpush3.bf16.msra.mxu0 %v9830_v5  ;;  %9855 = vmatpush3.bf16.msra.mxu1 %v9830_v5 }
 0x4f4   : > { %6773 = vperm.xlu1 %10692, %v6611_v8   ;;  %v6889_v8 = vld [vmem:[#allocation14 + $0x78] sm:$0xff]  ;;  %9832 = vmatprep.subr.bf16.mxu0 %v11062_v13 }
 0x4f5   : > { %6768 = vperm.xlu0 %10691, %v6610_v40   ;;  %v9833_v40 = vpack.c.bf16 %v6889_v8, %v6888_v11  ;;  %9856 = vmatprep.subr.bf16.mxu1 %v11062_v13 }
 0x4f7   : > { %9834 = vmatpush3.bf16.msra.mxu0 %v9833_v40  ;;  %9858 = vmatpush3.bf16.msra.mxu1 %v9833_v40 }
 0x4f8   : > { %6783 = vperm.xlu1 %10692, %v6613_v22  }
 0x4f9   : > { %6778 = vperm.xlu0 %10691, %v6612_v58  }
 0x4fc   : > { %6793 = vperm.xlu1 %10692, %v6615_v41  }
 0x4fd   : > { %6788 = vperm.xlu0 %10691, %v6614_v34  }
 0x537   : > { %v12579_v4 = vpop.permute.xlu1 %6628 }
 0x538   : > { %13969 = vst [vmem:[#allocation78_spill] sm:$0xff] %v12579_v4  ;;  %v12581_v10 = vpop.permute.xlu0 %6618  ;;  %v6798_v47 = vmul.f32 %v12579_v4, %v12393_v27 }
 0x539   : > { %v6796_v58 = vmul.f32 %v12581_v10, %v12371_v29 }
 0x53b   : > { %v12583_v15 = vpop.permute.xlu1 %6633 }
 0x53c   : > { %13970 = vst [vmem:[#allocation79_spill] sm:$0xff] %v12583_v15  ;;  %v12585_v22 = vpop.permute.xlu0 %6623  ;;  %v6799_v34 = vmul.f32 %v12583_v15, %v12399_v42 }
 0x53d   : > { %v6797_v63 = vmul.f32 %v12585_v22, %v12377_v35 }
 0x53f   : > { %v6832_v13 = vadd.f32 %v6797_v63, %v6796_v58  ;;  %v12593_v18 = vpop.permute.xlu1 %6643 }
 0x540   : > { %13971 = vst [vmem:[#allocation80_spill] sm:$0xff] %v12593_v18  ;;  %v12595_v41 = vpop.permute.xlu0 %6638  ;;  %v6801_v60 = vmul.f32 %v12593_v18, %v12421_v52 }
 0x541   : > { %13972 = vst [vmem:[#allocation81_spill] sm:$0xff] %v12595_v41  ;;  %v6833_v32 = vadd.f32 %v6832_v13, %v6798_v47  ;;  %v6800_v55 = vmul.f32 %v12595_v41, %v12415_v61 }
 0x543   : > { %v6834_v26 = vadd.f32 %v6833_v32, %v6799_v34  ;;  %v12601_v36 = vpop.permute.xlu1 %6653 }
 0x544   : > { %13973 = vst [vmem:[#allocation82_spill] sm:$0xff] %v12601_v36  ;;  %v12603_v54 = vpop.permute.xlu0 %6648  ;;  %v6803_v53 = vmul.f32 %v12601_v36, %v12442_v1 }
 0x545   : > { %13974 = vst [vmem:[#allocation83_spill] sm:$0xff] %v12603_v54  ;;  %v6835_v48 = vadd.f32 %v6834_v26, %v6800_v55  ;;  %v6802_v39 = vmul.f32 %v12603_v54, %v12436_v59 }
 0x547   : > { %v6836_v45 = vadd.f32 %v6835_v48, %v6801_v60  ;;  %v12609_v49 = vpop.permute.xlu1 %6663 }
 0x548   : > { %13975 = vst [vmem:[#allocation84_spill] sm:$0xff] %v12609_v49  ;;  %v12611_v0 = vpop.permute.xlu0 %6658  ;;  %v6805_v58 = vmul.f32 %v12609_v49, %v12452_v44 }
 0x549   : > { %13976 = vst [vmem:[#allocation85_spill] sm:$0xff] %v12611_v0  ;;  %v6837_v5 = vadd.f32 %v6836_v45, %v6802_v39  ;;  %v6804_v11 = vmul.f32 %v12611_v0, %v12449_v21 }
 0x54b   : > { %v6838_v25 = vadd.f32 %v6837_v5, %v6803_v53  ;;  %v12617_v8 = vpop.permute.xlu1 %6673 }
 0x54c   : > { %13977 = vst [vmem:[#allocation86_spill] sm:$0xff] %v12617_v8  ;;  %v12619_v40 = vpop.permute.xlu0 %6668  ;;  %v6807_v26 = vmul.f32 %v12617_v8, %v12305_v51 }
 0x54d   : > { %13978 = vst [vmem:[#allocation87_spill] sm:$0xff] %v12619_v40  ;;  %v6839_v63 = vadd.f32 %v6838_v25, %v6804_v11  ;;  %v6806_v13 = vmul.f32 %v12619_v40, %v12298_v28 }
 0x54f   : > { %v6840_v47 = vadd.f32 %v6839_v63, %v6805_v58  ;;  %v12625_v34 = vpop.permute.xlu1 %6683 }
 0x550   : > { %13979 = vst [vmem:[#allocation88_spill] sm:$0xff] %v12625_v34  ;;  %v12627_v32 = vpop.permute.xlu0 %6678  ;;  %v6809_v53 = vmul.f32 %v12625_v34, %v12329_v7 }
 0x551   : > { %13980 = vst [vmem:[#allocation89_spill] sm:$0xff] %v12627_v32  ;;  %v6841_v55 = vadd.f32 %v6840_v47, %v6806_v13  ;;  %v6808_v48 = vmul.f32 %v12627_v32, %v12323_v24 }
 0x553   : > { %v6842_v60 = vadd.f32 %v6841_v55, %v6807_v26  ;;  %v12633_v45 = vpop.permute.xlu1 %6693 }
 0x554   : > { %13981 = vst [vmem:[#allocation90_spill] sm:$0xff] %v12633_v45  ;;  %v12635_v39 = vpop.permute.xlu0 %6688  ;;  %v6811_v47 = vmul.f32 %v12633_v45, %v12326_v14 }
 0x555   : > { %13982 = vst [vmem:[#allocation91_spill] sm:$0xff] %v12635_v39  ;;  %v6843_v5 = vadd.f32 %v6842_v60, %v6808_v48  ;;  %v6810_v11 = vmul.f32 %v12635_v39, %v12318_v30 }
 0x557   : > { %v6844_v25 = vadd.f32 %v6843_v5, %v6809_v53  ;;  %v12641_v58 = vpop.permute.xlu1 %6703 }
 0x558   : > { %13983 = vst [vmem:[#allocation92_spill] sm:$0xff] %v12641_v58  ;;  %v12643_v63 = vpop.permute.xlu0 %6698  ;;  %v6813_v60 = vmul.f32 %v12641_v58, %v12351_v19 }
 0x559   : > { %13984 = vst [vmem:[#allocation93_spill] sm:$0xff] %v12643_v63  ;;  %v6845_v13 = vadd.f32 %v6844_v25, %v6810_v11  ;;  %v6812_v55 = vmul.f32 %v12643_v63, %v12345_v9 }
 0x55b   : > { %v6846_v26 = vadd.f32 %v6845_v13, %v6811_v47  ;;  %v12649_v32 = vpop.permute.xlu1 %6713 }
 0x55c   : > { %13985 = vst [vmem:[#allocation94_spill] sm:$0xff] %v12649_v32  ;;  %v12651_v34 = vpop.permute.xlu0 %6708  ;;  %v6815_v25 = vmul.f32 %v12649_v32, %v12348_v23 }
 0x55d   : > { %13986 = vst [vmem:[#allocation95_spill] sm:$0xff] %v12651_v34  ;;  %v6847_v48 = vadd.f32 %v6846_v26, %v6812_v55  ;;  %v6814_v5 = vmul.f32 %v12651_v34, %v12340_v46 }
 0x55f   : > { %v6848_v53 = vadd.f32 %v6847_v48, %v6813_v60  ;;  %v12657_v39 = vpop.permute.xlu1 %6723 }
 0x560   : > { %13987 = vst [vmem:[#allocation96_spill] sm:$0xff] %v12657_v39  ;;  %v12659_v45 = vpop.permute.xlu0 %6718  ;;  %v6817_v26 = vmul.f32 %v12657_v39, %v12374_v12 }
 0x561   : > { %13988 = vst [vmem:[#allocation97_spill] sm:$0xff] %v12659_v45  ;;  %v6849_v11 = vadd.f32 %v6848_v53, %v6814_v5  ;;  %v6816_v13 = vmul.f32 %v12659_v45, %v12365_v56 }
 0x563   : > { %v6850_v47 = vadd.f32 %v6849_v11, %v6815_v25  ;;  %v12665_v63 = vpop.permute.xlu1 %6733 }
 0x564   : > { %13989 = vst [vmem:[#allocation98_spill] sm:$0xff] %v12665_v63  ;;  %v12667_v58 = vpop.permute.xlu0 %6728  ;;  %v6819_v53 = vmul.f32 %v12665_v63, %v12368_v3 }
 0x565   : > { %13990 = vst [vmem:[#allocation99_spill] sm:$0xff] %v12667_v58  ;;  %v6851_v55 = vadd.f32 %v6850_v47, %v6816_v13  ;;  %v6818_v48 = vmul.f32 %v12667_v58, %v12360_v38 }
 0x567   : > { %v6852_v60 = vadd.f32 %v6851_v55, %v6817_v26  ;;  %v12673_v34 = vpop.permute.xlu1 %6743 }
 0x568   : > { %13991 = vst [vmem:[#allocation100_spill] sm:$0xff] %v12673_v34  ;;  %v12675_v32 = vpop.permute.xlu0 %6738  ;;  %v6821_v47 = vmul.f32 %v12673_v34, %v12396_v16 }
 0x569   : > { %13992 = vst [vmem:[#allocation101_spill] sm:$0xff] %v12675_v32  ;;  %v6853_v5 = vadd.f32 %v6852_v60, %v6818_v48  ;;  %v6820_v11 = vmul.f32 %v12675_v32, %v12387_v57 }
 0x56b   : > { %v6854_v25 = vadd.f32 %v6853_v5, %v6819_v53  ;;  %v12681_v45 = vpop.permute.xlu1 %6753 }
 0x56c   : > { %13993 = vst [vmem:[#allocation102_spill] sm:$0xff] %v12681_v45  ;;  %v12683_v39 = vpop.permute.xlu0 %6748  ;;  %v6823_v60 = vmul.f32 %v12681_v45, %v12390_v43 }
 0x56d   : > { %13994 = vst [vmem:[#allocation103_spill] sm:$0xff] %v12683_v39  ;;  %v6855_v13 = vadd.f32 %v6854_v25, %v6820_v11  ;;  %v6822_v55 = vmul.f32 %v12683_v39, %v12382_v6 }
 0x56f   : > { %v6856_v26 = vadd.f32 %v6855_v13, %v6821_v47  ;;  %v12689_v58 = vpop.permute.xlu1 %6763 }
 0x570   : > { %13995 = vst [vmem:[#allocation104_spill] sm:$0xff] %v12689_v58  ;;  %v12691_v63 = vpop.permute.xlu0 %6758  ;;  %v6825_v25 = vmul.f32 %v12689_v58, %v12418_v33 }
 0x571   : > { %13996 = vst [vmem:[#allocation105_spill] sm:$0xff] %v12691_v63  ;;  %v6857_v48 = vadd.f32 %v6856_v26, %v6822_v55  ;;  %v6824_v5 = vmul.f32 %v12691_v63, %v12409_v20 }
 0x573   : > { %v6858_v53 = vadd.f32 %v6857_v48, %v6823_v60  ;;  %v12697_v32 = vpop.permute.xlu1 %6773 }
 0x574   : > { %13997 = vst [vmem:[#allocation106_spill] sm:$0xff] %v12697_v32  ;;  %v12699_v34 = vpop.permute.xlu0 %6768  ;;  %v6827_v26 = vmul.f32 %v12697_v32, %v12412_v50 }
 0x575   : > { %13998 = vst [vmem:[#allocation107_spill] sm:$0xff] %v12699_v34  ;;  %v6859_v11 = vadd.f32 %v6858_v53, %v6824_v5  ;;  %v6826_v13 = vmul.f32 %v12699_v34, %v12404_v37 }
 0x577   : > { %v6860_v47 = vadd.f32 %v6859_v11, %v6825_v25  ;;  %v12705_v39 = vpop.permute.xlu1 %6783 }
 0x578   : > { %13999 = vst [vmem:[#allocation108_spill] sm:$0xff] %v12705_v39  ;;  %v12707_v45 = vpop.permute.xlu0 %6778  ;;  %v6829_v53 = vmul.f32 %v12705_v39, %v12439_v17  ;;  %v6960_v39 = vlaneseq }
 0x579   : > { %14000 = vst [vmem:[#allocation109_spill] sm:$0xff] %v12707_v45  ;;  %v6861_v55 = vadd.f32 %v6860_v47, %v6826_v13  ;;  %v6828_v48 = vmul.f32 %v12707_v45, %v12430_v62 }
 0x57b   : > { %v6862_v60 = vadd.f32 %v6861_v55, %v6827_v26  ;;  %v12717_v25 = vpop.permute.xlu1 %6793 }
 0x57c   : > { %v12713_v63 = vpop.permute.xlu0 %6788  ;;  %14001 = vst [vmem:[#allocation110_spill] sm:$0xff] %v12717_v25  ;;  %v6831_v32 = vmul.f32 %v12717_v25, %v12433_v31 }
 0x57d   : > { %v6863_v5 = vadd.f32 %v6862_v60, %v6828_v48  ;;  %v6830_v34 = vmul.f32 %v12713_v63, %v12425_v2 }
 0x57f   : > { %v6864_v11 = vadd.f32 %v6863_v5, %v6829_v53  ;;  %v12723_v53 = vshrl.u32 %v6960_v39, 7 }
 0x581   : > { %v6865_v47 = vadd.f32 %v6864_v11, %v6830_v34  ;;  %v13807_v5 = vsub.s32 0, %v12723_v53 }
 0x583   : > { %v6866_v13 = vadd.f32 %v6865_v47, %v6831_v32 }
 0x585   : > { %v6867_v26 = vrot.slane %v6866_v13, 4 }
 0x587   : > { %v6868_v55 = vadd.f32 %v6867_v26, %v6866_v13 }
 0x589   : > { %v6869_v45 = vrot.slane %v6868_v55, 2 }
 0x58b   : > { %v6870_v58 = vadd.f32 %v6869_v45, %v6868_v55 }
 0x58d   : > { %v6871_v62 = vrot.slane %v6870_v58, 1 }
 0x58f   : > { %v6872_v50 = vadd.f32 %v6871_v62, %v6870_v58 }
 0x591   : > { %v6873_v37 = vmul.f32 0.00390625, %v6872_v50 }
 0x593   : > { %9774 = vmatmul.mubr.f32.vlgmr.msra.gmra.mrb[0].mxu0 %v6873_v37 }
 0x666   : > { %v6956_v60 = vpop.f32.mrb[0].mxu0 }
 0x667   : > { %v9775_v48 = vpop.f32.mrb[1].mxu0  ;;  %v12728_v25 = vrot.slane %v6956_v60, %v13807_v5 }
 0x669   : > { %v12732_v34 = vsub.f32 %v12371_v29, %v12728_v25  ;;  %v12736_v62 = vsub.f32 %v12377_v35, %v12728_v25  ;;  %v12740_v37 = vsub.f32 %v12393_v27, %v12728_v25  ;;  %v12748_v45 = vsub.f32 %v12399_v42, %v12728_v25  ;;  %v14002_v27 = vld [vmem:[#allocation89_spill] sm:$0xff]  ;;  %v14003_v35 = vld [vmem:[#allocation88_spill] sm:$0xff]  ;;  %v14004_v29 = vld [vmem:[#allocation91_spill] sm:$0xff] }
 0x66a   : > { %v12752_v39 = vsub.f32 %v12415_v61, %v12728_v25  ;;  %v12760_v13 = vsub.f32 %v12421_v52, %v12728_v25  ;;  %v12766_v55 = vsub.f32 %v12436_v59, %v12728_v25  ;;  %v12780_v59 = vsub.f32 %v12449_v21, %v12728_v25 }
 0x66b   : > { %v7000_v50 = vmul.f32 %v12732_v34, %v12732_v34  ;;  %v7001_v32 = vmul.f32 %v12736_v62, %v12736_v62  ;;  %v7002_v58 = vmul.f32 %v12740_v37, %v12740_v37  ;;  %v7003_v26 = vmul.f32 %v12748_v45, %v12748_v45 }
 0x66c   : > { %v7004_v60 = vmul.f32 %v12752_v39, %v12752_v39  ;;  %v7006_v42 = vmul.f32 %v12766_v55, %v12766_v55  ;;  %v7008_v21 = vmul.f32 %v12780_v59, %v12780_v59 }
 0x66d   : > { %v7036_v11 = vmul.f32 %v7000_v50, %v12581_v10  ;;  %v7037_v47 = vmul.f32 %v7001_v32, %v12585_v22  ;;  %v7038_v48 = vmul.f32 %v7002_v58, %v12579_v4  ;;  %v12773_v50 = vsub.f32 %v12442_v1, %v12728_v25 }
 0x66e   : > { %v7005_v32 = vmul.f32 %v12760_v13, %v12760_v13  ;;  %v7039_v52 = vmul.f32 %v7003_v26, %v12583_v15  ;;  %v7040_v58 = vmul.f32 %v7004_v60, %v12595_v41  ;;  %v7042_v60 = vmul.f32 %v7006_v42, %v12603_v54 }
 0x66f   : > { %v7072_v5 = vadd.f32 %v7037_v47, %v7036_v11  ;;  %v12787_v47 = vsub.f32 %v12452_v44, %v12728_v25  ;;  %v7007_v1 = vmul.f32 %v12773_v50, %v12773_v50  ;;  %v7044_v42 = vmul.f32 %v7008_v21, %v12611_v0 }
 0x670   : > { %v7041_v26 = vmul.f32 %v7005_v32, %v12593_v18 }
 0x671   : > { %v7073_v61 = vadd.f32 %v7072_v5, %v7038_v48  ;;  %v12794_v48 = vsub.f32 %v12298_v28, %v12728_v25  ;;  %v7009_v44 = vmul.f32 %v12787_v47, %v12787_v47  ;;  %v7043_v32 = vmul.f32 %v7007_v1, %v12601_v36  ;;  %v14027_v36 = vld [vmem:[#allocation110_spill] sm:$0xff] }
 0x673   : > { %v7074_v11 = vadd.f32 %v7073_v61, %v7039_v52  ;;  %v12801_v52 = vsub.f32 %v12305_v51, %v12728_v25  ;;  %v7010_v28 = vmul.f32 %v12794_v48, %v12794_v48  ;;  %v7045_v1 = vmul.f32 %v7009_v44, %v12609_v49  ;;  %v14021_v49 = vld [vmem:[#allocation105_spill] sm:$0xff] }
 0x675   : > { %v7075_v5 = vadd.f32 %v7074_v11, %v7040_v58  ;;  %v12808_v11 = vsub.f32 %v12323_v24, %v12728_v25  ;;  %v7011_v51 = vmul.f32 %v12801_v52, %v12801_v52  ;;  %v7046_v21 = vmul.f32 %v7010_v28, %v12619_v40  ;;  %v14019_v40 = vld [vmem:[#allocation102_spill] sm:$0xff] }
 0x677   : > { %v7076_v61 = vadd.f32 %v7075_v5, %v7041_v26  ;;  %v12815_v5 = vsub.f32 %v12329_v7, %v12728_v25  ;;  %v7012_v24 = vmul.f32 %v12808_v11, %v12808_v11  ;;  %v7047_v44 = vmul.f32 %v7011_v51, %v12617_v8  ;;  %v14017_v8 = vld [vmem:[#allocation103_spill] sm:$0xff] }
 0x679   : > { %v7077_v58 = vadd.f32 %v7076_v61, %v7042_v60  ;;  %v12822_v61 = vsub.f32 %v12318_v30, %v12728_v25  ;;  %v7013_v7 = vmul.f32 %v12815_v5, %v12815_v5  ;;  %v7048_v28 = vmul.f32 %v7012_v24, %v14002_v27  ;;  %v14005_v27 = vld [vmem:[#allocation90_spill] sm:$0xff] }
 0x67b   : > { %v7078_v26 = vadd.f32 %v7077_v58, %v7043_v32  ;;  %v12829_v58 = vsub.f32 %v12326_v14, %v12728_v25  ;;  %v7014_v30 = vmul.f32 %v12822_v61, %v12822_v61  ;;  %v7049_v51 = vmul.f32 %v7013_v7, %v14003_v35  ;;  %v14006_v35 = vld [vmem:[#allocation93_spill] sm:$0xff] }
 0x67d   : > { %v7079_v60 = vadd.f32 %v7078_v26, %v7044_v42  ;;  %v12836_v26 = vsub.f32 %v12345_v9, %v12728_v25  ;;  %v7015_v14 = vmul.f32 %v12829_v58, %v12829_v58  ;;  %v7050_v24 = vmul.f32 %v7014_v30, %v14004_v29  ;;  %v14007_v29 = vld [vmem:[#allocation92_spill] sm:$0xff] }
 0x67f   : > { %v7080_v32 = vadd.f32 %v7079_v60, %v7045_v1  ;;  %v12843_v60 = vsub.f32 %v12351_v19, %v12728_v25  ;;  %v7016_v9 = vmul.f32 %v12836_v26, %v12836_v26  ;;  %v7051_v7 = vmul.f32 %v7015_v14, %v14005_v27  ;;  %v14008_v27 = vld [vmem:[#allocation95_spill] sm:$0xff] }
 0x681   : > { %v7081_v42 = vadd.f32 %v7080_v32, %v7046_v21  ;;  %v12850_v32 = vsub.f32 %v12340_v46, %v12728_v25  ;;  %v7017_v19 = vmul.f32 %v12843_v60, %v12843_v60  ;;  %v7052_v30 = vmul.f32 %v7016_v9, %v14006_v35  ;;  %v14009_v35 = vld [vmem:[#allocation94_spill] sm:$0xff] }
 0x683   : > { %v7082_v1 = vadd.f32 %v7081_v42, %v7047_v44  ;;  %v12857_v42 = vsub.f32 %v12348_v23, %v12728_v25  ;;  %v7018_v46 = vmul.f32 %v12850_v32, %v12850_v32  ;;  %v7053_v14 = vmul.f32 %v7017_v19, %v14007_v29  ;;  %v14010_v29 = vld [vmem:[#allocation97_spill] sm:$0xff] }
 0x685   : > { %v7083_v21 = vadd.f32 %v7082_v1, %v7048_v28  ;;  %v12864_v1 = vsub.f32 %v12365_v56, %v12728_v25  ;;  %v7019_v23 = vmul.f32 %v12857_v42, %v12857_v42  ;;  %v7054_v9 = vmul.f32 %v7018_v46, %v14008_v27  ;;  %v14011_v27 = vld [vmem:[#allocation96_spill] sm:$0xff] }
 0x687   : > { %v7084_v44 = vadd.f32 %v7083_v21, %v7049_v51  ;;  %v12871_v21 = vsub.f32 %v12374_v12, %v12728_v25  ;;  %v7020_v56 = vmul.f32 %v12864_v1, %v12864_v1  ;;  %v7055_v19 = vmul.f32 %v7019_v23, %v14009_v35  ;;  %v14012_v35 = vld [vmem:[#allocation99_spill] sm:$0xff] }
 0x689   : > { %v7085_v28 = vadd.f32 %v7084_v44, %v7050_v24  ;;  %v12878_v44 = vsub.f32 %v12360_v38, %v12728_v25  ;;  %v7021_v12 = vmul.f32 %v12871_v21, %v12871_v21  ;;  %v7056_v46 = vmul.f32 %v7020_v56, %v14010_v29  ;;  %v14013_v29 = vld [vmem:[#allocation98_spill] sm:$0xff] }
 0x68b   : > { %v7086_v51 = vadd.f32 %v7085_v28, %v7051_v7  ;;  %v12885_v28 = vsub.f32 %v12368_v3, %v12728_v25  ;;  %v7022_v38 = vmul.f32 %v12878_v44, %v12878_v44  ;;  %v7057_v23 = vmul.f32 %v7021_v12, %v14011_v27  ;;  %v14014_v27 = vld [vmem:[#allocation101_spill] sm:$0xff] }
 0x68d   : > { %v7087_v24 = vadd.f32 %v7086_v51, %v7052_v30  ;;  %v12892_v51 = vsub.f32 %v12387_v57, %v12728_v25  ;;  %v7023_v3 = vmul.f32 %v12885_v28, %v12885_v28  ;;  %v7058_v56 = vmul.f32 %v7022_v38, %v14012_v35  ;;  %v14015_v35 = vld [vmem:[#allocation100_spill] sm:$0xff] }
 0x68f   : > { %v7088_v7 = vadd.f32 %v7087_v24, %v7053_v14  ;;  %v12899_v24 = vsub.f32 %v12396_v16, %v12728_v25  ;;  %v7024_v57 = vmul.f32 %v12892_v51, %v12892_v51  ;;  %v7059_v12 = vmul.f32 %v7023_v3, %v14013_v29 }
 0x691   : > { %v7089_v30 = vadd.f32 %v7088_v7, %v7054_v9  ;;  %v12906_v7 = vsub.f32 %v12382_v6, %v12728_v25  ;;  %v7025_v16 = vmul.f32 %v12899_v24, %v12899_v24  ;;  %v7060_v38 = vmul.f32 %v7024_v57, %v14014_v27 }
 0x693   : > { %v7090_v14 = vadd.f32 %v7089_v30, %v7055_v19  ;;  %v12913_v30 = vsub.f32 %v12390_v43, %v12728_v25  ;;  %v7026_v6 = vmul.f32 %v12906_v7, %v12906_v7  ;;  %v7061_v3 = vmul.f32 %v7025_v16, %v14015_v35 }
 0x695   : > { %v7091_v9 = vadd.f32 %v7090_v14, %v7056_v46  ;;  %v12920_v14 = vsub.f32 %v12409_v20, %v12728_v25  ;;  %v7027_v43 = vmul.f32 %v12913_v30, %v12913_v30  ;;  %v7062_v57 = vmul.f32 %v7026_v6, %v14017_v8  ;;  %v14022_v8 = vld [vmem:[#allocation104_spill] sm:$0xff] }
 0x697   : > { %v7092_v19 = vadd.f32 %v7091_v9, %v7057_v23  ;;  %v12927_v9 = vsub.f32 %v12418_v33, %v12728_v25  ;;  %v7028_v29 = vmul.f32 %v12920_v14, %v12920_v14  ;;  %v7063_v16 = vmul.f32 %v7027_v43, %v14019_v40  ;;  %v14023_v40 = vld [vmem:[#allocation107_spill] sm:$0xff] }
 0x699   : > { %v7093_v46 = vadd.f32 %v7092_v19, %v7058_v56  ;;  %v14016_v19 = vld [vmem:[#allocation65_spill] sm:$0xff]  ;;  %v7029_v27 = vmul.f32 %v12927_v9, %v12927_v9  ;;  %v7064_v6 = vmul.f32 %v7028_v29, %v14021_v49  ;;  %v14024_v49 = vld [vmem:[#allocation106_spill] sm:$0xff] }
 0x69a   : > { %v12934_v20 = vsub.f32 %v14016_v19, %v12728_v25 }
 0x69b   : > { %v7094_v23 = vadd.f32 %v7093_v46, %v7059_v12  ;;  %v14018_v46 = vld [vmem:[#allocation67_spill] sm:$0xff]  ;;  %v7065_v43 = vmul.f32 %v7029_v27, %v14022_v8 }
 0x69c   : > { %v12941_v33 = vsub.f32 %v14018_v46, %v12728_v25  ;;  %v7030_v35 = vmul.f32 %v12934_v20, %v12934_v20 }
 0x69d   : > { %v7095_v56 = vadd.f32 %v7094_v23, %v7060_v38  ;;  %v14020_v23 = vld [vmem:[#allocation72_spill] sm:$0xff] }
 0x69e   : > { %v12948_v19 = vsub.f32 %v14020_v23, %v12728_v25  ;;  %v7031_v46 = vmul.f32 %v12941_v33, %v12941_v33  ;;  %v7066_v29 = vmul.f32 %v7030_v35, %v14023_v40 }
 0x69f   : > { %v7096_v12 = vadd.f32 %v7095_v56, %v7061_v3  ;;  %v12955_v56 = vsub.f32 %v12439_v17, %v12728_v25 }
 0x6a0   : > { %v7032_v23 = vmul.f32 %v12948_v19, %v12948_v19  ;;  %v7067_v27 = vmul.f32 %v7031_v46, %v14024_v49 }
 0x6a1   : > { %v7097_v38 = vadd.f32 %v7096_v12, %v7062_v57  ;;  %v12962_v12 = vsub.f32 %v12425_v2, %v12728_v25  ;;  %v7033_v17 = vmul.f32 %v12955_v56, %v12955_v56  ;;  %v14025_v2 = vld [vmem:[#allocation109_spill] sm:$0xff] }
 0x6a2   : > { %v7068_v8 = vmul.f32 %v7032_v23, %v14025_v2 }
 0x6a3   : > { %v7098_v3 = vadd.f32 %v7097_v38, %v7063_v16  ;;  %v12969_v38 = vsub.f32 %v12433_v31, %v12728_v25 }
 0x6a5   : > { %v7099_v57 = vadd.f32 %v7098_v3, %v7064_v6  ;;  %v7034_v3 = vmul.f32 %v12962_v12, %v12962_v12  ;;  %v7035_v35 = vmul.f32 %v12969_v38, %v12969_v38 }
 0x6a7   : > { %v7100_v16 = vadd.f32 %v7099_v57, %v7065_v43  ;;  %v14026_v43 = vld [vmem:[#allocation108_spill] sm:$0xff]  ;;  %v7070_v25 = vmul.f32 %v7034_v3, %v12713_v63  ;;  %v7071_v54 = vmul.f32 %v7035_v35, %v14027_v36 }
 0x6a8   : > { %v7069_v57 = vmul.f32 %v7033_v17, %v14026_v43 }
 0x6a9   : > { %v7101_v6 = vadd.f32 %v7100_v16, %v7066_v29 }
 0x6ab   : > { %v7102_v0 = vadd.f32 %v7101_v6, %v7067_v27 }
 0x6ad   : > { %v7103_v40 = vadd.f32 %v7102_v0, %v7068_v8  ;;  %v14028_v0 = vsub.s32 0, %v12723_v53 }
 0x6af   : > { %v7104_v31 = vadd.f32 %v7103_v40, %v7069_v57 }
 0x6b1   : > { %v7105_v18 = vadd.f32 %v7104_v31, %v7070_v25 }
 0x6b3   : > { %v7106_v46 = vadd.f32 %v7105_v18, %v7071_v54 }
 0x6b5   : > { %v7107_v29 = vrot.slane %v7106_v46, 4 }
 0x6b7   : > { %v7108_v16 = vadd.f32 %v7107_v29, %v7106_v46 }
 0x6b9   : > { %v7109_v49 = vrot.slane %v7108_v16, 2 }
 0x6bb   : > { %v7110_v41 = vadd.f32 %v7109_v49, %v7108_v16 }
 0x6bd   : > { %v7111_v15 = vrot.slane %v7110_v41, 1 }
 0x6bf   : > { %v7112_v23 = vadd.f32 %v7111_v15, %v7110_v41 }
 0x6c1   : > { %v7113_v27 = vmul.f32 0.00390625, %v7112_v23 }
 0x6c3   : > { %9809 = vmatmul.mubr.f32.vlgmr.msra.gmra.mrb[0].mxu1 %v7113_v27 }
 0x796   : > { %v7180_v6 = vpop.f32.mrb[0].mxu1 }
 0x797   : > { %v7181_v2 = vadd.f32 1e-05, %v7180_v6  ;;  %v9810_v4 = vpop.f32.mrb[1].mxu1 }
 0x799   : > { %10693 = vrsqrt.f32 %v7181_v2 }
 0x7a3   : > { %v10694_v17 = vpop.eup %10693 }
 0x7a4   : > { %v7188_v8 = vrot.slane %v10694_v17, %v14028_v0 }
 0x7a6   : > { %v7189_v40 = vmul.f32 %v7188_v8, %v12732_v34  ;;  %v7190_v31 = vmul.f32 %v7188_v8, %v12736_v62  ;;  %v7191_v18 = vmul.f32 %v7188_v8, %v12740_v37  ;;  %v7192_v54 = vmul.f32 %v7188_v8, %v12748_v45 }
 0x7a7   : > { %v7193_v15 = vmul.f32 %v7188_v8, %v12752_v39  ;;  %v7194_v41 = vmul.f32 %v7188_v8, %v12760_v13  ;;  %v7195_v49 = vmul.f32 %v7188_v8, %v12766_v55  ;;  %v7196_v2 = vmul.f32 %v7188_v8, %v12773_v50 }
 0x7a8   : > { %v7197_v4 = vmul.f32 %v7188_v8, %v12780_v59  ;;  %v7198_v53 = vmul.f32 %v7188_v8, %v12787_v47  ;;  %v7199_v34 = vmul.f32 %v7188_v8, %v12794_v48  ;;  %v7200_v62 = vmul.f32 %v7188_v8, %v12801_v52 }
 0x7a9   : > { %v7201_v37 = vmul.f32 %v7188_v8, %v12808_v11  ;;  %v7202_v45 = vmul.f32 %v7188_v8, %v12815_v5  ;;  %v7203_v39 = vmul.f32 %v7188_v8, %v12822_v61  ;;  %v7204_v13 = vmul.f32 %v7188_v8, %v12829_v58 }
 0x7aa   : > { %v7205_v55 = vmul.f32 %v7188_v8, %v12836_v26  ;;  %v7206_v50 = vmul.f32 %v7188_v8, %v12843_v60  ;;  %v7207_v59 = vmul.f32 %v7188_v8, %v12850_v32  ;;  %v7208_v47 = vmul.f32 %v7188_v8, %v12857_v42  ;;  %v9298_v32 = vld [vmem:[%s425_s23] ss:$0 sm:$0xff] }
 0x7ab   : > { %v7209_v48 = vmul.f32 %v7188_v8, %v12864_v1  ;;  %v7210_v52 = vmul.f32 %v7188_v8, %v12871_v21  ;;  %v7211_v11 = vmul.f32 %v7188_v8, %v12878_v44  ;;  %v7212_v5 = vmul.f32 %v7188_v8, %v12885_v28 }
 0x7ac   : > { %v7213_v61 = vmul.f32 %v7188_v8, %v12892_v51  ;;  %v7214_v58 = vmul.f32 %v7188_v8, %v12899_v24  ;;  %v7215_v26 = vmul.f32 %v7188_v8, %v12906_v7  ;;  %v7216_v60 = vmul.f32 %v7188_v8, %v12913_v30 }
 0x7ad   : > { %v7217_v42 = vmul.f32 %v7188_v8, %v12920_v14  ;;  %v7218_v1 = vmul.f32 %v7188_v8, %v12927_v9  ;;  %v7219_v21 = vmul.f32 %v7188_v8, %v12934_v20  ;;  %v7220_v44 = vmul.f32 %v7188_v8, %v12941_v33 }
 0x7ae   : > { %v7221_v28 = vmul.f32 %v7188_v8, %v12948_v19  ;;  %v7222_v51 = vmul.f32 %v7188_v8, %v12955_v56  ;;  %v7223_v24 = vmul.f32 %v7188_v8, %v12962_v12  ;;  %v7224_v7 = vmul.f32 %v7188_v8, %v12969_v38 }
 0x7af   : > { %v7232_v3 = vmul.f32 %v9298_v32, %v7189_v40  ;;  %v7233_v30 = vmul.f32 %v9298_v32, %v7190_v31  ;;  %v7234_v35 = vmul.f32 %v9298_v32, %v7191_v18  ;;  %v7235_v57 = vmul.f32 %v9298_v32, %v7192_v54 }
 0x7b0   : > { %v7236_v25 = vmul.f32 %v9298_v32, %v7193_v15  ;;  %v7237_v14 = vmul.f32 %v9298_v32, %v7194_v41  ;;  %v7238_v46 = vmul.f32 %v9298_v32, %v7195_v49  ;;  %v7239_v9 = vmul.f32 %v9298_v32, %v7196_v2  ;;  %v9299_v49 = vld [vmem:[%s433_s12] ss:$0 sm:$0xff] }
 0x7b1   : > { %v7240_v29 = vmul.f32 %v9298_v32, %v7197_v4  ;;  %v7241_v20 = vmul.f32 %v9298_v32, %v7198_v53  ;;  %v7242_v16 = vmul.f32 %v9298_v32, %v7199_v34  ;;  %v7243_v33 = vmul.f32 %v9298_v32, %v7200_v62 }
 0x7b2   : > { %v7244_v23 = vmul.f32 %v9298_v32, %v7201_v37  ;;  %v7245_v19 = vmul.f32 %v9298_v32, %v7202_v45  ;;  %v7246_v56 = vmul.f32 %v9298_v32, %v7203_v39  ;;  %v7247_v27 = vmul.f32 %v9298_v32, %v7204_v13 }
 0x7b3   : > { %v7248_v12 = vmul.f32 %v9298_v32, %v7205_v55  ;;  %v7249_v6 = vmul.f32 %v9298_v32, %v7206_v50  ;;  %v7250_v38 = vmul.f32 %v9298_v32, %v7207_v59  ;;  %v7251_v17 = vmul.f32 %v9298_v32, %v7208_v47 }
 0x7b4   : > { %v7252_v0 = vmul.f32 %v9298_v32, %v7209_v48  ;;  %v7253_v8 = vmul.f32 %v9298_v32, %v7210_v52  ;;  %v7254_v40 = vmul.f32 %v9298_v32, %v7211_v11  ;;  %v7255_v31 = vmul.f32 %v9298_v32, %v7212_v5 }
 0x7b5   : > { %v7256_v18 = vmul.f32 %v9298_v32, %v7213_v61  ;;  %v7257_v54 = vmul.f32 %v9298_v32, %v7214_v58  ;;  %v7258_v15 = vmul.f32 %v9298_v32, %v7215_v26  ;;  %v7259_v41 = vmul.f32 %v9298_v32, %v7216_v60 }
 0x7b6   : > { %v7260_v2 = vmul.f32 %v9298_v32, %v7217_v42  ;;  %v7261_v4 = vmul.f32 %v9298_v32, %v7218_v1  ;;  %v7262_v53 = vmul.f32 %v9298_v32, %v7219_v21  ;;  %v7263_v34 = vmul.f32 %v9298_v32, %v7220_v44 }
 0x7b7   : > { %v7264_v62 = vmul.f32 %v9298_v32, %v7221_v28  ;;  %v7265_v37 = vmul.f32 %v9298_v32, %v7222_v51  ;;  %v7266_v45 = vmul.f32 %v9298_v32, %v7223_v24  ;;  %v7267_v39 = vmul.f32 %v9298_v32, %v7224_v7 }
 0x7b8   : > { %v13024_v13 = vadd.f32 %v9299_v49, %v7232_v3  ;;  %v13026_v55 = vadd.f32 %v9299_v49, %v7233_v30  ;;  %v13028_v50 = vadd.f32 %v9299_v49, %v7234_v35  ;;  %v13030_v59 = vadd.f32 %v9299_v49, %v7235_v57 }
 0x7b9   : > { %v13032_v47 = vadd.f32 %v9299_v49, %v7236_v25  ;;  %v13034_v48 = vadd.f32 %v9299_v49, %v7237_v14  ;;  %v13036_v52 = vadd.f32 %v9299_v49, %v7238_v46  ;;  %v13038_v11 = vadd.f32 %v9299_v49, %v7239_v9 }
 0x7ba   : > { %v13040_v5 = vadd.f32 %v9299_v49, %v7240_v29  ;;  %v13042_v61 = vadd.f32 %v9299_v49, %v7241_v20  ;;  %v13044_v58 = vadd.f32 %v9299_v49, %v7242_v16  ;;  %v13046_v26 = vadd.f32 %v9299_v49, %v7243_v33 }
 0x7bb   : > { %v13048_v60 = vadd.f32 %v9299_v49, %v7244_v23  ;;  %v13050_v32 = vadd.f32 %v9299_v49, %v7245_v19  ;;  %v13052_v42 = vadd.f32 %v9299_v49, %v7246_v56  ;;  %v13054_v1 = vadd.f32 %v9299_v49, %v7247_v27 }
 0x7bc   : > { %v13056_v21 = vadd.f32 %v9299_v49, %v7248_v12  ;;  %v13058_v44 = vadd.f32 %v9299_v49, %v7249_v6  ;;  %v13060_v28 = vadd.f32 %v9299_v49, %v7250_v38  ;;  %v13062_v51 = vadd.f32 %v9299_v49, %v7251_v17 }
 0x7bd   : > { %v13064_v24 = vadd.f32 %v9299_v49, %v7252_v0  ;;  %v13066_v7 = vadd.f32 %v9299_v49, %v7253_v8  ;;  %v13068_v3 = vadd.f32 %v9299_v49, %v7254_v40  ;;  %v13070_v30 = vadd.f32 %v9299_v49, %v7255_v31 }
 0x7be   : > { %v13072_v35 = vadd.f32 %v9299_v49, %v7256_v18  ;;  %v13074_v57 = vadd.f32 %v9299_v49, %v7257_v54  ;;  %v13076_v25 = vadd.f32 %v9299_v49, %v7258_v15  ;;  %v13078_v14 = vadd.f32 %v9299_v49, %v7259_v41 }
 0x7bf   : > { %v13080_v46 = vadd.f32 %v9299_v49, %v7260_v2  ;;  %v13082_v9 = vadd.f32 %v9299_v49, %v7261_v4  ;;  %v13084_v29 = vadd.f32 %v9299_v49, %v7262_v53  ;;  %v13086_v20 = vadd.f32 %v9299_v49, %v7263_v34 }
 0x7c0   : > { %v13088_v16 = vadd.f32 %v9299_v49, %v7264_v62  ;;  %v13090_v33 = vadd.f32 %v9299_v49, %v7265_v37  ;;  %v13092_v23 = vadd.f32 %v9299_v49, %v7266_v45  ;;  %v13094_v19 = vadd.f32 %v9299_v49, %v7267_v39 }
 0x7c1   : > { %v7311_v56 = vmax.f32 %v13024_v13, 0.0  ;;  %v7312_v27 = vmax.f32 %v13026_v55, 0.0  ;;  %v7313_v12 = vmax.f32 %v13028_v50, 0.0  ;;  %v7314_v6 = vmax.f32 %v13030_v59, 0.0 }
 0x7c2   : > { %v7315_v38 = vmax.f32 %v13032_v47, 0.0  ;;  %v7316_v17 = vmax.f32 %v13034_v48, 0.0  ;;  %v7317_v0 = vmax.f32 %v13036_v52, 0.0  ;;  %v7318_v8 = vmax.f32 %v13038_v11, 0.0 }
 0x7c3   : > { %v7319_v40 = vmax.f32 %v13040_v5, 0.0  ;;  %v7320_v31 = vmax.f32 %v13042_v61, 0.0  ;;  %v7321_v18 = vmax.f32 %v13044_v58, 0.0  ;;  %v7322_v54 = vmax.f32 %v13046_v26, 0.0 }
 0x7c4   : > { %v7323_v15 = vmax.f32 %v13048_v60, 0.0  ;;  %v7324_v41 = vmax.f32 %v13050_v32, 0.0  ;;  %v7325_v49 = vmax.f32 %v13052_v42, 0.0  ;;  %v7326_v2 = vmax.f32 %v13054_v1, 0.0  ;;  %v14029_v1 = vld [vmem:[#allocation78_spill] sm:$0xff] }
 0x7c5   : > { %v7327_v4 = vmax.f32 %v13056_v21, 0.0  ;;  %v7328_v53 = vmax.f32 %v13058_v44, 0.0  ;;  %v7329_v34 = vmax.f32 %v13060_v28, 0.0  ;;  %v7330_v62 = vmax.f32 %v13062_v51, 0.0  ;;  %v14030_v44 = vld [vmem:[#allocation79_spill] sm:$0xff]  ;;  %v14031_v51 = vld [vmem:[#allocation81_spill] sm:$0xff] }
 0x7c6   : > { %v7331_v37 = vmax.f32 %v13064_v24, 0.0  ;;  %v7332_v45 = vmax.f32 %v13066_v7, 0.0  ;;  %v7333_v39 = vmax.f32 %v13068_v3, 0.0  ;;  %v7334_v13 = vmax.f32 %v13070_v30, 0.0  ;;  %v14032_v7 = vld [vmem:[#allocation80_spill] sm:$0xff]  ;;  %v14033_v30 = vld [vmem:[#allocation83_spill] sm:$0xff] }
 0x7c7   : > { %v7335_v55 = vmax.f32 %v13072_v35, 0.0  ;;  %v7336_v50 = vmax.f32 %v13074_v57, 0.0  ;;  %v7337_v59 = vmax.f32 %v13076_v25, 0.0  ;;  %v7338_v47 = vmax.f32 %v13078_v14, 0.0  ;;  %v14036_v14 = vld [vmem:[#allocation84_spill] sm:$0xff] }
 0x7c8   : > { %v7339_v48 = vmax.f32 %v13080_v46, 0.0  ;;  %v7340_v52 = vmax.f32 %v13082_v9, 0.0  ;;  %v7341_v11 = vmax.f32 %v13084_v29, 0.0  ;;  %v7342_v5 = vmax.f32 %v13086_v20, 0.0  ;;  %v14037_v9 = vld [vmem:[#allocation87_spill] sm:$0xff]  ;;  %v14038_v20 = vld [vmem:[#allocation86_spill] sm:$0xff] }
 0x7c9   : > { %v7343_v61 = vmax.f32 %v13088_v16, 0.0  ;;  %v7344_v58 = vmax.f32 %v13090_v33, 0.0  ;;  %v7345_v26 = vmax.f32 %v13092_v23, 0.0  ;;  %v7346_v60 = vmax.f32 %v13094_v19, 0.0  ;;  %v14039_v33 = vld [vmem:[#allocation89_spill] sm:$0xff]  ;;  %v14040_v19 = vld [vmem:[#allocation88_spill] sm:$0xff] }
 0x7ca   : > { %v13133_v32 = vmul.f32 %v7311_v56, %v12581_v10  ;;  %v13136_v42 = vmul.f32 %v7312_v27, %v12585_v22  ;;  %v13139_v21 = vmul.f32 %v7313_v12, %v14029_v1  ;;  %v13142_v28 = vmul.f32 %v7314_v6, %v14030_v44  ;;  %v14034_v10 = vld [vmem:[#allocation82_spill] sm:$0xff]  ;;  %v14035_v22 = vld [vmem:[#allocation85_spill] sm:$0xff]  ;;  %v14041_v27 = vld [vmem:[#allocation91_spill] sm:$0xff] }
 0x7cb   : > { %v13145_v24 = vmul.f32 %v7315_v38, %v14031_v51  ;;  %v13148_v3 = vmul.f32 %v7316_v17, %v14032_v7  ;;  %v13151_v35 = vmul.f32 %v7317_v0, %v14033_v30  ;;  %v13154_v57 = vmul.f32 %v7318_v8, %v14034_v10  ;;  %v14042_v6 = vld [vmem:[#allocation90_spill] sm:$0xff]  ;;  %v14043_v17 = vld [vmem:[#allocation93_spill] sm:$0xff]  ;;  %v14044_v8 = vld [vmem:[#allocation92_spill] sm:$0xff] }
 0x7cc   : > { %v13157_v25 = vmul.f32 %v7319_v40, %v14035_v22  ;;  %v13160_v46 = vmul.f32 %v7320_v31, %v14036_v14  ;;  %v13163_v29 = vmul.f32 %v7321_v18, %v14037_v9  ;;  %v13166_v16 = vmul.f32 %v7322_v54, %v14038_v20  ;;  %v14045_v31 = vld [vmem:[#allocation95_spill] sm:$0xff]  ;;  %v14046_v54 = vld [vmem:[#allocation94_spill] sm:$0xff]  ;;  %7403 = sbr.rel (%p8882_p3) target bundleno = 2083 (0x823), region = 92 }
 0x7cd   : > { %v13169_v23 = vmul.f32 %v7323_v15, %v14039_v33  ;;  %v13172_v56 = vmul.f32 %v7324_v41, %v14040_v19  ;;  %v13175_v12 = vmul.f32 %v7325_v49, %v14041_v27  ;;  %v13178_v38 = vmul.f32 %v7326_v2, %v14042_v6  ;;  %v14047_v41 = vld [vmem:[#allocation97_spill] sm:$0xff]  ;;  %v14048_v49 = vld [vmem:[#allocation96_spill] sm:$0xff]  ;;  %v14049_v2 = vld [vmem:[#allocation99_spill] sm:$0xff] }
 0x7ce   : > { %v13181_v0 = vmul.f32 %v7327_v4, %v14043_v17  ;;  %v13184_v40 = vmul.f32 %v7328_v53, %v14044_v8  ;;  %v13187_v18 = vmul.f32 %v7329_v34, %v14045_v31  ;;  %v13190_v15 = vmul.f32 %v7330_v62, %v14046_v54  ;;  %v14050_v4 = vld [vmem:[#allocation98_spill] sm:$0xff]  ;;  %v14051_v53 = vld [vmem:[#allocation101_spill] sm:$0xff]  ;;  %v14052_v34 = vld [vmem:[#allocation100_spill] sm:$0xff] }
 0x7cf   : > { %v13193_v1 = vmul.f32 %v7331_v37, %v14047_v41  ;;  %v13196_v44 = vmul.f32 %v7332_v45, %v14048_v49  ;;  %v13199_v51 = vmul.f32 %v7333_v39, %v14049_v2  ;;  %v13202_v7 = vmul.f32 %v7334_v13, %v14050_v4  ;;  %v14053_v62 = vld [vmem:[#allocation103_spill] sm:$0xff]  ;;  %v14054_v37 = vld [vmem:[#allocation102_spill] sm:$0xff]  ;;  %v14055_v45 = vld [vmem:[#allocation105_spill] sm:$0xff] }
 0x7d0   : > { %v13205_v30 = vmul.f32 %v7335_v55, %v14051_v53  ;;  %v13208_v10 = vmul.f32 %v7336_v50, %v14052_v34  ;;  %v13211_v22 = vmul.f32 %v7337_v59, %v14053_v62  ;;  %v13214_v14 = vmul.f32 %v7338_v47, %v14054_v37  ;;  %v14056_v39 = vld [vmem:[#allocation104_spill] sm:$0xff]  ;;  %v14057_v13 = vld [vmem:[#allocation107_spill] sm:$0xff]  ;;  %v14058_v55 = vld [vmem:[#allocation106_spill] sm:$0xff] }
 0x7d1   : > { %v13217_v9 = vmul.f32 %v7339_v48, %v14055_v45  ;;  %v13220_v20 = vmul.f32 %v7340_v52, %v14056_v39  ;;  %v13223_v33 = vmul.f32 %v7341_v11, %v14057_v13  ;;  %v13226_v19 = vmul.f32 %v7342_v5, %v14058_v55  ;;  %v14059_v50 = vld [vmem:[#allocation109_spill] sm:$0xff]  ;;  %v7896_v2 = vld [vmem:[#allocation2 + $0x8] sm:$0xe] (!%p8882_p3) }
 0x7d2   : > { %v13229_v27 = vmul.f32 %v7343_v61, %v14059_v50  ;;  %v13232_v59 = vmul.f32 %v7344_v58, %v14026_v43  ;;  %v13235_v47 = vmul.f32 %v7345_v26, %v12713_v63  ;;  %v13238_v48 = vmul.f32 %v7346_v60, %v14027_v36 }
 0x7d3   : > { %v9414_v52 = vpack.c.bf16 %v13133_v32, %v13133_v32  ;;  %v9415_v11 = vpack.c.bf16 %v13136_v42, %v13136_v42  ;;  %v9416_v63 = vpack.c.bf16 %v13139_v21, %v13139_v21  ;;  %v9417_v36 = vpack.c.bf16 %v13142_v28, %v13142_v28 }
 0x7d4   : > { %v9418_v39 = vpack.c.bf16 %v13145_v24, %v13145_v24  ;;  %v9419_v13 = vpack.c.bf16 %v13148_v3, %v13148_v3 }
 0x7d5   : > { %v7498_v43 = vshrl.u32 %v9414_v52, 16  ;;  %v7501_v5 = vshll.u32 %v9414_v52, 16  ;;  %v7507_v61 = vshrl.u32 %v9415_v11, 16  ;;  %v7510_v58 = vshll.u32 %v9415_v11, 16 }
 0x7d6   : > { %v7517_v26 = vshrl.u32 %v9416_v63, 16  ;;  %v7520_v60 = vshll.u32 %v9416_v63, 16  ;;  %v7527_v6 = vshrl.u32 %v9417_v36, 16  ;;  %v7530_v17 = vshll.u32 %v9417_v36, 16 }
 0x7d7   : > { %v7500_v8 = vrot.slane %v7498_v43, 6  ;;  %v7503_v31 = vrot.slane %v7501_v5, 7  ;;  %v7509_v54 = vrot.slane %v7507_v61, 6  ;;  %v7512_v41 = vrot.slane %v7510_v58, 7 }
 0x7d8   : > { %v7519_v4 = vrot.slane %v7517_v26, 6  ;;  %v7522_v53 = vrot.slane %v7520_v60, 7  ;;  %v7529_v34 = vrot.slane %v7527_v6, 6  ;;  %v7532_v62 = vrot.slane %v7530_v17, 7 }
 0x7d9   : > { %v7504_v37 = vor.u32 %v7503_v31, %v7500_v8  ;;  %v7513_v45 = vor.u32 %v7512_v41, %v7509_v54  ;;  %v9420_v11 = vpack.c.bf16 %v13151_v35, %v13151_v35  ;;  %v9421_v63 = vpack.c.bf16 %v13154_v57, %v13154_v57 }
 0x7da   : > { %v7523_v50 = vor.u32 %v7522_v53, %v7519_v4  ;;  %v7533_v52 = vor.u32 %v7532_v62, %v7529_v34  ;;  %v7537_v61 = vshrl.u32 %v9418_v39, 16  ;;  %v7540_v60 = vshll.u32 %v9418_v39, 16 }
 0x7db   : > { %v7897_v36 = vsel %vm13252_vm7, %v7504_v37, %v7896_v2  ;;  %v7505_v43 = vrot.slane %v7504_v37, 4  ;;  %v7515_v5 = vrot.slane %v7513_v45, 4  ;;  %v7547_v6 = vshrl.u32 %v9419_v13, 16 }
 0x7dc   : > { %7898 = vst [vmem:[#allocation2 + $0x8] sm:$0xe] %v7897_v36  ;;  %v7525_v58 = vrot.slane %v7523_v50, 4  ;;  %v7535_v26 = vrot.slane %v7533_v52, 4  ;;  %v7539_v31 = vrot.slane %v7537_v61, 6  ;;  %v7550_v54 = vshll.u32 %v9419_v13, 16 }
 0x7dd   : > { %v7514_v17 = vsel %vm13262_vm8, %v7505_v43, %v7513_v45  ;;  %v7524_v8 = vsel %vm13262_vm8, %v7515_v5, %v7523_v50  ;;  %v7542_v49 = vrot.slane %v7540_v60, 7  ;;  %v7549_v2 = vrot.slane %v7547_v6, 6 }
 0x7de   : > { %7899 = vst [vmem:[#allocation2 + $0xc] sm:$0xf] %v7514_v17  ;;  %7900 = vst [vmem:[#allocation2 + $0x10] sm:$0xf] %v7524_v8  ;;  %v7534_v41 = vsel %vm13262_vm8, %v7525_v58, %v7533_v52  ;;  %v7557_v4 = vshrl.u32 %v9420_v11, 16  ;;  %v7552_v53 = vrot.slane %v7550_v54, 7  ;;  %v9422_v50 = vpack.c.bf16 %v13157_v25, %v13157_v25 }
 0x7df   : > { %7901 = vst [vmem:[#allocation2 + $0x14] sm:$0xf] %v7534_v41  ;;  %v7560_v34 = vshll.u32 %v9420_v11, 16  ;;  %v7567_v62 = vshrl.u32 %v9421_v63, 16  ;;  %v7570_v37 = vshll.u32 %v9421_v63, 16  ;;  %v7543_v39 = vor.u32 %v7542_v49, %v7539_v31 }
 0x7e0   : > { %v7559_v45 = vrot.slane %v7557_v4, 6  ;;  %v9423_v13 = vpack.c.bf16 %v13160_v46, %v13160_v46  ;;  %v7553_v36 = vor.u32 %v7552_v53, %v7549_v2  ;;  %v7577_v60 = vshrl.u32 %v9422_v50, 16 }
 0x7e1   : > { %v7562_v43 = vrot.slane %v7560_v34, 7  ;;  %v7569_v5 = vrot.slane %v7567_v62, 6  ;;  %v7572_v52 = vrot.slane %v7570_v37, 7  ;;  %v7544_v61 = vsel %vm13262_vm8, %v7535_v26, %v7543_v39 }
 0x7e2   : > { %v7545_v58 = vrot.slane %v7543_v39, 4  ;;  %v7580_v11 = vshll.u32 %v9422_v50, 16  ;;  %7902 = vst [vmem:[#allocation2 + $0x18] sm:$0xf] %v7544_v61  ;;  %v7555_v63 = vrot.slane %v7553_v36, 4  ;;  %v7587_v8 = vshrl.u32 %v9423_v13, 16 }
 0x7e3   : > { %v7563_v6 = vor.u32 %v7562_v43, %v7559_v45  ;;  %v7573_v17 = vor.u32 %v7572_v52, %v7569_v5  ;;  %v7579_v54 = vrot.slane %v7577_v60, 6  ;;  %v7590_v49 = vshll.u32 %v9423_v13, 16 }
 0x7e4   : > { %v7554_v31 = vsel %vm13262_vm8, %v7545_v58, %v7553_v36  ;;  %v7582_v41 = vrot.slane %v7580_v11, 7  ;;  %v7589_v53 = vrot.slane %v7587_v8, 6  ;;  %v9424_v37 = vpack.c.bf16 %v13163_v29, %v13163_v29 }
 0x7e5   : > { %7903 = vst [vmem:[#allocation2 + $0x1c] sm:$0xf] %v7554_v31  ;;  %v7564_v2 = vsel %vm13262_vm8, %v7555_v63, %v7563_v6  ;;  %v7565_v4 = vrot.slane %v7563_v6, 4  ;;  %v7575_v26 = vrot.slane %v7573_v17, 4  ;;  %v7592_v62 = vrot.slane %v7590_v49, 7 }
 0x7e6   : > { %7904 = vst [vmem:[#allocation2 + $0x20] sm:$0xf] %v7564_v2  ;;  %v7583_v34 = vor.u32 %v7582_v41, %v7579_v54  ;;  %v9425_v39 = vpack.c.bf16 %v13166_v16, %v13166_v16  ;;  %v9426_v50 = vpack.c.bf16 %v13169_v23, %v13169_v23  ;;  %v9427_v13 = vpack.c.bf16 %v13172_v56, %v13172_v56 }
 0x7e7   : > { %v7574_v45 = vsel %vm13262_vm8, %v7565_v4, %v7573_v17  ;;  %v9428_v36 = vpack.c.bf16 %v13175_v12, %v13175_v12  ;;  %v7593_v52 = vor.u32 %v7592_v62, %v7589_v53  ;;  %v7597_v61 = vshrl.u32 %v9424_v37, 16 }
 0x7e8   : > { %7905 = vst [vmem:[#allocation2 + $0x24] sm:$0xf] %v7574_v45  ;;  %v7584_v43 = vsel %vm13262_vm8, %v7575_v26, %v7583_v34  ;;  %v7585_v5 = vrot.slane %v7583_v34, 4  ;;  %v7600_v58 = vshll.u32 %v9424_v37, 16  ;;  %v7607_v60 = vshrl.u32 %v9425_v39, 16 }
 0x7e9   : > { %7906 = vst [vmem:[#allocation2 + $0x28] sm:$0xf] %v7584_v43  ;;  %v7610_v11 = vshll.u32 %v9425_v39, 16  ;;  %v7617_v63 = vshrl.u32 %v9426_v50, 16  ;;  %v7595_v17 = vrot.slane %v7593_v52, 4  ;;  %v7599_v8 = vrot.slane %v7597_v61, 6 }
 0x7ea   : > { %v7594_v6 = vsel %vm13262_vm8, %v7585_v5, %v7593_v52  ;;  %v7620_v31 = vshll.u32 %v9426_v50, 16  ;;  %v7602_v54 = vrot.slane %v7600_v58, 7  ;;  %v7609_v41 = vrot.slane %v7607_v60, 6 }
 0x7eb   : > { %7907 = vst [vmem:[#allocation2 + $0x2c] sm:$0xf] %v7594_v6  ;;  %v7612_v49 = vrot.slane %v7610_v11, 7  ;;  %v7619_v2 = vrot.slane %v7617_v63, 6  ;;  %v7627_v26 = vshrl.u32 %v9427_v13, 16  ;;  %v7630_v53 = vshll.u32 %v9427_v13, 16 }
 0x7ec   : > { %v7622_v4 = vrot.slane %v7620_v31, 7  ;;  %v7637_v34 = vshrl.u32 %v9428_v36, 16  ;;  %v7603_v62 = vor.u32 %v7602_v54, %v7599_v8  ;;  %v7640_v45 = vshll.u32 %v9428_v36, 16 }
 0x7ed   : > { %v7613_v37 = vor.u32 %v7612_v49, %v7609_v41  ;;  %v9429_v39 = vpack.c.bf16 %v13178_v38, %v13178_v38  ;;  %v7629_v5 = vrot.slane %v7627_v26, 6  ;;  %v7632_v52 = vrot.slane %v7630_v53, 7 }
 0x7ee   : > { %v7623_v43 = vor.u32 %v7622_v4, %v7619_v2  ;;  %v7639_v61 = vrot.slane %v7637_v34, 6  ;;  %v7604_v50 = vsel %vm13262_vm8, %v7595_v17, %v7603_v62  ;;  %v7605_v58 = vrot.slane %v7603_v62, 4 }
 0x7ef   : > { %v7615_v60 = vrot.slane %v7613_v37, 4  ;;  %v7642_v11 = vrot.slane %v7640_v45, 7  ;;  %7908 = vst [vmem:[#allocation2 + $0x30] sm:$0xf] %v7604_v50  ;;  %v7633_v13 = vor.u32 %v7632_v52, %v7629_v5  ;;  %v7647_v6 = vshrl.u32 %v9429_v39, 16 }
 0x7f0   : > { %v7625_v63 = vrot.slane %v7623_v43, 4  ;;  %v7650_v8 = vshll.u32 %v9429_v39, 16  ;;  %v7614_v36 = vsel %vm13262_vm8, %v7605_v58, %v7613_v37  ;;  %v9430_v41 = vpack.c.bf16 %v13181_v0, %v13181_v0 }
 0x7f1   : > { %v7624_v31 = vsel %vm13262_vm8, %v7615_v60, %v7623_v43  ;;  %v7643_v54 = vor.u32 %v7642_v11, %v7639_v61  ;;  %7909 = vst [vmem:[#allocation2 + $0x34] sm:$0xf] %v7614_v36  ;;  %v7635_v49 = vrot.slane %v7633_v13, 4  ;;  %v7649_v2 = vrot.slane %v7647_v6, 6 }
 0x7f2   : > { %7910 = vst [vmem:[#allocation2 + $0x38] sm:$0xf] %v7624_v31  ;;  %v7634_v17 = vsel %vm13262_vm8, %v7625_v63, %v7633_v13  ;;  %v7652_v4 = vrot.slane %v7650_v8, 7  ;;  %v7657_v53 = vshrl.u32 %v9430_v41, 16  ;;  %v7660_v34 = vshll.u32 %v9430_v41, 16 }
 0x7f3   : > { %7911 = vst [vmem:[#allocation2 + $0x3c] sm:$0xf] %v7634_v17  ;;  %v7645_v26 = vrot.slane %v7643_v54, 4  ;;  %v9431_v62 = vpack.c.bf16 %v13184_v40, %v13184_v40  ;;  %v7644_v37 = vsel %vm13262_vm8, %v7635_v49, %v7643_v54  ;;  %v9432_v39 = vpack.c.bf16 %v13187_v18, %v13187_v18 }
 0x7f4   : > { %v7653_v45 = vor.u32 %v7652_v4, %v7649_v2  ;;  %v9433_v43 = vpack.c.bf16 %v13190_v15, %v13190_v15  ;;  %7912 = vst [vmem:[#allocation2 + $0x40] sm:$0xf] %v7644_v37  ;;  %v7659_v5 = vrot.slane %v7657_v53, 6  ;;  %v7662_v52 = vrot.slane %v7660_v34, 7 }
 0x7f5   : > { %v7667_v61 = vshrl.u32 %v9431_v62, 16  ;;  %v7670_v50 = vshll.u32 %v9431_v62, 16  ;;  %v7677_v11 = vshrl.u32 %v9432_v39, 16  ;;  %v7680_v63 = vshll.u32 %v9432_v39, 16 }
 0x7f6   : > { %v7654_v58 = vsel %vm13262_vm8, %v7645_v26, %v7653_v45  ;;  %v7655_v60 = vrot.slane %v7653_v45, 4  ;;  %v7663_v13 = vor.u32 %v7662_v52, %v7659_v5  ;;  %v7687_v36 = vshrl.u32 %v9433_v43, 16 }
 0x7f7   : > { %7913 = vst [vmem:[#allocation2 + $0x44] sm:$0xf] %v7654_v58  ;;  %v7669_v6 = vrot.slane %v7667_v61, 6  ;;  %v7672_v8 = vrot.slane %v7670_v50, 7  ;;  %v7679_v31 = vrot.slane %v7677_v11, 6  ;;  %v7682_v54 = vrot.slane %v7680_v63, 7 }
 0x7f8   : > { %v7690_v41 = vshll.u32 %v9433_v43, 16  ;;  %v9434_v17 = vpack.c.bf16 %v13193_v1, %v13193_v1  ;;  %v7664_v49 = vsel %vm13262_vm8, %v7655_v60, %v7663_v13  ;;  %v7665_v2 = vrot.slane %v7663_v13, 4 }
 0x7f9   : > { %v7673_v4 = vor.u32 %v7672_v8, %v7669_v6  ;;  %v7689_v26 = vrot.slane %v7687_v36, 6  ;;  %7914 = vst [vmem:[#allocation2 + $0x48] sm:$0xf] %v7664_v49  ;;  %v7683_v53 = vor.u32 %v7682_v54, %v7679_v31  ;;  %v9435_v43 = vpack.c.bf16 %v13196_v44, %v13196_v44 }
 0x7fa   : > { %v7692_v34 = vrot.slane %v7690_v41, 7  ;;  %v7697_v62 = vshrl.u32 %v9434_v17, 16  ;;  %v7700_v37 = vshll.u32 %v9434_v17, 16  ;;  %v9436_v5 = vpack.c.bf16 %v13199_v51, %v13199_v51 }
 0x7fb   : > { %v7674_v45 = vsel %vm13262_vm8, %v7665_v2, %v7673_v4  ;;  %v7675_v39 = vrot.slane %v7673_v4, 4  ;;  %v7685_v52 = vrot.slane %v7683_v53, 4  ;;  %v7707_v11 = vshrl.u32 %v9435_v43, 16 }
 0x7fc   : > { %7915 = vst [vmem:[#allocation2 + $0x4c] sm:$0xf] %v7674_v45  ;;  %v7693_v61 = vor.u32 %v7692_v34, %v7689_v26  ;;  %v7699_v50 = vrot.slane %v7697_v62, 6  ;;  %v7702_v58 = vrot.slane %v7700_v37, 7  ;;  %v7710_v63 = vshll.u32 %v9435_v43, 16 }
 0x7fd   : > { %v7684_v60 = vsel %vm13262_vm8, %v7675_v39, %v7683_v53  ;;  %v7717_v13 = vshrl.u32 %v9436_v5, 16  ;;  %v7720_v31 = vshll.u32 %v9436_v5, 16  ;;  %v7709_v54 = vrot.slane %v7707_v11, 6 }
 0x7fe   : > { %7916 = vst [vmem:[#allocation2 + $0x50] sm:$0xf] %v7684_v60  ;;  %v7694_v6 = vsel %vm13262_vm8, %v7685_v52, %v7693_v61  ;;  %v7695_v8 = vrot.slane %v7693_v61, 4  ;;  %v7703_v36 = vor.u32 %v7702_v58, %v7699_v50  ;;  %v7712_v41 = vrot.slane %v7710_v63, 7 }
 0x7ff   : > { %7917 = vst [vmem:[#allocation2 + $0x54] sm:$0xf] %v7694_v6  ;;  %v7719_v17 = vrot.slane %v7717_v13, 6  ;;  %v9437_v49 = vpack.c.bf16 %v13202_v7, %v13202_v7  ;;  %v7722_v26 = vrot.slane %v7720_v31, 7  ;;  %v9438_v53 = vpack.c.bf16 %v13205_v30, %v13205_v30 }
 0x800   : > { %v7704_v2 = vsel %vm13262_vm8, %v7695_v8, %v7703_v36  ;;  %v7705_v4 = vrot.slane %v7703_v36, 4  ;;  %v7713_v34 = vor.u32 %v7712_v41, %v7709_v54  ;;  %v9439_v45 = vpack.c.bf16 %v13208_v10, %v13208_v10 }
 0x801   : > { %7918 = vst [vmem:[#allocation2 + $0x58] sm:$0xf] %v7704_v2  ;;  %v7727_v62 = vshrl.u32 %v9437_v49, 16  ;;  %v7730_v37 = vshll.u32 %v9437_v49, 16  ;;  %v7723_v39 = vor.u32 %v7722_v26, %v7719_v17  ;;  %v7737_v43 = vshrl.u32 %v9438_v53, 16 }
 0x802   : > { %v7740_v5 = vshll.u32 %v9438_v53, 16  ;;  %v9440_v52 = vpack.c.bf16 %v13211_v22, %v13211_v22  ;;  %v7714_v61 = vsel %vm13262_vm8, %v7705_v4, %v7713_v34  ;;  %v7715_v50 = vrot.slane %v7713_v34, 4 }
 0x803   : > { %v7729_v58 = vrot.slane %v7727_v62, 6  ;;  %v7732_v60 = vrot.slane %v7730_v37, 7  ;;  %7919 = vst [vmem:[#allocation2 + $0x5c] sm:$0xf] %v7714_v61  ;;  %v7725_v11 = vrot.slane %v7723_v39, 4  ;;  %v7739_v63 = vrot.slane %v7737_v43, 6 }
 0x804   : > { %v7742_v13 = vrot.slane %v7740_v5, 7  ;;  %v7747_v6 = vshrl.u32 %v9439_v45, 16  ;;  %v7724_v8 = vsel %vm13262_vm8, %v7715_v50, %v7723_v39  ;;  %v7750_v31 = vshll.u32 %v9439_v45, 16 }
 0x805   : > { %v7733_v36 = vor.u32 %v7732_v60, %v7729_v58  ;;  %v7757_v54 = vshrl.u32 %v9440_v52, 16  ;;  %7920 = vst [vmem:[#allocation2 + $0x60] sm:$0xf] %v7724_v8  ;;  %v7760_v49 = vshll.u32 %v9440_v52, 16  ;;  %v9441_v2 = vpack.c.bf16 %v13214_v14, %v13214_v14 }
 0x806   : > { %v7743_v41 = vor.u32 %v7742_v13, %v7739_v63  ;;  %v7749_v17 = vrot.slane %v7747_v6, 6  ;;  %v7752_v53 = vrot.slane %v7750_v31, 7  ;;  %v9442_v52 = vpack.c.bf16 %v13217_v9, %v13217_v9 }
 0x807   : > { %v7734_v4 = vsel %vm13262_vm8, %v7725_v11, %v7733_v36  ;;  %v7735_v26 = vrot.slane %v7733_v36, 4  ;;  %v7759_v34 = vrot.slane %v7757_v54, 6  ;;  %v7762_v37 = vrot.slane %v7760_v49, 7 }
 0x808   : > { %7921 = vst [vmem:[#allocation2 + $0x64] sm:$0xf] %v7734_v4  ;;  %v7745_v62 = vrot.slane %v7743_v41, 4  ;;  %v7767_v39 = vshrl.u32 %v9441_v2, 16  ;;  %v7770_v43 = vshll.u32 %v9441_v2, 16  ;;  %v7753_v5 = vor.u32 %v7752_v53, %v7749_v17 }
 0x809   : > { %v7744_v45 = vsel %vm13262_vm8, %v7735_v26, %v7743_v41  ;;  %v9443_v61 = vpack.c.bf16 %v13220_v20, %v13220_v20  ;;  %v7763_v50 = vor.u32 %v7762_v37, %v7759_v34  ;;  %v9444_v11 = vpack.c.bf16 %v13223_v33, %v13223_v33 }
 0x80a   : > { %7922 = vst [vmem:[#allocation2 + $0x68] sm:$0xf] %v7744_v45  ;;  %v7769_v58 = vrot.slane %v7767_v39, 6  ;;  %v7772_v60 = vrot.slane %v7770_v43, 7  ;;  %v7754_v63 = vsel %vm13262_vm8, %v7745_v62, %v7753_v5  ;;  %v7755_v13 = vrot.slane %v7753_v5, 4 }
 0x80b   : > { %v7777_v6 = vshrl.u32 %v9442_v52, 16  ;;  %v7780_v8 = vshll.u32 %v9442_v52, 16  ;;  %7923 = vst [vmem:[#allocation2 + $0x6c] sm:$0xf] %v7754_v63  ;;  %v7765_v36 = vrot.slane %v7763_v50, 4  ;;  %v7787_v54 = vshrl.u32 %v9443_v61, 16 }
 0x80c   : > { %v7773_v31 = vor.u32 %v7772_v60, %v7769_v58  ;;  %v7790_v41 = vshll.u32 %v9443_v61, 16  ;;  %v7764_v17 = vsel %vm13262_vm8, %v7755_v13, %v7763_v50  ;;  %v7797_v4 = vshrl.u32 %v9444_v11, 16 }
 0x80d   : > { %v7779_v49 = vrot.slane %v7777_v6, 6  ;;  %v7782_v2 = vrot.slane %v7780_v8, 7  ;;  %7924 = vst [vmem:[#allocation2 + $0x70] sm:$0xf] %v7764_v17  ;;  %v7789_v34 = vrot.slane %v7787_v54, 6  ;;  %v7800_v43 = vshll.u32 %v9444_v11, 16 }
 0x80e   : > { %v7774_v26 = vsel %vm13262_vm8, %v7765_v36, %v7773_v31  ;;  %v7775_v53 = vrot.slane %v7773_v31, 4  ;;  %v7792_v62 = vrot.slane %v7790_v41, 7  ;;  %v7799_v39 = vrot.slane %v7797_v4, 6 }
 0x80f   : > { %7925 = vst [vmem:[#allocation2 + $0x74] sm:$0xf] %v7774_v26  ;;  %v7783_v37 = vor.u32 %v7782_v2, %v7779_v49  ;;  %v9445_v45 = vpack.c.bf16 %v13226_v19, %v13226_v19  ;;  %v9446_v52 = vpack.c.bf16 %v13229_v27, %v13229_v27  ;;  %v9447_v61 = vpack.c.bf16 %v13232_v59, %v13232_v59 }
 0x810   : > { %v7793_v5 = vor.u32 %v7792_v62, %v7789_v34  ;;  %v9448_v50 = vpack.c.bf16 %v13235_v47, %v13235_v47  ;;  %v7802_v63 = vrot.slane %v7800_v43, 7 }
 0x811   : > { %v7784_v58 = vsel %vm13262_vm8, %v7775_v53, %v7783_v37  ;;  %v7785_v60 = vrot.slane %v7783_v37, 4  ;;  %v7807_v13 = vshrl.u32 %v9445_v45, 16  ;;  %v7810_v6 = vshll.u32 %v9445_v45, 16 }
 0x812   : > { %7926 = vst [vmem:[#allocation2 + $0x78] sm:$0xf] %v7784_v58  ;;  %v7795_v11 = vrot.slane %v7793_v5, 4  ;;  %v7817_v8 = vshrl.u32 %v9446_v52, 16  ;;  %v7820_v36 = vshll.u32 %v9446_v52, 16  ;;  %v7803_v54 = vor.u32 %v7802_v63, %v7799_v39 }
 0x813   : > { %v7794_v31 = vsel %vm13262_vm8, %v7785_v60, %v7793_v5  ;;  %v7809_v41 = vrot.slane %v7807_v13, 6  ;;  %v7827_v17 = vshrl.u32 %v9447_v61, 16  ;;  %v7812_v49 = vrot.slane %v7810_v6, 7 }
 0x814   : > { %7927 = vst [vmem:[#allocation2 + $0x7c] sm:$0xf] %v7794_v31  ;;  %v7819_v2 = vrot.slane %v7817_v8, 6  ;;  %v7822_v4 = vrot.slane %v7820_v36, 7  ;;  %v7830_v26 = vshll.u32 %v9447_v61, 16  ;;  %v7804_v53 = vsel %vm13262_vm8, %v7795_v11, %v7803_v54 }
 0x815   : > { %v7805_v34 = vrot.slane %v7803_v54, 4  ;;  %v7829_v62 = vrot.slane %v7827_v17, 6  ;;  %v7837_v37 = vshrl.u32 %v9448_v50, 16  ;;  %7928 = vst [vmem:[#allocation2 + $0x80] sm:$0xf] %v7804_v53  ;;  %v7813_v43 = vor.u32 %v7812_v49, %v7809_v41 }
 0x816   : > { %v7823_v45 = vor.u32 %v7822_v4, %v7819_v2  ;;  %v7832_v52 = vrot.slane %v7830_v26, 7  ;;  %v7840_v58 = vshll.u32 %v9448_v50, 16  ;;  %v9449_v39 = vpack.c.bf16 %v13238_v48, %v13238_v48  ;;  %v7936_v26 = vld [vmem:[#allocation2 + $0x98] sm:$0x3] }
 0x817   : > { %v7839_v5 = vrot.slane %v7837_v37, 6  ;;  %v7814_v60 = vsel %vm13262_vm8, %v7805_v34, %v7813_v43  ;;  %v7815_v63 = vrot.slane %v7813_v43, 4 }
 0x818   : > { %v7825_v61 = vrot.slane %v7823_v45, 4  ;;  %v7833_v13 = vor.u32 %v7832_v52, %v7829_v62  ;;  %7929 = vst [vmem:[#allocation2 + $0x84] sm:$0xf] %v7814_v60  ;;  %v7842_v11 = vrot.slane %v7840_v58, 7  ;;  %v7847_v6 = vshrl.u32 %v9449_v39, 16 }
 0x819   : > { %v7850_v8 = vshll.u32 %v9449_v39, 16  ;;  %v7824_v36 = vsel %vm13262_vm8, %v7815_v63, %v7823_v45 }
 0x81a   : > { %v7834_v50 = vsel %vm13262_vm8, %v7825_v61, %v7833_v13  ;;  %v7835_v31 = vrot.slane %v7833_v13, 4  ;;  %7930 = vst [vmem:[#allocation2 + $0x88] sm:$0xf] %v7824_v36  ;;  %v7843_v54 = vor.u32 %v7842_v11, %v7839_v5  ;;  %v7849_v41 = vrot.slane %v7847_v6, 6 }
 0x81b   : > { %7931 = vst [vmem:[#allocation2 + $0x8c] sm:$0xf] %v7834_v50  ;;  %v7852_v17 = vrot.slane %v7850_v8, 7 }
 0x81c   : > { %v7844_v49 = vsel %vm13262_vm8, %v7835_v31, %v7843_v54  ;;  %v7845_v2 = vrot.slane %v7843_v54, 4 }
 0x81d   : > { %v7853_v4 = vor.u32 %v7852_v17, %v7849_v41  ;;  %7932 = vst [vmem:[#allocation2 + $0x90] sm:$0xf] %v7844_v49 }
 0x81f   : > { %v7854_v53 = vsel %vm13262_vm8, %v7845_v2, %v7853_v4  ;;  %v7855_v34 = vrot.slane %v7853_v4, 4 }
 0x820   : > { %7933 = vst [vmem:[#allocation2 + $0x94] sm:$0xf] %v7854_v53 }
 0x821   : > { %v7937_v62 = vsel %vm7935_vm10, %v7855_v34, %v7936_v26 }
 0x822   : > { %7938 = vst [vmem:[#allocation2 + $0x98] sm:$0x3] %v7937_v62 }
 0x823 PF: > { %7941 = sbr.rel (%p9053_p6) target bundleno = 2163 (0x873), region = 96  ;;  %v9450_v37 = vpack.c.bf16 (!%p9053_p6), %v13133_v32, %v13133_v32  ;;  %vm8431_vm11 = vcmask (!%p9053_p6), 1043457   ;;  %vm8432_vm12 = vsmask.f32 (!%p9053_p6), 7942  ;;  %v9451_v43 = vpack.c.bf16 (!%p9053_p6), %v13136_v42, %v13136_v42 }
 0x824   : > { %vm8032_vm13 = vsmask.f32 (!%p9053_p6), 1280  ;;  %vm8033_vm14 = vsmask.f32 (!%p9053_p6), 5392  ;;  %v9452_v55 = vpack.c.bf16 (!%p9053_p6), %v13139_v21, %v13139_v21  ;;  %v9453_v45 = vpack.c.bf16 (!%p9053_p6), %v13142_v28, %v13142_v28  ;;  %vm13411_vm15 = vmand (!%p9053_p6), %vm8431_vm11, %vm8432_vm12  ;;  %v8434_v21 = vld [vmem:[#allocation3 + $0x8] sm:$0xe] (!%p9053_p6) }
 0x825   : > { %v8036_v52 = vshrl.u32 (!%p9053_p6), %v9450_v37, 16  ;;  %v8039_v58 = vshll.u32 (!%p9053_p6), %v9450_v37, 16  ;;  %v8045_v5 = vshrl.u32 (!%p9053_p6), %v9451_v43, 16  ;;  %v8048_v39 = vshll.u32 (!%p9053_p6), %v9451_v43, 16  ;;  %vm13421_vm0 = vmor (!%p9053_p6), %vm8032_vm13, %vm8033_vm14 }
 0x826   : > { %v8055_v60 = vshrl.u32 (!%p9053_p6), %v9452_v55, 16  ;;  %v8058_v63 = vshll.u32 (!%p9053_p6), %v9452_v55, 16  ;;  %v8065_v32 = vshrl.u32 (!%p9053_p6), %v9453_v45, 16  ;;  %v8068_v61 = vshll.u32 (!%p9053_p6), %v9453_v45, 16 }
 0x827   : > { %v8038_v13 = vrot.slane (!%p9053_p6), %v8036_v52, 6  ;;  %v8041_v11 = vrot.slane (!%p9053_p6), %v8039_v58, 7  ;;  %v8047_v6 = vrot.slane (!%p9053_p6), %v8045_v5, 6  ;;  %v8050_v42 = vrot.slane (!%p9053_p6), %v8048_v39, 7 }
 0x828   : > { %v8057_v28 = vrot.slane (!%p9053_p6), %v8055_v60, 6  ;;  %v8060_v36 = vrot.slane (!%p9053_p6), %v8058_v63, 7  ;;  %v8067_v50 = vrot.slane (!%p9053_p6), %v8065_v32, 6  ;;  %v8070_v31 = vrot.slane (!%p9053_p6), %v8068_v61, 7 }
 0x829   : > { %v8042_v54 = vor.u32 (!%p9053_p6), %v8041_v11, %v8038_v13  ;;  %v8051_v41 = vor.u32 (!%p9053_p6), %v8050_v42, %v8047_v6  ;;  %v9454_v17 = vpack.c.bf16 (!%p9053_p6), %v13145_v24, %v13145_v24  ;;  %v9455_v49 = vpack.c.bf16 (!%p9053_p6), %v13148_v3, %v13148_v3 }
 0x82a   : > { %v8061_v4 = vor.u32 %v8060_v36, %v8057_v28  ;;  %v8071_v26 = vor.u32 %v8070_v31, %v8067_v50  ;;  %v9456_v53 = vpack.c.bf16 %v13151_v35, %v13151_v35  ;;  %v9457_v34 = vpack.c.bf16 %v13154_v57, %v13154_v57 }
 0x82b   : > { %v8435_v24 = vsel %vm13411_vm15, %v8042_v54, %v8434_v21  ;;  %v8043_v62 = vrot.slane %v8042_v54, 4  ;;  %v8053_v37 = vrot.slane %v8051_v41, 4  ;;  %v8075_v3 = vshrl.u32 %v9454_v17, 16 }
 0x82c   : > { %8436 = vst [vmem:[#allocation3 + $0x8] sm:$0xe] %v8435_v24  ;;  %v8063_v43 = vrot.slane %v8061_v4, 4  ;;  %v8073_v55 = vrot.slane %v8071_v26, 4  ;;  %v8078_v45 = vshll.u32 %v9454_v17, 16  ;;  %v8085_v52 = vshrl.u32 %v9455_v49, 16 }
 0x82d   : > { %v8052_v58 = vsel %vm13421_vm0, %v8043_v62, %v8051_v41  ;;  %v8062_v35 = vsel %vm13421_vm0, %v8053_v37, %v8061_v4  ;;  %v8077_v5 = vrot.slane %v8075_v3, 6  ;;  %v8088_v39 = vshll.u32 %v9455_v49, 16 }
 0x82e   : > { %8437 = vst [vmem:[#allocation3 + $0xc] sm:$0xf] %v8052_v58  ;;  %8438 = vst [vmem:[#allocation3 + $0x10] sm:$0xf] %v8062_v35  ;;  %v8072_v57 = vsel %vm13421_vm0, %v8063_v43, %v8071_v26  ;;  %v8080_v60 = vrot.slane %v8078_v45, 7  ;;  %v8087_v63 = vrot.slane %v8085_v52, 6  ;;  %v9458_v21 = vpack.c.bf16 %v13157_v25, %v13157_v25 }
 0x82f   : > { %v8095_v32 = vshrl.u32 %v9456_v53, 16  ;;  %8439 = vst [vmem:[#allocation3 + $0x14] sm:$0xf] %v8072_v57  ;;  %v8090_v61 = vrot.slane %v8088_v39, 7  ;;  %v8098_v13 = vshll.u32 %v9456_v53, 16  ;;  %v8105_v11 = vshrl.u32 %v9457_v34, 16 }
 0x830   : > { %v8108_v6 = vshll.u32 %v9457_v34, 16  ;;  %v8081_v42 = vor.u32 %v8080_v60, %v8077_v5  ;;  %v9459_v28 = vpack.c.bf16 %v13160_v46, %v13160_v46  ;;  %v8115_v49 = vshrl.u32 %v9458_v21, 16 }
 0x831   : > { %v8097_v8 = vrot.slane %v8095_v32, 6  ;;  %v8091_v36 = vor.u32 %v8090_v61, %v8087_v63  ;;  %v8100_v50 = vrot.slane %v8098_v13, 7  ;;  %v8107_v31 = vrot.slane %v8105_v11, 6 }
 0x832   : > { %v8110_v54 = vrot.slane %v8108_v6, 7  ;;  %v8082_v41 = vsel %vm13421_vm0, %v8073_v55, %v8081_v42  ;;  %v8083_v17 = vrot.slane %v8081_v42, 4  ;;  %v8118_v4 = vshll.u32 %v9458_v21, 16 }
 0x833   : > { %8440 = vst [vmem:[#allocation3 + $0x18] sm:$0xf] %v8082_v41  ;;  %v8093_v26 = vrot.slane %v8091_v36, 4  ;;  %v8101_v53 = vor.u32 %v8100_v50, %v8097_v8  ;;  %v8125_v24 = vshrl.u32 %v9459_v28, 16  ;;  %v8117_v62 = vrot.slane %v8115_v49, 6 }
 0x834   : > { %v8111_v34 = vor.u32 %v8110_v54, %v8107_v31  ;;  %v8092_v25 = vsel %vm13421_vm0, %v8083_v17, %v8091_v36  ;;  %v8120_v46 = vrot.slane %v8118_v4, 7  ;;  %v8128_v37 = vshll.u32 %v9459_v28, 16 }
 0x835   : > { %8441 = vst [vmem:[#allocation3 + $0x1c] sm:$0xf] %v8092_v25  ;;  %v8102_v3 = vsel %vm13421_vm0, %v8093_v26, %v8101_v53  ;;  %v8103_v43 = vrot.slane %v8101_v53, 4  ;;  %v8127_v45 = vrot.slane %v8125_v24, 6  ;;  %v9460_v35 = vpack.c.bf16 %v13163_v29, %v13163_v29 }
 0x836   : > { %v8113_v55 = vrot.slane %v8111_v34, 4  ;;  %8442 = vst [vmem:[#allocation3 + $0x20] sm:$0xf] %v8102_v3  ;;  %v8121_v52 = vor.u32 %v8120_v46, %v8117_v62  ;;  %v8130_v58 = vrot.slane %v8128_v37, 7  ;;  %v9461_v5 = vpack.c.bf16 %v13166_v16, %v13166_v16 }
 0x837   : > { %v8112_v39 = vsel %vm13421_vm0, %v8103_v43, %v8111_v34  ;;  %v9462_v57 = vpack.c.bf16 %v13169_v23, %v13169_v23  ;;  %v9463_v60 = vpack.c.bf16 %v13172_v56, %v13172_v56  ;;  %v9464_v63 = vpack.c.bf16 %v13175_v12, %v13175_v12 }
 0x838   : > { %8443 = vst [vmem:[#allocation3 + $0x24] sm:$0xf] %v8112_v39  ;;  %v8122_v32 = vsel %vm13421_vm0, %v8113_v55, %v8121_v52  ;;  %v8123_v29 = vrot.slane %v8121_v52, 4  ;;  %v8131_v61 = vor.u32 %v8130_v58, %v8127_v45  ;;  %v8135_v13 = vshrl.u32 %v9460_v35, 16 }
 0x839   : > { %8444 = vst [vmem:[#allocation3 + $0x28] sm:$0xf] %v8122_v32  ;;  %v8138_v16 = vshll.u32 %v9460_v35, 16  ;;  %v8145_v11 = vshrl.u32 %v9461_v5, 16  ;;  %v8148_v6 = vshll.u32 %v9461_v5, 16  ;;  %v8155_v42 = vshrl.u32 %v9462_v57, 16 }
 0x83a   : > { %v8132_v23 = vsel %vm13421_vm0, %v8123_v29, %v8131_v61  ;;  %v8133_v8 = vrot.slane %v8131_v61, 4  ;;  %v8137_v56 = vrot.slane %v8135_v13, 6  ;;  %v8158_v21 = vshll.u32 %v9462_v57, 16 }
 0x83b   : > { %8445 = vst [vmem:[#allocation3 + $0x2c] sm:$0xf] %v8132_v23  ;;  %v8140_v12 = vrot.slane %v8138_v16, 7  ;;  %v8147_v28 = vrot.slane %v8145_v11, 6  ;;  %v8150_v36 = vrot.slane %v8148_v6, 7  ;;  %v8157_v50 = vrot.slane %v8155_v42, 6 }
 0x83c   : > { %v8160_v31 = vrot.slane %v8158_v21, 7  ;;  %v8165_v54 = vshrl.u32 %v9463_v60, 16  ;;  %v8168_v41 = vshll.u32 %v9463_v60, 16  ;;  %v8175_v17 = vshrl.u32 %v9464_v63, 16 }
 0x83d   : > { %v8141_v49 = vor.u32 %v8140_v12, %v8137_v56  ;;  %v8151_v4 = vor.u32 %v8150_v36, %v8147_v28  ;;  %v8178_v26 = vshll.u32 %v9464_v63, 16  ;;  %v9465_v53 = vpack.c.bf16 %v13178_v38, %v13178_v38 }
 0x83e   : > { %v8161_v34 = vor.u32 %v8160_v31, %v8157_v50  ;;  %v8167_v24 = vrot.slane %v8165_v54, 6  ;;  %v8170_v25 = vrot.slane %v8168_v41, 7  ;;  %v8177_v62 = vrot.slane %v8175_v17, 6 }
 0x83f   : > { %v8142_v46 = vsel %vm13421_vm0, %v8133_v8, %v8141_v49  ;;  %v8143_v37 = vrot.slane %v8141_v49, 4  ;;  %v8153_v3 = vrot.slane %v8151_v4, 4  ;;  %v8180_v43 = vrot.slane %v8178_v26, 7 }
 0x840   : > { %8446 = vst [vmem:[#allocation3 + $0x30] sm:$0xf] %v8142_v46  ;;  %v8163_v55 = vrot.slane %v8161_v34, 4  ;;  %v8171_v45 = vor.u32 %v8170_v25, %v8167_v24  ;;  %v8185_v52 = vshrl.u32 %v9465_v53, 16  ;;  %v8188_v58 = vshll.u32 %v9465_v53, 16 }
 0x841   : > { %v8152_v35 = vsel %vm13421_vm0, %v8143_v37, %v8151_v4  ;;  %v8162_v38 = vsel %vm13421_vm0, %v8153_v3, %v8161_v34  ;;  %v8181_v5 = vor.u32 %v8180_v43, %v8177_v62  ;;  %v9466_v39 = vpack.c.bf16 %v13181_v0, %v13181_v0 }
 0x842   : > { %8447 = vst [vmem:[#allocation3 + $0x34] sm:$0xf] %v8152_v35  ;;  %8448 = vst [vmem:[#allocation3 + $0x38] sm:$0xf] %v8162_v38  ;;  %v8172_v57 = vsel %vm13421_vm0, %v8163_v55, %v8171_v45  ;;  %v8173_v60 = vrot.slane %v8171_v45, 4  ;;  %v8187_v63 = vrot.slane %v8185_v52, 6  ;;  %v9467_v16 = vpack.c.bf16 %v13184_v40, %v13184_v40 }
 0x843   : > { %v8190_v32 = vrot.slane %v8188_v58, 7  ;;  %8449 = vst [vmem:[#allocation3 + $0x3c] sm:$0xf] %v8172_v57  ;;  %v8183_v29 = vrot.slane %v8181_v5, 4  ;;  %v8195_v61 = vshrl.u32 %v9466_v39, 16  ;;  %v8198_v13 = vshll.u32 %v9466_v39, 16 }
 0x844   : > { %v8182_v11 = vsel %vm13421_vm0, %v8173_v60, %v8181_v5  ;;  %v9468_v0 = vpack.c.bf16 %v13187_v18, %v13187_v18  ;;  %v9469_v42 = vpack.c.bf16 %v13190_v15, %v13190_v15  ;;  %v8205_v56 = vshrl.u32 %v9467_v16, 16 }
 0x845   : > { %v8191_v6 = vor.u32 %v8190_v32, %v8187_v63  ;;  %8450 = vst [vmem:[#allocation3 + $0x40] sm:$0xf] %v8182_v11  ;;  %v8197_v23 = vrot.slane %v8195_v61, 6  ;;  %v8200_v8 = vrot.slane %v8198_v13, 7  ;;  %v8208_v21 = vshll.u32 %v9467_v16, 16 }
 0x846   : > { %v8215_v40 = vshrl.u32 %v9468_v0, 16  ;;  %v8218_v36 = vshll.u32 %v9468_v0, 16  ;;  %v8207_v31 = vrot.slane %v8205_v56, 6  ;;  %v8225_v41 = vshrl.u32 %v9469_v42, 16 }
 0x847   : > { %v8192_v12 = vsel %vm13421_vm0, %v8183_v29, %v8191_v6  ;;  %v8193_v28 = vrot.slane %v8191_v6, 4  ;;  %v8201_v50 = vor.u32 %v8200_v8, %v8197_v23  ;;  %v8210_v54 = vrot.slane %v8208_v21, 7 }
 0x848   : > { %8451 = vst [vmem:[#allocation3 + $0x44] sm:$0xf] %v8192_v12  ;;  %v8217_v18 = vrot.slane %v8215_v40, 6  ;;  %v8220_v17 = vrot.slane %v8218_v36, 7  ;;  %v8228_v49 = vshll.u32 %v9469_v42, 16  ;;  %v9470_v15 = vpack.c.bf16 %v13193_v1, %v13193_v1 }
 0x849   : > { %v8202_v4 = vsel %vm13421_vm0, %v8193_v28, %v8201_v50  ;;  %v8203_v26 = vrot.slane %v8201_v50, 4  ;;  %v8211_v53 = vor.u32 %v8210_v54, %v8207_v31  ;;  %v8227_v34 = vrot.slane %v8225_v41, 6 }
 0x84a   : > { %8452 = vst [vmem:[#allocation3 + $0x48] sm:$0xf] %v8202_v4  ;;  %v8221_v24 = vor.u32 %v8220_v17, %v8217_v18  ;;  %v8230_v25 = vrot.slane %v8228_v49, 7  ;;  %v8235_v62 = vshrl.u32 %v9470_v15, 16  ;;  %v8238_v46 = vshll.u32 %v9470_v15, 16 }
 0x84b   : > { %v8212_v37 = vsel %vm13421_vm0, %v8203_v26, %v8211_v53  ;;  %v8213_v3 = vrot.slane %v8211_v53, 4  ;;  %v9471_v43 = vpack.c.bf16 %v13196_v44, %v13196_v44  ;;  %v9472_v1 = vpack.c.bf16 %v13199_v51, %v13199_v51 }
 0x84c   : > { %8453 = vst [vmem:[#allocation3 + $0x4c] sm:$0xf] %v8212_v37  ;;  %v8223_v55 = vrot.slane %v8221_v24, 4  ;;  %v8231_v45 = vor.u32 %v8230_v25, %v8227_v34  ;;  %v8237_v52 = vrot.slane %v8235_v62, 6  ;;  %v8240_v58 = vrot.slane %v8238_v46, 7 }
 0x84d   : > { %v8222_v35 = vsel %vm13421_vm0, %v8213_v3, %v8221_v24  ;;  %v8245_v38 = vshrl.u32 %v9471_v43, 16  ;;  %v8248_v5 = vshll.u32 %v9471_v43, 16  ;;  %v8255_v39 = vshrl.u32 %v9472_v1, 16 }
 0x84e   : > { %8454 = vst [vmem:[#allocation3 + $0x50] sm:$0xf] %v8222_v35  ;;  %v8232_v57 = vsel %vm13421_vm0, %v8223_v55, %v8231_v45  ;;  %v8233_v60 = vrot.slane %v8231_v45, 4  ;;  %v8241_v44 = vor.u32 %v8240_v58, %v8237_v52  ;;  %v8258_v63 = vshll.u32 %v9472_v1, 16 }
 0x84f   : > { %8455 = vst [vmem:[#allocation3 + $0x54] sm:$0xf] %v8232_v57  ;;  %v8247_v51 = vrot.slane %v8245_v38, 6  ;;  %v8250_v32 = vrot.slane %v8248_v5, 7  ;;  %v8257_v29 = vrot.slane %v8255_v39, 6  ;;  %v9473_v61 = vpack.c.bf16 %v13202_v7, %v13202_v7 }
 0x850   : > { %v8242_v13 = vsel %vm13421_vm0, %v8233_v60, %v8241_v44  ;;  %v8243_v16 = vrot.slane %v8241_v44, 4  ;;  %v8260_v11 = vrot.slane %v8258_v63, 7  ;;  %v9474_v6 = vpack.c.bf16 %v13205_v30, %v13205_v30 }
 0x851   : > { %8456 = vst [vmem:[#allocation3 + $0x58] sm:$0xf] %v8242_v13  ;;  %v8251_v0 = vor.u32 %v8250_v32, %v8247_v51  ;;  %v8265_v42 = vshrl.u32 %v9473_v61, 16  ;;  %v8268_v23 = vshll.u32 %v9473_v61, 16  ;;  %v9475_v8 = vpack.c.bf16 %v13208_v10, %v13208_v10 }
 0x852   : > { %v8261_v56 = vor.u32 %v8260_v11, %v8257_v29  ;;  %v8275_v21 = vshrl.u32 %v9474_v6, 16  ;;  %v8278_v12 = vshll.u32 %v9474_v6, 16  ;;  %v9476_v7 = vpack.c.bf16 %v13211_v22, %v13211_v22 }
 0x853   : > { %v8252_v28 = vsel %vm13421_vm0, %v8243_v16, %v8251_v0  ;;  %v8253_v40 = vrot.slane %v8251_v0, 4  ;;  %v8267_v36 = vrot.slane %v8265_v42, 6  ;;  %v8270_v50 = vrot.slane %v8268_v23, 7 }
 0x854   : > { %8457 = vst [vmem:[#allocation3 + $0x5c] sm:$0xf] %v8252_v28  ;;  %v8263_v30 = vrot.slane %v8261_v56, 4  ;;  %v8277_v31 = vrot.slane %v8275_v21, 6  ;;  %v8280_v54 = vrot.slane %v8278_v12, 7  ;;  %v8285_v41 = vshrl.u32 %v9475_v8, 16 }
 0x855   : > { %v8262_v10 = vsel %vm13421_vm0, %v8253_v40, %v8261_v56  ;;  %v8271_v18 = vor.u32 %v8270_v50, %v8267_v36  ;;  %v8288_v17 = vshll.u32 %v9475_v8, 16  ;;  %v8295_v49 = vshrl.u32 %v9476_v7, 16 }
 0x856   : > { %8458 = vst [vmem:[#allocation3 + $0x60] sm:$0xf] %v8262_v10  ;;  %v8281_v15 = vor.u32 %v8280_v54, %v8277_v31  ;;  %v8287_v22 = vrot.slane %v8285_v41, 6  ;;  %v8298_v4 = vshll.u32 %v9476_v7, 16  ;;  %v9477_v26 = vpack.c.bf16 %v13214_v14, %v13214_v14 }
 0x857   : > { %v8272_v53 = vsel %vm13421_vm0, %v8263_v30, %v8271_v18  ;;  %v8273_v34 = vrot.slane %v8271_v18, 4  ;;  %v8290_v24 = vrot.slane %v8288_v17, 7  ;;  %v8297_v25 = vrot.slane %v8295_v49, 6 }
 0x858   : > { %8459 = vst [vmem:[#allocation3 + $0x64] sm:$0xf] %v8272_v53  ;;  %v8283_v62 = vrot.slane %v8281_v15, 4  ;;  %v8300_v46 = vrot.slane %v8298_v4, 7  ;;  %v8305_v37 = vshrl.u32 %v9477_v26, 16  ;;  %v8308_v3 = vshll.u32 %v9477_v26, 16 }
 0x859   : > { %v8282_v43 = vsel %vm13421_vm0, %v8273_v34, %v8281_v15  ;;  %v8291_v1 = vor.u32 %v8290_v24, %v8287_v22  ;;  %v9478_v55 = vpack.c.bf16 %v13217_v9, %v13217_v9  ;;  %v9479_v14 = vpack.c.bf16 %v13220_v20, %v13220_v20 }
 0x85a   : > { %8460 = vst [vmem:[#allocation3 + $0x68] sm:$0xf] %v8282_v43  ;;  %v8301_v45 = vor.u32 %v8300_v46, %v8297_v25  ;;  %v8307_v52 = vrot.slane %v8305_v37, 6  ;;  %v8310_v58 = vrot.slane %v8308_v3, 7  ;;  %v9480_v35 = vpack.c.bf16 %v13223_v33, %v13223_v33 }
 0x85b   : > { %v8292_v38 = vsel %vm13421_vm0, %v8283_v62, %v8291_v1  ;;  %v8293_v5 = vrot.slane %v8291_v1, 4  ;;  %v8315_v39 = vshrl.u32 %v9478_v55, 16  ;;  %v8318_v57 = vshll.u32 %v9478_v55, 16 }
 0x85c   : > { %8461 = vst [vmem:[#allocation3 + $0x6c] sm:$0xf] %v8292_v38  ;;  %v8303_v60 = vrot.slane %v8301_v45, 4  ;;  %v8311_v44 = vor.u32 %v8310_v58, %v8307_v52  ;;  %v8325_v9 = vshrl.u32 %v9479_v14, 16  ;;  %v8328_v63 = vshll.u32 %v9479_v14, 16 }
 0x85d   : > { %v8302_v20 = vsel %vm13421_vm0, %v8293_v5, %v8301_v45  ;;  %v8317_v51 = vrot.slane %v8315_v39, 6  ;;  %v8320_v32 = vrot.slane %v8318_v57, 7  ;;  %v8335_v29 = vshrl.u32 %v9480_v35, 16  ;;  %v8474_v57 = vld [vmem:[#allocation3 + $0x98] sm:$0x3] }
 0x85e   : > { %8462 = vst [vmem:[#allocation3 + $0x70] sm:$0xf] %v8302_v20  ;;  %v8312_v33 = vsel %vm13421_vm0, %v8303_v60, %v8311_v44  ;;  %v8313_v61 = vrot.slane %v8311_v44, 4  ;;  %v8327_v13 = vrot.slane %v8325_v9, 6  ;;  %v8330_v16 = vrot.slane %v8328_v63, 7 }
 0x85f   : > { %8463 = vst [vmem:[#allocation3 + $0x74] sm:$0xf] %v8312_v33  ;;  %v8321_v11 = vor.u32 %v8320_v32, %v8317_v51  ;;  %v8337_v6 = vrot.slane %v8335_v29, 6  ;;  %v8338_v0 = vshll.u32 %v9480_v35, 16  ;;  %v9481_v42 = vpack.c.bf16 %v13226_v19, %v13226_v19 }
 0x860   : > { %v8331_v23 = vor.u32 %v8330_v16, %v8327_v13  ;;  %v9482_v8 = vpack.c.bf16 %v13229_v27, %v13229_v27  ;;  %v9483_v56 = vpack.c.bf16 %v13232_v59, %v13232_v59  ;;  %v9484_v21 = vpack.c.bf16 %v13235_v47, %v13235_v47 }
 0x861   : > { %v8322_v12 = vsel %vm13421_vm0, %v8313_v61, %v8321_v11  ;;  %v8323_v7 = vrot.slane %v8321_v11, 4  ;;  %v8340_v28 = vrot.slane %v8338_v0, 7  ;;  %v8345_v40 = vshrl.u32 %v9481_v42, 16 }
 0x862   : > { %8464 = vst [vmem:[#allocation3 + $0x78] sm:$0xf] %v8322_v12  ;;  %v8333_v36 = vrot.slane %v8331_v23, 4  ;;  %v8348_v50 = vshll.u32 %v9481_v42, 16  ;;  %v8355_v19 = vshrl.u32 %v9482_v8, 16  ;;  %v8358_v30 = vshll.u32 %v9482_v8, 16 }
 0x863   : > { %v8332_v27 = vsel %vm13421_vm0, %v8323_v7, %v8331_v23  ;;  %v8341_v31 = vor.u32 %v8340_v28, %v8337_v6  ;;  %v8347_v54 = vrot.slane %v8345_v40, 6  ;;  %v8365_v59 = vshrl.u32 %v9483_v56, 16 }
 0x864   : > { %8465 = vst [vmem:[#allocation3 + $0x7c] sm:$0xf] %v8332_v27  ;;  %v8350_v41 = vrot.slane %v8348_v50, 7  ;;  %v8357_v47 = vrot.slane %v8355_v19, 6  ;;  %v8360_v10 = vrot.slane %v8358_v30, 7  ;;  %v8368_v18 = vshll.u32 %v9483_v56, 16 }
 0x865   : > { %v8342_v17 = vsel %vm13421_vm0, %v8333_v36, %v8341_v31  ;;  %v8343_v49 = vrot.slane %v8341_v31, 4  ;;  %v8367_v15 = vrot.slane %v8365_v59, 6  ;;  %v8375_v22 = vshrl.u32 %v9484_v21, 16 }
 0x866   : > { %8466 = vst [vmem:[#allocation3 + $0x80] sm:$0xf] %v8342_v17  ;;  %v8351_v4 = vor.u32 %v8350_v41, %v8347_v54  ;;  %v8361_v26 = vor.u32 %v8360_v10, %v8357_v47  ;;  %v8370_v53 = vrot.slane %v8368_v18, 7  ;;  %v8378_v34 = vshll.u32 %v9484_v21, 16 }
 0x867   : > { %v8377_v24 = vrot.slane %v8375_v22, 6  ;;  %v9485_v25 = vpack.c.bf16 %v13238_v48, %v13238_v48  ;;  %vm8472_vm1 = vcmask 1041408  }
 0x868   : > { %v8352_v62 = vsel %vm13421_vm0, %v8343_v49, %v8351_v4  ;;  %v8353_v46 = vrot.slane %v8351_v4, 4  ;;  %v8363_v37 = vrot.slane %v8361_v26, 4  ;;  %v8371_v3 = vor.u32 %v8370_v53, %v8367_v15  ;;  %vm8473_vm2 = vmand %vm8472_vm1, %vm8032_vm13 }
 0x869   : > { %8467 = vst [vmem:[#allocation3 + $0x84] sm:$0xf] %v8352_v62  ;;  %v8380_v43 = vrot.slane %v8378_v34, 7  ;;  %v8385_v1 = vshrl.u32 %v9485_v25, 16  ;;  %v8388_v55 = vshll.u32 %v9485_v25, 16 }
 0x86a   : > { %v8362_v14 = vsel %vm13421_vm0, %v8353_v46, %v8361_v26  ;;  %v8372_v45 = vsel %vm13421_vm0, %v8363_v37, %v8371_v3  ;;  %v8373_v52 = vrot.slane %v8371_v3, 4 }
 0x86b   : > { %8468 = vst [vmem:[#allocation3 + $0x88] sm:$0xf] %v8362_v14  ;;  %8469 = vst [vmem:[#allocation3 + $0x8c] sm:$0xf] %v8372_v45  ;;  %v8381_v48 = vor.u32 %v8380_v43, %v8377_v24  ;;  %v8387_v58 = vrot.slane %v8385_v1, 6  ;;  %v8390_v35 = vrot.slane %v8388_v55, 7 }
 0x86d   : > { %v8382_v38 = vsel %vm13421_vm0, %v8373_v52, %v8381_v48  ;;  %v8383_v5 = vrot.slane %v8381_v48, 4  ;;  %v8391_v39 = vor.u32 %v8390_v35, %v8387_v58 }
 0x86e   : > { %8470 = vst [vmem:[#allocation3 + $0x90] sm:$0xf] %v8382_v38 }
 0x86f   : > { %v8392_v60 = vsel %vm13421_vm0, %v8383_v5, %v8391_v39  ;;  %v8393_v44 = vrot.slane %v8391_v39, 4 }
 0x870   : > { %8471 = vst [vmem:[#allocation3 + $0x94] sm:$0xf] %v8392_v60 }
 0x871   : > { %v8475_v9 = vsel %vm8473_vm2, %v8393_v44, %v8474_v57 }
 0x872   : > { %8476 = vst [vmem:[#allocation3 + $0x98] sm:$0x3] %v8475_v9 }
 0x873 PF: > { %s14068_s19 = sld [smem:[#allocation28_spill]] }
 0x879   : > { %p9374_p5 = scmp.ne.s32.totalorder %s14068_s19, 4 }
 0x87a   : > { %v14069_v63 = vld [vmem:[#allocation56_spill] sm:$0xff] (!%p9374_p5)  ;;  %v14070_v20 = vld [vmem:[#allocation58_spill] sm:$0xff] (!%p9374_p5)  ;;  %v14078_v42 = vld [vmem:[#allocation77_spill] sm:$0xff] (!%p9374_p5) }
 0x87b   : > { %8480 = sbr.rel (%p9374_p5) target bundleno = 2187 (0x88b), region = 100  ;;  %v9525_v51 = vpack.c.bf16 (!%p9374_p5), %v14070_v20, %v14069_v63  ;;  %v14071_v32 = vld [vmem:[#allocation62_spill] sm:$0xff] (!%p9374_p5)  ;;  %v14072_v29 = vld [vmem:[#allocation64_spill] sm:$0xff] (!%p9374_p5)  ;;  %v14079_v8 = vld [vmem:[#allocation43_spill] sm:$0xff] (!%p9374_p5) }
 0x87c   : > { %v9530_v2 = vpack.c.bf16 (!%p9374_p5), %v14072_v29, %v14071_v32  ;;  %v14073_v33 = vld [vmem:[#allocation68_spill] sm:$0xff] (!%p9374_p5)  ;;  %v14074_v61 = vld [vmem:[#allocation70_spill] sm:$0xff] (!%p9374_p5)  ;;  %v14083_v40 = vld [vmem:[#allocation45_spill] sm:$0xff] (!%p9374_p5) }
 0x87d   : > { %v9535_v13 = vpack.c.bf16 (!%p9374_p5), %v14074_v61, %v14073_v33  ;;  %v14075_v16 = vld [vmem:[#allocation74_spill] sm:$0xff] (!%p9374_p5)  ;;  %v14076_v11 = vld [vmem:[#allocation76_spill] sm:$0xff] (!%p9374_p5)  ;;  %v14084_v36 = vld [vmem:[#allocation47_spill] sm:$0xff] (!%p9374_p5)  ;;  %9526 = vst [vmem:[%s11531_s30] sm:$0xff] (!%p9374_p5), %v9525_v51  }
 0x87e   : > { %v9540_v6 = vpack.c.bf16 (!%p9374_p5), %v14076_v11, %v14075_v16  ;;  %v14077_v0 = vld [vmem:[#allocation42_spill] sm:$0xff] (!%p9374_p5)  ;;  %v14080_v56 = vld [vmem:[#allocation44_spill] sm:$0xff] (!%p9374_p5)  ;;  %v9560_v50 = vpack.c.bf16 (!%p9374_p5), %v14084_v36, %v14083_v40  ;;  %9612 = vst [vmem:[%s11531_s30 + $0x8] sm:$0xff] (!%p9374_p5), %v9530_v2   ;;  %v14087_v31 = vld [vmem:[#allocation49_spill] sm:$0xff] (!%p9374_p5) }
 0x87f   : > { %v9545_v23 = vpack.c.bf16 (!%p9374_p5), %v14078_v42, %v14077_v0  ;;  %v9550_v21 = vpack.c.bf16 (!%p9374_p5), %v14080_v56, %v14079_v8  ;;  %v14081_v12 = vld [vmem:[#allocation46_spill] sm:$0xff] (!%p9374_p5)  ;;  %v14082_v7 = vld [vmem:[#allocation48_spill] sm:$0xff] (!%p9374_p5)  ;;  %9613 = vst [vmem:[%s11531_s30 + $0x10] sm:$0xff] (!%p9374_p5), %v9535_v13   ;;  %v14088_v54 = vld [vmem:[#allocation51_spill] sm:$0xff] (!%p9374_p5) }
 0x880   : > { %v9555_v28 = vpack.c.bf16 (!%p9374_p5), %v14082_v7, %v14081_v12  ;;  %9614 = vst [vmem:[%s11531_s30 + $0x18] sm:$0xff] (!%p9374_p5), %v9540_v6   ;;  %v14085_v19 = vld [vmem:[#allocation50_spill] sm:$0xff] (!%p9374_p5)  ;;  %v14086_v30 = vld [vmem:[#allocation52_spill] sm:$0xff] (!%p9374_p5)  ;;  %v9570_v59 = vpack.c.bf16 (!%p9374_p5), %v14088_v54, %v14087_v31  ;;  %v14090_v47 = vld [vmem:[#allocation57_spill] sm:$0xff] (!%p9374_p5) }
 0x881   : > { %v9565_v27 = vpack.c.bf16 (!%p9374_p5), %v14086_v30, %v14085_v19  ;;  %v14089_v41 = vld [vmem:[#allocation54_spill] sm:$0xff] (!%p9374_p5)  ;;  %v14091_v18 = vld [vmem:[#allocation53_spill] sm:$0xff] (!%p9374_p5)  ;;  %v14092_v17 = vld [vmem:[#allocation55_spill] sm:$0xff] (!%p9374_p5)  ;;  %9615 = vst [vmem:[%s11531_s30 + $0x20] sm:$0xff] (!%p9374_p5), %v9545_v23  }
 0x882   : > { %v9575_v10 = vpack.c.bf16 %v14090_v47, %v14089_v41  ;;  %v9580_v49 = vpack.c.bf16 %v14092_v17, %v14091_v18  ;;  %9616 = vst [vmem:[%s11531_s30 + $0x28] sm:$0xff] %v9550_v21   ;;  %9617 = vst [vmem:[%s11531_s30 + $0x30] sm:$0xff] %v9555_v28   ;;  %v14093_v15 = vld [vmem:[#allocation60_spill] sm:$0xff]  ;;  %v14094_v22 = vld [vmem:[#allocation63_spill] sm:$0xff] }
 0x883   : > { %9618 = vst [vmem:[%s11531_s30 + $0x38] sm:$0xff] %v9560_v50   ;;  %v9585_v4 = vpack.c.bf16 %v14094_v22, %v14093_v15  ;;  %v14095_v26 = vld [vmem:[#allocation59_spill] sm:$0xff]  ;;  %v14096_v53 = vld [vmem:[#allocation61_spill] sm:$0xff]  ;;  %v14097_v24 = vld [vmem:[#allocation66_spill] sm:$0xff] }
 0x884   : > { %v9590_v34 = vpack.c.bf16 %v14096_v53, %v14095_v26  ;;  %v14098_v25 = vld [vmem:[#allocation69_spill] sm:$0xff]  ;;  %v14100_v37 = vld [vmem:[#allocation67_spill] sm:$0xff]  ;;  %9619 = vst [vmem:[%s11531_s30 + $0x40] sm:$0xff] %v9565_v27   ;;  %9620 = vst [vmem:[%s11531_s30 + $0x48] sm:$0xff] %v9570_v59  }
 0x885   : > { %v9595_v62 = vpack.c.bf16 %v14098_v25, %v14097_v24  ;;  %v14099_v46 = vld [vmem:[#allocation65_spill] sm:$0xff]  ;;  %9621 = vst [vmem:[%s11531_s30 + $0x50] sm:$0xff] %v9575_v10   ;;  %9622 = vst [vmem:[%s11531_s30 + $0x58] sm:$0xff] %v9580_v49   ;;  %v14101_v43 = vld [vmem:[#allocation72_spill] sm:$0xff] }
 0x886   : > { %v9600_v3 = vpack.c.bf16 %v14100_v37, %v14099_v46  ;;  %v14102_v1 = vld [vmem:[#allocation75_spill] sm:$0xff]  ;;  %v14104_v45 = vld [vmem:[#allocation73_spill] sm:$0xff]  ;;  %9623 = vst [vmem:[%s11531_s30 + $0x60] sm:$0xff] %v9585_v4   ;;  %9624 = vst [vmem:[%s11531_s30 + $0x68] sm:$0xff] %v9590_v34  }
 0x887   : > { %v9605_v55 = vpack.c.bf16 %v14102_v1, %v14101_v43  ;;  %v14103_v14 = vld [vmem:[#allocation71_spill] sm:$0xff]  ;;  %9625 = vst [vmem:[%s11531_s30 + $0x70] sm:$0xff] %v9595_v62  }
 0x888   : > { %v9610_v52 = vpack.c.bf16 %v14104_v45, %v14103_v14  ;;  %9626 = vst [vmem:[%s11531_s30 + $0x78] sm:$0xff] %v9600_v3  }
 0x889   : > { %9627 = vst [vmem:[%s11531_s30 + $0x80] sm:$0xff] %v9605_v55  }
 0x88a   : > { %9628 = vst [vmem:[%s11531_s30 + $0x88] sm:$0xff] %v9610_v52  }
 0x88b PF: > { %s14105_s23 = sld [smem:[#allocation29_spill]]  ;;  %s14106_s12 = sld [smem:[#allocation30_spill]] }
 0x88c   : > { %s14108_s25 = sld [smem:[#allocation37_spill]]  ;;  %s8677_s11 = sshll.u32 %s11531_s30, 4  ;;  %s13616_s11 = int_to_ptr.vmem [resolvable:$true] %s8677_s11 }
 0x88d   : > { %s14109_s1 = sld [smem:[#allocation118_spill]]  ;;  %s13625_s29 = scalar_lea.sflag [#allocation7], %s482_s10 }
 0x88e   : > { %s10873_s16 = scalar_lea.vmem %s13616_s11, 2304  ;;  %s11065_s30 = smov [#allocation16]  }
 0x88f   : > { %p10874_p0 = scmp.ne.s32.totalorder %s13616_s11, %s10873_s16  ;;  %s10877_s5 = sshll.u32 %s11065_s30, 4  ;;  %s10878_s5 = int_to_ptr.vmem [resolvable:$false] %s10877_s5 }
 0x890   : > { %s10879_s27 = scalar_lea.vmem %s10878_s5, 4608  ;;  %p10880_p11 = scmp.lt.s32.totalorder %s13616_s11, %s10878_s5 }
 0x891   : > { %s10092_s8 = smul.u32 36, %s14105_s23  ;;  %p10881_p1 = scmp.lt.s32.totalorder %s10879_s27, %s10873_s16 }
 0x892   : > { %s10093_s9 = smul.u32 72, %s14106_s12  ;;  %p14110_p10 = scmp.ne.s32.totalorder %s14108_s25, 0 }
 0x893   : > { %p10882_p13 = por %p10881_p1, %p10880_p11 }
 0x894   : > { %s8674_s3 = sadd.s32 %s10093_s9, %s10092_s8  ;;  %p10875_p2 = pnand %p10874_p0, %p14110_p10 }
 0x895   : > { %s9411_s7 = sshll.u32 %s8674_s3, 6 }
 0x896   : > { %s13621_s28 = scalar_lea.hbm %s14109_s1, %s9411_s7  ;;  %p10876_p7 = pneg %p10875_p2 }
 0x898   : > { %p10883_p12 = pnand %p10882_p13, %p10876_p7 }
 0x89a   : > { %10886 = shalt.err (!%p10883_p12)
}
 0x89b   : > { %s10887_s10 = scalar_lea.hbm %s13621_s28, 2304  ;;  %s10891_s12 = scalar_lea.hbm %s14109_s1, 9216 }
 0x89c   : > { %p10888_p4 = scmp.ne.s32.totalorder %s13621_s28, %s10887_s10  ;;  %p10892_p6 = scmp.lt.u32.totalorder %s13621_s28, %s14109_s1 }
 0x89d   : > { %p10893_p8 = scmp.lt.u32.totalorder %s10891_s12, %s10887_s10  ;;  %p10895_p0 = scmp.lt.u32.totalorder %s10887_s10, %s13621_s28 }
 0x89e   : > { %p10889_p9 = pnand %p10888_p4, %p14110_p10 }
 0x89f   : > { %p10894_p5 = por %p10893_p8, %p10892_p6 }
 0x8a0   : > { %p10890_p3 = pneg %p10889_p9 }
 0x8a1   : > { %p10896_p2 = por %p10895_p0, %p10894_p5 }
 0x8a3   : > { %p10897_p7 = pnand %p10896_p2, %p10890_p3 }
 0x8a5   : > { %10900 = shalt.err (!%p10897_p7)
}
 0x8a6   : > { %s11066_s9 = smov 64   ;;  %s11067_s3 = smov 4  }
 0x8a7   : > { %10108 = dma.vmem_to_hbm [thread:$0]  (%p14110_p10), %s13616_s11, 2304, %s13621_s28, %s13625_s29, %s11066_s9, %s11066_s9, %s11067_s3  }
 0x8a8 PF: > { %s14111_s7 = sld [smem:[#allocation31_spill]]  ;;  %s14112_s24 = sld [smem:[#allocation22_spill]] }
 0x8a9   : > { %s14113_s4 = sld [smem:[#allocation38_spill]] }
 0x8ae   : > { %p10137_p11 = scmp.ge.s32.totalorder %s14111_s7, 2  ;;  %s8692_s16 = sand.u32 1, %s14112_s24  }
 0x8af   : > { %p14114_p1 = scmp.ne.s32.totalorder %s14113_s4, 0  ;;  %s8693_s30 = scalar_lea.sflag [#allocation7], %s8692_s16 }
 0x8b1   : > { %p10131_p13 = pnand %p10137_p11, %p14114_p1 }
 0x8b3   : > { %10982 = dma.done.wait (!%p10131_p13), %s8693_s30, 2304  }
 0x8b4   : > { %10984 = vsyncadd (!%p10131_p13), %s8693_s30, 4294964992  ;;  %s30_s16 = sadd.s32 1, %s14111_s7   ;;  %s14116_s24 = sld [smem:[#allocation23_spill]] }
 0x8b5   : > { %p13654_p12 = scmp.ge.s32.totalorder %s30_s16, 22   ;;  %s14117_s27 = sld [smem:[#allocation24_spill]] }
 0x8b6   : > { %s14118_s28 = sld [smem:[#allocation25_spill]]  ;;  %s14119_s30 = sld [smem:[#allocation26_spill]] }
 0x8b7   : > { %s14120_s8 = sld [smem:[#allocation27_spill]]  ;;  %s14121_s9 = sld [smem:[#allocation41_spill]] }
 0x8b8   : > { %s14122_s19 = sld [smem:[#allocation33_spill]]  ;;  %s14123_s23 = sld [smem:[#allocation40_spill]] }
 0x8b9   : > { %s14124_s25 = smov %s10995_s26  ;;  %s14125_s26 = smov %s11402_s6 }
 0x8ba   : > { %s14126_s29 = smov %s14146_s18  ;;  %s14127_s10 = smov %s11035_s13 }
 0x8bb   : > { %s14128_s11 = smov %s11039_s14  ;;  %s14129_s12 = smov %s11043_s15 }
 0x8bc   : > { %s14132_s15 = smov %s14142_s21  ;;  %29 = sbr.rel (!%p13654_p12) target bundleno = 25 (0x19), region = 173 }
 0x8be   : > { %s14130_s13 = smov %s14122_s19  ;;  %s14131_s14 = smov %s14123_s23 }
 0x8c3   :  { %8698 = vsyncpa [#allocation6], 1 }
 0x8c4   :  { %8700 = vsyncpa [#allocation6 + $0x1], 1 }
 0x8c5   :  { %8701 = vsyncpa [#allocation9], 1 }
 0x8c6   :  { %8703 = vsyncpa [#allocation9 + $0x1], 1 }
 0x8c7   :  { %8704 = vsyncpa [#allocation12], 1 }
 0x8c8   :  { %8706 = vsyncpa [#allocation12 + $0x1], 1 }
 0x8c9   :  { %8707 = vsyncpa [#allocation15], 1 }
 0x8ca   :  { %8708 = vsyncpa [#allocation7], 1 }
 0x8cb   :  { %8710 = vsyncpa [#allocation7 + $0x1], 1 }

</bundles_post_ra>
